<compile_context>
chip_gen: v5e
topology: v5e:2x2
jax: 0.10.0
libtpu: 0.0.40
codegen_flags: <defaults>
</compile_context>

<pallas_src>
import functools

import jax
import jax.numpy as jnp
from jax import lax
from jax.experimental import pallas as pl
from jax.experimental.pallas import tpu as pltpu


# ---------------------------------------------------------------------------
# Fused Pallas kernel: K-tiled matmul (bf16 MXU, f32 acc) + shift + activation
# ---------------------------------------------------------------------------
def _fused_matmul_kernel(a_ref, w_ref, shift_ref, o_ref, acc_ref, *, act):
    @pl.when(pl.program_id(1) == 0)
    def _():
        acc_ref[...] = jnp.zeros_like(acc_ref)

    acc_ref[...] += jnp.dot(a_ref[...], w_ref[...],
                            preferred_element_type=jnp.float32)

    @pl.when(pl.program_id(1) == pl.num_programs(1) - 1)
    def _():
        y = acc_ref[...] + shift_ref[...]
        if act == "relu":
            y = jnp.maximum(y, 0.0)
        else:  # "tanh"
            y = jnp.tanh(y)
        o_ref[...] = y.astype(o_ref.dtype)


def fused_matmul_shift_act(a, w, shift, act, out_dtype,
                           tm_max=512, w_slab_budget=4 * 1024 * 1024):
    """out = act(a @ w + shift) with lane-dense (128-padded) output columns.

    a: (M, K), w: (K, C), shift: (C,)  ->  (M, C) in `out_dtype`.
    Operands are fed to the MXU in bf16; accumulation stays f32.
    """
    M, K = a.shape
    Kw, C = w.shape
    assert K == Kw

    # Lane-dense output: pad the channel axis to a multiple of 128 (zeros
    # flow through affine+activation as zeros and are sliced off afterwards).
    Cp = max(128, ((C + 127) // 128) * 128)
    if Cp != C:
        w = jnp.pad(w, ((0, 0), (0, Cp - C)))
        shift = jnp.pad(shift, (0, Cp - C))

    # K-reduction tiling: keep the resident bf16 weight slab under budget so
    # large real-world configs (hidden_dim=64, v7x 64 MiB VMEM) still fit.
    nk = 1
    for cand in (1, 3, 9):
        tk_c = K // cand
        if K % cand == 0 and (cand == 1 or tk_c % 128 == 0) \
                and tk_c * Cp * 2 <= w_slab_budget:
            nk = cand
            break
    tk = K // nk

    # M tiling: big tiles for HBM-roofline efficiency; full-M when small.
    tm = tm_max if M >= tm_max else M
    Mp = ((M + tm - 1) // tm) * tm
    if Mp != M:  # only pads when tm does not divide M
        a = jnp.pad(a, ((0, Mp - M), (0, 0)))

    out = pl.pallas_call(
        functools.partial(_fused_matmul_kernel, act=act),
        out_shape=jax.ShapeDtypeStruct((Mp, Cp), out_dtype),
        grid_spec=pltpu.PrefetchScalarGridSpec(
            num_scalar_prefetch=0,
            grid=(Mp // tm, nk),                                  # reduction axis last
            in_specs=[
                pl.BlockSpec((tm, tk), lambda i, k: (i, k)),      # A tile
                pl.BlockSpec((tk, Cp), lambda i, k: (k, 0)),      # W slab
                pl.BlockSpec((1, Cp), lambda i, k: (0, 0)),       # folded shift
            ],
            out_specs=pl.BlockSpec((tm, Cp), lambda i, k: (i, 0)),
            scratch_shapes=[pltpu.VMEM((tm, Cp), jnp.float32)],
        ),
        compiler_params=pltpu.CompilerParams(
            dimension_semantics=("parallel", "arbitrary")),
    )(a.astype(jnp.bfloat16), w.astype(jnp.bfloat16),
      shift.reshape(1, Cp).astype(jnp.float32))
    return out[:M, :C]


# ---------------------------------------------------------------------------
# ConvTranspose2d(k=4, s=2, p=1) via sub-pixel (phase) decomposition
# ---------------------------------------------------------------------------
def _build_phase_weight(w_t, scale):
    """Combined phase-weight matrix.

    Rows ordered (u, v, cin) over the 3x3 tap window of the 1-padded input;
    cols ordered (py, px, cout) over the 4 output phases.  BN scale folded in.
    out[2m+py, 2n+px] = sum_{u,v} x_pad[m+u, n+v] . wflip[2u-py, 2v-px]
    (only taps with u-py, v-px in {0,1} contribute; others are zero blocks).
    """
    Cin, Cout, k, _ = w_t.shape
    assert k == 4
    wf = jnp.transpose(w_t[:, :, ::-1, ::-1], (2, 3, 0, 1))  # (ty, tx, Cin, Cout)
    w_big = jnp.zeros((3, 3, Cin, 2, 2, Cout), jnp.float32)
    for u in range(3):
        for v in range(3):
            for py in range(2):
                for px in range(2):
                    if 0 <= u - py <= 1 and 0 <= v - px <= 1:
                        w_big = w_big.at[u, v, :, py, px, :].set(
                            wf[2 * u - py, 2 * v - px])
    w_big = w_big * scale[None, None, None, None, None, :].astype(jnp.float32)
    return w_big.reshape(9 * Cin, 4 * Cout)


def _im2col3(x_pad):
    """3x3 'valid' im2col of the 1-padded NHWC input -> (N*H*W, 9*C)."""
    N, Hp, Wp, C = x_pad.shape
    H, W = Hp - 2, Wp - 2
    cols = [x_pad[:, u:u + H, v:v + W, :] for u in range(3) for v in range(3)]
    p = jnp.stack(cols, axis=3)                         # (N, H, W, 9, C)
    return p.reshape(N * H * W, 9 * C), (N, H, W)


def conv_transpose_s2_fused(x_nhwc, w_t, scale, shift, act, out_dtype):
    """ConvTranspose2d(Cin, Cout, 4, stride=2, padding=1) + affine + activation."""
    N, H, W, Cin = x_nhwc.shape
    Cin_w, Cout, _, _ = w_t.shape
    assert Cin == Cin_w
    x_pad = jnp.pad(x_nhwc.astype(jnp.bfloat16), ((0, 0), (1, 1), (1, 1), (0, 0)))
    a, _ = _im2col3(x_pad)                              # (N*H*W, 9*Cin) bf16
    w_big = _build_phase_weight(w_t, scale)             # (9*Cin, 4*Cout), scale folded
    shift4 = jnp.tile(shift.astype(jnp.float32), 4)     # per (py, px, cout) column
    out = fused_matmul_shift_act(a, w_big, shift4, act, out_dtype)
    out = out.reshape(N, H, W, 2, 2, Cout)              # (..., py, px, cout)
    out = out.transpose(0, 1, 3, 2, 4, 5).reshape(N, 2 * H, 2 * W, Cout)
    return out


def dense_project_fused(x_flat, w_t, scale, shift, act, out_dtype):
    """First layer: ConvTranspose2d(latent, C, 4, stride=1, padding=0) on a 1x1
    input is a dense matmul; output reshaped to 4x4 NHWC."""
    Cin, Cout, k, _ = w_t.shape
    w0 = jnp.transpose(w_t, (0, 2, 3, 1)).reshape(Cin, k * k * Cout)
    w0 = w0 * jnp.tile(scale.astype(jnp.float32), k * k)[None, :]
    shift_cols = jnp.tile(shift.astype(jnp.float32), k * k)
    out = fused_matmul_shift_act(x_flat, w0, shift_cols, act, out_dtype)
    return out.reshape(x_flat.shape[0], k, k, Cout)


# ---------------------------------------------------------------------------
# Generator: parameters + forward
# ---------------------------------------------------------------------------
def init_generator_params(key, latent_dim, output_channel, hidden_dim):
    dims = [latent_dim, hidden_dim * 16, hidden_dim * 8, hidden_dim * 4,
            hidden_dim * 2, hidden_dim, output_channel]
    params = {}
    for idx in range(5):
        cin, cout = dims[idx], dims[idx + 1]
        key, kw, kg, kb = jax.random.split(key, 4)
        params[f"block{idx}"] = {
            "w": 0.02 * jax.random.normal(kw, (cin, cout, 4, 4), jnp.float32),
            "gamma": 1.0 + 0.1 * jax.random.normal(kg, (cout,), jnp.float32),
            "beta": 0.1 * jax.random.normal(kb, (cout,), jnp.float32),
            "mean": jnp.zeros((cout,), jnp.float32),
            "var": jnp.ones((cout,), jnp.float32),
        }
    cin, cout = dims[5], dims[6]
    key, kw, kb = jax.random.split(key, 3)
    params["out"] = {
        "w": 0.02 * jax.random.normal(kw, (cin, cout, 4, 4), jnp.float32),
        "b": 0.02 * jax.random.normal(kb, (cout,), jnp.float32),
    }
    return params


def generator_forward(params, x_nchw):
    eps = 1e-5
    # Block 0: 1x1 -> 4x4 (dense matmul path).
    p = params["block0"]
    scale = p["gamma"] / jnp.sqrt(p["var"] + eps)
    shift = p["beta"] - p["mean"] * scale
    x = dense_project_fused(x_nchw.reshape(x_nchw.shape[0], -1),
                            p["w"], scale, shift, "relu", jnp.bfloat16)
    # Blocks 1-4: stride-2 upsampling + folded BN + ReLU (bf16 inter-layer acts).
    for idx in range(1, 5):
        p = params[f"block{idx}"]
        scale = p["gamma"] / jnp.sqrt(p["var"] + eps)
        shift = p["beta"] - p["mean"] * scale
        x = conv_transpose_s2_fused(x, p["w"], scale, shift, "relu", jnp.bfloat16)
    # Final layer: stride-2 upsampling + bias + tanh, f32 output.
    p = params["out"]
    ones = jnp.ones((p["w"].shape[1],), jnp.float32)
    x = conv_transpose_s2_fused(x, p["w"], ones, p["b"], "tanh", jnp.float32)
    return jnp.transpose(x, (0, 3, 1, 2))  # NHWC -> NCHW


# ---------------------------------------------------------------------------
# Pure-JAX f32 reference (lax conv with lhs_dilation) for correctness checking
# ---------------------------------------------------------------------------
def _conv_transpose_ref(x_nchw, w_t, stride, padding):
    Cin, Cout, k, _ = w_t.shape
    w_conv = jnp.transpose(w_t[:, :, ::-1, ::-1], (1, 0, 2, 3))  # (Cout, Cin, k, k)
    pad = k - 1 - padding
    return lax.conv_general_dilated(
        x_nchw, w_conv, window_strides=(1, 1),
        padding=[(pad, pad), (pad, pad)], lhs_dilation=(stride, stride),
        dimension_numbers=("NCHW", "OIHW", "NCHW"))


def generator_forward_ref(params, x_nchw):
    eps = 1e-5
    strides = [1, 2, 2, 2, 2]
    pads = [0, 1, 1, 1, 1]
    x = x_nchw
    for idx in range(5):
        p = params[f"block{idx}"]
        x = _conv_transpose_ref(x, p["w"], strides[idx], pads[idx])
        scale = (p["gamma"] / jnp.sqrt(p["var"] + eps)).reshape(1, -1, 1, 1)
        shift = (p["beta"] - p["mean"] * p["gamma"] / jnp.sqrt(p["var"] + eps)).reshape(1, -1, 1, 1)
        x = jnp.maximum(x * scale + shift, 0.0)
    p = params["out"]
    x = _conv_transpose_ref(x, p["w"], 2, 1) + p["b"].reshape(1, -1, 1, 1)
    return jnp.tanh(x)


# ---------------------------------------------------------------------------
if __name__ == "__main__":
    # Small config: latent_dim=16, output_channel=3, hidden_dim=8, batch=2.
    latent_dim, output_channel, hidden_dim, batch = 16, 3, 8, 2

    key = jax.random.PRNGKey(0)
    kx, kp = jax.random.split(key)
    x = jax.random.normal(kx, (batch, latent_dim, 1, 1), jnp.float32)  # NCHW latent
    params = init_generator_params(kp, latent_dim, output_channel, hidden_dim)

    fwd = jax.jit(generator_forward)
    out = jax.block_until_ready(fwd(params, x))
    assert out.shape == (batch, output_channel, 128, 128), out.shape

    ref = jax.block_until_ready(jax.jit(generator_forward_ref)(params, x))
    # Tolerance accounts for bf16 MXU operands / bf16 inter-layer activations
    # (accumulation is f32) against the pure-f32 reference.
    max_err = float(jnp.max(jnp.abs(out - ref)))
    assert jnp.allclose(out, ref, atol=5e-3, rtol=5e-3), max_err

    print("KERNEL_OK")
</pallas_src>

<mosaic_0001>
module attributes {stable_mosaic.version = 11 : i64} {
  func.func @_fused_matmul_kernel(%arg0: i32, %arg1: i32, %arg2: memref<2x16xbf16, #tpu.memory_space<vmem>>, %arg3: memref<16x2048xbf16, #tpu.memory_space<vmem>>, %arg4: memref<1x2048xf32, #tpu.memory_space<vmem>>, %arg5: memref<2x2048xbf16, #tpu.memory_space<vmem>>, %arg6: memref<2x2048xf32, #tpu.memory_space<vmem>>) attributes {dimension_semantics = [#tpu.dimension_semantics<parallel>, #tpu.dimension_semantics<arbitrary>], iteration_bounds = array<i64: 1, 1>, scalar_prefetch = 0 : i64, scratch_operands = 1 : i64, tpu.core_type = #tpu.core_type<tc>, window_params = [{transform_indices = @transform_0, window_bounds = array<i64: 2, 16>}, {transform_indices = @transform_1, window_bounds = array<i64: 16, 2048>}, {pipeline_mode = #tpu.pipeline_mode<synchronous>, transform_indices = @transform_2, window_bounds = array<i64: 1, 2048>}, {transform_indices = @transform_3, window_bounds = array<i64: 2, 2048>}]} {
    %c0_i32 = arith.constant 0 : i32
    %0 = arith.cmpi eq, %arg1, %c0_i32 : i32
    %1 = arith.extui %0 : i1 to i32
    %c0_i32_0 = arith.constant 0 : i32
    %2 = arith.cmpi ne, %1, %c0_i32_0 : i32
    scf.if %2 {
      %cst_10 = arith.constant 0.000000e+00 : f32
      %12 = vector.broadcast %cst_10 : f32 to vector<2x2048xf32>
      %c0_11 = arith.constant 0 : index
      %c0_12 = arith.constant 0 : index
      %13 = vector.load %arg6[%c0_11, %c0_12] : memref<2x2048xf32, #tpu.memory_space<vmem>>, vector<2x2048xf32>
      tpu.vector_store %arg6[%c0_11, %c0_12], %12 {strides = array<i32>} : memref<2x2048xf32, #tpu.memory_space<vmem>>, vector<2x2048xf32>,
    } else {
    }
    %c0 = arith.constant 0 : index
    %c0_1 = arith.constant 0 : index
    %3 = vector.load %arg6[%c0, %c0_1] : memref<2x2048xf32, #tpu.memory_space<vmem>>, vector<2x2048xf32>
    %c0_2 = arith.constant 0 : index
    %c0_3 = arith.constant 0 : index
    %4 = vector.load %arg2[%c0_2, %c0_3] : memref<2x16xbf16, #tpu.memory_space<vmem>>, vector<2x16xbf16>
    %c0_4 = arith.constant 0 : index
    %c0_5 = arith.constant 0 : index
    %5 = vector.load %arg3[%c0_4, %c0_5] : memref<16x2048xbf16, #tpu.memory_space<vmem>>, vector<16x2048xbf16>
    %cst = arith.constant dense<0.000000e+00> : vector<2x2048xf32>
    %6 = tpu.matmul %4, %5, %cst {dimension_numbers = #tpu.dot_dimension_numbers<[1], [0], [0], [1], [0, 0, 1, 1], [], []>} : vector<2x16xbf16>, vector<16x2048xbf16>, vector<2x2048xf32> -> vector<2x2048xf32>
    %7 = arith.addf %3, %6 : vector<2x2048xf32>
    %c0_6 = arith.constant 0 : index
    %c0_7 = arith.constant 0 : index
    %8 = vector.load %arg6[%c0_6, %c0_7] : memref<2x2048xf32, #tpu.memory_space<vmem>>, vector<2x2048xf32>
    tpu.vector_store %arg6[%c0_6, %c0_7], %7 {strides = array<i32>} : memref<2x2048xf32, #tpu.memory_space<vmem>>, vector<2x2048xf32>,
    %c0_i32_8 = arith.constant 0 : i32
    %9 = arith.cmpi eq, %arg1, %c0_i32_8 : i32
    %10 = arith.extui %9 : i1 to i32
    %c0_i32_9 = arith.constant 0 : i32
    %11 = arith.cmpi ne, %10, %c0_i32_9 : i32
    scf.if %11 {
      %c0_10 = arith.constant 0 : index
      %c0_11 = arith.constant 0 : index
      %12 = vector.load %arg6[%c0_10, %c0_11] : memref<2x2048xf32, #tpu.memory_space<vmem>>, vector<2x2048xf32>
      %c0_12 = arith.constant 0 : index
      %c0_13 = arith.constant 0 : index
      %13 = vector.load %arg4[%c0_12, %c0_13] : memref<1x2048xf32, #tpu.memory_space<vmem>>, vector<1x2048xf32>
      %14 = vector.broadcast %13 : vector<1x2048xf32> to vector<2x2048xf32>
      %15 = arith.addf %12, %14 : vector<2x2048xf32>
      %cst_14 = arith.constant 0.000000e+00 : f32
      %16 = vector.broadcast %cst_14 : f32 to vector<2x2048xf32>
      %17 = arith.maximumf %15, %16 : vector<2x2048xf32>
      %18 = arith.truncf %17 : vector<2x2048xf32> to vector<2x2048xbf16>
      %c0_15 = arith.constant 0 : index
      %c0_16 = arith.constant 0 : index
      %19 = vector.load %arg5[%c0_15, %c0_16] : memref<2x2048xbf16, #tpu.memory_space<vmem>>, vector<2x2048xbf16>
      tpu.vector_store %arg5[%c0_15, %c0_16], %18 {strides = array<i32>} : memref<2x2048xbf16, #tpu.memory_space<vmem>>, vector<2x2048xbf16>,
    } else {
    }
    return
  }
  func.func @transform_0(%arg0: i32, %arg1: i32) -> (i32, i32) {
    %c0_i32 = arith.constant 0 : i32
    return %arg0, %arg1 : i32, i32
  }
  func.func @transform_1(%arg0: i32, %arg1: i32) -> (i32, i32) {
    %c0_i32 = arith.constant 0 : i32
    %c0_i32_0 = arith.constant 0 : i32
    return %arg1, %c0_i32 : i32, i32
  }
  func.func @transform_2(%arg0: i32, %arg1: i32) -> (i32, i32) {
    %c0_i32 = arith.constant 0 : i32
    %c0_i32_0 = arith.constant 0 : i32
    %c0_i32_1 = arith.constant 0 : i32
    return %c0_i32, %c0_i32_0 : i32, i32
  }
  func.func @transform_3(%arg0: i32, %arg1: i32) -> (i32, i32) {
    %c0_i32 = arith.constant 0 : i32
    %c0_i32_0 = arith.constant 0 : i32
    return %arg0, %c0_i32 : i32, i32
  }
}

module attributes {stable_mosaic.version = 11 : i64} {
  func.func @_fused_matmul_kernel(%arg0: i32, %arg1: i32, %arg2: memref<32x1152xbf16, #tpu.memory_space<vmem>>, %arg3: memref<1152x256xbf16, #tpu.memory_space<vmem>>, %arg4: memref<1x256xf32, #tpu.memory_space<vmem>>, %arg5: memref<32x256xbf16, #tpu.memory_space<vmem>>, %arg6: memref<32x256xf32, #tpu.memory_space<vmem>>) attributes {dimension_semantics = [#tpu.dimension_semantics<parallel>, #tpu.dimension_semantics<arbitrary>], iteration_bounds = array<i64: 1, 1>, scalar_prefetch = 0 : i64, scratch_operands = 1 : i64, tpu.core_type = #tpu.core_type<tc>, window_params = [{transform_indices = @transform_0, window_bounds = array<i64: 32, 1152>}, {transform_indices = @transform_1, window_bounds = array<i64: 1152, 256>}, {pipeline_mode = #tpu.pipeline_mode<synchronous>, transform_indices = @transform_2, window_bounds = array<i64: 1, 256>}, {transform_indices = @transform_3, window_bounds = array<i64: 32, 256>}]} {
    %c0_i32 = arith.constant 0 : i32
    %0 = arith.cmpi eq, %arg1, %c0_i32 : i32
    %1 = arith.extui %0 : i1 to i32
    %c0_i32_0 = arith.constant 0 : i32
    %2 = arith.cmpi ne, %1, %c0_i32_0 : i32
    scf.if %2 {
      %cst_10 = arith.constant 0.000000e+00 : f32
      %12 = vector.broadcast %cst_10 : f32 to vector<32x256xf32>
      %c0_11 = arith.constant 0 : index
      %c0_12 = arith.constant 0 : index
      %13 = vector.load %arg6[%c0_11, %c0_12] : memref<32x256xf32, #tpu.memory_space<vmem>>, vector<32x256xf32>
      tpu.vector_store %arg6[%c0_11, %c0_12], %12 {strides = array<i32>} : memref<32x256xf32, #tpu.memory_space<vmem>>, vector<32x256xf32>,
    } else {
    }
    %c0 = arith.constant 0 : index
    %c0_1 = arith.constant 0 : index
    %3 = vector.load %arg6[%c0, %c0_1] : memref<32x256xf32, #tpu.memory_space<vmem>>, vector<32x256xf32>
    %c0_2 = arith.constant 0 : index
    %c0_3 = arith.constant 0 : index
    %4 = vector.load %arg2[%c0_2, %c0_3] : memref<32x1152xbf16, #tpu.memory_space<vmem>>, vector<32x1152xbf16>
    %c0_4 = arith.constant 0 : index
    %c0_5 = arith.constant 0 : index
    %5 = vector.load %arg3[%c0_4, %c0_5] : memref<1152x256xbf16, #tpu.memory_space<vmem>>, vector<1152x256xbf16>
    %cst = arith.constant dense<0.000000e+00> : vector<32x256xf32>
    %6 = tpu.matmul %4, %5, %cst {dimension_numbers = #tpu.dot_dimension_numbers<[1], [0], [0], [1], [0, 0, 1, 1], [], []>} : vector<32x1152xbf16>, vector<1152x256xbf16>, vector<32x256xf32> -> vector<32x256xf32>
    %7 = arith.addf %3, %6 : vector<32x256xf32>
    %c0_6 = arith.constant 0 : index
    %c0_7 = arith.constant 0 : index
    %8 = vector.load %arg6[%c0_6, %c0_7] : memref<32x256xf32, #tpu.memory_space<vmem>>, vector<32x256xf32>
    tpu.vector_store %arg6[%c0_6, %c0_7], %7 {strides = array<i32>} : memref<32x256xf32, #tpu.memory_space<vmem>>, vector<32x256xf32>,
    %c0_i32_8 = arith.constant 0 : i32
    %9 = arith.cmpi eq, %arg1, %c0_i32_8 : i32
    %10 = arith.extui %9 : i1 to i32
    %c0_i32_9 = arith.constant 0 : i32
    %11 = arith.cmpi ne, %10, %c0_i32_9 : i32
    scf.if %11 {
      %c0_10 = arith.constant 0 : index
      %c0_11 = arith.constant 0 : index
      %12 = vector.load %arg6[%c0_10, %c0_11] : memref<32x256xf32, #tpu.memory_space<vmem>>, vector<32x256xf32>
      %c0_12 = arith.constant 0 : index
      %c0_13 = arith.constant 0 : index
      %13 = vector.load %arg4[%c0_12, %c0_13] : memref<1x256xf32, #tpu.memory_space<vmem>>, vector<1x256xf32>
      %14 = vector.broadcast %13 : vector<1x256xf32> to vector<32x256xf32>
      %15 = arith.addf %12, %14 : vector<32x256xf32>
      %cst_14 = arith.constant 0.000000e+00 : f32
      %16 = vector.broadcast %cst_14 : f32 to vector<32x256xf32>
      %17 = arith.maximumf %15, %16 : vector<32x256xf32>
      %18 = arith.truncf %17 : vector<32x256xf32> to vector<32x256xbf16>
      %c0_15 = arith.constant 0 : index
      %c0_16 = arith.constant 0 : index
      %19 = vector.load %arg5[%c0_15, %c0_16] : memref<32x256xbf16, #tpu.memory_space<vmem>>, vector<32x256xbf16>
      tpu.vector_store %arg5[%c0_15, %c0_16], %18 {strides = array<i32>} : memref<32x256xbf16, #tpu.memory_space<vmem>>, vector<32x256xbf16>,
    } else {
    }
    return
  }
  func.func @transform_0(%arg0: i32, %arg1: i32) -> (i32, i32) {
    %c0_i32 = arith.constant 0 : i32
    return %arg0, %arg1 : i32, i32
  }
  func.func @transform_1(%arg0: i32, %arg1: i32) -> (i32, i32) {
    %c0_i32 = arith.constant 0 : i32
    %c0_i32_0 = arith.constant 0 : i32
    return %arg1, %c0_i32 : i32, i32
  }
  func.func @transform_2(%arg0: i32, %arg1: i32) -> (i32, i32) {
    %c0_i32 = arith.constant 0 : i32
    %c0_i32_0 = arith.constant 0 : i32
    %c0_i32_1 = arith.constant 0 : i32
    return %c0_i32, %c0_i32_0 : i32, i32
  }
  func.func @transform_3(%arg0: i32, %arg1: i32) -> (i32, i32) {
    %c0_i32 = arith.constant 0 : i32
    %c0_i32_0 = arith.constant 0 : i32
    return %arg0, %c0_i32 : i32, i32
  }
}

module attributes {stable_mosaic.version = 11 : i64} {
  func.func @_fused_matmul_kernel(%arg0: i32, %arg1: i32, %arg2: memref<128x576xbf16, #tpu.memory_space<vmem>>, %arg3: memref<576x128xbf16, #tpu.memory_space<vmem>>, %arg4: memref<1x128xf32, #tpu.memory_space<vmem>>, %arg5: memref<128x128xbf16, #tpu.memory_space<vmem>>, %arg6: memref<128x128xf32, #tpu.memory_space<vmem>>) attributes {dimension_semantics = [#tpu.dimension_semantics<parallel>, #tpu.dimension_semantics<arbitrary>], iteration_bounds = array<i64: 1, 1>, scalar_prefetch = 0 : i64, scratch_operands = 1 : i64, tpu.core_type = #tpu.core_type<tc>, window_params = [{transform_indices = @transform_0, window_bounds = array<i64: 128, 576>}, {transform_indices = @transform_1, window_bounds = array<i64: 576, 128>}, {pipeline_mode = #tpu.pipeline_mode<synchronous>, transform_indices = @transform_2, window_bounds = array<i64: 1, 128>}, {transform_indices = @transform_3, window_bounds = array<i64: 128, 128>}]} {
    %c0_i32 = arith.constant 0 : i32
    %0 = arith.cmpi eq, %arg1, %c0_i32 : i32
    %1 = arith.extui %0 : i1 to i32
    %c0_i32_0 = arith.constant 0 : i32
    %2 = arith.cmpi ne, %1, %c0_i32_0 : i32
    scf.if %2 {
      %cst_10 = arith.constant 0.000000e+00 : f32
      %12 = vector.broadcast %cst_10 : f32 to vector<128x128xf32>
      %c0_11 = arith.constant 0 : index
      %c0_12 = arith.constant 0 : index
      %13 = vector.load %arg6[%c0_11, %c0_12] : memref<128x128xf32, #tpu.memory_space<vmem>>, vector<128x128xf32>
      tpu.vector_store %arg6[%c0_11, %c0_12], %12 {strides = array<i32>} : memref<128x128xf32, #tpu.memory_space<vmem>>, vector<128x128xf32>,
    } else {
    }
    %c0 = arith.constant 0 : index
    %c0_1 = arith.constant 0 : index
    %3 = vector.load %arg6[%c0, %c0_1] : memref<128x128xf32, #tpu.memory_space<vmem>>, vector<128x128xf32>
    %c0_2 = arith.constant 0 : index
    %c0_3 = arith.constant 0 : index
    %4 = vector.load %arg2[%c0_2, %c0_3] : memref<128x576xbf16, #tpu.memory_space<vmem>>, vector<128x576xbf16>
    %c0_4 = arith.constant 0 : index
    %c0_5 = arith.constant 0 : index
    %5 = vector.load %arg3[%c0_4, %c0_5] : memref<576x128xbf16, #tpu.memory_space<vmem>>, vector<576x128xbf16>
    %cst = arith.constant dense<0.000000e+00> : vector<128x128xf32>
    %6 = tpu.matmul %4, %5, %cst {dimension_numbers = #tpu.dot_dimension_numbers<[1], [0], [0], [1], [0, 0, 1, 1], [], []>} : vector<128x576xbf16>, vector<576x128xbf16>, vector<128x128xf32> -> vector<128x128xf32>
    %7 = arith.addf %3, %6 : vector<128x128xf32>
    %c0_6 = arith.constant 0 : index
    %c0_7 = arith.constant 0 : index
    %8 = vector.load %arg6[%c0_6, %c0_7] : memref<128x128xf32, #tpu.memory_space<vmem>>, vector<128x128xf32>
    tpu.vector_store %arg6[%c0_6, %c0_7], %7 {strides = array<i32>} : memref<128x128xf32, #tpu.memory_space<vmem>>, vector<128x128xf32>,
    %c0_i32_8 = arith.constant 0 : i32
    %9 = arith.cmpi eq, %arg1, %c0_i32_8 : i32
    %10 = arith.extui %9 : i1 to i32
    %c0_i32_9 = arith.constant 0 : i32
    %11 = arith.cmpi ne, %10, %c0_i32_9 : i32
    scf.if %11 {
      %c0_10 = arith.constant 0 : index
      %c0_11 = arith.constant 0 : index
      %12 = vector.load %arg6[%c0_10, %c0_11] : memref<128x128xf32, #tpu.memory_space<vmem>>, vector<128x128xf32>
      %c0_12 = arith.constant 0 : index
      %c0_13 = arith.constant 0 : index
      %13 = vector.load %arg4[%c0_12, %c0_13] : memref<1x128xf32, #tpu.memory_space<vmem>>, vector<1x128xf32>
      %14 = vector.broadcast %13 : vector<1x128xf32> to vector<128x128xf32>
      %15 = arith.addf %12, %14 : vector<128x128xf32>
      %cst_14 = arith.constant 0.000000e+00 : f32
      %16 = vector.broadcast %cst_14 : f32 to vector<128x128xf32>
      %17 = arith.maximumf %15, %16 : vector<128x128xf32>
      %18 = arith.truncf %17 : vector<128x128xf32> to vector<128x128xbf16>
      %c0_15 = arith.constant 0 : index
      %c0_16 = arith.constant 0 : index
      %19 = vector.load %arg5[%c0_15, %c0_16] : memref<128x128xbf16, #tpu.memory_space<vmem>>, vector<128x128xbf16>
      tpu.vector_store %arg5[%c0_15, %c0_16], %18 {strides = array<i32>} : memref<128x128xbf16, #tpu.memory_space<vmem>>, vector<128x128xbf16>,
    } else {
    }
    return
  }
  func.func @transform_0(%arg0: i32, %arg1: i32) -> (i32, i32) {
    %c0_i32 = arith.constant 0 : i32
    return %arg0, %arg1 : i32, i32
  }
  func.func @transform_1(%arg0: i32, %arg1: i32) -> (i32, i32) {
    %c0_i32 = arith.constant 0 : i32
    %c0_i32_0 = arith.constant 0 : i32
    return %arg1, %c0_i32 : i32, i32
  }
  func.func @transform_2(%arg0: i32, %arg1: i32) -> (i32, i32) {
    %c0_i32 = arith.constant 0 : i32
    %c0_i32_0 = arith.constant 0 : i32
    %c0_i32_1 = arith.constant 0 : i32
    return %c0_i32, %c0_i32_0 : i32, i32
  }
  func.func @transform_3(%arg0: i32, %arg1: i32) -> (i32, i32) {
    %c0_i32 = arith.constant 0 : i32
    %c0_i32_0 = arith.constant 0 : i32
    return %arg0, %c0_i32 : i32, i32
  }
}

module attributes {stable_mosaic.version = 11 : i64} {
  func.func @_fused_matmul_kernel(%arg0: i32, %arg1: i32, %arg2: memref<512x288xbf16, #tpu.memory_space<vmem>>, %arg3: memref<288x128xbf16, #tpu.memory_space<vmem>>, %arg4: memref<1x128xf32, #tpu.memory_space<vmem>>, %arg5: memref<512x128xbf16, #tpu.memory_space<vmem>>, %arg6: memref<512x128xf32, #tpu.memory_space<vmem>>) attributes {dimension_semantics = [#tpu.dimension_semantics<parallel>, #tpu.dimension_semantics<arbitrary>], iteration_bounds = array<i64: 1, 1>, scalar_prefetch = 0 : i64, scratch_operands = 1 : i64, tpu.core_type = #tpu.core_type<tc>, window_params = [{transform_indices = @transform_0, window_bounds = array<i64: 512, 288>}, {transform_indices = @transform_1, window_bounds = array<i64: 288, 128>}, {pipeline_mode = #tpu.pipeline_mode<synchronous>, transform_indices = @transform_2, window_bounds = array<i64: 1, 128>}, {transform_indices = @transform_3, window_bounds = array<i64: 512, 128>}]} {
    %c0_i32 = arith.constant 0 : i32
    %0 = arith.cmpi eq, %arg1, %c0_i32 : i32
    %1 = arith.extui %0 : i1 to i32
    %c0_i32_0 = arith.constant 0 : i32
    %2 = arith.cmpi ne, %1, %c0_i32_0 : i32
    scf.if %2 {
      %cst_10 = arith.constant 0.000000e+00 : f32
      %12 = vector.broadcast %cst_10 : f32 to vector<512x128xf32>
      %c0_11 = arith.constant 0 : index
      %c0_12 = arith.constant 0 : index
      %13 = vector.load %arg6[%c0_11, %c0_12] : memref<512x128xf32, #tpu.memory_space<vmem>>, vector<512x128xf32>
      tpu.vector_store %arg6[%c0_11, %c0_12], %12 {strides = array<i32>} : memref<512x128xf32, #tpu.memory_space<vmem>>, vector<512x128xf32>,
    } else {
    }
    %c0 = arith.constant 0 : index
    %c0_1 = arith.constant 0 : index
    %3 = vector.load %arg6[%c0, %c0_1] : memref<512x128xf32, #tpu.memory_space<vmem>>, vector<512x128xf32>
    %c0_2 = arith.constant 0 : index
    %c0_3 = arith.constant 0 : index
    %4 = vector.load %arg2[%c0_2, %c0_3] : memref<512x288xbf16, #tpu.memory_space<vmem>>, vector<512x288xbf16>
    %c0_4 = arith.constant 0 : index
    %c0_5 = arith.constant 0 : index
    %5 = vector.load %arg3[%c0_4, %c0_5] : memref<288x128xbf16, #tpu.memory_space<vmem>>, vector<288x128xbf16>
    %cst = arith.constant dense<0.000000e+00> : vector<512x128xf32>
    %6 = tpu.matmul %4, %5, %cst {dimension_numbers = #tpu.dot_dimension_numbers<[1], [0], [0], [1], [0, 0, 1, 1], [], []>} : vector<512x288xbf16>, vector<288x128xbf16>, vector<512x128xf32> -> vector<512x128xf32>
    %7 = arith.addf %3, %6 : vector<512x128xf32>
    %c0_6 = arith.constant 0 : index
    %c0_7 = arith.constant 0 : index
    %8 = vector.load %arg6[%c0_6, %c0_7] : memref<512x128xf32, #tpu.memory_space<vmem>>, vector<512x128xf32>
    tpu.vector_store %arg6[%c0_6, %c0_7], %7 {strides = array<i32>} : memref<512x128xf32, #tpu.memory_space<vmem>>, vector<512x128xf32>,
    %c0_i32_8 = arith.constant 0 : i32
    %9 = arith.cmpi eq, %arg1, %c0_i32_8 : i32
    %10 = arith.extui %9 : i1 to i32
    %c0_i32_9 = arith.constant 0 : i32
    %11 = arith.cmpi ne, %10, %c0_i32_9 : i32
    scf.if %11 {
      %c0_10 = arith.constant 0 : index
      %c0_11 = arith.constant 0 : index
      %12 = vector.load %arg6[%c0_10, %c0_11] : memref<512x128xf32, #tpu.memory_space<vmem>>, vector<512x128xf32>
      %c0_12 = arith.constant 0 : index
      %c0_13 = arith.constant 0 : index
      %13 = vector.load %arg4[%c0_12, %c0_13] : memref<1x128xf32, #tpu.memory_space<vmem>>, vector<1x128xf32>
      %14 = vector.broadcast %13 : vector<1x128xf32> to vector<512x128xf32>
      %15 = arith.addf %12, %14 : vector<512x128xf32>
      %cst_14 = arith.constant 0.000000e+00 : f32
      %16 = vector.broadcast %cst_14 : f32 to vector<512x128xf32>
      %17 = arith.maximumf %15, %16 : vector<512x128xf32>
      %18 = arith.truncf %17 : vector<512x128xf32> to vector<512x128xbf16>
      %c0_15 = arith.constant 0 : index
      %c0_16 = arith.constant 0 : index
      %19 = vector.load %arg5[%c0_15, %c0_16] : memref<512x128xbf16, #tpu.memory_space<vmem>>, vector<512x128xbf16>
      tpu.vector_store %arg5[%c0_15, %c0_16], %18 {strides = array<i32>} : memref<512x128xbf16, #tpu.memory_space<vmem>>, vector<512x128xbf16>,
    } else {
    }
    return
  }
  func.func @transform_0(%arg0: i32, %arg1: i32) -> (i32, i32) {
    %c0_i32 = arith.constant 0 : i32
    return %arg0, %arg1 : i32, i32
  }
  func.func @transform_1(%arg0: i32, %arg1: i32) -> (i32, i32) {
    %c0_i32 = arith.constant 0 : i32
    %c0_i32_0 = arith.constant 0 : i32
    return %arg1, %c0_i32 : i32, i32
  }
  func.func @transform_2(%arg0: i32, %arg1: i32) -> (i32, i32) {
    %c0_i32 = arith.constant 0 : i32
    %c0_i32_0 = arith.constant 0 : i32
    %c0_i32_1 = arith.constant 0 : i32
    return %c0_i32, %c0_i32_0 : i32, i32
  }
  func.func @transform_3(%arg0: i32, %arg1: i32) -> (i32, i32) {
    %c0_i32 = arith.constant 0 : i32
    %c0_i32_0 = arith.constant 0 : i32
    return %arg0, %c0_i32 : i32, i32
  }
}

module attributes {stable_mosaic.version = 11 : i64} {
  func.func @_fused_matmul_kernel(%arg0: i32, %arg1: i32, %arg2: memref<512x144xbf16, #tpu.memory_space<vmem>>, %arg3: memref<144x128xbf16, #tpu.memory_space<vmem>>, %arg4: memref<1x128xf32, #tpu.memory_space<vmem>>, %arg5: memref<512x128xbf16, #tpu.memory_space<vmem>>, %arg6: memref<512x128xf32, #tpu.memory_space<vmem>>) attributes {dimension_semantics = [#tpu.dimension_semantics<parallel>, #tpu.dimension_semantics<arbitrary>], iteration_bounds = array<i64: 4, 1>, scalar_prefetch = 0 : i64, scratch_operands = 1 : i64, tpu.core_type = #tpu.core_type<tc>, window_params = [{transform_indices = @transform_0, window_bounds = array<i64: 512, 144>}, {transform_indices = @transform_1, window_bounds = array<i64: 144, 128>}, {pipeline_mode = #tpu.pipeline_mode<synchronous>, transform_indices = @transform_2, window_bounds = array<i64: 1, 128>}, {transform_indices = @transform_3, window_bounds = array<i64: 512, 128>}]} {
    %c0_i32 = arith.constant 0 : i32
    %0 = arith.cmpi eq, %arg1, %c0_i32 : i32
    %1 = arith.extui %0 : i1 to i32
    %c0_i32_0 = arith.constant 0 : i32
    %2 = arith.cmpi ne, %1, %c0_i32_0 : i32
    scf.if %2 {
      %cst_10 = arith.constant 0.000000e+00 : f32
      %12 = vector.broadcast %cst_10 : f32 to vector<512x128xf32>
      %c0_11 = arith.constant 0 : index
      %c0_12 = arith.constant 0 : index
      %13 = vector.load %arg6[%c0_11, %c0_12] : memref<512x128xf32, #tpu.memory_space<vmem>>, vector<512x128xf32>
      tpu.vector_store %arg6[%c0_11, %c0_12], %12 {strides = array<i32>} : memref<512x128xf32, #tpu.memory_space<vmem>>, vector<512x128xf32>,
    } else {
    }
    %c0 = arith.constant 0 : index
    %c0_1 = arith.constant 0 : index
    %3 = vector.load %arg6[%c0, %c0_1] : memref<512x128xf32, #tpu.memory_space<vmem>>, vector<512x128xf32>
    %c0_2 = arith.constant 0 : index
    %c0_3 = arith.constant 0 : index
    %4 = vector.load %arg2[%c0_2, %c0_3] : memref<512x144xbf16, #tpu.memory_space<vmem>>, vector<512x144xbf16>
    %c0_4 = arith.constant 0 : index
    %c0_5 = arith.constant 0 : index
    %5 = vector.load %arg3[%c0_4, %c0_5] : memref<144x128xbf16, #tpu.memory_space<vmem>>, vector<144x128xbf16>
    %cst = arith.constant dense<0.000000e+00> : vector<512x128xf32>
    %6 = tpu.matmul %4, %5, %cst {dimension_numbers = #tpu.dot_dimension_numbers<[1], [0], [0], [1], [0, 0, 1, 1], [], []>} : vector<512x144xbf16>, vector<144x128xbf16>, vector<512x128xf32> -> vector<512x128xf32>
    %7 = arith.addf %3, %6 : vector<512x128xf32>
    %c0_6 = arith.constant 0 : index
    %c0_7 = arith.constant 0 : index
    %8 = vector.load %arg6[%c0_6, %c0_7] : memref<512x128xf32, #tpu.memory_space<vmem>>, vector<512x128xf32>
    tpu.vector_store %arg6[%c0_6, %c0_7], %7 {strides = array<i32>} : memref<512x128xf32, #tpu.memory_space<vmem>>, vector<512x128xf32>,
    %c0_i32_8 = arith.constant 0 : i32
    %9 = arith.cmpi eq, %arg1, %c0_i32_8 : i32
    %10 = arith.extui %9 : i1 to i32
    %c0_i32_9 = arith.constant 0 : i32
    %11 = arith.cmpi ne, %10, %c0_i32_9 : i32
    scf.if %11 {
      %c0_10 = arith.constant 0 : index
      %c0_11 = arith.constant 0 : index
      %12 = vector.load %arg6[%c0_10, %c0_11] : memref<512x128xf32, #tpu.memory_space<vmem>>, vector<512x128xf32>
      %c0_12 = arith.constant 0 : index
      %c0_13 = arith.constant 0 : index
      %13 = vector.load %arg4[%c0_12, %c0_13] : memref<1x128xf32, #tpu.memory_space<vmem>>, vector<1x128xf32>
      %14 = vector.broadcast %13 : vector<1x128xf32> to vector<512x128xf32>
      %15 = arith.addf %12, %14 : vector<512x128xf32>
      %cst_14 = arith.constant 0.000000e+00 : f32
      %16 = vector.broadcast %cst_14 : f32 to vector<512x128xf32>
      %17 = arith.maximumf %15, %16 : vector<512x128xf32>
      %18 = arith.truncf %17 : vector<512x128xf32> to vector<512x128xbf16>
      %c0_15 = arith.constant 0 : index
      %c0_16 = arith.constant 0 : index
      %19 = vector.load %arg5[%c0_15, %c0_16] : memref<512x128xbf16, #tpu.memory_space<vmem>>, vector<512x128xbf16>
      tpu.vector_store %arg5[%c0_15, %c0_16], %18 {strides = array<i32>} : memref<512x128xbf16, #tpu.memory_space<vmem>>, vector<512x128xbf16>,
    } else {
    }
    return
  }
  func.func @transform_0(%arg0: i32, %arg1: i32) -> (i32, i32) {
    %c0_i32 = arith.constant 0 : i32
    return %arg0, %arg1 : i32, i32
  }
  func.func @transform_1(%arg0: i32, %arg1: i32) -> (i32, i32) {
    %c0_i32 = arith.constant 0 : i32
    %c0_i32_0 = arith.constant 0 : i32
    return %arg1, %c0_i32 : i32, i32
  }
  func.func @transform_2(%arg0: i32, %arg1: i32) -> (i32, i32) {
    %c0_i32 = arith.constant 0 : i32
    %c0_i32_0 = arith.constant 0 : i32
    %c0_i32_1 = arith.constant 0 : i32
    return %c0_i32, %c0_i32_0 : i32, i32
  }
  func.func @transform_3(%arg0: i32, %arg1: i32) -> (i32, i32) {
    %c0_i32 = arith.constant 0 : i32
    %c0_i32_0 = arith.constant 0 : i32
    return %arg0, %c0_i32 : i32, i32
  }
}

module attributes {stable_mosaic.version = 11 : i64} {
  func.func @_fused_matmul_kernel(%arg0: i32, %arg1: i32, %arg2: memref<512x72xbf16, #tpu.memory_space<vmem>>, %arg3: memref<72x128xbf16, #tpu.memory_space<vmem>>, %arg4: memref<1x128xf32, #tpu.memory_space<vmem>>, %arg5: memref<512x128xf32, #tpu.memory_space<vmem>>, %arg6: memref<512x128xf32, #tpu.memory_space<vmem>>) attributes {dimension_semantics = [#tpu.dimension_semantics<parallel>, #tpu.dimension_semantics<arbitrary>], iteration_bounds = array<i64: 16, 1>, scalar_prefetch = 0 : i64, scratch_operands = 1 : i64, tpu.core_type = #tpu.core_type<tc>, window_params = [{transform_indices = @transform_0, window_bounds = array<i64: 512, 72>}, {transform_indices = @transform_1, window_bounds = array<i64: 72, 128>}, {pipeline_mode = #tpu.pipeline_mode<synchronous>, transform_indices = @transform_2, window_bounds = array<i64: 1, 128>}, {transform_indices = @transform_3, window_bounds = array<i64: 512, 128>}]} {
    %c0_i32 = arith.constant 0 : i32
    %0 = arith.cmpi eq, %arg1, %c0_i32 : i32
    %1 = arith.extui %0 : i1 to i32
    %c0_i32_0 = arith.constant 0 : i32
    %2 = arith.cmpi ne, %1, %c0_i32_0 : i32
    scf.if %2 {
      %cst_10 = arith.constant 0.000000e+00 : f32
      %12 = vector.broadcast %cst_10 : f32 to vector<512x128xf32>
      %c0_11 = arith.constant 0 : index
      %c0_12 = arith.constant 0 : index
      %13 = vector.load %arg6[%c0_11, %c0_12] : memref<512x128xf32, #tpu.memory_space<vmem>>, vector<512x128xf32>
      tpu.vector_store %arg6[%c0_11, %c0_12], %12 {strides = array<i32>} : memref<512x128xf32, #tpu.memory_space<vmem>>, vector<512x128xf32>,
    } else {
    }
    %c0 = arith.constant 0 : index
    %c0_1 = arith.constant 0 : index
    %3 = vector.load %arg6[%c0, %c0_1] : memref<512x128xf32, #tpu.memory_space<vmem>>, vector<512x128xf32>
    %c0_2 = arith.constant 0 : index
    %c0_3 = arith.constant 0 : index
    %4 = vector.load %arg2[%c0_2, %c0_3] : memref<512x72xbf16, #tpu.memory_space<vmem>>, vector<512x72xbf16>
    %c0_4 = arith.constant 0 : index
    %c0_5 = arith.constant 0 : index
    %5 = vector.load %arg3[%c0_4, %c0_5] : memref<72x128xbf16, #tpu.memory_space<vmem>>, vector<72x128xbf16>
    %cst = arith.constant dense<0.000000e+00> : vector<512x128xf32>
    %6 = tpu.matmul %4, %5, %cst {dimension_numbers = #tpu.dot_dimension_numbers<[1], [0], [0], [1], [0, 0, 1, 1], [], []>} : vector<512x72xbf16>, vector<72x128xbf16>, vector<512x128xf32> -> vector<512x128xf32>
    %7 = arith.addf %3, %6 : vector<512x128xf32>
    %c0_6 = arith.constant 0 : index
    %c0_7 = arith.constant 0 : index
    %8 = vector.load %arg6[%c0_6, %c0_7] : memref<512x128xf32, #tpu.memory_space<vmem>>, vector<512x128xf32>
    tpu.vector_store %arg6[%c0_6, %c0_7], %7 {strides = array<i32>} : memref<512x128xf32, #tpu.memory_space<vmem>>, vector<512x128xf32>,
    %c0_i32_8 = arith.constant 0 : i32
    %9 = arith.cmpi eq, %arg1, %c0_i32_8 : i32
    %10 = arith.extui %9 : i1 to i32
    %c0_i32_9 = arith.constant 0 : i32
    %11 = arith.cmpi ne, %10, %c0_i32_9 : i32
    scf.if %11 {
      %c0_10 = arith.constant 0 : index
      %c0_11 = arith.constant 0 : index
      %12 = vector.load %arg6[%c0_10, %c0_11] : memref<512x128xf32, #tpu.memory_space<vmem>>, vector<512x128xf32>
      %c0_12 = arith.constant 0 : index
      %c0_13 = arith.constant 0 : index
      %13 = vector.load %arg4[%c0_12, %c0_13] : memref<1x128xf32, #tpu.memory_space<vmem>>, vector<1x128xf32>
      %14 = vector.broadcast %13 : vector<1x128xf32> to vector<512x128xf32>
      %15 = arith.addf %12, %14 : vector<512x128xf32>
      %16 = math.tanh %15 : vector<512x128xf32>
      %c0_14 = arith.constant 0 : index
      %c0_15 = arith.constant 0 : index
      %17 = vector.load %arg5[%c0_14, %c0_15] : memref<512x128xf32, #tpu.memory_space<vmem>>, vector<512x128xf32>
      tpu.vector_store %arg5[%c0_14, %c0_15], %16 {strides = array<i32>} : memref<512x128xf32, #tpu.memory_space<vmem>>, vector<512x128xf32>,
    } else {
    }
    return
  }
  func.func @transform_0(%arg0: i32, %arg1: i32) -> (i32, i32) {
    %c0_i32 = arith.constant 0 : i32
    return %arg0, %arg1 : i32, i32
  }
  func.func @transform_1(%arg0: i32, %arg1: i32) -> (i32, i32) {
    %c0_i32 = arith.constant 0 : i32
    %c0_i32_0 = arith.constant 0 : i32
    return %arg1, %c0_i32 : i32, i32
  }
  func.func @transform_2(%arg0: i32, %arg1: i32) -> (i32, i32) {
    %c0_i32 = arith.constant 0 : i32
    %c0_i32_0 = arith.constant 0 : i32
    %c0_i32_1 = arith.constant 0 : i32
    return %c0_i32, %c0_i32_0 : i32, i32
  }
  func.func @transform_3(%arg0: i32, %arg1: i32) -> (i32, i32) {
    %c0_i32 = arith.constant 0 : i32
    %c0_i32_0 = arith.constant 0 : i32
    return %arg0, %c0_i32 : i32, i32
  }
}

</mosaic_0001>

<bundles_post_ra>
// kernel: tile.43
= control target key start
LH: loop header
LB: loop body
LE: loop exit
PB: predicated region body
PF: predicated region fallthrough
CT: control target
= control target key end

     0   :  { %s28_s0 = inlined_call_operand.vmem [shape: f32[128], index: 0, kind: input, shape index: {}]   ;;  %s29_s1 = inlined_call_operand.vmem [shape: f32[16,128], index: 1, kind: output, shape index: {}]  }
   0x1   :  { %v4_v0 = vld [vmem:[%s28_s0] ss:$0 sm:$0xff] }
   0x2   :  { %5 = vst [vmem:[%s29_s1] sm:$0xff] %v4_v0 }
   0x3   :  { %8 = vst [vmem:[%s29_s1 + $0x8] sm:$0xff] %v4_v0 }

// kernel: tile.48
= control target key start
LH: loop header
LB: loop body
LE: loop exit
PB: predicated region body
PF: predicated region fallthrough
CT: control target
= control target key end

     0   :  { %s22_s0 = inlined_call_operand.vmem [shape: f32[64], index: 0, kind: input, shape index: {}]   ;;  %s23_s1 = inlined_call_operand.vmem [shape: f32[4,64], index: 1, kind: output, shape index: {}]  }
   0x1   :  { %v4_v0 = vld [vmem:[%s22_s0] ss:$0 sm:$0xff] }
   0x2   :  { %5 = vst [vmem:[%s23_s1] sm:$0xf] %v4_v0 }

// kernel: tile.49
= control target key start
LH: loop header
LB: loop body
LE: loop exit
PB: predicated region body
PF: predicated region fallthrough
CT: control target
= control target key end

     0   :  { %s6_s8 = smov 3  ;;  %vm8_vm0 = vcmask 523264   ;;  %s31_s9 = smov 64   ;;  %vm15_vm1 = vcmask 1048064   ;;  %s51_s0 = inlined_call_operand.vmem [shape: f32[4,64], index: 0, kind: input, shape index: {}]   ;;  %s52_s1 = inlined_call_operand.vmem [shape: f32[1,256], index: 1, kind: output, shape index: {}]  }
   0x1   :  { %v4_v0 = vld [vmem:[%s51_s0] sm:$0xf]  ;;  %s11_s0 = smov 3 }
   0x2   :  { %5 = vst [vmem:[#allocation1] sm:$0xf] %v4_v0 }
   0x9   :  { %v12_v1 = vld [vmem:[#allocation1 + $0x1] ss:$2 sm:%s11_s0]   ;;  %v7_v2 = vld [vmem:[#allocation1] ss:$2 sm:%s6_s8]  }
   0xa   :  { %13 = vrot.lane.b32.xlu0 %v12_v1, %s31_s9  ;;  %9 = vst.msk [vmem:[#allocation0] ss:$8 sm:$0x3] %vm8_vm0, %v7_v2  }
  0x7c   :  { %v14_v3 = vpop.permute.xlu0 %13  }
  0x7d   :  { %16 = vst.msk [vmem:[#allocation0] ss:$8 sm:$0x3] %vm15_vm1, %v14_v3  }
  0x84   :  { %v19_v4 = vld [vmem:[#allocation0] sm:$0x1]  ;;  %v24_v5 = vld [vmem:[#allocation0 + $0x8] sm:$0x1] }
  0x85   :  { %22 = vst [vmem:[%s52_s1] sm:$0x1] %v19_v4 }
  0x86   :  { %29 = vst [vmem:[%s52_s1 + $0x1] sm:$0x1] %v24_v5 }

// kernel: generator_forward.6
= control target key start
LH: loop header
LB: loop body
LE: loop exit
PB: predicated region body
PF: predicated region fallthrough
CT: control target
= control target key end

     0   :  { %vm124_vm0 = vcmask 130048   ;;  %vm364_vm1 = vcmask 1041408   ;;  %vm366_vm2 = vcmask 1045508   ;;  %vm368_vm3 = vcmask 1043456   ;;  %s876_s1 = inlined_call_operand.vmem [shape: bf16[16,2048], index: 1, kind: input, shape index: {}]   ;;  %s877_s0 = inlined_call_operand.vmem [shape: bf16[2,16], index: 0, kind: input, shape index: {}]   ;;  %s878_s2 = inlined_call_operand.vmem [shape: f32[1,2048], index: 2, kind: input, shape index: {}]   ;;  %s879_s3 = inlined_call_operand.vmem [shape: bf16[2,2048], index: 3, kind: output, shape index: {}]  }
   0x1   :  { %v569_v0 = vld [vmem:[%s876_s1] sm:$0xf]  ;;  %v647_v2 = vld [vmem:[%s876_s1 + $0x4] sm:$0xf]  ;;  %v577_v5 = vld [vmem:[%s876_s1 + $0x8] sm:$0xf] }
   0x2   :  { %v655_v1 = vld [vmem:[%s876_s1 + $0x3c] sm:$0xf0]  ;;  %v571_v4 = vld [vmem:[%s876_s1 + $0x40] sm:$0xf0]  ;;  %v656_v6 = vld [vmem:[%s876_s1 + $0x44] sm:$0xf0] }
   0x3   :  { %v570_v3 = vor.u32 %v655_v1, %v569_v0  ;;  %v574_v7 = vor.u32 %v647_v2, %v571_v4  ;;  %v578_v8 = vor.u32 %v656_v6, %v577_v5  ;;  %v648_v9 = vld [vmem:[%s876_s1 + $0xc] sm:$0xf]  ;;  %v710_v11 = vld [vmem:[%s877_s0] sm:$0x1]  ;;  %v593_v13 = vld [vmem:[%s876_s1 + $0x18] sm:$0xf] }
   0x4   :  { %v579_v10 = vld [vmem:[%s876_s1 + $0x48] sm:$0xf0]  ;;  %v658_v14 = vld [vmem:[%s876_s1 + $0x54] sm:$0xf0]  ;;  %v650_v15 = vld [vmem:[%s876_s1 + $0x1c] sm:$0xf] }
   0x5   :  { %135 = vmatpush.bf16.msra.mxu0 %v570_v3  ;;  %v582_v12 = vor.u32 %v648_v9, %v579_v10  ;;  %148 = vmatpush.bf16.msra.mxu1 %v574_v7  ;;  %v594_v16 = vor.u32 %v658_v14, %v593_v13  ;;  %v595_v17 = vld [vmem:[%s876_s1 + $0x58] sm:$0xf0]  ;;  %v649_v18 = vld [vmem:[%s876_s1 + $0x14] sm:$0xf]  ;;  %v585_v22 = vld [vmem:[%s876_s1 + $0x10] sm:$0xf] }
   0x6   :  { %161 = vmatpush.bf16.msra.mxu2 %v578_v8  ;;  %v587_v19 = vld [vmem:[%s876_s1 + $0x50] sm:$0xf0]  ;;  %v598_v20 = vor.u32 %v650_v15, %v595_v17  ;;  %v657_v23 = vld [vmem:[%s876_s1 + $0x4c] sm:$0xf0]  ;;  %v609_v24 = vld [vmem:[%s876_s1 + $0x28] sm:$0xf] }
   0x7   :  { %174 = vmatpush.bf16.msra.mxu3 %v582_v12  ;;  %v590_v21 = vor.u32 %v649_v18, %v587_v19  ;;  %v586_v25 = vor.u32 %v657_v23, %v585_v22  ;;  %v660_v26 = vld [vmem:[%s876_s1 + $0x64] sm:$0xf0]  ;;  %v652_v27 = vld [vmem:[%s876_s1 + $0x2c] sm:$0xf]  ;;  %v651_v31 = vld [vmem:[%s876_s1 + $0x24] sm:$0xf] }
   0x8   :  { %631 = vmatmul.msk.bf16.vlgmr.msra.gmra.mxu0 %vm124_vm0, %v710_v11  ;;  %v611_v28 = vld [vmem:[%s876_s1 + $0x68] sm:$0xf0]  ;;  %632 = vmatmul.msk.bf16.vlgmr.msra.gmra.mxu1 %vm124_vm0, %v710_v11  ;;  %v610_v29 = vor.u32 %v660_v26, %v609_v24  ;;  %v603_v32 = vld [vmem:[%s876_s1 + $0x60] sm:$0xf0]  ;;  %v601_v33 = vld [vmem:[%s876_s1 + $0x20] sm:$0xf] }
   0x9   :  { %633 = vmatmul.msk.bf16.vlgmr.msra.gmra.mxu2 %vm124_vm0, %v710_v11  ;;  %v614_v30 = vor.u32 %v652_v27, %v611_v28  ;;  %200 = vmatpush.bf16.msrb.mxu1 %v590_v21  ;;  %v606_v34 = vor.u32 %v651_v31, %v603_v32  ;;  %v659_v35 = vld [vmem:[%s876_s1 + $0x5c] sm:$0xf0]  ;;  %v625_v37 = vld [vmem:[%s876_s1 + $0x38] sm:$0xf]  ;;  %v654_v39 = vld [vmem:[%s876_s1 + $0x3c] sm:$0xf] }
   0xa   :  { %213 = vmatpush.bf16.msrb.mxu2 %v594_v16  ;;  %634 = vmatmul.msk.bf16.vlgmr.msra.gmra.mxu3 %vm124_vm0, %v710_v11  ;;  %v602_v36 = vor.u32 %v659_v35, %v601_v33  ;;  %v662_v38 = vld [vmem:[%s876_s1 + $0x74] sm:$0xf0]  ;;  %v627_v40 = vld [vmem:[%s876_s1 + $0x78] sm:$0xf0]  ;;  %v653_v41 = vld [vmem:[%s876_s1 + $0x34] sm:$0xf] }
   0xb   :  { %226 = vmatpush.bf16.msrb.mxu3 %v598_v20  ;;  %187 = vmatpush.bf16.msrb.mxu0 %v586_v25  ;;  %v619_v42 = vld [vmem:[%s876_s1 + $0x70] sm:$0xf0]  ;;  %v617_v43 = vld [vmem:[%s876_s1 + $0x30] sm:$0xf]  ;;  %v626_v45 = vor.u32 %v662_v38, %v625_v37  ;;  %v630_v46 = vor.u32 %v654_v39, %v627_v40  ;;  %v398_v49 = vld [vmem:[%s878_s2] sm:$0xff]  ;;  %vm525_vm4 = vcmask 1040384  }
   0xc   :  { %v661_v44 = vld [vmem:[%s876_s1 + $0x6c] sm:$0xf0]  ;;  %v622_v47 = vor.u32 %v653_v41, %v619_v42  ;;  %v403_v50 = vperm.slane %v398_v49, 1  ;;  %v404_v51 = vperm.slane %v398_v49, 2  ;;  %v405_v52 = vperm.slane %v398_v49, 3 }
   0xd   :  { %252 = vmatpush.bf16.msra.mxu1 %v606_v34  ;;  %v618_v48 = vor.u32 %v661_v44, %v617_v43  ;;  %v402_v55 = vperm.slane %v398_v49, 0  ;;  %v408_v12 = vperm.slane %v398_v49, 6  ;;  %v409_v13 = vperm.slane %v398_v49, 7  ;;  %v834_v34 = vld [vmem:[%s878_s2 + $0x8] sm:$0xff] }
   0xe   :  { %265 = vmatpush.bf16.msra.mxu2 %v610_v29  ;;  %v418_v56 = vrot.slane %v403_v50, 6  ;;  %v419_v57 = vrot.slane %v404_v51, 4  ;;  %v420_v58 = vrot.slane %v405_v52, 2  ;;  %v406_v17 = vperm.slane %v398_v49, 4 }
   0xf   :  { %278 = vmatpush.bf16.msra.mxu3 %v614_v30  ;;  %239 = vmatpush.bf16.msra.mxu0 %v602_v36  ;;  %v422_v19 = vrot.slane %v408_v12, 4  ;;  %v423_v20 = vrot.slane %v409_v13, 2  ;;  %v411_v38 = vperm.slane %v834_v34, 1  ;;  %v412_v39 = vperm.slane %v834_v34, 2 }
  0x10   :  { %v430_v61 = vsel %vm364_vm1, %v402_v55, %v418_v56  ;;  %v431_v62 = vsel %vm366_vm2, %v419_v57, %v420_v58  ;;  %v413_v40 = vperm.slane %v834_v34, 3  ;;  %vm529_vm5 = vcmask 1042434  }
  0x11   :  { %v432_v5 = vsel %vm368_vm3, %v430_v61, %v431_v62  ;;  %v434_v24 = vsel %vm366_vm2, %v422_v19, %v423_v20  ;;  %v425_v50 = vrot.slane %v412_v39, 4  ;;  %vm534_vm6 = vcmask 1044484  }
  0x12   :  { %v426_v51 = vrot.slane %v413_v40, 2  ;;  %vm538_vm7 = vcmask 1046534  }
  0x14   :  { %v437_v57 = vsel %vm366_vm2, %v425_v50, %v426_v51 }
  0x18   :  { %635 = vmatmul.msk.bf16.vlgmr.msrb.gmra.mxu0 %vm124_vm0, %v710_v11  ;;  %636 = vmatmul.msk.bf16.vlgmr.msrb.gmra.mxu1 %vm124_vm0, %v710_v11 }
  0x19   :  { %637 = vmatmul.msk.bf16.vlgmr.msrb.gmra.mxu2 %vm124_vm0, %v710_v11  ;;  %304 = vmatpush.bf16.msrb.mxu1 %v622_v47 }
  0x1a   :  { %638 = vmatmul.msk.bf16.vlgmr.msrb.gmra.mxu3 %vm124_vm0, %v710_v11  ;;  %317 = vmatpush.bf16.msrb.mxu2 %v626_v45 }
  0x1b   :  { %330 = vmatpush.bf16.msrb.mxu3 %v630_v46  ;;  %291 = vmatpush.bf16.msrb.mxu0 %v618_v48  ;;  %v410_v48 = vperm.slane %v834_v34, 0 }
  0x28   :  { %639 = vmatmul.msk.bf16.vlgmr.msra.gmra.mxu0 %vm124_vm0, %v710_v11  ;;  %640 = vmatmul.msk.bf16.vlgmr.msra.gmra.mxu1 %vm124_vm0, %v710_v11 }
  0x29   :  { %641 = vmatmul.msk.bf16.vlgmr.msra.gmra.mxu2 %vm124_vm0, %v710_v11 }
  0x2a   :  { %642 = vmatmul.msk.bf16.vlgmr.msra.gmra.mxu3 %vm124_vm0, %v710_v11 }
  0x38   :  { %643 = vmatmul.msk.bf16.vlgmr.msrb.gmra.mxu0 %vm124_vm0, %v710_v11  ;;  %644 = vmatmul.msk.bf16.vlgmr.msrb.gmra.mxu1 %vm124_vm0, %v710_v11 }
  0x39   :  { %645 = vmatmul.msk.bf16.vlgmr.msrb.gmra.mxu2 %vm124_vm0, %v710_v11 }
  0x3a   :  { %646 = vmatmul.msk.bf16.vlgmr.msrb.gmra.mxu3 %vm124_vm0, %v710_v11  ;;  %v407_v11 = vperm.slane %v398_v49, 5  ;;  %v424_v49 = vrot.slane %v411_v38, 6 }
  0x3c   :  { %v421_v18 = vrot.slane %v407_v11, 6  ;;  %v436_v56 = vsel %vm364_vm1, %v410_v48, %v424_v49 }
  0x3e   :  { %v433_v23 = vsel %vm364_vm1, %v406_v17, %v421_v18 }
  0x3f   :  { %v435_v31 = vsel %vm368_vm3, %v433_v23, %v434_v24 }
  0x85   :  { %v137_v53 = vpop.f32.mrf.mxu0  ;;  %v150_v54 = vpop.f32.mrf.mxu1 }
  0x86   :  { %v352_v59 = vrot.slane %v150_v54, 6 }
  0x88   :  { %v365_v2 = vsel %vm364_vm1, %v137_v53, %v352_v59 }
  0x8c   :  { %v163_v60 = vpop.f32.mrf.mxu2 }
  0x8d   :  { %v353_v63 = vrot.slane %v163_v60, 4  ;;  %v176_v0 = vpop.f32.mrf.mxu3  ;;  %v139_v1 = vpop.f32.mrf.mxu0 }
  0x8e   :  { %v354_v3 = vrot.slane %v176_v0, 2  ;;  %v152_v4 = vpop.f32.mrf.mxu1 }
  0x90   :  { %v367_v6 = vsel %vm366_vm2, %v353_v63, %v354_v3 }
  0x91   :  { %v369_v7 = vsel %vm368_vm3, %v365_v2, %v367_v6 }
  0x92   :  { %v446_v8 = vadd.f32 %v432_v5, %v369_v7  ;;  %v438_v5 = vsel %vm368_vm3, %v436_v56, %v437_v57 }
  0x94   :  { %v450_v9 = vmax.f32 %v446_v8, 0.0  ;;  %v165_v10 = vpop.f32.mrf.mxu2 }
  0x95   :  { %v178_v14 = vpop.f32.mrf.mxu3  ;;  %v189_v15 = vpop.f32.mrf.mxu0 }
  0x96   :  { %458 = vst [vmem:[#allocation1] ss:$4 sm:$0xff] %v450_v9  ;;  %v202_v16 = vpop.f32.mrf.mxu1 }
  0x97   :  { %v355_v21 = vrot.slane %v202_v16, 6 }
  0x99   :  { %v370_v28 = vsel %vm364_vm1, %v189_v15, %v355_v21 }
  0x9c   :  { %v215_v22 = vpop.f32.mrf.mxu2 }
  0x9d   :  { %v356_v25 = vrot.slane %v215_v22, 4  ;;  %v228_v26 = vpop.f32.mrf.mxu3  ;;  %v191_v27 = vpop.f32.mrf.mxu0  ;;  %v461_v43 = vld.sshfl [vmem:[#allocation1] sm:$0xff pattern:$0x73625140]  ;;  %v415_v22 = vperm.slane %v834_v34, 5 }
  0x9e   :  { %v357_v29 = vrot.slane %v228_v26, 2  ;;  %v204_v30 = vpop.f32.mrf.mxu1  ;;  %v462_v45 = vld.sshfl [vmem:[#allocation1 + $0x8] sm:$0xff pattern:$0x73625140]  ;;  %v416_v27 = vperm.slane %v834_v34, 6 }
  0x9f   :  { %v463_v46 = vld.sshfl [vmem:[#allocation1 + $0x10] sm:$0xff pattern:$0x73625140]  ;;  %v464_v47 = vld.sshfl [vmem:[#allocation1 + $0x18] sm:$0xff pattern:$0x73625140]  ;;  %v495_v52 = vpack.c.bf16 %v462_v45, %v461_v43 }
  0xa0   :  { %v371_v32 = vsel %vm366_vm2, %v356_v25, %v357_v29  ;;  %v496_v54 = vpack.c.bf16 %v464_v47, %v463_v46 }
  0xa1   :  { %v372_v33 = vsel %vm368_vm3, %v370_v28, %v371_v32  ;;  %v511_v60 = vrot.slane %v495_v52, 3  ;;  %v417_v28 = vperm.slane %v834_v34, 7  ;;  %v414_v32 = vperm.slane %v834_v34, 4 }
  0xa2   :  { %v447_v35 = vadd.f32 %v435_v31, %v372_v33  ;;  %v512_v1 = vrot.slane %v496_v54, 6  ;;  %v513_v2 = vrot.slane %v496_v54, 1  ;;  %v427_v33 = vrot.slane %v415_v22, 6 }
  0xa3   :  { %v528_v12 = vsel %vm525_vm4, %v495_v52, %v511_v60 }
  0xa4   :  { %v451_v36 = vmax.f32 %v447_v35, 0.0  ;;  %v217_v37 = vpop.f32.mrf.mxu2  ;;  %v532_v16 = vsel %vm529_vm5, %v512_v1, %v513_v2  ;;  %v428_v35 = vrot.slane %v416_v27, 4  ;;  %v439_v40 = vsel %vm364_vm1, %v414_v32, %v427_v33 }
  0xa5   :  { %v230_v41 = vpop.f32.mrf.mxu3  ;;  %v241_v42 = vpop.f32.mrf.mxu0  ;;  %v533_v24 = vsel %vm364_vm1, %v528_v12, %v532_v16 }
  0xa6   :  { %460 = vst [vmem:[#allocation1 + $0x20] ss:$4 sm:$0xff] %v451_v36  ;;  %v254_v44 = vpop.f32.mrf.mxu1  ;;  %v429_v36 = vrot.slane %v417_v28, 2 }
  0xa7   :  { %v358_v53 = vrot.slane %v254_v44, 6 }
  0xa8   :  { %v440_v41 = vsel %vm366_vm2, %v428_v35, %v429_v36 }
  0xa9   :  { %v373_v63 = vsel %vm364_vm1, %v241_v42, %v358_v53  ;;  %v441_v47 = vsel %vm368_vm3, %v439_v40, %v440_v41 }
  0xac   :  { %v267_v55 = vpop.f32.mrf.mxu2 }
  0xad   :  { %v359_v58 = vrot.slane %v267_v55, 4  ;;  %v280_v59 = vpop.f32.mrf.mxu3  ;;  %v243_v61 = vpop.f32.mrf.mxu0  ;;  %v465_v62 = vld.sshfl [vmem:[#allocation1 + $0x20] sm:$0xff pattern:$0x73625140] }
  0xae   :  { %v360_v0 = vrot.slane %v280_v59, 2  ;;  %v256_v3 = vpop.f32.mrf.mxu1  ;;  %v466_v4 = vld.sshfl [vmem:[#allocation1 + $0x28] sm:$0xff pattern:$0x73625140] }
  0xaf   :  { %v467_v6 = vld.sshfl [vmem:[#allocation1 + $0x30] sm:$0xff pattern:$0x73625140]  ;;  %v468_v7 = vld.sshfl [vmem:[#allocation1 + $0x38] sm:$0xff pattern:$0x73625140]  ;;  %v497_v8 = vpack.c.bf16 %v466_v4, %v465_v62 }
  0xb0   :  { %v374_v9 = vsel %vm366_vm2, %v359_v58, %v360_v0  ;;  %v498_v10 = vpack.c.bf16 %v468_v7, %v467_v6 }
  0xb1   :  { %v375_v11 = vsel %vm368_vm3, %v373_v63, %v374_v9  ;;  %v514_v13 = vrot.slane %v497_v8, 4  ;;  %v515_v14 = vrot.slane %v497_v8, 7 }
  0xb2   :  { %v448_v15 = vadd.f32 %v438_v5, %v375_v11  ;;  %v516_v17 = vrot.slane %v498_v10, 2  ;;  %v517_v18 = vrot.slane %v498_v10, 5 }
  0xb3   :  { %v537_v19 = vsel %vm534_vm6, %v514_v13, %v515_v14 }
  0xb4   :  { %v452_v20 = vmax.f32 %v448_v15, 0.0  ;;  %v269_v21 = vpop.f32.mrf.mxu2  ;;  %v541_v23 = vsel %vm538_vm7, %v516_v17, %v517_v18 }
  0xb5   :  { %v282_v25 = vpop.f32.mrf.mxu3  ;;  %v293_v26 = vpop.f32.mrf.mxu0  ;;  %v542_v29 = vsel %vm366_vm2, %v537_v19, %v541_v23 }
  0xb6   :  { %469 = vst [vmem:[#allocation1] ss:$4 sm:$0xff] %v452_v20  ;;  %v306_v30 = vpop.f32.mrf.mxu1  ;;  %v543_v31 = vsel %vm368_vm3, %v533_v24, %v542_v29 }
  0xb7   :  { %561 = vst [vmem:[%s879_s3] sm:$0xff] %v543_v31  ;;  %v361_v37 = vrot.slane %v306_v30, 6 }
  0xb9   :  { %v376_v44 = vsel %vm364_vm1, %v293_v26, %v361_v37 }
  0xbc   :  { %v319_v38 = vpop.f32.mrf.mxu2 }
  0xbd   :  { %v332_v39 = vpop.f32.mrf.mxu3  ;;  %v295_v42 = vpop.f32.mrf.mxu0  ;;  %v362_v45 = vrot.slane %v319_v38, 4  ;;  %v471_v50 = vld.sshfl [vmem:[#allocation1] sm:$0xff pattern:$0x73625140] }
  0xbe   :  { %v308_v43 = vpop.f32.mrf.mxu1  ;;  %v363_v46 = vrot.slane %v332_v39, 2  ;;  %v472_v52 = vld.sshfl [vmem:[#allocation1 + $0x8] sm:$0xff pattern:$0x73625140] }
  0xbf   :  { %v473_v55 = vld.sshfl [vmem:[#allocation1 + $0x10] sm:$0xff pattern:$0x73625140]  ;;  %v474_v56 = vld.sshfl [vmem:[#allocation1 + $0x18] sm:$0xff pattern:$0x73625140]  ;;  %v499_v57 = vpack.c.bf16 %v472_v52, %v471_v50 }
  0xc0   :  { %v377_v34 = vsel %vm366_vm2, %v362_v45, %v363_v46  ;;  %v500_v58 = vpack.c.bf16 %v474_v56, %v473_v55 }
  0xc1   :  { %v378_v48 = vsel %vm368_vm3, %v376_v44, %v377_v34  ;;  %v518_v59 = vrot.slane %v499_v57, 3 }
  0xc2   :  { %v449_v49 = vadd.f32 %v441_v47, %v378_v48  ;;  %v519_v60 = vrot.slane %v500_v58, 6  ;;  %v520_v61 = vrot.slane %v500_v58, 1 }
  0xc3   :  { %v546_v6 = vsel %vm525_vm4, %v499_v57, %v518_v59 }
  0xc4   :  { %v321_v51 = vpop.f32.mrf.mxu2  ;;  %v453_v53 = vmax.f32 %v449_v49, 0.0  ;;  %v549_v7 = vsel %vm529_vm5, %v519_v60, %v520_v61 }
  0xc5   :  { %v334_v54 = vpop.f32.mrf.mxu3  ;;  %v550_v12 = vsel %vm364_vm1, %v546_v6, %v549_v7 }
  0xc6   :  { %470 = vst [vmem:[#allocation1 + $0x20] ss:$4 sm:$0xff] %v453_v53 }
  0xcd   :  { %v475_v62 = vld.sshfl [vmem:[#allocation1 + $0x20] sm:$0xff pattern:$0x73625140]  ;;  %v476_v63 = vld.sshfl [vmem:[#allocation1 + $0x28] sm:$0xff pattern:$0x73625140] }
  0xce   :  { %v477_v0 = vld.sshfl [vmem:[#allocation1 + $0x30] sm:$0xff pattern:$0x73625140]  ;;  %v478_v1 = vld.sshfl [vmem:[#allocation1 + $0x38] sm:$0xff pattern:$0x73625140]  ;;  %v501_v2 = vpack.c.bf16 %v476_v63, %v475_v62 }
  0xcf   :  { %v502_v3 = vpack.c.bf16 %v478_v1, %v477_v0 }
  0xd0   :  { %v521_v4 = vrot.slane %v501_v2, 4  ;;  %v522_v5 = vrot.slane %v501_v2, 7 }
  0xd1   :  { %v523_v8 = vrot.slane %v502_v3, 2  ;;  %v524_v9 = vrot.slane %v502_v3, 5 }
  0xd2   :  { %v553_v10 = vsel %vm534_vm6, %v521_v4, %v522_v5 }
  0xd3   :  { %v556_v11 = vsel %vm538_vm7, %v523_v8, %v524_v9 }
  0xd4   :  { %v557_v13 = vsel %vm366_vm2, %v553_v10, %v556_v11 }
  0xd5   :  { %v558_v14 = vsel %vm368_vm3, %v550_v12, %v557_v13 }
  0xd6   :  { %562 = vst [vmem:[%s879_s3 + $0x8] sm:$0xff] %v558_v14 }

// kernel: generator_forward.7
= control target key start
LH: loop header
LB: loop body
LE: loop exit
PB: predicated region body
PF: predicated region fallthrough
CT: control target
= control target key end

     0   :  { %s3330_s1 = inlined_call_operand.vmem [shape: bf16[1152,256], index: 1, kind: input, shape index: {}]   ;;  %s3331_s0 = inlined_call_operand.vmem [shape: bf16[32,1152], index: 0, kind: input, shape index: {}]   ;;  %s3332_s2 = inlined_call_operand.vmem [shape: f32[1,256], index: 2, kind: input, shape index: {}]   ;;  %s3333_s3 = inlined_call_operand.vmem [shape: bf16[32,256], index: 3, kind: output, shape index: {}]  }
   0x1   :  { %v1543_v0 = vld [vmem:[%s3330_s1 + $0x70] sm:$0xf]  ;;  %v2094_v1 = vld [vmem:[%s3330_s1 + $0x74] sm:$0xf0]  ;;  %v1535_v11 = vld [vmem:[%s3330_s1 + $0x60] sm:$0xf] }
   0x2   :  { %v1607_v2 = vld [vmem:[%s3330_s1 + $0xf0] sm:$0xf]  ;;  %v1544_v3 = vor.u32 %v2094_v1, %v1543_v0  ;;  %v2110_v4 = vld [vmem:[%s3330_s1 + $0xf4] sm:$0xf0]  ;;  %v2092_v13 = vld [vmem:[%s3330_s1 + $0x64] sm:$0xf0] }
   0x3   :  { %v1671_v5 = vld [vmem:[%s3330_s1 + $0x170] sm:$0xf]  ;;  %v2126_v6 = vld [vmem:[%s3330_s1 + $0x174] sm:$0xf0]  ;;  %v1608_v7 = vor.u32 %v2110_v4, %v1607_v2  ;;  %v1599_v14 = vld [vmem:[%s3330_s1 + $0xe0] sm:$0xf]  ;;  %v1536_v16 = vor.u32 %v2092_v13, %v1535_v11 }
   0x4   :  { %v1672_v8 = vor.u32 %v2126_v6, %v1671_v5  ;;  %v1735_v9 = vld [vmem:[%s3330_s1 + $0x1f0] sm:$0xf]  ;;  %v2142_v10 = vld [vmem:[%s3330_s1 + $0x1f4] sm:$0xf0]  ;;  %1010 = vmatpush.bf16.msra.mxu0 %v1544_v3  ;;  %v2108_v15 = vld [vmem:[%s3330_s1 + $0xe4] sm:$0xf0] }
   0x5   :  { %v1736_v12 = vor.u32 %v2142_v10, %v1735_v9  ;;  %1029 = vmatpush.bf16.msra.mxu1 %v1608_v7  ;;  %v1600_v17 = vor.u32 %v2108_v15, %v1599_v14  ;;  %v1663_v18 = vld [vmem:[%s3330_s1 + $0x160] sm:$0xf]  ;;  %v2124_v19 = vld [vmem:[%s3330_s1 + $0x164] sm:$0xf0]  ;;  %v1527_v23 = vld [vmem:[%s3330_s1 + $0x50] sm:$0xf] }
   0x6   :  { %1048 = vmatpush.bf16.msra.mxu2 %v1672_v8  ;;  %v1727_v20 = vld [vmem:[%s3330_s1 + $0x1e0] sm:$0xf]  ;;  %v1664_v21 = vor.u32 %v2124_v19, %v1663_v18  ;;  %v2140_v22 = vld [vmem:[%s3330_s1 + $0x1e4] sm:$0xf0]  ;;  %v2090_v24 = vld [vmem:[%s3330_s1 + $0x54] sm:$0xf0] }
   0x7   :  { %1067 = vmatpush.bf16.msra.mxu3 %v1736_v12  ;;  %v1728_v25 = vor.u32 %v2140_v22, %v1727_v20  ;;  %v1591_v26 = vld [vmem:[%s3330_s1 + $0xd0] sm:$0xf]  ;;  %v2106_v27 = vld [vmem:[%s3330_s1 + $0xd4] sm:$0xf0]  ;;  %v1528_v29 = vor.u32 %v2090_v24, %v1527_v23  ;;  %v1519_v35 = vld [vmem:[%s3330_s1 + $0x40] sm:$0xf] }
   0x8   :  { %v1655_v28 = vld [vmem:[%s3330_s1 + $0x150] sm:$0xf]  ;;  %1011 = vmatpush.bf16.msra.mxu0 %v1536_v16  ;;  %v2122_v30 = vld [vmem:[%s3330_s1 + $0x154] sm:$0xf0]  ;;  %v1592_v33 = vor.u32 %v2106_v27, %v1591_v26  ;;  %v2088_v36 = vld [vmem:[%s3330_s1 + $0x44] sm:$0xf0] }
   0x9   :  { %v1719_v31 = vld [vmem:[%s3330_s1 + $0x1d0] sm:$0xf]  ;;  %v2138_v32 = vld [vmem:[%s3330_s1 + $0x1d4] sm:$0xf0]  ;;  %1030 = vmatpush.bf16.msra.mxu1 %v1600_v17  ;;  %v1656_v34 = vor.u32 %v2122_v30, %v1655_v28  ;;  %v1583_v37 = vld [vmem:[%s3330_s1 + $0xc0] sm:$0xf]  ;;  %v1520_v44 = vor.u32 %v2088_v36, %v1519_v35 }
   0xa   :  { %1049 = vmatpush.bf16.msra.mxu2 %v1664_v21  ;;  %v1720_v38 = vor.u32 %v2138_v32, %v1719_v31  ;;  %v2104_v39 = vld [vmem:[%s3330_s1 + $0xc4] sm:$0xf0]  ;;  %v1647_v40 = vld [vmem:[%s3330_s1 + $0x140] sm:$0xf]  ;;  %v1511_v47 = vld [vmem:[%s3330_s1 + $0x30] sm:$0xf] }
   0xb   :  { %1068 = vmatpush.bf16.msra.mxu3 %v1728_v25  ;;  %v2120_v41 = vld [vmem:[%s3330_s1 + $0x144] sm:$0xf0]  ;;  %v1711_v42 = vld [vmem:[%s3330_s1 + $0x1c0] sm:$0xf]  ;;  %v1584_v45 = vor.u32 %v2104_v39, %v1583_v37  ;;  %v2086_v48 = vld [vmem:[%s3330_s1 + $0x34] sm:$0xf0] }
   0xc   :  { %v2136_v43 = vld [vmem:[%s3330_s1 + $0x1c4] sm:$0xf0]  ;;  %1012 = vmatpush.bf16.msra.mxu0 %v1528_v29  ;;  %v1648_v46 = vor.u32 %v2120_v41, %v1647_v40  ;;  %v1575_v49 = vld [vmem:[%s3330_s1 + $0xb0] sm:$0xf]  ;;  %v2102_v51 = vld [vmem:[%s3330_s1 + $0xb4] sm:$0xf0]  ;;  %v1512_v56 = vor.u32 %v2086_v48, %v1511_v47 }
   0xd   :  { %1031 = vmatpush.bf16.msra.mxu1 %v1592_v33  ;;  %v1712_v50 = vor.u32 %v2136_v43, %v1711_v42  ;;  %v1639_v52 = vld [vmem:[%s3330_s1 + $0x130] sm:$0xf]  ;;  %v2118_v53 = vld [vmem:[%s3330_s1 + $0x134] sm:$0xf0]  ;;  %v1576_v57 = vor.u32 %v2102_v51, %v1575_v49  ;;  %v1503_v59 = vld [vmem:[%s3330_s1 + $0x20] sm:$0xf] }
   0xe   :  { %1050 = vmatpush.bf16.msra.mxu2 %v1656_v34  ;;  %v1703_v54 = vld [vmem:[%s3330_s1 + $0x1b0] sm:$0xf]  ;;  %v2134_v55 = vld [vmem:[%s3330_s1 + $0x1b4] sm:$0xf0]  ;;  %v1640_v58 = vor.u32 %v2118_v53, %v1639_v52  ;;  %v2084_v60 = vld [vmem:[%s3330_s1 + $0x24] sm:$0xf0] }
   0xf   :  { %1069 = vmatpush.bf16.msra.mxu3 %v1720_v38  ;;  %v1567_v61 = vld [vmem:[%s3330_s1 + $0xa0] sm:$0xf]  ;;  %v1704_v62 = vor.u32 %v2134_v55, %v1703_v54  ;;  %v2100_v63 = vld [vmem:[%s3330_s1 + $0xa4] sm:$0xf0]  ;;  %v1504_v4 = vor.u32 %v2084_v60, %v1503_v59  ;;  %v1495_v7 = vld [vmem:[%s3330_s1 + $0x10] sm:$0xf] }
  0x10   :  { %1013 = vmatpush.bf16.msra.mxu0 %v1520_v44  ;;  %v1631_v0 = vld [vmem:[%s3330_s1 + $0x120] sm:$0xf]  ;;  %v2116_v1 = vld [vmem:[%s3330_s1 + $0x124] sm:$0xf0]  ;;  %v1568_v5 = vor.u32 %v2100_v63, %v1567_v61  ;;  %v2082_v8 = vld [vmem:[%s3330_s1 + $0x14] sm:$0xf0] }
  0x11   :  { %1032 = vmatpush.bf16.msra.mxu1 %v1584_v45  ;;  %v1695_v2 = vld [vmem:[%s3330_s1 + $0x1a0] sm:$0xf]  ;;  %v2132_v3 = vld [vmem:[%s3330_s1 + $0x1a4] sm:$0xf0]  ;;  %v1632_v6 = vor.u32 %v2116_v1, %v1631_v0  ;;  %v1559_v9 = vld [vmem:[%s3330_s1 + $0x90] sm:$0xf]  ;;  %v1496_v17 = vor.u32 %v2082_v8, %v1495_v7 }
  0x12   :  { %1051 = vmatpush.bf16.msra.mxu2 %v1648_v46  ;;  %v1696_v10 = vor.u32 %v2132_v3, %v1695_v2  ;;  %v2098_v11 = vld [vmem:[%s3330_s1 + $0x94] sm:$0xf0]  ;;  %v1623_v12 = vld [vmem:[%s3330_s1 + $0x110] sm:$0xf]  ;;  %v1487_v16 = vld [vmem:[%s3330_s1] sm:$0xf] }
  0x13   :  { %1070 = vmatpush.bf16.msra.mxu3 %v1712_v50  ;;  %v2114_v13 = vld [vmem:[%s3330_s1 + $0x114] sm:$0xf0]  ;;  %v1687_v14 = vld [vmem:[%s3330_s1 + $0x190] sm:$0xf]  ;;  %v2080_v18 = vld [vmem:[%s3330_s1 + $0x4] sm:$0xf0]  ;;  %v1560_v21 = vor.u32 %v2098_v11, %v1559_v9 }
  0x14   :  { %1014 = vmatpush.bf16.msra.mxu0 %v1512_v56  ;;  %v2130_v15 = vld [vmem:[%s3330_s1 + $0x194] sm:$0xf0]  ;;  %v1551_v19 = vld [vmem:[%s3330_s1 + $0x80] sm:$0xf]  ;;  %v2096_v20 = vld [vmem:[%s3330_s1 + $0x84] sm:$0xf0]  ;;  %v1624_v22 = vor.u32 %v2114_v13, %v1623_v12  ;;  %v1488_v34 = vor.u32 %v2080_v18, %v1487_v16 }
  0x15   :  { %1033 = vmatpush.bf16.msra.mxu1 %v1576_v57  ;;  %v1615_v23 = vld [vmem:[%s3330_s1 + $0x100] sm:$0xf]  ;;  %v2112_v24 = vld [vmem:[%s3330_s1 + $0x104] sm:$0xf0]  ;;  %v1688_v26 = vor.u32 %v2130_v15, %v1687_v14  ;;  %v2065_v29 = vld [vmem:[%s3331_s0 + $0x20] sm:$0xf0]  ;;  %v1552_v38 = vor.u32 %v2096_v20, %v1551_v19 }
  0x16   :  { %1052 = vmatpush.bf16.msra.mxu2 %v1640_v58  ;;  %v1679_v25 = vld [vmem:[%s3330_s1 + $0x180] sm:$0xf]  ;;  %v2128_v27 = vld [vmem:[%s3330_s1 + $0x184] sm:$0xf0]  ;;  %v2061_v30 = vld [vmem:[%s3331_s0 + $0x4] sm:$0xf]  ;;  %v1616_v39 = vor.u32 %v2112_v24, %v1615_v23 }
  0x17   :  { %1071 = vmatpush.bf16.msra.mxu3 %v1704_v62  ;;  %v1415_v28 = vld [vmem:[%s3331_s0] sm:$0xf]  ;;  %v1417_v31 = vld [vmem:[%s3331_s0 + $0x24] sm:$0xf0]  ;;  %v1927_v32 = vld [vmem:[%s3330_s1 + $0x370] sm:$0xf]  ;;  %v1680_v43 = vor.u32 %v2128_v27, %v1679_v25 }
  0x18   :  { %1015 = vmatpush.bf16.msra.mxu0 %v1504_v4  ;;  %v2190_v33 = vld [vmem:[%s3330_s1 + $0x374] sm:$0xf0]  ;;  %v1423_v35 = vld [vmem:[%s3331_s0 + $0x8] sm:$0xf]  ;;  %v1863_v36 = vld [vmem:[%s3330_s1 + $0x2f0] sm:$0xf]  ;;  %v2496_v48 = vor.u32 %v2065_v29, %v1415_v28  ;;  %v2507_v53 = vor.u32 %v2061_v30, %v1417_v31 }
  0x19   :  { %1034 = vmatpush.bf16.msra.mxu1 %v1568_v5  ;;  %v2174_v37 = vld [vmem:[%s3330_s1 + $0x2f4] sm:$0xf0]  ;;  %v2066_v40 = vld [vmem:[%s3331_s0 + $0x28] sm:$0xf0]  ;;  %v1425_v42 = vld [vmem:[%s3331_s0 + $0x2c] sm:$0xf0]  ;;  %v1928_v44 = vor.u32 %v2190_v33, %v1927_v32 }
  0x1a   :  { %1053 = vmatpush.bf16.msra.mxu2 %v1632_v6  ;;  %v2062_v41 = vld [vmem:[%s3331_s0 + $0xc] sm:$0xf]  ;;  %v1799_v45 = vld [vmem:[%s3330_s1 + $0x270] sm:$0xf]  ;;  %v2158_v46 = vld [vmem:[%s3330_s1 + $0x274] sm:$0xf0]  ;;  %v1864_v49 = vor.u32 %v2174_v37, %v1863_v36  ;;  %v2509_v54 = vor.u32 %v2066_v40, %v1423_v35 }
  0x1b   :  { %1072 = vmatpush.bf16.msra.mxu3 %v1696_v10  ;;  %v1991_v47 = vld [vmem:[%s3330_s1 + $0x3f0] sm:$0xf]  ;;  %v2206_v50 = vld [vmem:[%s3330_s1 + $0x3f4] sm:$0xf0]  ;;  %v1919_v51 = vld [vmem:[%s3330_s1 + $0x360] sm:$0xf]  ;;  %v2517_v57 = vor.u32 %v2062_v41, %v1425_v42  ;;  %v1800_v58 = vor.u32 %v2158_v46, %v1799_v45 }
  0x1c   :  { %1016 = vmatpush.bf16.msra.mxu0 %v1496_v17  ;;  %v2188_v52 = vld [vmem:[%s3330_s1 + $0x364] sm:$0xf0]  ;;  %v1855_v55 = vld [vmem:[%s3330_s1 + $0x2e0] sm:$0xf]  ;;  %v1992_v59 = vor.u32 %v2206_v50, %v1991_v47  ;;  %v1911_v2 = vld [vmem:[%s3330_s1 + $0x350] sm:$0xf] }
  0x1d   :  { %1035 = vmatpush.bf16.msra.mxu1 %v1560_v21  ;;  %v2172_v56 = vld [vmem:[%s3330_s1 + $0x2e4] sm:$0xf0]  ;;  %v1920_v60 = vor.u32 %v2188_v52, %v1919_v51  ;;  %v1791_v61 = vld [vmem:[%s3330_s1 + $0x260] sm:$0xf]  ;;  %v2186_v3 = vld [vmem:[%s3330_s1 + $0x354] sm:$0xf0] }
  0x1e   :  { %1054 = vmatpush.bf16.msra.mxu2 %v1624_v22  ;;  %v2156_v62 = vld [vmem:[%s3330_s1 + $0x264] sm:$0xf0]  ;;  %v1983_v63 = vld [vmem:[%s3330_s1 + $0x3e0] sm:$0xf]  ;;  %v1856_v0 = vor.u32 %v2172_v56, %v1855_v55  ;;  %v1847_v4 = vld [vmem:[%s3330_s1 + $0x2d0] sm:$0xf]  ;;  %v1912_v8 = vor.u32 %v2186_v3, %v1911_v2 }
  0x1f   :  { %1073 = vmatpush.bf16.msra.mxu3 %v1688_v26  ;;  %v2204_v1 = vld [vmem:[%s3330_s1 + $0x3e4] sm:$0xf0]  ;;  %v2170_v5 = vld [vmem:[%s3330_s1 + $0x2d4] sm:$0xf0]  ;;  %v1792_v6 = vor.u32 %v2156_v62, %v1791_v61  ;;  %v1783_v9 = vld [vmem:[%s3330_s1 + $0x250] sm:$0xf] }
  0x20   :  { %1017 = vmatpush.bf16.msra.mxu0 %v1488_v34  ;;  %v1984_v7 = vor.u32 %v2204_v1, %v1983_v63  ;;  %v2154_v10 = vld [vmem:[%s3330_s1 + $0x254] sm:$0xf0]  ;;  %v1975_v11 = vld [vmem:[%s3330_s1 + $0x3d0] sm:$0xf]  ;;  %v1848_v12 = vor.u32 %v2170_v5, %v1847_v4  ;;  %v1903_v14 = vld [vmem:[%s3330_s1 + $0x340] sm:$0xf] }
  0x21   :  { %1036 = vmatpush.bf16.msra.mxu1 %v1552_v38  ;;  %v2202_v13 = vld [vmem:[%s3330_s1 + $0x3d4] sm:$0xf0]  ;;  %v2184_v15 = vld [vmem:[%s3330_s1 + $0x344] sm:$0xf0]  ;;  %v1839_v16 = vld [vmem:[%s3330_s1 + $0x2c0] sm:$0xf]  ;;  %v1784_v18 = vor.u32 %v2154_v10, %v1783_v9 }
  0x22   :  { %1055 = vmatpush.bf16.msra.mxu2 %v1616_v39  ;;  %v2168_v17 = vld [vmem:[%s3330_s1 + $0x2c4] sm:$0xf0]  ;;  %v1775_v19 = vld [vmem:[%s3330_s1 + $0x240] sm:$0xf]  ;;  %v1976_v22 = vor.u32 %v2202_v13, %v1975_v11  ;;  %v1904_v23 = vor.u32 %v2184_v15, %v1903_v14  ;;  %v2074_v26 = vld [vmem:[%s3331_s0 + $0x68] sm:$0xf0] }
  0x23   :  { %1074 = vmatpush.bf16.msra.mxu3 %v1680_v43  ;;  %1018 = vmatmul.bf16.vlgmr.msra.gmra.mxu0 %v2496_v48  ;;  %v2152_v20 = vld [vmem:[%s3330_s1 + $0x244] sm:$0xf0]  ;;  %v1967_v21 = vld [vmem:[%s3330_s1 + $0x3c0] sm:$0xf]  ;;  %v1840_v27 = vor.u32 %v2168_v17, %v1839_v16  ;;  %v2070_v28 = vld [vmem:[%s3331_s0 + $0x4c] sm:$0xf] }
  0x24   :  { %1037 = vmatmul.bf16.vlgmr.msra.gmra.mxu1 %v2507_v53  ;;  %1086 = vmatpush.bf16.msrb.mxu0 %v1800_v58  ;;  %v2200_v24 = vld [vmem:[%s3330_s1 + $0x3c4] sm:$0xf0]  ;;  %v1453_v29 = vld [vmem:[%s3331_s0 + $0x6c] sm:$0xf0]  ;;  %v2182_v31 = vld [vmem:[%s3330_s1 + $0x334] sm:$0xf0]  ;;  %v1776_v35 = vor.u32 %v2152_v20, %v1775_v19 }
  0x25   :  { %1105 = vmatpush.bf16.msrb.mxu1 %v1864_v49  ;;  %1056 = vmatmul.bf16.vlgmr.msra.gmra.mxu2 %v2509_v54  ;;  %v1451_v25 = vld [vmem:[%s3331_s0 + $0x48] sm:$0xf]  ;;  %v1895_v30 = vld [vmem:[%s3330_s1 + $0x330] sm:$0xf]  ;;  %v2166_v34 = vld [vmem:[%s3330_s1 + $0x2b4] sm:$0xf0]  ;;  %v1968_v39 = vor.u32 %v2200_v24, %v1967_v21  ;;  %v2639_v50 = vor.u32 %v2070_v28, %v1453_v29 }
  0x26   :  { %1124 = vmatpush.bf16.msrb.mxu2 %v1928_v44  ;;  %1075 = vmatmul.bf16.vlgmr.msra.gmra.mxu3 %v2517_v57  ;;  %v1459_v32 = vld [vmem:[%s3331_s0 + $0x50] sm:$0xf]  ;;  %v2075_v36 = vld [vmem:[%s3331_s0 + $0x70] sm:$0xf0]  ;;  %v1461_v38 = vld [vmem:[%s3331_s0 + $0x74] sm:$0xf0]  ;;  %v1896_v40 = vor.u32 %v2182_v31, %v1895_v30  ;;  %v2628_v44 = vor.u32 %v2074_v26, %v1451_v25 }
  0x27   :  { %1143 = vmatpush.bf16.msrb.mxu3 %v1992_v59  ;;  %v1831_v33 = vld [vmem:[%s3330_s1 + $0x2b0] sm:$0xf]  ;;  %v2071_v37 = vld [vmem:[%s3331_s0 + $0x54] sm:$0xf]  ;;  %v2150_v42 = vld [vmem:[%s3330_s1 + $0x234] sm:$0xf0]  ;;  %v2641_v51 = vor.u32 %v2075_v36, %v1459_v32 }
  0x28   :  { %1087 = vmatpush.bf16.msrb.mxu0 %v1792_v6  ;;  %v1767_v41 = vld [vmem:[%s3330_s1 + $0x230] sm:$0xf]  ;;  %v1832_v45 = vor.u32 %v2166_v34, %v1831_v33  ;;  %v2198_v46 = vld [vmem:[%s3330_s1 + $0x3b4] sm:$0xf0]  ;;  %v1887_v47 = vld [vmem:[%s3330_s1 + $0x320] sm:$0xf]  ;;  %v2649_v56 = vor.u32 %v2071_v37, %v1461_v38 }
  0x29   :  { %1106 = vmatpush.bf16.msrb.mxu1 %v1856_v0  ;;  %v1959_v43 = vld [vmem:[%s3330_s1 + $0x3b0] sm:$0xf]  ;;  %v2180_v49 = vld [vmem:[%s3330_s1 + $0x324] sm:$0xf0]  ;;  %v1823_v52 = vld [vmem:[%s3330_s1 + $0x2a0] sm:$0xf]  ;;  %v1768_v58 = vor.u32 %v2150_v42, %v1767_v41 }
  0x2a   :  { %1125 = vmatpush.bf16.msrb.mxu2 %v1920_v60  ;;  %v2164_v55 = vld [vmem:[%s3330_s1 + $0x2a4] sm:$0xf0]  ;;  %v1960_v59 = vor.u32 %v2198_v46, %v1959_v43  ;;  %v1888_v60 = vor.u32 %v2180_v49, %v1887_v47  ;;  %v1759_v61 = vld [vmem:[%s3330_s1 + $0x220] sm:$0xf]  ;;  %v1879_v2 = vld [vmem:[%s3330_s1 + $0x310] sm:$0xf] }
  0x2b   :  { %1144 = vmatpush.bf16.msrb.mxu3 %v1984_v7  ;;  %v2148_v62 = vld [vmem:[%s3330_s1 + $0x224] sm:$0xf0]  ;;  %v1951_v63 = vld [vmem:[%s3330_s1 + $0x3a0] sm:$0xf]  ;;  %v1824_v0 = vor.u32 %v2164_v55, %v1823_v52  ;;  %v2178_v3 = vld [vmem:[%s3330_s1 + $0x314] sm:$0xf0] }
  0x2c   :  { %1088 = vmatpush.bf16.msrb.mxu0 %v1784_v18  ;;  %v2196_v1 = vld [vmem:[%s3330_s1 + $0x3a4] sm:$0xf0]  ;;  %v1815_v4 = vld [vmem:[%s3330_s1 + $0x290] sm:$0xf]  ;;  %v2162_v5 = vld [vmem:[%s3330_s1 + $0x294] sm:$0xf0]  ;;  %v1760_v6 = vor.u32 %v2148_v62, %v1759_v61  ;;  %v1880_v9 = vor.u32 %v2178_v3, %v1879_v2 }
  0x2d   :  { %1107 = vmatpush.bf16.msrb.mxu1 %v1848_v12  ;;  %v1751_v7 = vld [vmem:[%s3330_s1 + $0x210] sm:$0xf]  ;;  %v2146_v10 = vld [vmem:[%s3330_s1 + $0x214] sm:$0xf0]  ;;  %v1816_v13 = vor.u32 %v2162_v5, %v1815_v4  ;;  %v1871_v14 = vld [vmem:[%s3330_s1 + $0x300] sm:$0xf] }
  0x2e   :  { %1126 = vmatpush.bf16.msrb.mxu2 %v1912_v8  ;;  %v1952_v8 = vor.u32 %v2196_v1, %v1951_v63  ;;  %v1943_v11 = vld [vmem:[%s3330_s1 + $0x390] sm:$0xf]  ;;  %v2194_v12 = vld [vmem:[%s3330_s1 + $0x394] sm:$0xf0]  ;;  %v2176_v15 = vld [vmem:[%s3330_s1 + $0x304] sm:$0xf0]  ;;  %v1752_v20 = vor.u32 %v2146_v10, %v1751_v7 }
  0x2f   :  { %1145 = vmatpush.bf16.msrb.mxu3 %v1976_v22  ;;  %v1807_v16 = vld [vmem:[%s3330_s1 + $0x280] sm:$0xf]  ;;  %v2160_v17 = vld [vmem:[%s3330_s1 + $0x284] sm:$0xf0]  ;;  %v2109_v18 = vld [vmem:[%s3330_s1 + $0xf4] sm:$0xf]  ;;  %v1944_v24 = vor.u32 %v2194_v12, %v1943_v11  ;;  %v1872_v25 = vor.u32 %v2176_v15, %v1871_v14 }
  0x30   :  { %1089 = vmatpush.bf16.msrb.mxu0 %v1776_v35  ;;  %v1609_v19 = vld [vmem:[%s3330_s1 + $0xf8] sm:$0xf0]  ;;  %v1743_v21 = vld [vmem:[%s3330_s1 + $0x200] sm:$0xf]  ;;  %v2093_v22 = vld [vmem:[%s3330_s1 + $0x74] sm:$0xf]  ;;  %v1808_v29 = vor.u32 %v2160_v17, %v1807_v16 }
  0x31   :  { %1108 = vmatpush.bf16.msrb.mxu1 %v1840_v27  ;;  %v2144_v26 = vld [vmem:[%s3330_s1 + $0x204] sm:$0xf0]  ;;  %v1935_v27 = vld [vmem:[%s3330_s1 + $0x380] sm:$0xf]  ;;  %v1431_v30 = vld [vmem:[%s3331_s0 + $0x10] sm:$0xf]  ;;  %v1612_v34 = vor.u32 %v2109_v18, %v1609_v19 }
  0x32   :  { %1127 = vmatpush.bf16.msrb.mxu2 %v1904_v23  ;;  %v1545_v23 = vld [vmem:[%s3330_s1 + $0x78] sm:$0xf0]  ;;  %v2192_v28 = vld [vmem:[%s3330_s1 + $0x384] sm:$0xf0]  ;;  %v2067_v31 = vld [vmem:[%s3331_s0 + $0x30] sm:$0xf0]  ;;  %v1744_v42 = vor.u32 %v2144_v26, %v1743_v21 }
  0x33   :  { %1146 = vmatpush.bf16.msrb.mxu3 %v1968_v39  ;;  %1023 = vmatmul.bf16.gmra.mxu0 %v2628_v44  ;;  %v2063_v32 = vld [vmem:[%s3331_s0 + $0x14] sm:$0xf]  ;;  %v1433_v33 = vld [vmem:[%s3331_s0 + $0x34] sm:$0xf0]  ;;  %v2055_v35 = vld [vmem:[%s3330_s1 + $0x470] sm:$0xf]  ;;  %v1548_v38 = vor.u32 %v2093_v22, %v1545_v23  ;;  %v1936_v47 = vor.u32 %v2192_v28, %v1935_v27 }
  0x34   :  { %1042 = vmatmul.bf16.gmra.mxu1 %v2639_v50  ;;  %1090 = vmatpush.bf16.msrb.mxu0 %v1768_v58  ;;  %v2222_v36 = vld [vmem:[%s3330_s1 + $0x474] sm:$0xf0]  ;;  %v2125_v37 = vld [vmem:[%s3330_s1 + $0x174] sm:$0xf]  ;;  %v1673_v39 = vld [vmem:[%s3330_s1 + $0x178] sm:$0xf0]  ;;  %v2786_v1 = vor.u32 %v2063_v32, %v1433_v33 }
  0x35   :  { %1109 = vmatpush.bf16.msrb.mxu1 %v1832_v45  ;;  %1061 = vmatmul.bf16.gmra.mxu2 %v2641_v51  ;;  %v1601_v41 = vld [vmem:[%s3330_s1 + $0xe8] sm:$0xf0]  ;;  %v1439_v43 = vld [vmem:[%s3331_s0 + $0x18] sm:$0xf]  ;;  %v2068_v45 = vld [vmem:[%s3331_s0 + $0x38] sm:$0xf0]  ;;  %v2056_v52 = vor.u32 %v2222_v36, %v2055_v35 }
  0x36   :  { %1128 = vmatpush.bf16.msrb.mxu2 %v1896_v40  ;;  %1080 = vmatmul.bf16.gmra.mxu3 %v2649_v56  ;;  %v2107_v40 = vld [vmem:[%s3330_s1 + $0xe4] sm:$0xf]  ;;  %v2064_v46 = vld [vmem:[%s3331_s0 + $0x1c] sm:$0xf]  ;;  %v1441_v49 = vld [vmem:[%s3331_s0 + $0x3c] sm:$0xf0]  ;;  %v2797_v5 = vor.u32 %v2068_v45, %v1439_v43 }
  0x37   :  { %1147 = vmatpush.bf16.msrb.mxu3 %v1960_v59  ;;  %v2047_v55 = vld [vmem:[%s3330_s1 + $0x460] sm:$0xf]  ;;  %v2220_v58 = vld [vmem:[%s3330_s1 + $0x464] sm:$0xf0]  ;;  %v1676_v59 = vor.u32 %v2125_v37, %v1673_v39  ;;  %v2091_v61 = vld [vmem:[%s3330_s1 + $0x64] sm:$0xf] }
  0x38   :  { %1091 = vmatpush.bf16.msrb.mxu0 %v1760_v6  ;;  %v1537_v62 = vld [vmem:[%s3330_s1 + $0x68] sm:$0xf0]  ;;  %v2123_v63 = vld [vmem:[%s3330_s1 + $0x164] sm:$0xf]  ;;  %v2105_v3 = vld [vmem:[%s3330_s1 + $0xd4] sm:$0xf]  ;;  %v2799_v6 = vor.u32 %v2064_v46, %v1441_v49  ;;  %v2048_v7 = vor.u32 %v2220_v58, %v2047_v55 }
  0x39   :  { %1110 = vmatpush.bf16.msrb.mxu1 %v1824_v0  ;;  %v2784_v0 = vor.u32 %v2067_v31, %v1431_v30  ;;  %v1665_v2 = vld [vmem:[%s3330_s1 + $0x168] sm:$0xf0]  ;;  %v1593_v4 = vld [vmem:[%s3330_s1 + $0xd8] sm:$0xf0]  ;;  %v2218_v10 = vld [vmem:[%s3330_s1 + $0x454] sm:$0xf0] }
  0x3a   :  { %1129 = vmatpush.bf16.msrb.mxu2 %v1888_v60  ;;  %v1604_v60 = vor.u32 %v2107_v40, %v1601_v41  ;;  %v1668_v11 = vor.u32 %v2123_v63, %v1665_v2  ;;  %v1596_v12 = vor.u32 %v2105_v3, %v1593_v4  ;;  %v1529_v14 = vld [vmem:[%s3330_s1 + $0x58] sm:$0xf0]  ;;  %v2121_v15 = vld [vmem:[%s3330_s1 + $0x154] sm:$0xf]  ;;  %v2103_v17 = vld [vmem:[%s3330_s1 + $0xc4] sm:$0xf] }
  0x3b   :  { %1148 = vmatpush.bf16.msrb.mxu3 %v1952_v8  ;;  %v1540_v8 = vor.u32 %v2091_v61, %v1537_v62  ;;  %v1657_v16 = vld [vmem:[%s3330_s1 + $0x158] sm:$0xf0]  ;;  %v1585_v18 = vld [vmem:[%s3330_s1 + $0xc8] sm:$0xf0]  ;;  %v2031_v21 = vld [vmem:[%s3330_s1 + $0x440] sm:$0xf] }
  0x3c   :  { %1092 = vmatpush.bf16.msrb.mxu0 %v1752_v20  ;;  %v2216_v22 = vld [vmem:[%s3330_s1 + $0x444] sm:$0xf0]  ;;  %v1660_v23 = vor.u32 %v2121_v15, %v1657_v16  ;;  %v1521_v26 = vld [vmem:[%s3330_s1 + $0x48] sm:$0xf0]  ;;  %v2119_v27 = vld [vmem:[%s3330_s1 + $0x144] sm:$0xf] }
  0x3d   :  { %1111 = vmatpush.bf16.msrb.mxu1 %v1816_v13  ;;  %v2089_v13 = vld [vmem:[%s3330_s1 + $0x54] sm:$0xf]  ;;  %v1649_v28 = vld [vmem:[%s3330_s1 + $0x148] sm:$0xf0]  ;;  %v1577_v30 = vld [vmem:[%s3330_s1 + $0xb8] sm:$0xf0]  ;;  %v2032_v31 = vor.u32 %v2216_v22, %v2031_v21 }
  0x3e   :  { %1130 = vmatpush.bf16.msrb.mxu2 %v1880_v9  ;;  %v2039_v9 = vld [vmem:[%s3330_s1 + $0x450] sm:$0xf]  ;;  %v1532_v20 = vor.u32 %v2089_v13, %v1529_v14  ;;  %v1652_v35 = vor.u32 %v2119_v27, %v1649_v28  ;;  %v1467_v36 = vld [vmem:[%s3331_s0 + $0x58] sm:$0xf]  ;;  %v2076_v37 = vld [vmem:[%s3331_s0 + $0x78] sm:$0xf0] }
  0x3f   :  { %1149 = vmatpush.bf16.msrb.mxu3 %v1944_v24  ;;  %v2040_v19 = vor.u32 %v2218_v10, %v2039_v9  ;;  %v1588_v24 = vor.u32 %v2103_v17, %v1585_v18  ;;  %v2023_v33 = vld [vmem:[%s3330_s1 + $0x430] sm:$0xf]  ;;  %v1469_v39 = vld [vmem:[%s3331_s0 + $0x7c] sm:$0xf0]  ;;  %v2085_v41 = vld [vmem:[%s3330_s1 + $0x34] sm:$0xf] }
  0x40   :  { %1093 = vmatpush.bf16.msrb.mxu0 %v1744_v42  ;;  %v1513_v42 = vld [vmem:[%s3330_s1 + $0x38] sm:$0xf0]  ;;  %v2117_v43 = vld [vmem:[%s3330_s1 + $0x134] sm:$0xf]  ;;  %v2099_v46 = vld [vmem:[%s3330_s1 + $0xa4] sm:$0xf] }
  0x41   :  { %1112 = vmatpush.bf16.msrb.mxu1 %v1808_v29  ;;  %v2101_v29 = vld [vmem:[%s3330_s1 + $0xb4] sm:$0xf]  ;;  %v1641_v45 = vld [vmem:[%s3330_s1 + $0x138] sm:$0xf0]  ;;  %v1475_v49 = vld [vmem:[%s3331_s0 + $0x60] sm:$0xf] }
  0x42   :  { %1131 = vmatpush.bf16.msrb.mxu2 %v1872_v25  ;;  %v2087_v25 = vld [vmem:[%s3330_s1 + $0x44] sm:$0xf]  ;;  %v1580_v40 = vor.u32 %v2101_v29, %v1577_v30  ;;  %v1477_v58 = vld [vmem:[%s3331_s0 + $0x84] sm:$0xf0]  ;;  %v2015_v61 = vld [vmem:[%s3330_s1 + $0x420] sm:$0xf]  ;;  %v1644_v63 = vor.u32 %v2117_v43, %v1641_v45 }
  0x43   :  { %1150 = vmatpush.bf16.msrb.mxu3 %v1936_v47  ;;  %1094 = vmatmul.bf16.vlgmr.msrb.gmra.mxu0 %v2784_v0  ;;  %v1524_v32 = vor.u32 %v2087_v25, %v1521_v26  ;;  %v1569_v47 = vld [vmem:[%s3330_s1 + $0xa8] sm:$0xf0]  ;;  %v2073_v55 = vld [vmem:[%s3331_s0 + $0x64] sm:$0xf]  ;;  %v2212_v62 = vld [vmem:[%s3330_s1 + $0x424] sm:$0xf0] }
  0x44   :  { %1162 = vmatpush.bf16.msra.mxu0 %v2056_v52  ;;  %1113 = vmatmul.bf16.vlgmr.msrb.gmra.mxu1 %v2786_v1  ;;  %v2077_v52 = vld [vmem:[%s3331_s0 + $0x80] sm:$0xf0]  ;;  %v1572_v2 = vor.u32 %v2099_v46, %v1569_v47  ;;  %v1505_v4 = vld [vmem:[%s3330_s1 + $0x28] sm:$0xf0]  ;;  %v2931_v14 = vor.u32 %v2073_v55, %v1477_v58  ;;  %v2016_v15 = vor.u32 %v2212_v62, %v2015_v61  ;;  %v2007_v17 = vld [vmem:[%s3330_s1 + $0x410] sm:$0xf] }
  0x45   :  { %1181 = vmatpush.bf16.msra.mxu1 %v1548_v38  ;;  %1132 = vmatmul.bf16.vlgmr.msrb.gmra.mxu2 %v2797_v5  ;;  %v2072_v38 = vld [vmem:[%s3331_s0 + $0x5c] sm:$0xf]  ;;  %v2083_v3 = vld [vmem:[%s3330_s1 + $0x24] sm:$0xf]  ;;  %v1633_v10 = vld [vmem:[%s3330_s1 + $0x128] sm:$0xf0]  ;;  %v2929_v13 = vor.u32 %v2077_v52, %v1475_v49 }
  0x46   :  { %1200 = vmatpush.bf16.msra.mxu2 %v1612_v34  ;;  %1151 = vmatmul.bf16.vlgmr.msrb.gmra.mxu3 %v2799_v6  ;;  %v2214_v34 = vld [vmem:[%s3330_s1 + $0x434] sm:$0xf0]  ;;  %v2918_v9 = vor.u32 %v2072_v38, %v1469_v39  ;;  %v1508_v16 = vor.u32 %v2083_v3, %v1505_v4  ;;  %v2081_v21 = vld [vmem:[%s3330_s1 + $0x14] sm:$0xf]  ;;  %v1497_v22 = vld [vmem:[%s3330_s1 + $0x18] sm:$0xf0] }
  0x47   :  { %1219 = vmatpush.bf16.msra.mxu3 %v1676_v59  ;;  %v2024_v59 = vor.u32 %v2214_v34, %v2023_v33  ;;  %v2210_v18 = vld [vmem:[%s3330_s1 + $0x414] sm:$0xf0]  ;;  %v2095_v25 = vld [vmem:[%s3330_s1 + $0x84] sm:$0xf]  ;;  %v1553_v26 = vld [vmem:[%s3330_s1 + $0x88] sm:$0xf0]  ;;  %v1500_v30 = vor.u32 %v2081_v21, %v1497_v22 }
  0x48   :  { %1163 = vmatpush.bf16.msra.mxu0 %v2048_v7  ;;  %v2115_v7 = vld [vmem:[%s3330_s1 + $0x124] sm:$0xf]  ;;  %v2173_v27 = vld [vmem:[%s3330_s1 + $0x2f4] sm:$0xf]  ;;  %v1865_v28 = vld [vmem:[%s3330_s1 + $0x2f8] sm:$0xf0]  ;;  %v2008_v29 = vor.u32 %v2210_v18, %v2007_v17 }
  0x49   :  { %1182 = vmatpush.bf16.msra.mxu1 %v1540_v8  ;;  %v2916_v8 = vor.u32 %v2076_v37, %v1467_v36  ;;  %v2079_v33 = vld [vmem:[%s3330_s1 + $0x4] sm:$0xf]  ;;  %v1489_v36 = vld [vmem:[%s3330_s1 + $0x8] sm:$0xf0]  ;;  %v1868_v39 = vor.u32 %v2173_v27, %v1865_v28  ;;  %v1801_v43 = vld [vmem:[%s3330_s1 + $0x278] sm:$0xf0] }
  0x4a   :  { %1201 = vmatpush.bf16.msra.mxu2 %v1604_v60  ;;  %v1516_v60 = vor.u32 %v2085_v41, %v1513_v42  ;;  %v2111_v37 = vld [vmem:[%s3330_s1 + $0x104] sm:$0xf]  ;;  %v1617_v38 = vld [vmem:[%s3330_s1 + $0x108] sm:$0xf0]  ;;  %v1737_v41 = vld [vmem:[%s3330_s1 + $0x1f8] sm:$0xf0]  ;;  %v1492_v49 = vor.u32 %v2079_v33, %v1489_v36 }
  0x4b   :  { %1220 = vmatpush.bf16.msra.mxu3 %v1668_v11  ;;  %v2097_v11 = vld [vmem:[%s3330_s1 + $0x94] sm:$0xf]  ;;  %v1929_v46 = vld [vmem:[%s3330_s1 + $0x378] sm:$0xf0]  ;;  %v2171_v52 = vld [vmem:[%s3330_s1 + $0x2e4] sm:$0xf]  ;;  %v1620_v58 = vor.u32 %v2111_v37, %v1617_v38 }
  0x4c   :  { %1164 = vmatpush.bf16.msra.mxu0 %v2040_v19  ;;  %v1636_v19 = vor.u32 %v2115_v7, %v1633_v10  ;;  %v2157_v42 = vld [vmem:[%s3330_s1 + $0x274] sm:$0xf]  ;;  %v1857_v55 = vld [vmem:[%s3330_s1 + $0x2e8] sm:$0xf0]  ;;  %v2139_v62 = vld [vmem:[%s3330_s1 + $0x1e4] sm:$0xf] }
  0x4d   :  { %1183 = vmatpush.bf16.msra.mxu1 %v1532_v20  ;;  %v2189_v45 = vld [vmem:[%s3330_s1 + $0x374] sm:$0xf]  ;;  %v2069_v3 = vld [vmem:[%s3331_s0 + $0x40] sm:$0xf0]  ;;  %v1860_v4 = vor.u32 %v2171_v52, %v1857_v55  ;;  %v1793_v10 = vld [vmem:[%s3330_s1 + $0x268] sm:$0xf0] }
  0x4e   :  { %1202 = vmatpush.bf16.msra.mxu2 %v1596_v12  ;;  %v1561_v12 = vld [vmem:[%s3330_s1 + $0x98] sm:$0xf0]  ;;  %v1932_v61 = vor.u32 %v2189_v45, %v1929_v46  ;;  %v2155_v7 = vld [vmem:[%s3330_s1 + $0x264] sm:$0xf]  ;;  %v2185_v27 = vld [vmem:[%s3330_s1 + $0x354] sm:$0xf] }
  0x4f   :  { %1221 = vmatpush.bf16.msra.mxu3 %v1660_v23  ;;  %v1564_v20 = vor.u32 %v2097_v11, %v1561_v12  ;;  %v2113_v23 = vld [vmem:[%s3330_s1 + $0x114] sm:$0xf]  ;;  %v2187_v12 = vld [vmem:[%s3330_s1 + $0x364] sm:$0xf]  ;;  %v1849_v18 = vld [vmem:[%s3330_s1 + $0x2d8] sm:$0xf0]  ;;  %v1796_v21 = vor.u32 %v2155_v7, %v1793_v10 }
  0x50   :  { %1165 = vmatpush.bf16.msra.mxu0 %v2032_v31  ;;  %v1999_v31 = vld [vmem:[%s3330_s1 + $0x400] sm:$0xf]  ;;  %v1913_v28 = vld [vmem:[%s3330_s1 + $0x358] sm:$0xf0]  ;;  %v2165_v38 = vld [vmem:[%s3330_s1 + $0x2b4] sm:$0xf] }
  0x51   :  { %1184 = vmatpush.bf16.msra.mxu1 %v1524_v32  ;;  %v2208_v32 = vld [vmem:[%s3330_s1 + $0x404] sm:$0xf0]  ;;  %v2149_v45 = vld [vmem:[%s3330_s1 + $0x234] sm:$0xf]  ;;  %v1769_v46 = vld [vmem:[%s3330_s1 + $0x238] sm:$0xf0] }
  0x52   :  { %1203 = vmatpush.bf16.msra.mxu2 %v1588_v24  ;;  %v1625_v24 = vld [vmem:[%s3330_s1 + $0x118] sm:$0xf0]  ;;  %v2000_v47 = vor.u32 %v2208_v32, %v1999_v31  ;;  %v2135_v31 = vld [vmem:[%s3330_s1 + $0x1c4] sm:$0xf]  ;;  %v1713_v32 = vld [vmem:[%s3330_s1 + $0x1c8] sm:$0xf0] }
  0x53   :  { %1222 = vmatpush.bf16.msra.mxu3 %v1652_v35  ;;  %1099 = vmatmul.bf16.gmra.mxu0 %v2916_v8  ;;  %v1628_v34 = vor.u32 %v2113_v23, %v1625_v24  ;;  %v1556_v35 = vor.u32 %v2095_v25, %v1553_v26  ;;  %v2153_v23 = vld [vmem:[%s3330_s1 + $0x254] sm:$0xf]  ;;  %v1785_v24 = vld [vmem:[%s3330_s1 + $0x258] sm:$0xf0]  ;;  %v1716_v37 = vor.u32 %v2135_v31, %v1713_v32  ;;  %v1761_v7 = vld [vmem:[%s3330_s1 + $0x228] sm:$0xf0] }
  0x54   :  { %1166 = vmatpush.bf16.msra.mxu0 %v2024_v59  ;;  %1118 = vmatmul.bf16.gmra.mxu1 %v2918_v9  ;;  %v1788_v33 = vor.u32 %v2153_v23, %v1785_v24  ;;  %v2181_v52 = vld [vmem:[%s3330_s1 + $0x334] sm:$0xf]  ;;  %v1897_v55 = vld [vmem:[%s3330_s1 + $0x338] sm:$0xf0]  ;;  %v1809_v31 = vld [vmem:[%s3330_s1 + $0x288] sm:$0xf0] }
  0x55   :  { %1185 = vmatpush.bf16.msra.mxu1 %v1516_v60  ;;  %1137 = vmatmul.bf16.gmra.mxu2 %v2929_v13  ;;  %v1804_v60 = vor.u32 %v2157_v42, %v1801_v43  ;;  %v2145_v24 = vld [vmem:[%s3330_s1 + $0x214] sm:$0xf]  ;;  %v2127_v32 = vld [vmem:[%s3330_s1 + $0x184] sm:$0xf] }
  0x56   :  { %1204 = vmatpush.bf16.msra.mxu2 %v1580_v40  ;;  %1156 = vmatmul.bf16.gmra.mxu3 %v2931_v14  ;;  %v2141_v40 = vld [vmem:[%s3330_s1 + $0x1f4] sm:$0xf] }
  0x57   :  { %1223 = vmatpush.bf16.msra.mxu3 %v1644_v63  ;;  %v1740_v59 = vor.u32 %v2141_v40, %v1737_v41  ;;  %v1729_v63 = vld [vmem:[%s3330_s1 + $0x1e8] sm:$0xf0]  ;;  %v2133_v40 = vld [vmem:[%s3330_s1 + $0x1b4] sm:$0xf]  ;;  %v1705_v41 = vld [vmem:[%s3330_s1 + $0x1b8] sm:$0xf0] }
  0x58   :  { %1167 = vmatpush.bf16.msra.mxu0 %v2016_v15  ;;  %v1732_v11 = vor.u32 %v2139_v62, %v1729_v63  ;;  %v1921_v15 = vld [vmem:[%s3330_s1 + $0x368] sm:$0xf0]  ;;  %v1483_v62 = vld [vmem:[%s3331_s0 + $0x68] sm:$0xf] }
  0x59   :  { %1186 = vmatpush.bf16.msra.mxu1 %v1508_v16  ;;  %v2169_v16 = vld [vmem:[%s3330_s1 + $0x2d4] sm:$0xf]  ;;  %v1924_v22 = vor.u32 %v2187_v12, %v1921_v15  ;;  %v2078_v63 = vld [vmem:[%s3331_s0 + $0x88] sm:$0xf0]  ;;  %v2179_v12 = vld [vmem:[%s3330_s1 + $0x324] sm:$0xf] }
  0x5a   :  { %1205 = vmatpush.bf16.msra.mxu2 %v1572_v2  ;;  %v1447_v2 = vld [vmem:[%s3331_s0 + $0x20] sm:$0xf]  ;;  %v1852_v25 = vor.u32 %v2169_v16, %v1849_v18  ;;  %v1889_v15 = vld [vmem:[%s3330_s1 + $0x328] sm:$0xf0]  ;;  %v2161_v16 = vld [vmem:[%s3330_s1 + $0x294] sm:$0xf]  ;;  %v3144_v18 = vor.u32 %v2078_v63, %v1483_v62 }
  0x5b   :  { %1224 = vmatpush.bf16.msra.mxu3 %v1636_v19  ;;  %v3036_v17 = vor.u32 %v2069_v3, %v1447_v2  ;;  %v2137_v19 = vld [vmem:[%s3330_s1 + $0x1d4] sm:$0xf]  ;;  %v1772_v2 = vor.u32 %v2149_v45, %v1769_v46  ;;  %v1900_v3 = vor.u32 %v2181_v52, %v1897_v55  ;;  %v1892_v23 = vor.u32 %v2179_v12, %v1889_v15  ;;  %v2049_v52 = vld [vmem:[%s3330_s1 + $0x468] sm:$0xf0] }
  0x5c   :  { %1168 = vmatpush.bf16.msra.mxu0 %v2008_v29  ;;  %v2167_v29 = vld [vmem:[%s3330_s1 + $0x2c4] sm:$0xf] }
  0x5d   :  { %1187 = vmatpush.bf16.msra.mxu1 %v1500_v30  ;;  %v1841_v30 = vld [vmem:[%s3330_s1 + $0x2c8] sm:$0xf0] }
  0x5e   :  { %1206 = vmatpush.bf16.msra.mxu2 %v1564_v20  ;;  %v1721_v20 = vld [vmem:[%s3330_s1 + $0x1d8] sm:$0xf0]  ;;  %v1844_v36 = vor.u32 %v2167_v29, %v1841_v30  ;;  %v2159_v30 = vld [vmem:[%s3330_s1 + $0x284] sm:$0xf] }
  0x5f   :  { %1225 = vmatpush.bf16.msra.mxu3 %v1628_v34  ;;  %v1724_v26 = vor.u32 %v2137_v19, %v1721_v20  ;;  %v2151_v34 = vld [vmem:[%s3330_s1 + $0x244] sm:$0xf]  ;;  %v1817_v19 = vld [vmem:[%s3330_s1 + $0x298] sm:$0xf0]  ;;  %v2129_v20 = vld [vmem:[%s3330_s1 + $0x194] sm:$0xf] }
  0x60   :  { %1169 = vmatpush.bf16.msra.mxu0 %v2000_v47  ;;  %v1881_v29 = vld [vmem:[%s3330_s1 + $0x318] sm:$0xf0] }
  0x61   :  { %1188 = vmatpush.bf16.msra.mxu1 %v1492_v49  ;;  %v1708_v49 = vor.u32 %v2133_v40, %v1705_v41  ;;  %v2057_v40 = vld [vmem:[%s3330_s1 + $0x478] sm:$0xf0]  ;;  %v2203_v41 = vld [vmem:[%s3330_s1 + $0x3e4] sm:$0xf] }
  0x62   :  { %1207 = vmatpush.bf16.msra.mxu2 %v1556_v35  ;;  %v1777_v35 = vld [vmem:[%s3330_s1 + $0x248] sm:$0xf0] }
  0x63   :  { %1226 = vmatpush.bf16.msra.mxu3 %v1620_v58  ;;  %1170 = vmatmul.bf16.vlgmr.msra.gmra.mxu0 %v3036_v17  ;;  %v1780_v42 = vor.u32 %v2151_v34, %v1777_v35  ;;  %v2163_v58 = vld [vmem:[%s3330_s1 + $0x2a4] sm:$0xf] }
  0x64   :  { %1238 = vmatpush.bf16.msrb.mxu0 %v1740_v59  ;;  %1189 = vmatmul.bf16.vlgmr.msra.gmra.mxu1 %v2496_v48  ;;  %v1916_v48 = vor.u32 %v2185_v27, %v1913_v28  ;;  %v1825_v59 = vld [vmem:[%s3330_s1 + $0x2a8] sm:$0xf0]  ;;  %v2177_v28 = vld [vmem:[%s3330_s1 + $0x314] sm:$0xf] }
  0x65   :  { %1257 = vmatpush.bf16.msrb.mxu1 %v1804_v60  ;;  %1208 = vmatmul.bf16.vlgmr.msra.gmra.mxu2 %v2507_v53  ;;  %v2183_v53 = vld [vmem:[%s3330_s1 + $0x344] sm:$0xf]  ;;  %v1828_v10 = vor.u32 %v2163_v58, %v1825_v59  ;;  %v1884_v35 = vor.u32 %v2177_v28, %v1881_v29  ;;  %v2201_v58 = vld [vmem:[%s3330_s1 + $0x3d4] sm:$0xf]  ;;  %v1977_v59 = vld [vmem:[%s3330_s1 + $0x3d8] sm:$0xf0] }
  0x66   :  { %1276 = vmatpush.bf16.msrb.mxu2 %v1868_v39  ;;  %1227 = vmatmul.bf16.vlgmr.msra.gmra.mxu3 %v2509_v54  ;;  %v1905_v54 = vld [vmem:[%s3330_s1 + $0x348] sm:$0xf0]  ;;  %v1833_v39 = vld [vmem:[%s3330_s1 + $0x2b8] sm:$0xf0]  ;;  %v2131_v60 = vld [vmem:[%s3330_s1 + $0x1a4] sm:$0xf]  ;;  %v1980_v62 = vor.u32 %v2201_v58, %v1977_v59 }
  0x67   :  { %1295 = vmatpush.bf16.msrb.mxu3 %v1932_v61  ;;  %v1908_v43 = vor.u32 %v2183_v53, %v1905_v54  ;;  %v1836_v47 = vor.u32 %v2165_v38, %v1833_v39  ;;  %v1697_v61 = vld [vmem:[%s3330_s1 + $0x1a8] sm:$0xf0]  ;;  %v2175_v53 = vld [vmem:[%s3330_s1 + $0x304] sm:$0xf]  ;;  %v2221_v39 = vld [vmem:[%s3330_s1 + $0x474] sm:$0xf] }
  0x68   :  { %1239 = vmatpush.bf16.msrb.mxu0 %v1732_v11  ;;  %v1700_v11 = vor.u32 %v2131_v60, %v1697_v61  ;;  %v1873_v54 = vld [vmem:[%s3330_s1 + $0x308] sm:$0xf0]  ;;  %v2060_v46 = vor.u32 %v2221_v39, %v2057_v40  ;;  %v2217_v60 = vld [vmem:[%s3330_s1 + $0x454] sm:$0xf]  ;;  %v2041_v61 = vld [vmem:[%s3330_s1 + $0x458] sm:$0xf0] }
  0x69   :  { %1258 = vmatpush.bf16.msrb.mxu1 %v1796_v21  ;;  %v1689_v21 = vld [vmem:[%s3330_s1 + $0x198] sm:$0xf0]  ;;  %v1876_v45 = vor.u32 %v2175_v53, %v1873_v54  ;;  %v2044_v63 = vor.u32 %v2217_v60, %v2041_v61 }
  0x6a   :  { %1277 = vmatpush.bf16.msrb.mxu2 %v1860_v4  ;;  %v2147_v4 = vld [vmem:[%s3330_s1 + $0x224] sm:$0xf]  ;;  %v1692_v27 = vor.u32 %v2129_v20, %v1689_v21  ;;  %v2017_v21 = vld [vmem:[%s3330_s1 + $0x428] sm:$0xf0] }
  0x6b   :  { %1296 = vmatpush.bf16.msrb.mxu3 %v1924_v22  ;;  %v1764_v22 = vor.u32 %v2147_v4, %v1761_v7  ;;  %v2215_v4 = vld [vmem:[%s3330_s1 + $0x444] sm:$0xf]  ;;  %v2033_v7 = vld [vmem:[%s3330_s1 + $0x448] sm:$0xf0] }
  0x6c   :  { %1240 = vmatpush.bf16.msrb.mxu0 %v1724_v26  ;;  %v1820_v26 = vor.u32 %v2161_v16, %v1817_v19  ;;  %v2195_v16 = vld [vmem:[%s3330_s1 + $0x3a4] sm:$0xf]  ;;  %v1953_v19 = vld [vmem:[%s3330_s1 + $0x3a8] sm:$0xf0] }
  0x6d   :  { %1259 = vmatpush.bf16.msrb.mxu1 %v1788_v33  ;;  %v1681_v33 = vld [vmem:[%s3330_s1 + $0x188] sm:$0xf0]  ;;  %v2211_v20 = vld [vmem:[%s3330_s1 + $0x424] sm:$0xf] }
  0x6e   :  { %1278 = vmatpush.bf16.msrb.mxu2 %v1852_v25  ;;  %v1753_v25 = vld [vmem:[%s3330_s1 + $0x218] sm:$0xf0] }
  0x6f   :  { %1297 = vmatpush.bf16.msrb.mxu3 %v1916_v48  ;;  %v1993_v48 = vld [vmem:[%s3330_s1 + $0x3f8] sm:$0xf0]  ;;  %v1756_v34 = vor.u32 %v2145_v24, %v1753_v25  ;;  %v2193_v24 = vld [vmem:[%s3330_s1 + $0x394] sm:$0xf] }
  0x70   :  { %1241 = vmatpush.bf16.msrb.mxu0 %v1716_v37  ;;  %v1745_v37 = vld [vmem:[%s3330_s1 + $0x208] sm:$0xf0]  ;;  %v1945_v25 = vld [vmem:[%s3330_s1 + $0x398] sm:$0xf0] }
  0x71   :  { %1260 = vmatpush.bf16.msrb.mxu1 %v1780_v42  ;;  %v1985_v42 = vld [vmem:[%s3330_s1 + $0x3e8] sm:$0xf0]  ;;  %v1948_v28 = vor.u32 %v2193_v24, %v1945_v25 }
  0x72   :  { %1279 = vmatpush.bf16.msrb.mxu2 %v1844_v36  ;;  %v2143_v36 = vld [vmem:[%s3330_s1 + $0x204] sm:$0xf] }
  0x73   :  { %1298 = vmatpush.bf16.msrb.mxu3 %v1908_v43  ;;  %1175 = vmatmul.bf16.gmra.mxu0 %v3144_v18  ;;  %v1748_v43 = vor.u32 %v2143_v36, %v1745_v37 }
  0x74   :  { %1242 = vmatpush.bf16.msrb.mxu0 %v1708_v49  ;;  %1194 = vmatmul.bf16.gmra.mxu1 %v2628_v44  ;;  %v2205_v44 = vld [vmem:[%s3330_s1 + $0x3f4] sm:$0xf]  ;;  %v2219_v49 = vld [vmem:[%s3330_s1 + $0x464] sm:$0xf] }
  0x75   :  { %1261 = vmatpush.bf16.msrb.mxu1 %v1772_v2  ;;  %1213 = vmatmul.bf16.gmra.mxu2 %v2639_v50  ;;  %v1812_v50 = vor.u32 %v2159_v30, %v1809_v31  ;;  %v1996_v38 = vor.u32 %v2205_v44, %v1993_v48  ;;  %v2052_v55 = vor.u32 %v2219_v49, %v2049_v52  ;;  %v2199_v2 = vld [vmem:[%s3330_s1 + $0x3c4] sm:$0xf]  ;;  %v1937_v31 = vld [vmem:[%s3330_s1 + $0x388] sm:$0xf0] }
  0x76   :  { %1280 = vmatpush.bf16.msrb.mxu2 %v1836_v47  ;;  %1232 = vmatmul.bf16.gmra.mxu3 %v2641_v51  ;;  %v1684_v51 = vor.u32 %v2127_v32, %v1681_v33  ;;  %v1988_v47 = vor.u32 %v2203_v41, %v1985_v42  ;;  %v2191_v30 = vld [vmem:[%s3330_s1 + $0x384] sm:$0xf]  ;;  %v2001_v33 = vld [vmem:[%s3330_s1 + $0x408] sm:$0xf0] }
  0x77   :  { %1299 = vmatpush.bf16.msrb.mxu3 %v1900_v3  ;;  %v1969_v3 = vld [vmem:[%s3330_s1 + $0x3c8] sm:$0xf0]  ;;  %v2207_v32 = vld [vmem:[%s3330_s1 + $0x404] sm:$0xf]  ;;  %v1940_v44 = vor.u32 %v2191_v30, %v1937_v31 }
  0x78   :  { %1243 = vmatpush.bf16.msrb.mxu0 %v1700_v11  ;;  %v1961_v11 = vld [vmem:[%s3330_s1 + $0x3b8] sm:$0xf0] }
  0x79   :  { %1262 = vmatpush.bf16.msrb.mxu1 %v1764_v22  ;;  %v1956_v22 = vor.u32 %v2195_v16, %v1953_v19 }
  0x7a   :  { %1281 = vmatpush.bf16.msrb.mxu2 %v1828_v10  ;;  %v1972_v10 = vor.u32 %v2199_v2, %v1969_v3 }
  0x7b   :  { %1300 = vmatpush.bf16.msrb.mxu3 %v1892_v23  ;;  %v2020_v23 = vor.u32 %v2211_v20, %v2017_v21 }
  0x7c   :  { %1244 = vmatpush.bf16.msrb.mxu0 %v1692_v27  ;;  %v2009_v27 = vld [vmem:[%s3330_s1 + $0x418] sm:$0xf0] }
  0x7d   :  { %1263 = vmatpush.bf16.msrb.mxu1 %v1756_v34 }
  0x7e   :  { %1282 = vmatpush.bf16.msrb.mxu2 %v1820_v26  ;;  %v2209_v26 = vld [vmem:[%s3330_s1 + $0x414] sm:$0xf] }
  0x7f   :  { %1301 = vmatpush.bf16.msrb.mxu3 %v1884_v35  ;;  %v2012_v29 = vor.u32 %v2209_v26, %v2009_v27 }
  0x80   :  { %1245 = vmatpush.bf16.msrb.mxu0 %v1684_v51 }
  0x81   :  { %1264 = vmatpush.bf16.msrb.mxu1 %v1748_v43 }
  0x82   :  { %1283 = vmatpush.bf16.msrb.mxu2 %v1812_v50 }
  0x83   :  { %1302 = vmatpush.bf16.msrb.mxu3 %v1876_v45  ;;  %1246 = vmatmul.bf16.vlgmr.msrb.gmra.mxu0 %v2517_v57  ;;  %v2036_v57 = vor.u32 %v2215_v4, %v2033_v7 }
  0x84   :  { %1314 = vmatpush.bf16.msra.mxu0 %v1996_v38  ;;  %1265 = vmatmul.bf16.vlgmr.msrb.gmra.mxu1 %v2784_v0  ;;  %v2197_v0 = vld [vmem:[%s3330_s1 + $0x3b4] sm:$0xf] }
  0x85   :  { %1333 = vmatpush.bf16.msra.mxu1 %v2060_v46  ;;  %1284 = vmatmul.bf16.vlgmr.msrb.gmra.mxu2 %v2786_v1  ;;  %v2213_v1 = vld [vmem:[%s3330_s1 + $0x434] sm:$0xf]  ;;  %v1964_v12 = vor.u32 %v2197_v0, %v1961_v11 }
  0x86   :  { %2223 = vmatpush.bf16.msra.mxu2 %v1996_v38  ;;  %1303 = vmatmul.bf16.vlgmr.msrb.gmra.mxu3 %v2797_v5  ;;  %v2025_v5 = vld [vmem:[%s3330_s1 + $0x438] sm:$0xf0] }
  0x87   :  { %2231 = vmatpush.bf16.msra.mxu3 %v2060_v46  ;;  %v2028_v15 = vor.u32 %v2213_v1, %v2025_v5 }
  0x88   :  { %1315 = vmatpush.bf16.msra.mxu0 %v1988_v47 }
  0x89   :  { %1334 = vmatpush.bf16.msra.mxu1 %v2052_v55 }
  0x8a   :  { %2224 = vmatpush.bf16.msra.mxu2 %v1988_v47 }
  0x8b   :  { %2232 = vmatpush.bf16.msra.mxu3 %v2052_v55 }
  0x8c   :  { %1316 = vmatpush.bf16.msra.mxu0 %v1980_v62 }
  0x8d   :  { %1335 = vmatpush.bf16.msra.mxu1 %v2044_v63 }
  0x8e   :  { %2225 = vmatpush.bf16.msra.mxu2 %v1980_v62 }
  0x8f   :  { %2233 = vmatpush.bf16.msra.mxu3 %v2044_v63 }
  0x90   :  { %1317 = vmatpush.bf16.msra.mxu0 %v1972_v10 }
  0x91   :  { %1336 = vmatpush.bf16.msra.mxu1 %v2036_v57 }
  0x92   :  { %2226 = vmatpush.bf16.msra.mxu2 %v1972_v10 }
  0x93   :  { %2234 = vmatpush.bf16.msra.mxu3 %v2036_v57  ;;  %1251 = vmatmul.bf16.gmra.mxu0 %v2649_v56  ;;  %v2004_v56 = vor.u32 %v2207_v32, %v2001_v33 }
  0x94   :  { %1318 = vmatpush.bf16.msra.mxu0 %v1964_v12  ;;  %1270 = vmatmul.bf16.gmra.mxu1 %v2916_v8 }
  0x95   :  { %1337 = vmatpush.bf16.msra.mxu1 %v2028_v15  ;;  %1289 = vmatmul.bf16.gmra.mxu2 %v2918_v9 }
  0x96   :  { %2227 = vmatpush.bf16.msra.mxu2 %v1964_v12  ;;  %1308 = vmatmul.bf16.gmra.mxu3 %v2929_v13 }
  0x97   :  { %2235 = vmatpush.bf16.msra.mxu3 %v2028_v15 }
  0x98   :  { %1319 = vmatpush.bf16.msra.mxu0 %v1956_v22 }
  0x99   :  { %1338 = vmatpush.bf16.msra.mxu1 %v2020_v23 }
  0x9a   :  { %2228 = vmatpush.bf16.msra.mxu2 %v1956_v22 }
  0x9b   :  { %2236 = vmatpush.bf16.msra.mxu3 %v2020_v23 }
  0x9c   :  { %1320 = vmatpush.bf16.msra.mxu0 %v1948_v28 }
  0x9d   :  { %1339 = vmatpush.bf16.msra.mxu1 %v2012_v29 }
  0x9e   :  { %2229 = vmatpush.bf16.msra.mxu2 %v1948_v28 }
  0x9f   :  { %2237 = vmatpush.bf16.msra.mxu3 %v2012_v29 }
  0xa0   :  { %1321 = vmatpush.bf16.msra.mxu0 %v1940_v44  ;;  %v1019_v8 = vpop.f32.mrf.mxu0 }
  0xa1   :  { %1340 = vmatpush.bf16.msra.mxu1 %v2004_v56  ;;  %v1038_v48 = vpop.f32.mrf.mxu1 }
  0xa2   :  { %2230 = vmatpush.bf16.msra.mxu2 %v1940_v44  ;;  %v1039_v34 = vadd.f32 %v1038_v48, %v1019_v8 }
  0xa3   :  { %2238 = vmatpush.bf16.msra.mxu3 %v2004_v56  ;;  %1322 = vmatmul.bf16.vlgmr.msra.gmra.mxu0 %v2799_v6 }
  0xa4   :  { %1341 = vmatmul.bf16.vlgmr.msra.gmra.mxu1 %v3036_v17 }
  0xa5   :  { %1327 = vmatmul.bf16.vlgmr.msra.gmra.mxu2 %v2931_v14 }
  0xa6   :  { %1346 = vmatmul.bf16.vlgmr.msra.gmra.mxu3 %v3144_v18 }
  0xa8   :  { %v1057_v9 = vpop.f32.mrf.mxu2  ;;  %v1021_v36 = vpop.f32.mrf.mxu0 }
  0xa9   :  { %v1058_v13 = vadd.f32 %v1057_v9, %v1039_v34  ;;  %v1076_v35 = vpop.f32.mrf.mxu3  ;;  %v1040_v50 = vpop.f32.mrf.mxu1 }
  0xaa   :  { %v1041_v37 = vadd.f32 %v1040_v50, %v1021_v36 }
  0xab   :  { %v1077_v51 = vadd.f32 %v1076_v35, %v1058_v13 }
  0xb0   :  { %v1059_v53 = vpop.f32.mrf.mxu2  ;;  %v1024_v39 = vpop.f32.mrf.mxu0 }
  0xb1   :  { %v1060_v54 = vadd.f32 %v1059_v53, %v1041_v37  ;;  %v1078_v38 = vpop.f32.mrf.mxu3  ;;  %v1043_v40 = vpop.f32.mrf.mxu1 }
  0xb2   :  { %v1044_v6 = vadd.f32 %v1043_v40, %v1024_v39 }
  0xb3   :  { %v1079_v41 = vadd.f32 %v1078_v38, %v1060_v54 }
  0xb8   :  { %v1062_v42 = vpop.f32.mrf.mxu2  ;;  %v1026_v14 = vpop.f32.mrf.mxu0 }
  0xb9   :  { %v1063_v17 = vadd.f32 %v1062_v42, %v1044_v6  ;;  %v1081_v43 = vpop.f32.mrf.mxu3  ;;  %v1045_v45 = vpop.f32.mrf.mxu1 }
  0xba   :  { %v1046_v46 = vadd.f32 %v1045_v45, %v1026_v14 }
  0xbb   :  { %v1082_v18 = vadd.f32 %v1081_v43, %v1063_v17 }
  0xc0   :  { %v1064_v47 = vpop.f32.mrf.mxu2  ;;  %v1095_v55 = vpop.f32.mrf.mxu0 }
  0xc1   :  { %v1065_v49 = vadd.f32 %v1064_v47, %v1046_v46  ;;  %v1083_v52 = vpop.f32.mrf.mxu3  ;;  %v1114_v58 = vpop.f32.mrf.mxu1  ;;  %v1096_v60 = vadd.f32 %v1095_v55, %v1077_v51 }
  0xc3   :  { %v1084_v59 = vadd.f32 %v1083_v52, %v1065_v49  ;;  %v1115_v61 = vadd.f32 %v1114_v58, %v1096_v60 }
  0xc8   :  { %v1133_v62 = vpop.f32.mrf.mxu2  ;;  %v1097_v3 = vpop.f32.mrf.mxu0 }
  0xc9   :  { %v1152_v63 = vpop.f32.mrf.mxu3  ;;  %v1134_v2 = vadd.f32 %v1133_v62, %v1115_v61  ;;  %v1116_v4 = vpop.f32.mrf.mxu1  ;;  %v1098_v7 = vadd.f32 %v1097_v3, %v1079_v41 }
  0xcb   :  { %v1153_v10 = vadd.f32 %v1152_v63, %v1134_v2  ;;  %v1117_v57 = vadd.f32 %v1116_v4, %v1098_v7  ;;  %v1379_v7 = vld [vmem:[%s3332_s2] sm:$0x3] }
  0xd0   :  { %v1135_v0 = vpop.f32.mrf.mxu2  ;;  %v1100_v5 = vpop.f32.mrf.mxu0 }
  0xd1   :  { %v1154_v11 = vpop.f32.mrf.mxu3  ;;  %v1136_v1 = vadd.f32 %v1135_v0, %v1117_v57  ;;  %v1119_v12 = vpop.f32.mrf.mxu1  ;;  %v1101_v15 = vadd.f32 %v1100_v5, %v1082_v18 }
  0xd3   :  { %v1155_v16 = vadd.f32 %v1154_v11, %v1136_v1  ;;  %v1120_v19 = vadd.f32 %v1119_v12, %v1101_v15  ;;  %v1381_v11 = vperm.slane %v1379_v7, 0 }
  0xd8   :  { %v1138_v20 = vpop.f32.mrf.mxu2  ;;  %v1102_v23 = vpop.f32.mrf.mxu0 }
  0xd9   :  { %v1157_v21 = vpop.f32.mrf.mxu3  ;;  %v1139_v22 = vadd.f32 %v1138_v20, %v1120_v19  ;;  %v1121_v24 = vpop.f32.mrf.mxu1  ;;  %v1103_v25 = vadd.f32 %v1102_v23, %v1084_v59 }
  0xdb   :  { %v3303_v26 = vadd.f32 %v1157_v21, %v1139_v22  ;;  %v1122_v27 = vadd.f32 %v1121_v24, %v1103_v25  ;;  %v1382_v22 = vperm.slane %v1379_v7, 1 }
  0xe0   :  { %v1140_v28 = vpop.f32.mrf.mxu2  ;;  %v1171_v31 = vpop.f32.mrf.mxu0 }
  0xe1   :  { %v1159_v29 = vpop.f32.mrf.mxu3  ;;  %v1141_v30 = vadd.f32 %v1140_v28, %v1122_v27  ;;  %v1190_v32 = vpop.f32.mrf.mxu1  ;;  %v1172_v33 = vadd.f32 %v1171_v31, %v1153_v10 }
  0xe3   :  { %v3305_v44 = vadd.f32 %v1159_v29, %v1141_v30  ;;  %v1385_v25 = vadd.f32 %v1381_v11, %v1172_v33 }
  0xe8   :  { %v1209_v56 = vpop.f32.mrf.mxu2  ;;  %v1173_v48 = vpop.f32.mrf.mxu0 }
  0xe9   :  { %v1228_v8 = vpop.f32.mrf.mxu3  ;;  %v1192_v34 = vpop.f32.mrf.mxu1  ;;  %v3307_v9 = vadd.f32 %v1173_v48, %v1155_v16  ;;  %v1210_v14 = vadd.f32 %v1209_v56, %v1190_v32  ;;  %v1393_v56 = vmax.f32 %v1385_v25, 0.0 }
  0xeb   :  { %v1229_v49 = vadd.f32 %v1228_v8, %v1210_v14 }
  0xf0   :  { %v1211_v13 = vpop.f32.mrf.mxu2  ;;  %v1176_v36 = vpop.f32.mrf.mxu0 }
  0xf1   :  { %v1230_v35 = vpop.f32.mrf.mxu3  ;;  %v1195_v50 = vpop.f32.mrf.mxu1  ;;  %v1212_v58 = vadd.f32 %v1211_v13, %v1192_v34  ;;  %v1177_v31 = vadd.f32 %v1176_v36, %v3303_v26 }
  0xf3   :  { %v1231_v3 = vadd.f32 %v1230_v35, %v1212_v58 }
  0xf8   :  { %v1214_v51 = vpop.f32.mrf.mxu2  ;;  %v3309_v53 = vpop.f32.mrf.mxu0 }
  0xf9   :  { %v1233_v37 = vpop.f32.mrf.mxu3  ;;  %v1197_v54 = vpop.f32.mrf.mxu1  ;;  %v1215_v55 = vadd.f32 %v1214_v51, %v1195_v50 }
  0xfb   :  { %v1234_v2 = vadd.f32 %v1233_v37, %v1215_v55 }
 0x100   :  { %v1216_v38 = vpop.f32.mrf.mxu2  ;;  %v1247_v40 = vpop.f32.mrf.mxu0 }
 0x101   :  { %v1235_v39 = vpop.f32.mrf.mxu3  ;;  %v1266_v41 = vpop.f32.mrf.mxu1  ;;  %v1248_v52 = vadd.f32 %v1247_v40, %v1229_v49  ;;  %v1217_v0 = vadd.f32 %v1216_v38, %v1197_v54  ;;  %v1389_v38 = vadd.f32 %v1381_v11, %v1177_v31 }
 0x103   :  { %v1267_v63 = vadd.f32 %v1266_v41, %v1248_v52  ;;  %v1236_v23 = vadd.f32 %v1235_v39, %v1217_v0  ;;  %v1387_v41 = vadd.f32 %v1381_v11, %v3307_v9 }
 0x108   :  { %v1285_v6 = vpop.f32.mrf.mxu2  ;;  %v1249_v17 = vpop.f32.mrf.mxu0 }
 0x109   :  { %v1304_v42 = vpop.f32.mrf.mxu3  ;;  %v1268_v43 = vpop.f32.mrf.mxu1  ;;  %v1286_v4 = vadd.f32 %v1285_v6, %v1267_v63  ;;  %v1250_v57 = vadd.f32 %v1249_v17, %v1231_v3  ;;  %v1179_v17 = vadd.f32 %v3309_v53, %v3305_v44 }
 0x10b   :  { %v1305_v1 = vadd.f32 %v1304_v42, %v1286_v4  ;;  %v1269_v20 = vadd.f32 %v1268_v43, %v1250_v57  ;;  %v1397_v42 = vmax.f32 %v1389_v38, 0.0  ;;  %v1391_v55 = vadd.f32 %v1381_v11, %v1179_v17 }
 0x10d   :  { %v1399_v53 = vmax.f32 %v1391_v55, 0.0 }
 0x110   :  { %v1287_v45 = vpop.f32.mrf.mxu2  ;;  %v1252_v46 = vpop.f32.mrf.mxu0 }
 0x111   :  { %v1306_v18 = vpop.f32.mrf.mxu3  ;;  %v1271_v47 = vpop.f32.mrf.mxu1  ;;  %v1253_v10 = vadd.f32 %v1252_v46, %v1234_v2  ;;  %v1288_v27 = vadd.f32 %v1287_v45, %v1269_v20  ;;  %v1395_v45 = vmax.f32 %v1387_v41, 0.0 }
 0x113   :  { %v1272_v15 = vadd.f32 %v1271_v47, %v1253_v10  ;;  %v1307_v8 = vadd.f32 %v1306_v18, %v1288_v27 }
 0x118   :  { %v1290_v59 = vpop.f32.mrf.mxu2  ;;  %v1254_v61 = vpop.f32.mrf.mxu0 }
 0x119   :  { %v1309_v60 = vpop.f32.mrf.mxu3  ;;  %v1273_v62 = vpop.f32.mrf.mxu1  ;;  %v1291_v24 = vadd.f32 %v1290_v59, %v1272_v15  ;;  %v1255_v29 = vadd.f32 %v1254_v61, %v1236_v23 }
 0x11b   :  { %v1310_v32 = vadd.f32 %v1309_v60, %v1291_v24  ;;  %v1274_v35 = vadd.f32 %v1273_v62, %v1255_v29 }
 0x120   :  { %v1292_v5 = vpop.f32.mrf.mxu2  ;;  %v1323_v16 = vpop.f32.mrf.mxu0 }
 0x121   :  { %v1311_v12 = vpop.f32.mrf.mxu3  ;;  %v1342_v19 = vpop.f32.mrf.mxu1  ;;  %v1324_v21 = vadd.f32 %v1323_v16, %v1305_v1  ;;  %v1293_v39 = vadd.f32 %v1292_v5, %v1274_v35 }
 0x123   :  { %v1343_v28 = vadd.f32 %v1342_v19, %v1324_v21  ;;  %v1312_v43 = vadd.f32 %v1311_v12, %v1293_v39 }
 0x125   :  { %v1386_v30 = vadd.f32 %v1382_v22, %v1343_v28 }
 0x127   :  { %v1394_v48 = vmax.f32 %v1386_v30, 0.0 }
 0x128   :  { %v1328_v34 = vpop.f32.mrf.mxu2  ;;  %v1325_v51 = vpop.f32.mrf.mxu0 }
 0x129   :  { %v1347_v13 = vpop.f32.mrf.mxu3  ;;  %v1329_v50 = vadd.f32 %v1328_v34, %v1310_v32  ;;  %v1401_v37 = vpack.c.bf16 %v1394_v48, %v1393_v56  ;;  %v1326_v54 = vadd.f32 %v1325_v51, %v1307_v8  ;;  %v1344_v40 = vpop.f32.mrf.mxu1 }
 0x12b   :  { %v1348_v33 = vadd.f32 %v1347_v13, %v1329_v50  ;;  %1405 = vst [vmem:[%s3333_s3] sm:$0xff] %v1401_v37  ;;  %v1345_v26 = vadd.f32 %v1344_v40, %v1326_v54 }
 0x12d   :  { %v1390_v36 = vadd.f32 %v1382_v22, %v1348_v33  ;;  %v1388_v6 = vadd.f32 %v1382_v22, %v1345_v26 }
 0x12f   :  { %v1398_v14 = vmax.f32 %v1390_v36, 0.0  ;;  %v1396_v18 = vmax.f32 %v1388_v6, 0.0 }
 0x130   :  { %v1330_v46 = vpop.f32.mrf.mxu2 }
 0x131   :  { %v1403_v47 = vpack.c.bf16 %v1398_v14, %v1397_v42  ;;  %v1331_v49 = vadd.f32 %v1330_v46, %v1312_v43  ;;  %v1402_v52 = vpack.c.bf16 %v1396_v18, %v1395_v45  ;;  %v1349_v9 = vpop.f32.mrf.mxu3 }
 0x133   :  { %1407 = vst [vmem:[%s3333_s3 + $0x10] sm:$0xff] %v1403_v47  ;;  %v1350_v58 = vadd.f32 %v1349_v9, %v1331_v49 }
 0x134   :  { %1406 = vst [vmem:[%s3333_s3 + $0x8] sm:$0xff] %v1402_v52 }
 0x135   :  { %v1392_v44 = vadd.f32 %v1382_v22, %v1350_v58 }
 0x137   :  { %v1400_v59 = vmax.f32 %v1392_v44, 0.0 }
 0x139   :  { %v1404_v60 = vpack.c.bf16 %v1400_v59, %v1399_v53 }
 0x13b   :  { %1408 = vst [vmem:[%s3333_s3 + $0x18] sm:$0xff] %v1404_v60 }

// kernel: tile.53
= control target key start
LH: loop header
LB: loop body
LE: loop exit
PB: predicated region body
PF: predicated region fallthrough
CT: control target
= control target key end

     0   :  { %s22_s0 = inlined_call_operand.vmem [shape: f32[32], index: 0, kind: input, shape index: {}]   ;;  %s23_s1 = inlined_call_operand.vmem [shape: f32[4,32], index: 1, kind: output, shape index: {}]  }
   0x1   :  { %v4_v0 = vld [vmem:[%s22_s0] ss:$0 sm:$0xff] }
   0x2   :  { %5 = vst [vmem:[%s23_s1] sm:$0xf] %v4_v0 }

// kernel: tile.54
= control target key start
LH: loop header
LB: loop body
LE: loop exit
PB: predicated region body
PF: predicated region fallthrough
CT: control target
= control target key end

     0   :  { %s37_s8 = smov 32   ;;  %s38_s9 = smov 64   ;;  %vm7_vm0 = vcmask 261120   ;;  %vm13_vm1 = vcmask 1048320   ;;  %vm19_vm2 = vcmask 785920   ;;  %vm25_vm3 = vcmask 523520   ;;  %s55_s0 = inlined_call_operand.vmem [shape: f32[4,32], index: 0, kind: input, shape index: {}]   ;;  %s56_s1 = inlined_call_operand.vmem [shape: f32[1,128], index: 1, kind: output, shape index: {}]  }
   0x1   :  { %v4_v0 = vld [vmem:[%s55_s0] sm:$0xf]  ;;  %s36_s0 = smov 96  }
   0x2   :  { %5 = vst [vmem:[#allocation1] sm:$0xf] %v4_v0 }
   0x9   :  { %v10_v1 = vld [vmem:[#allocation1 + $0x3] sm:$0x1]   ;;  %v22_v2 = vld [vmem:[#allocation1 + $0x1] sm:$0x1]   ;;  %v16_v3 = vld [vmem:[#allocation1 + $0x2] sm:$0x1]  }
   0xa   :  { %11 = vrot.lane.b32.xlu0 %v10_v1, %s36_s0  ;;  %23 = vrot.lane.b32.xlu1 %v22_v2, %s37_s8  ;;  %v6_v4 = vld [vmem:[#allocation1] sm:$0x1]  }
   0xb   :  { %8 = vst.msk [vmem:[#allocation0] sm:$0x1] %vm7_vm0, %v6_v4  }
  0x12   :  { %17 = vrot.lane.b32.xlu0 %v16_v3, %s38_s9 }
  0x7c   :  { %v12_v5 = vpop.permute.xlu0 %11   ;;  %v24_v6 = vpop.permute.xlu1 %23  }
  0x7d   :  { %14 = vst.msk [vmem:[#allocation0] sm:$0x1] %vm13_vm1, %v12_v5  }
  0x84   :  { %v18_v7 = vpop.permute.xlu0 %17  }
  0x85   :  { %20 = vst.msk [vmem:[#allocation0] sm:$0x1] %vm19_vm2, %v18_v7  }
  0x86   :  { %26 = vst.msk [vmem:[#allocation0] sm:$0x1] %vm25_vm3, %v24_v6  }
  0x8d   :  { %v29_v8 = vld [vmem:[#allocation0] sm:$0x1] }
  0x8e   :  { %32 = vst [vmem:[%s56_s1] sm:$0x1] %v29_v8 }

// kernel: generator_forward.8
= control target key start
LH: loop header
LB: loop body
LE: loop exit
PB: predicated region body
PF: predicated region fallthrough
CT: control target
= control target key end

     0   :  { %vm587_vm0 = vcmask 523264   ;;  %s1897_s1 = inlined_call_operand.vmem [shape: bf16[576,128], index: 1, kind: input, shape index: {}]   ;;  %s1898_s0 = inlined_call_operand.vmem [shape: bf16[128,576], index: 0, kind: input, shape index: {}]   ;;  %s1899_s2 = inlined_call_operand.vmem [shape: f32[1,128], index: 2, kind: input, shape index: {}]   ;;  %s1900_s3 = inlined_call_operand.vmem [shape: bf16[128,128], index: 3, kind: output, shape index: {}]  }
   0x1   :  { %v1339_v0 = vld [vmem:[%s1897_s1 + $0x38] sm:$0xff]  ;;  %v1338_v1 = vld [vmem:[%s1897_s1 + $0x30] sm:$0xff]  ;;  %v1337_v2 = vld [vmem:[%s1897_s1 + $0x28] sm:$0xff] }
   0x2   :  { %1415 = vmatpush.bf16.msra.mxu1 %v1339_v0  ;;  %1416 = vmatpush.bf16.msra.mxu2 %v1339_v0  ;;  %v1336_v3 = vld [vmem:[%s1897_s1 + $0x20] sm:$0xff]  ;;  %v1335_v4 = vld [vmem:[%s1897_s1 + $0x18] sm:$0xff]  ;;  %v1334_v5 = vld [vmem:[%s1897_s1 + $0x10] sm:$0xff] }
   0x3   :  { %1417 = vmatpush.bf16.msra.mxu3 %v1339_v0  ;;  %612 = vmatpush.bf16.msra.mxu0 %v1339_v0  ;;  %v1333_v6 = vld [vmem:[%s1897_s1 + $0x8] sm:$0xff]  ;;  %v1332_v7 = vld [vmem:[%s1897_s1] sm:$0xff]  ;;  %v1022_v8 = vld [vmem:[%s1898_s0 + $0x50] sm:$0xf] }
   0x4   :  { %v1304_v9 = vld [vmem:[%s1898_s0 + $0x60] sm:$0xf0]  ;;  %v1062_v10 = vld [vmem:[%s1898_s0 + $0xa0] sm:$0xf]  ;;  %v1314_v11 = vld [vmem:[%s1898_s0 + $0xb0] sm:$0xf0] }
   0x5   :  { %v1102_v12 = vld [vmem:[%s1898_s0 + $0xf0] sm:$0xf]  ;;  %v1324_v13 = vld [vmem:[%s1898_s0 + $0x100] sm:$0xf0]  ;;  %v982_v14 = vld [vmem:[%s1898_s0] sm:$0xf]  ;;  %v1023_v18 = vor.u32 %v1304_v9, %v1022_v8  ;;  %v1063_v19 = vor.u32 %v1314_v11, %v1062_v10 }
   0x6   :  { %1418 = vmatpush.bf16.msra.mxu1 %v1338_v1  ;;  %1419 = vmatpush.bf16.msra.mxu2 %v1338_v1  ;;  %v1294_v15 = vld [vmem:[%s1898_s0 + $0x10] sm:$0xf0]  ;;  %v1355_v16 = vld [vmem:[%s1897_s1 + $0xb8] sm:$0xff]  ;;  %v1103_v20 = vor.u32 %v1324_v13, %v1102_v12  ;;  %v1353_v28 = vld [vmem:[%s1897_s1 + $0xa8] sm:$0xff] }
   0x7   :  { %1420 = vmatpush.bf16.msra.mxu3 %v1338_v1  ;;  %613 = vmatpush.bf16.msra.mxu0 %v1338_v1  ;;  %v1347_v17 = vld [vmem:[%s1897_s1 + $0x78] sm:$0xff]  ;;  %v983_v21 = vor.u32 %v1294_v15, %v982_v14  ;;  %v1354_v24 = vld [vmem:[%s1897_s1 + $0xb0] sm:$0xff]  ;;  %v1345_v29 = vld [vmem:[%s1897_s1 + $0x68] sm:$0xff] }
   0x8   :  { %v1363_v22 = vld [vmem:[%s1897_s1 + $0xf8] sm:$0xff]  ;;  %v1346_v25 = vld [vmem:[%s1897_s1 + $0x70] sm:$0xff]  ;;  %v1361_v30 = vld [vmem:[%s1897_s1 + $0xe8] sm:$0xff] }
   0x9   :  { %v1367_v23 = vld [vmem:[%s1897_s1 + $0x118] sm:$0xff]  ;;  %v1362_v26 = vld [vmem:[%s1897_s1 + $0xf0] sm:$0xff]  ;;  %v1365_v31 = vld [vmem:[%s1897_s1 + $0x108] sm:$0xff] }
   0xa   :  { %1421 = vmatpush.bf16.msra.mxu1 %v1337_v2  ;;  %1422 = vmatpush.bf16.msra.mxu2 %v1337_v2  ;;  %v1366_v27 = vld [vmem:[%s1897_s1 + $0x110] sm:$0xff]  ;;  %v1352_v32 = vld [vmem:[%s1897_s1 + $0xa0] sm:$0xff]  ;;  %v1042_v35 = vld [vmem:[%s1898_s0 + $0x78] sm:$0xf] }
   0xb   :  { %1423 = vmatpush.bf16.msra.mxu3 %v1337_v2  ;;  %614 = vmatpush.bf16.msra.mxu0 %v1337_v2  ;;  %v1344_v33 = vld [vmem:[%s1897_s1 + $0x60] sm:$0xff]  ;;  %v1309_v36 = vld [vmem:[%s1898_s0 + $0x88] sm:$0xf0]  ;;  %v1082_v37 = vld [vmem:[%s1898_s0 + $0xc8] sm:$0xf] }
   0xc   :  { %v1360_v34 = vld [vmem:[%s1897_s1 + $0xe0] sm:$0xff]  ;;  %v1319_v38 = vld [vmem:[%s1898_s0 + $0xd8] sm:$0xf0]  ;;  %v1122_v39 = vld [vmem:[%s1898_s0 + $0x118] sm:$0xf]  ;;  %v1043_v46 = vor.u32 %v1309_v36, %v1042_v35 }
   0xd   :  { %v1329_v40 = vld [vmem:[%s1898_s0 + $0x128] sm:$0xf0]  ;;  %v1002_v41 = vld [vmem:[%s1898_s0 + $0x28] sm:$0xf]  ;;  %v1299_v42 = vld [vmem:[%s1898_s0 + $0x38] sm:$0xf0]  ;;  %v1083_v47 = vor.u32 %v1319_v38, %v1082_v37 }
   0xe   :  { %1424 = vmatpush.bf16.msra.mxu1 %v1336_v3  ;;  %1425 = vmatpush.bf16.msra.mxu2 %v1336_v3  ;;  %v1364_v43 = vld [vmem:[%s1897_s1 + $0x100] sm:$0xff]  ;;  %v1351_v44 = vld [vmem:[%s1897_s1 + $0x98] sm:$0xff]  ;;  %v1123_v48 = vor.u32 %v1329_v40, %v1122_v39  ;;  %v1003_v49 = vor.u32 %v1299_v42, %v1002_v41  ;;  %v1350_v51 = vld [vmem:[%s1897_s1 + $0x90] sm:$0xff] }
   0xf   :  { %1426 = vmatpush.bf16.msra.mxu3 %v1336_v3  ;;  %615 = vmatpush.bf16.msra.mxu0 %v1336_v3  ;;  %v1343_v45 = vld [vmem:[%s1897_s1 + $0x58] sm:$0xff]  ;;  %v1342_v52 = vld [vmem:[%s1897_s1 + $0x50] sm:$0xff]  ;;  %v1349_v54 = vld [vmem:[%s1897_s1 + $0x88] sm:$0xff] }
  0x10   :  { %v1359_v50 = vld [vmem:[%s1897_s1 + $0xd8] sm:$0xff]  ;;  %v1358_v53 = vld [vmem:[%s1897_s1 + $0xd0] sm:$0xff]  ;;  %v1341_v55 = vld [vmem:[%s1897_s1 + $0x48] sm:$0xff] }
  0x11   :  { %v1357_v56 = vld [vmem:[%s1897_s1 + $0xc8] sm:$0xff]  ;;  %v1348_v57 = vld [vmem:[%s1897_s1 + $0x80] sm:$0xff]  ;;  %v984_v61 = vld [vmem:[%s1898_s0 + $0x14] sm:$0xf0] }
  0x12   :  { %1427 = vmatpush.bf16.msra.mxu1 %v1335_v4  ;;  %1428 = vmatpush.bf16.msra.mxu2 %v1335_v4  ;;  %v1340_v58 = vld [vmem:[%s1897_s1 + $0x40] sm:$0xff]  ;;  %v990_v62 = vld [vmem:[%s1898_s0 + $0x8] sm:$0xf]  ;;  %v1295_v63 = vld [vmem:[%s1898_s0 + $0x18] sm:$0xf0] }
  0x13   :  { %1429 = vmatpush.bf16.msra.mxu3 %v1335_v4  ;;  %616 = vmatpush.bf16.msra.mxu0 %v1335_v4  ;;  %v1356_v59 = vld [vmem:[%s1897_s1 + $0xc0] sm:$0xff]  ;;  %v1293_v0 = vld [vmem:[%s1898_s0 + $0xc] sm:$0xf]  ;;  %v998_v2 = vld [vmem:[%s1898_s0 + $0x10] sm:$0xf] }
  0x14   :  { %v1292_v60 = vld [vmem:[%s1898_s0 + $0x4] sm:$0xf]  ;;  %v992_v1 = vld [vmem:[%s1898_s0 + $0x1c] sm:$0xf0]  ;;  %v1297_v8 = vld [vmem:[%s1898_s0 + $0x2c] sm:$0xf] }
  0x15   :  { %v1296_v3 = vld [vmem:[%s1898_s0 + $0x20] sm:$0xf0]  ;;  %v987_v4 = vor.u32 %v1292_v60, %v984_v61  ;;  %v1004_v9 = vld [vmem:[%s1898_s0 + $0x3c] sm:$0xf0]  ;;  %v1010_v10 = vld [vmem:[%s1898_s0 + $0x30] sm:$0xf] }
  0x16   :  { %1430 = vmatpush.bf16.msra.mxu1 %v1334_v5  ;;  %1431 = vmatpush.bf16.msra.mxu2 %v1334_v5  ;;  %v1300_v11 = vld [vmem:[%s1898_s0 + $0x40] sm:$0xf0]  ;;  %v1298_v12 = vld [vmem:[%s1898_s0 + $0x34] sm:$0xf]  ;;  %v1012_v13 = vld [vmem:[%s1898_s0 + $0x44] sm:$0xf0] }
  0x17   :  { %1432 = vmatpush.bf16.msra.mxu3 %v1334_v5  ;;  %617 = vmatpush.bf16.msra.mxu0 %v1334_v5  ;;  %v991_v5 = vor.u32 %v1295_v63, %v990_v62  ;;  %v1018_v14 = vld [vmem:[%s1898_s0 + $0x38] sm:$0xf]  ;;  %v1301_v15 = vld [vmem:[%s1898_s0 + $0x48] sm:$0xf0]  ;;  %v1310_v35 = vld [vmem:[%s1898_s0 + $0x90] sm:$0xf0] }
  0x18   :  { %v1308_v36 = vld [vmem:[%s1898_s0 + $0x84] sm:$0xf]  ;;  %v1052_v37 = vld [vmem:[%s1898_s0 + $0x94] sm:$0xf0]  ;;  %v1058_v38 = vld [vmem:[%s1898_s0 + $0x88] sm:$0xf] }
  0x19   :  { %v1311_v39 = vld [vmem:[%s1898_s0 + $0x98] sm:$0xf0]  ;;  %v1055_v42 = vor.u32 %v1308_v36, %v1052_v37  ;;  %v1318_v60 = vld [vmem:[%s1898_s0 + $0xd4] sm:$0xf]  ;;  %v1092_v61 = vld [vmem:[%s1898_s0 + $0xe4] sm:$0xf0] }
  0x1a   :  { %1433 = vmatpush.bf16.msra.mxu1 %v1333_v6  ;;  %1434 = vmatpush.bf16.msra.mxu2 %v1333_v6  ;;  %v1098_v62 = vld [vmem:[%s1898_s0 + $0xd8] sm:$0xf]  ;;  %v1321_v63 = vld [vmem:[%s1898_s0 + $0xe8] sm:$0xf0] }
  0x1b   :  { %1435 = vmatpush.bf16.msra.mxu3 %v1333_v6  ;;  %618 = vmatpush.bf16.msra.mxu0 %v1333_v6  ;;  %v995_v6 = vor.u32 %v1293_v0, %v992_v1 }
  0x1e   :  { %1436 = vmatpush.bf16.msra.mxu1 %v1332_v7  ;;  %1437 = vmatpush.bf16.msra.mxu2 %v1332_v7 }
  0x1f   :  { %1438 = vmatpush.bf16.msra.mxu3 %v1332_v7  ;;  %619 = vmatpush.bf16.msra.mxu0 %v1332_v7  ;;  %v999_v7 = vor.u32 %v1296_v3, %v998_v2  ;;  %v1095_v2 = vor.u32 %v1318_v60, %v1092_v61  ;;  %v1099_v3 = vor.u32 %v1321_v63, %v1098_v62 }
  0x21   :  { %630 = vmatmul.bf16.vlgmr.msra.gmra.mxu1 %v1023_v18  ;;  %640 = vmatmul.bf16.vlgmr.msra.gmra.mxu2 %v1063_v19  ;;  %v1015_v18 = vor.u32 %v1298_v12, %v1012_v13  ;;  %v1019_v19 = vor.u32 %v1301_v15, %v1018_v14 }
  0x22   :  { %710 = vmatpush.bf16.msrb.mxu2 %v1355_v16  ;;  %661 = vmatpush.bf16.msrb.mxu1 %v1347_v17  ;;  %v1007_v16 = vor.u32 %v1297_v8, %v1004_v9  ;;  %v1011_v17 = vor.u32 %v1300_v11, %v1010_v10  ;;  %v1323_v8 = vld [vmem:[%s1898_s0 + $0xfc] sm:$0xf]  ;;  %v1112_v9 = vld [vmem:[%s1898_s0 + $0x10c] sm:$0xf0]  ;;  %v1118_v10 = vld [vmem:[%s1898_s0 + $0x100] sm:$0xf] }
  0x23   :  { %650 = vmatmul.bf16.vlgmr.msra.gmra.mxu3 %v1103_v20  ;;  %620 = vmatmul.bf16.vlgmr.msra.gmra.mxu0 %v983_v21  ;;  %v1302_v20 = vld [vmem:[%s1898_s0 + $0x54] sm:$0xf]  ;;  %v1024_v21 = vld [vmem:[%s1898_s0 + $0x64] sm:$0xf0]  ;;  %v1115_v15 = vor.u32 %v1323_v8, %v1112_v9 }
  0x24   :  { %759 = vmatpush.bf16.msrb.mxu3 %v1363_v22  ;;  %812 = vmatpush.bf16.msrb.mxu0 %v1367_v23  ;;  %v1030_v22 = vld [vmem:[%s1898_s0 + $0x58] sm:$0xf]  ;;  %v1305_v23 = vld [vmem:[%s1898_s0 + $0x68] sm:$0xf0]  ;;  %v1326_v11 = vld [vmem:[%s1898_s0 + $0x110] sm:$0xf0] }
  0x26   :  { %711 = vmatpush.bf16.msrb.mxu2 %v1354_v24  ;;  %662 = vmatpush.bf16.msrb.mxu1 %v1346_v25  ;;  %v1303_v24 = vld [vmem:[%s1898_s0 + $0x5c] sm:$0xf]  ;;  %v1032_v25 = vld [vmem:[%s1898_s0 + $0x6c] sm:$0xf0] }
  0x28   :  { %760 = vmatpush.bf16.msrb.mxu3 %v1362_v26  ;;  %813 = vmatpush.bf16.msrb.mxu0 %v1366_v27  ;;  %v1038_v26 = vld [vmem:[%s1898_s0 + $0x60] sm:$0xf]  ;;  %v1306_v27 = vld [vmem:[%s1898_s0 + $0x70] sm:$0xf0] }
  0x2a   :  { %712 = vmatpush.bf16.msrb.mxu2 %v1353_v28  ;;  %663 = vmatpush.bf16.msrb.mxu1 %v1345_v29  ;;  %v1027_v28 = vor.u32 %v1302_v20, %v1024_v21  ;;  %v1031_v29 = vor.u32 %v1305_v23, %v1030_v22  ;;  %v1327_v22 = vld [vmem:[%s1898_s0 + $0x11c] sm:$0xf]  ;;  %v1124_v23 = vld [vmem:[%s1898_s0 + $0x12c] sm:$0xf0] }
  0x2c   :  { %761 = vmatpush.bf16.msrb.mxu3 %v1361_v30  ;;  %814 = vmatpush.bf16.msrb.mxu0 %v1365_v31  ;;  %v1035_v30 = vor.u32 %v1303_v24, %v1032_v25  ;;  %v1039_v31 = vor.u32 %v1306_v27, %v1038_v26  ;;  %v1130_v24 = vld [vmem:[%s1898_s0 + $0x120] sm:$0xf]  ;;  %v1330_v25 = vld [vmem:[%s1898_s0 + $0x130] sm:$0xf0]  ;;  %v1328_v26 = vld [vmem:[%s1898_s0 + $0x124] sm:$0xf] }
  0x2d   :  { %v1132_v27 = vld [vmem:[%s1898_s0 + $0x134] sm:$0xf0] }
  0x2e   :  { %713 = vmatpush.bf16.msrb.mxu2 %v1352_v32  ;;  %664 = vmatpush.bf16.msrb.mxu1 %v1344_v33  ;;  %v1307_v32 = vld [vmem:[%s1898_s0 + $0x7c] sm:$0xf]  ;;  %v1044_v33 = vld [vmem:[%s1898_s0 + $0x8c] sm:$0xf0] }
  0x2f   :  { %v1047_v40 = vor.u32 %v1307_v32, %v1044_v33  ;;  %v1127_v32 = vor.u32 %v1327_v22, %v1124_v23  ;;  %v1131_v33 = vor.u32 %v1330_v25, %v1130_v24 }
  0x30   :  { %762 = vmatpush.bf16.msrb.mxu3 %v1360_v34  ;;  %815 = vmatpush.bf16.msrb.mxu0 %v1364_v43  ;;  %v1050_v34 = vld [vmem:[%s1898_s0 + $0x80] sm:$0xf]  ;;  %v1059_v43 = vor.u32 %v1311_v39, %v1058_v38 }
  0x31   :  { %635 = vmatmul.bf16.gmra.mxu1 %v1043_v46  ;;  %645 = vmatmul.bf16.gmra.mxu2 %v1083_v47  ;;  %v1051_v41 = vor.u32 %v1310_v35, %v1050_v34  ;;  %v1070_v46 = vld [vmem:[%s1898_s0 + $0xa8] sm:$0xf]  ;;  %v1315_v47 = vld [vmem:[%s1898_s0 + $0xb8] sm:$0xf0]  ;;  %v1135_v35 = vor.u32 %v1328_v26, %v1132_v27 }
  0x32   :  { %714 = vmatpush.bf16.msrb.mxu2 %v1351_v44  ;;  %665 = vmatpush.bf16.msrb.mxu1 %v1343_v45  ;;  %v1312_v44 = vld [vmem:[%s1898_s0 + $0xa4] sm:$0xf]  ;;  %v1064_v45 = vld [vmem:[%s1898_s0 + $0xb4] sm:$0xf0] }
  0x33   :  { %655 = vmatmul.bf16.gmra.mxu3 %v1123_v48  ;;  %625 = vmatmul.bf16.gmra.mxu0 %v1003_v49  ;;  %v1313_v48 = vld [vmem:[%s1898_s0 + $0xac] sm:$0xf]  ;;  %v1072_v49 = vld [vmem:[%s1898_s0 + $0xbc] sm:$0xf0] }
  0x34   :  { %763 = vmatpush.bf16.msrb.mxu3 %v1359_v50  ;;  %v1078_v50 = vld [vmem:[%s1898_s0 + $0xb0] sm:$0xf] }
  0x36   :  { %715 = vmatpush.bf16.msrb.mxu2 %v1350_v51  ;;  %666 = vmatpush.bf16.msrb.mxu1 %v1342_v52  ;;  %v1316_v51 = vld [vmem:[%s1898_s0 + $0xc0] sm:$0xf0]  ;;  %v1067_v52 = vor.u32 %v1312_v44, %v1064_v45 }
  0x38   :  { %764 = vmatpush.bf16.msrb.mxu3 %v1358_v53  ;;  %v1071_v53 = vor.u32 %v1315_v47, %v1070_v46 }
  0x3a   :  { %716 = vmatpush.bf16.msrb.mxu2 %v1349_v54  ;;  %667 = vmatpush.bf16.msrb.mxu1 %v1341_v55  ;;  %v1075_v54 = vor.u32 %v1313_v48, %v1072_v49  ;;  %v1079_v55 = vor.u32 %v1316_v51, %v1078_v50 }
  0x3c   :  { %765 = vmatpush.bf16.msrb.mxu3 %v1357_v56  ;;  %v1317_v56 = vld [vmem:[%s1898_s0 + $0xcc] sm:$0xf] }
  0x3e   :  { %717 = vmatpush.bf16.msrb.mxu2 %v1348_v57  ;;  %668 = vmatpush.bf16.msrb.mxu1 %v1340_v58  ;;  %v1084_v57 = vld [vmem:[%s1898_s0 + $0xdc] sm:$0xf0]  ;;  %v1090_v58 = vld [vmem:[%s1898_s0 + $0xd0] sm:$0xf] }
  0x3f   :  { %v1087_v0 = vor.u32 %v1317_v56, %v1084_v57  ;;  %v1843_v56 = vld [vmem:[%s1899_s2] ss:$0 sm:$0xff] }
  0x40   :  { %766 = vmatpush.bf16.msrb.mxu3 %v1356_v59  ;;  %v1320_v59 = vld [vmem:[%s1898_s0 + $0xe0] sm:$0xf0] }
  0x41   :  { %669 = vmatmul.bf16.vlgmr.msrb.gmra.mxu1 %v987_v4  ;;  %718 = vmatmul.bf16.vlgmr.msrb.gmra.mxu2 %v991_v5  ;;  %v1091_v1 = vor.u32 %v1320_v59, %v1090_v58  ;;  %v1322_v4 = vld [vmem:[%s1898_s0 + $0xf4] sm:$0xf]  ;;  %v1104_v5 = vld [vmem:[%s1898_s0 + $0x104] sm:$0xf0] }
  0x42   :  { %v1107_v12 = vor.u32 %v1322_v4, %v1104_v5 }
  0x43   :  { %767 = vmatmul.bf16.vlgmr.msrb.gmra.mxu3 %v995_v6  ;;  %1284 = vmatmul.msk.bf16.vlgmr.msrb.gmra.mxu0 %vm587_vm0, %v999_v7  ;;  %v1110_v6 = vld [vmem:[%s1898_s0 + $0xf8] sm:$0xf]  ;;  %v1325_v7 = vld [vmem:[%s1898_s0 + $0x108] sm:$0xf0] }
  0x44   :  { %v1111_v13 = vor.u32 %v1325_v7, %v1110_v6 }
  0x51   :  { %674 = vmatmul.bf16.gmra.mxu1 %v1007_v16  ;;  %723 = vmatmul.bf16.gmra.mxu2 %v1011_v17  ;;  %v1119_v16 = vor.u32 %v1326_v11, %v1118_v10 }
  0x53   :  { %772 = vmatmul.bf16.gmra.mxu3 %v1015_v18  ;;  %1285 = vmatmul.msk.bf16.gmra.mxu0 %vm587_vm0, %v1019_v19 }
  0x61   :  { %679 = vmatmul.bf16.gmra.mxu1 %v1027_v28  ;;  %728 = vmatmul.bf16.gmra.mxu2 %v1031_v29  ;;  %v1138_v28 = vld [vmem:[%s1898_s0 + $0x128] sm:$0xf]  ;;  %v1331_v29 = vld [vmem:[%s1898_s0 + $0x138] sm:$0xf0] }
  0x62   :  { %v1139_v36 = vor.u32 %v1331_v29, %v1138_v28 }
  0x63   :  { %777 = vmatmul.bf16.gmra.mxu3 %v1035_v30  ;;  %1286 = vmatmul.msk.bf16.gmra.mxu0 %vm587_vm0, %v1039_v31 }
  0x71   :  { %684 = vmatmul.bf16.gmra.mxu1 %v1047_v40  ;;  %733 = vmatmul.bf16.gmra.mxu2 %v1051_v41 }
  0x73   :  { %782 = vmatmul.bf16.gmra.mxu3 %v1055_v42  ;;  %1287 = vmatmul.msk.bf16.gmra.mxu0 %vm587_vm0, %v1059_v43 }
  0x81   :  { %689 = vmatmul.bf16.gmra.mxu1 %v1067_v52  ;;  %738 = vmatmul.bf16.gmra.mxu2 %v1071_v53 }
  0x83   :  { %787 = vmatmul.bf16.gmra.mxu3 %v1075_v54  ;;  %1288 = vmatmul.msk.bf16.gmra.mxu0 %vm587_vm0, %v1079_v55 }
  0x91   :  { %694 = vmatmul.bf16.gmra.mxu1 %v1087_v0  ;;  %743 = vmatmul.bf16.gmra.mxu2 %v1091_v1 }
  0x93   :  { %792 = vmatmul.bf16.gmra.mxu3 %v1095_v2  ;;  %1289 = vmatmul.msk.bf16.gmra.mxu0 %vm587_vm0, %v1099_v3 }
  0x9e   :  { %v1790_v14 = vpop.f32.mrf.mxu1 }
  0xa0   :  { %v621_v17 = vpop.f32.mrf.mxu0 }
  0xa1   :  { %699 = vmatmul.bf16.gmra.mxu1 %v1107_v12  ;;  %748 = vmatmul.bf16.gmra.mxu2 %v1111_v13 }
  0xa3   :  { %797 = vmatmul.bf16.gmra.mxu3 %v1115_v15  ;;  %1290 = vmatmul.msk.bf16.gmra.mxu0 %vm587_vm0, %v1119_v16 }
  0xa4   :  { %v1793_v18 = vpop.f32.mrf.mxu2 }
  0xa6   :  { %v1795_v19 = vpop.f32.mrf.mxu3  ;;  %v1797_v20 = vpop.f32.mrf.mxu1 }
  0xa8   :  { %v623_v21 = vpop.f32.mrf.mxu0 }
  0xac   :  { %v1823_v30 = vpop.f32.mrf.mxu2 }
  0xae   :  { %v1825_v31 = vpop.f32.mrf.mxu3  ;;  %v1827_v34 = vpop.f32.mrf.mxu1 }
  0xb0   :  { %v626_v37 = vpop.f32.mrf.mxu0 }
  0xb1   :  { %704 = vmatmul.bf16.gmra.mxu1 %v1127_v32  ;;  %753 = vmatmul.bf16.gmra.mxu2 %v1131_v33 }
  0xb3   :  { %802 = vmatmul.bf16.gmra.mxu3 %v1135_v35  ;;  %1291 = vmatmul.msk.bf16.gmra.mxu0 %vm587_vm0, %v1139_v36 }
  0xb4   :  { %v1830_v38 = vpop.f32.mrf.mxu2 }
  0xb6   :  { %v1832_v39 = vpop.f32.mrf.mxu3  ;;  %v1834_v40 = vpop.f32.mrf.mxu1 }
  0xb8   :  { %v628_v41 = vpop.f32.mrf.mxu0 }
  0xbc   :  { %v1836_v42 = vpop.f32.mrf.mxu2 }
  0xbe   :  { %v1838_v43 = vpop.f32.mrf.mxu3  ;;  %v670_v44 = vpop.f32.mrf.mxu1 }
  0xbf   :  { %v671_v46 = vadd.f32 %v670_v44, %v621_v17 }
  0xc0   :  { %v817_v45 = vpop.f32.mrf.mxu0 }
  0xc4   :  { %v719_v47 = vpop.f32.mrf.mxu2 }
  0xc5   :  { %v720_v48 = vadd.f32 %v719_v47, %v671_v46 }
  0xc6   :  { %v768_v49 = vpop.f32.mrf.mxu3  ;;  %v672_v50 = vpop.f32.mrf.mxu1 }
  0xc7   :  { %v769_v52 = vadd.f32 %v768_v49, %v720_v48  ;;  %v673_v53 = vadd.f32 %v672_v50, %v623_v21 }
  0xc8   :  { %v819_v51 = vpop.f32.mrf.mxu0 }
  0xc9   :  { %v818_v55 = vadd.f32 %v817_v45, %v769_v52 }
  0xcb   :  { %v912_v62 = vadd.f32 %v1843_v56, %v818_v55 }
  0xcc   :  { %v721_v54 = vpop.f32.mrf.mxu2 }
  0xcd   :  { %v722_v57 = vadd.f32 %v721_v54, %v673_v53  ;;  %v928_v3 = vmax.f32 %v912_v62, 0.0 }
  0xce   :  { %v770_v58 = vpop.f32.mrf.mxu3  ;;  %v675_v59 = vpop.f32.mrf.mxu1 }
  0xcf   :  { %v771_v60 = vadd.f32 %v770_v58, %v722_v57  ;;  %v676_v1 = vadd.f32 %v675_v59, %v626_v37 }
  0xd0   :  { %v822_v61 = vpop.f32.mrf.mxu0 }
  0xd1   :  { %v820_v63 = vadd.f32 %v819_v51, %v771_v60 }
  0xd3   :  { %v913_v0 = vadd.f32 %v1843_v56, %v820_v63 }
  0xd4   :  { %v724_v2 = vpop.f32.mrf.mxu2 }
  0xd5   :  { %v929_v4 = vmax.f32 %v913_v0, 0.0  ;;  %v725_v5 = vadd.f32 %v724_v2, %v676_v1 }
  0xd6   :  { %v773_v6 = vpop.f32.mrf.mxu3  ;;  %v677_v7 = vpop.f32.mrf.mxu1 }
  0xd7   :  { %v1371_v8 = vpack.c.bf16 %v929_v4, %v928_v3  ;;  %v774_v10 = vadd.f32 %v773_v6, %v725_v5  ;;  %v678_v11 = vadd.f32 %v677_v7, %v628_v41 }
  0xd8   :  { %v824_v9 = vpop.f32.mrf.mxu0 }
  0xd9   :  { %1372 = vst [vmem:[%s1900_s3] sm:$0xff] %v1371_v8   ;;  %v823_v13 = vadd.f32 %v822_v61, %v774_v10 }
  0xdb   :  { %v914_v23 = vadd.f32 %v1843_v56, %v823_v13 }
  0xdc   :  { %v726_v12 = vpop.f32.mrf.mxu2 }
  0xdd   :  { %v727_v15 = vadd.f32 %v726_v12, %v678_v11  ;;  %v930_v28 = vmax.f32 %v914_v23, 0.0 }
  0xde   :  { %v775_v16 = vpop.f32.mrf.mxu3  ;;  %v680_v17 = vpop.f32.mrf.mxu1 }
  0xdf   :  { %v776_v21 = vadd.f32 %v775_v16, %v727_v15  ;;  %v681_v26 = vadd.f32 %v680_v17, %v1790_v14 }
  0xe0   :  { %v827_v22 = vpop.f32.mrf.mxu0 }
  0xe1   :  { %v825_v24 = vadd.f32 %v824_v9, %v776_v21 }
  0xe3   :  { %v915_v25 = vadd.f32 %v1843_v56, %v825_v24 }
  0xe4   :  { %v729_v27 = vpop.f32.mrf.mxu2 }
  0xe5   :  { %v931_v29 = vmax.f32 %v915_v25, 0.0  ;;  %v730_v32 = vadd.f32 %v729_v27, %v681_v26 }
  0xe6   :  { %v778_v33 = vpop.f32.mrf.mxu3  ;;  %v682_v35 = vpop.f32.mrf.mxu1 }
  0xe7   :  { %v1376_v36 = vpack.c.bf16 %v931_v29, %v930_v28  ;;  %v779_v41 = vadd.f32 %v778_v33, %v730_v32  ;;  %v683_v44 = vadd.f32 %v682_v35, %v1797_v20 }
  0xe8   :  { %v829_v37 = vpop.f32.mrf.mxu0 }
  0xe9   :  { %1408 = vst [vmem:[%s1900_s3 + $0x8] sm:$0xff] %v1376_v36   ;;  %v828_v46 = vadd.f32 %v827_v22, %v779_v41 }
  0xeb   :  { %v916_v51 = vadd.f32 %v1843_v56, %v828_v46 }
  0xec   :  { %v731_v45 = vpop.f32.mrf.mxu2 }
  0xed   :  { %v732_v47 = vadd.f32 %v731_v45, %v683_v44  ;;  %v932_v57 = vmax.f32 %v916_v51, 0.0 }
  0xee   :  { %v780_v48 = vpop.f32.mrf.mxu3  ;;  %v685_v14 = vpop.f32.mrf.mxu1 }
  0xef   :  { %v781_v49 = vadd.f32 %v780_v48, %v732_v47  ;;  %v686_v54 = vadd.f32 %v685_v14, %v1827_v34 }
  0xf0   :  { %v832_v50 = vpop.f32.mrf.mxu0 }
  0xf1   :  { %v830_v52 = vadd.f32 %v829_v37, %v781_v49 }
  0xf3   :  { %v917_v53 = vadd.f32 %v1843_v56, %v830_v52 }
  0xf4   :  { %v734_v55 = vpop.f32.mrf.mxu2 }
  0xf5   :  { %v933_v58 = vmax.f32 %v917_v53, 0.0  ;;  %v735_v59 = vadd.f32 %v734_v55, %v686_v54 }
  0xf6   :  { %v783_v60 = vpop.f32.mrf.mxu3  ;;  %v687_v20 = vpop.f32.mrf.mxu1 }
  0xf7   :  { %v1381_v61 = vpack.c.bf16 %v933_v58, %v932_v57  ;;  %v784_v63 = vadd.f32 %v783_v60, %v735_v59  ;;  %v688_v0 = vadd.f32 %v687_v20, %v1834_v40 }
  0xf8   :  { %v834_v62 = vpop.f32.mrf.mxu0 }
  0xf9   :  { %1409 = vst [vmem:[%s1900_s3 + $0x10] sm:$0xff] %v1381_v61   ;;  %v833_v2 = vadd.f32 %v832_v50, %v784_v63 }
  0xfb   :  { %v918_v7 = vadd.f32 %v1843_v56, %v833_v2 }
  0xfc   :  { %v736_v1 = vpop.f32.mrf.mxu2 }
  0xfd   :  { %v737_v3 = vadd.f32 %v736_v1, %v688_v0  ;;  %v934_v12 = vmax.f32 %v918_v7, 0.0 }
  0xfe   :  { %v785_v4 = vpop.f32.mrf.mxu3  ;;  %v690_v34 = vpop.f32.mrf.mxu1 }
  0xff   :  { %v786_v5 = vadd.f32 %v785_v4, %v737_v3  ;;  %v691_v10 = vadd.f32 %v690_v34, %v1793_v18 }
 0x100   :  { %v837_v6 = vpop.f32.mrf.mxu0 }
 0x101   :  { %v835_v8 = vadd.f32 %v834_v62, %v786_v5 }
 0x103   :  { %v919_v9 = vadd.f32 %v1843_v56, %v835_v8 }
 0x104   :  { %v739_v11 = vpop.f32.mrf.mxu2 }
 0x105   :  { %v935_v13 = vmax.f32 %v919_v9, 0.0  ;;  %v740_v15 = vadd.f32 %v739_v11, %v691_v10 }
 0x106   :  { %v788_v16 = vpop.f32.mrf.mxu3  ;;  %v692_v40 = vpop.f32.mrf.mxu1 }
 0x107   :  { %v1386_v17 = vpack.c.bf16 %v935_v13, %v934_v12  ;;  %v789_v22 = vadd.f32 %v788_v16, %v740_v15  ;;  %v693_v23 = vadd.f32 %v692_v40, %v1823_v30 }
 0x108   :  { %v839_v21 = vpop.f32.mrf.mxu0 }
 0x109   :  { %1410 = vst [vmem:[%s1900_s3 + $0x18] sm:$0xff] %v1386_v17   ;;  %v838_v25 = vadd.f32 %v837_v6, %v789_v22 }
 0x10b   :  { %v920_v32 = vadd.f32 %v1843_v56, %v838_v25 }
 0x10c   :  { %v741_v24 = vpop.f32.mrf.mxu2 }
 0x10d   :  { %v742_v26 = vadd.f32 %v741_v24, %v693_v23  ;;  %v936_v41 = vmax.f32 %v920_v32, 0.0 }
 0x10e   :  { %v790_v27 = vpop.f32.mrf.mxu3  ;;  %v695_v18 = vpop.f32.mrf.mxu1 }
 0x10f   :  { %v791_v28 = vadd.f32 %v790_v27, %v742_v26  ;;  %v696_v36 = vadd.f32 %v695_v18, %v1830_v38 }
 0x110   :  { %v842_v29 = vpop.f32.mrf.mxu0 }
 0x111   :  { %v840_v33 = vadd.f32 %v839_v21, %v791_v28 }
 0x113   :  { %v921_v35 = vadd.f32 %v1843_v56, %v840_v33 }
 0x114   :  { %v744_v37 = vpop.f32.mrf.mxu2 }
 0x115   :  { %v937_v44 = vmax.f32 %v921_v35, 0.0  ;;  %v745_v45 = vadd.f32 %v744_v37, %v696_v36 }
 0x116   :  { %v793_v46 = vpop.f32.mrf.mxu3  ;;  %v697_v30 = vpop.f32.mrf.mxu1 }
 0x117   :  { %v1391_v47 = vpack.c.bf16 %v937_v44, %v936_v41  ;;  %v794_v14 = vadd.f32 %v793_v46, %v745_v45  ;;  %v698_v49 = vadd.f32 %v697_v30, %v1836_v42 }
 0x118   :  { %v844_v48 = vpop.f32.mrf.mxu0 }
 0x119   :  { %1411 = vst [vmem:[%s1900_s3 + $0x20] sm:$0xff] %v1391_v47   ;;  %v843_v51 = vadd.f32 %v842_v29, %v794_v14 }
 0x11b   :  { %v922_v55 = vadd.f32 %v1843_v56, %v843_v51 }
 0x11c   :  { %v746_v50 = vpop.f32.mrf.mxu2 }
 0x11d   :  { %v747_v52 = vadd.f32 %v746_v50, %v698_v49  ;;  %v938_v61 = vmax.f32 %v922_v55, 0.0 }
 0x11e   :  { %v795_v53 = vpop.f32.mrf.mxu3  ;;  %v700_v38 = vpop.f32.mrf.mxu1 }
 0x11f   :  { %v796_v54 = vadd.f32 %v795_v53, %v747_v52  ;;  %v701_v60 = vadd.f32 %v700_v38, %v1795_v19 }
 0x120   :  { %v847_v58 = vpop.f32.mrf.mxu0 }
 0x121   :  { %v845_v57 = vadd.f32 %v844_v48, %v796_v54 }
 0x123   :  { %v923_v59 = vadd.f32 %v1843_v56, %v845_v57 }
 0x124   :  { %v749_v20 = vpop.f32.mrf.mxu2 }
 0x125   :  { %v939_v62 = vmax.f32 %v923_v59, 0.0  ;;  %v750_v63 = vadd.f32 %v749_v20, %v701_v60 }
 0x126   :  { %v798_v0 = vpop.f32.mrf.mxu3  ;;  %v702_v42 = vpop.f32.mrf.mxu1 }
 0x127   :  { %v1396_v1 = vpack.c.bf16 %v939_v62, %v938_v61  ;;  %v799_v2 = vadd.f32 %v798_v0, %v750_v63  ;;  %v703_v3 = vadd.f32 %v702_v42, %v1825_v31 }
 0x128   :  { %v849_v4 = vpop.f32.mrf.mxu0 }
 0x129   :  { %1412 = vst [vmem:[%s1900_s3 + $0x28] sm:$0xff] %v1396_v1   ;;  %v848_v5 = vadd.f32 %v847_v58, %v799_v2 }
 0x12b   :  { %v924_v9 = vadd.f32 %v1843_v56, %v848_v5 }
 0x12c   :  { %v751_v34 = vpop.f32.mrf.mxu2 }
 0x12d   :  { %v752_v6 = vadd.f32 %v751_v34, %v703_v3  ;;  %v940_v15 = vmax.f32 %v924_v9, 0.0 }
 0x12e   :  { %v800_v7 = vpop.f32.mrf.mxu3  ;;  %v705_v19 = vpop.f32.mrf.mxu1 }
 0x12f   :  { %v801_v8 = vadd.f32 %v800_v7, %v752_v6  ;;  %v706_v12 = vadd.f32 %v705_v19, %v1832_v39 }
 0x130   :  { %v852_v31 = vpop.f32.mrf.mxu0 }
 0x131   :  { %v850_v10 = vadd.f32 %v849_v4, %v801_v8 }
 0x133   :  { %v925_v11 = vadd.f32 %v1843_v56, %v850_v10 }
 0x134   :  { %v754_v13 = vpop.f32.mrf.mxu2 }
 0x135   :  { %v941_v16 = vmax.f32 %v925_v11, 0.0  ;;  %v755_v40 = vadd.f32 %v754_v13, %v706_v12 }
 0x136   :  { %v803_v17 = vpop.f32.mrf.mxu3  ;;  %v707_v22 = vpop.f32.mrf.mxu1 }
 0x137   :  { %v1401_v21 = vpack.c.bf16 %v941_v16, %v940_v15  ;;  %v804_v23 = vadd.f32 %v803_v17, %v755_v40  ;;  %v708_v24 = vadd.f32 %v707_v22, %v1838_v43 }
 0x138   :  { %v854_v28 = vpop.f32.mrf.mxu0 }
 0x139   :  { %1413 = vst [vmem:[%s1900_s3 + $0x30] sm:$0xff] %v1401_v21   ;;  %v853_v26 = vadd.f32 %v852_v31, %v804_v23 }
 0x13b   :  { %v926_v29 = vadd.f32 %v1843_v56, %v853_v26 }
 0x13c   :  { %v756_v25 = vpop.f32.mrf.mxu2 }
 0x13d   :  { %v757_v27 = vadd.f32 %v756_v25, %v708_v24  ;;  %v942_v35 = vmax.f32 %v926_v29, 0.0 }
 0x13e   :  { %v805_v18 = vpop.f32.mrf.mxu3 }
 0x13f   :  { %v806_v39 = vadd.f32 %v805_v18, %v757_v27 }
 0x141   :  { %v855_v32 = vadd.f32 %v854_v28, %v806_v39 }
 0x143   :  { %v927_v33 = vadd.f32 %v1843_v56, %v855_v32 }
 0x145   :  { %v943_v36 = vmax.f32 %v927_v33, 0.0 }
 0x147   :  { %v1406_v37 = vpack.c.bf16 %v943_v36, %v942_v35 }
 0x149   :  { %1414 = vst [vmem:[%s1900_s3 + $0x38] sm:$0xff] %v1406_v37  }

// kernel: tile.58
= control target key start
LH: loop header
LB: loop body
LE: loop exit
PB: predicated region body
PF: predicated region fallthrough
CT: control target
= control target key end

     0   :  { %s22_s0 = inlined_call_operand.vmem [shape: f32[16], index: 0, kind: input, shape index: {}]   ;;  %s23_s1 = inlined_call_operand.vmem [shape: f32[4,16], index: 1, kind: output, shape index: {}]  }
   0x1   :  { %v4_v0 = vld [vmem:[%s22_s0] ss:$0 sm:$0xff] }
   0x2   :  { %5 = vst [vmem:[%s23_s1] sm:$0xf] %v4_v0 }

// kernel: tile.59
= control target key start
LH: loop header
LB: loop body
LE: loop exit
PB: predicated region body
PF: predicated region fallthrough
CT: control target
= control target key end

     0   :  { %s37_s8 = smov 16   ;;  %s38_s9 = smov 32   ;;  %vm7_vm0 = vcmask 130048   ;;  %vm13_vm1 = vcmask 523648   ;;  %vm19_vm2 = vcmask 392448   ;;  %vm25_vm3 = vcmask 261248   ;;  %s55_s0 = inlined_call_operand.vmem [shape: f32[4,16], index: 0, kind: input, shape index: {}]   ;;  %s56_s1 = inlined_call_operand.vmem [shape: f32[64], index: 1, kind: output, shape index: {}]  }
   0x1   :  { %v4_v0 = vld [vmem:[%s55_s0] sm:$0xf]  ;;  %s36_s0 = smov 48  }
   0x2   :  { %5 = vst [vmem:[#allocation1] sm:$0xf] %v4_v0 }
   0x9   :  { %v10_v1 = vld [vmem:[#allocation1 + $0x3] sm:$0x1]   ;;  %v22_v2 = vld [vmem:[#allocation1 + $0x1] sm:$0x1]   ;;  %v16_v3 = vld [vmem:[#allocation1 + $0x2] sm:$0x1]  }
   0xa   :  { %11 = vrot.lane.b32.xlu0 %v10_v1, %s36_s0  ;;  %23 = vrot.lane.b32.xlu1 %v22_v2, %s37_s8  ;;  %v6_v4 = vld [vmem:[#allocation1] sm:$0x1]  }
   0xb   :  { %8 = vst.msk [vmem:[#allocation0] sm:$0x1] %vm7_vm0, %v6_v4  }
  0x12   :  { %17 = vrot.lane.b32.xlu0 %v16_v3, %s38_s9 }
  0x7c   :  { %v12_v5 = vpop.permute.xlu0 %11   ;;  %v24_v6 = vpop.permute.xlu1 %23  }
  0x7d   :  { %14 = vst.msk [vmem:[#allocation0] sm:$0x1] %vm13_vm1, %v12_v5  }
  0x84   :  { %v18_v7 = vpop.permute.xlu0 %17  }
  0x85   :  { %20 = vst.msk [vmem:[#allocation0] sm:$0x1] %vm19_vm2, %v18_v7  }
  0x86   :  { %26 = vst.msk [vmem:[#allocation0] sm:$0x1] %vm25_vm3, %v24_v6  }
  0x8d   :  { %v29_v8 = vld [vmem:[#allocation0] sm:$0x1] }
  0x8e   :  { %32 = vst [vmem:[%s56_s1] sm:$0x1] %v29_v8 }

// kernel: generator_forward.9
= control target key start
LH: loop header
LB: loop body
LE: loop exit
PB: predicated region body
PF: predicated region fallthrough
CT: control target
= control target key end

     0   :  { %vm899_vm0 = vcmask 261120   ;;  %s3731_s1 = inlined_call_operand.vmem [shape: bf16[288,128], index: 1, kind: input, shape index: {}]   ;;  %s3732_s0 = inlined_call_operand.vmem [shape: bf16[512,288], index: 0, kind: input, shape index: {}]   ;;  %s3733_s2 = inlined_call_operand.vmem [shape: f32[1,128], index: 2, kind: input, shape index: {}]   ;;  %s3734_s3 = inlined_call_operand.vmem [shape: bf16[512,128], index: 3, kind: output, shape index: {}]  }
   0x1   :  { %v2553_v0 = vld [vmem:[%s3731_s1 + $0x38] sm:$0xff]  ;;  %v2804_v2 = vld [vmem:[%s3731_s1 + $0x88] sm:$0xff]  ;;  %v2552_v3 = vld [vmem:[%s3731_s1 + $0x30] sm:$0xff] }
   0x2   :  { %v2561_v1 = vld [vmem:[%s3731_s1 + $0x78] sm:$0xff]  ;;  %996 = vmatpush.bf16.msra.mxu0 %v2553_v0  ;;  %2755 = vmatpush.bf16.msra.mxu3 %v2553_v0  ;;  %v2560_v4 = vld [vmem:[%s3731_s1 + $0x70] sm:$0xff]  ;;  %v2816_v5 = vld [vmem:[%s3731_s1 + $0x80] sm:$0xff] }
   0x3   :  { %1165 = vmatpush.bf16.msra.mxu1 %v2561_v1  ;;  %1340 = vmatpush.bf16.msra.mxu2 %v2804_v2  ;;  %v1972_v6 = vld [vmem:[%s3732_s0 + $0x8] sm:$0xf]  ;;  %v2452_v7 = vld [vmem:[%s3732_s0 + $0x10] sm:$0xf0]  ;;  %v2550_v11 = vld [vmem:[%s3731_s1 + $0x20] sm:$0xff] }
   0x4   :  { %v1973_v8 = vor.u32 %v2452_v7, %v1972_v6  ;;  %v2551_v9 = vld [vmem:[%s3731_s1 + $0x28] sm:$0xff]  ;;  %v2558_v12 = vld [vmem:[%s3731_s1 + $0x60] sm:$0xff]  ;;  %v2549_v13 = vld [vmem:[%s3731_s1 + $0x18] sm:$0xff] }
   0x5   :  { %v2559_v10 = vld [vmem:[%s3731_s1 + $0x68] sm:$0xff]  ;;  %v2557_v14 = vld [vmem:[%s3731_s1 + $0x58] sm:$0xff]  ;;  %v2548_v15 = vld [vmem:[%s3731_s1 + $0x10] sm:$0xff] }
   0x6   :  { %997 = vmatpush.bf16.msra.mxu0 %v2552_v3  ;;  %2756 = vmatpush.bf16.msra.mxu3 %v2552_v3  ;;  %v2556_v16 = vld [vmem:[%s3731_s1 + $0x50] sm:$0xff]  ;;  %v1984_v17 = vld [vmem:[%s3732_s0 + $0x20] sm:$0xf]  ;;  %v2455_v18 = vld [vmem:[%s3732_s0 + $0x28] sm:$0xf0] }
   0x7   :  { %1166 = vmatpush.bf16.msra.mxu1 %v2560_v4  ;;  %1341 = vmatpush.bf16.msra.mxu2 %v2816_v5  ;;  %v1985_v19 = vor.u32 %v2455_v18, %v1984_v17  ;;  %v2547_v20 = vld [vmem:[%s3731_s1 + $0x8] sm:$0xff]  ;;  %v2546_v22 = vld [vmem:[%s3731_s1] sm:$0xff]  ;;  %v1966_v29 = vld [vmem:[%s3732_s0 + $0xc] sm:$0xf0] }
   0x8   :  { %v2555_v21 = vld [vmem:[%s3731_s1 + $0x48] sm:$0xff]  ;;  %v2554_v23 = vld [vmem:[%s3731_s1 + $0x40] sm:$0xff]  ;;  %v1996_v33 = vld [vmem:[%s3732_s0 + $0x38] sm:$0xf] }
   0x9   :  { %v1964_v24 = vld [vmem:[%s3732_s0] sm:$0xf]  ;;  %v2451_v25 = vld [vmem:[%s3732_s0 + $0x8] sm:$0xf0]  ;;  %v2450_v28 = vld [vmem:[%s3732_s0 + $0x4] sm:$0xf] }
   0xa   :  { %2418 = vmatmul.msk.bf16.vlgmr.msra.gmra.mxu2 %vm899_vm0, %v1973_v8  ;;  %998 = vmatpush.bf16.msra.mxu0 %v2551_v9  ;;  %v2252_v26 = vld [vmem:[%s3732_s0 + $0x240] sm:$0xf]  ;;  %v2523_v27 = vld [vmem:[%s3732_s0 + $0x248] sm:$0xf0]  ;;  %v1965_v30 = vor.u32 %v2451_v25, %v1964_v24  ;;  %v1969_v32 = vor.u32 %v2450_v28, %v1966_v29  ;;  %v2458_v34 = vld [vmem:[%s3732_s0 + $0x40] sm:$0xf0] }
   0xb   :  { %2757 = vmatpush.bf16.msra.mxu3 %v2551_v9  ;;  %1167 = vmatpush.bf16.msra.mxu1 %v2559_v10  ;;  %v2253_v31 = vor.u32 %v2523_v27, %v2252_v26  ;;  %v1997_v35 = vor.u32 %v2458_v34, %v1996_v33  ;;  %v1976_v36 = vld [vmem:[%s3732_s0 + $0x18] sm:$0xf]  ;;  %v2454_v37 = vld [vmem:[%s3732_s0 + $0x20] sm:$0xf0]  ;;  %v2453_v40 = vld [vmem:[%s3732_s0 + $0x1c] sm:$0xf] }
   0xc   :  { %v2264_v38 = vld [vmem:[%s3732_s0 + $0x258] sm:$0xf]  ;;  %v2526_v39 = vld [vmem:[%s3732_s0 + $0x260] sm:$0xf0]  ;;  %v1978_v41 = vld [vmem:[%s3732_s0 + $0x24] sm:$0xf0]  ;;  %v1977_v42 = vor.u32 %v2454_v37, %v1976_v36 }
   0xd   :  { %v2265_v43 = vor.u32 %v2526_v39, %v2264_v38  ;;  %v1981_v44 = vor.u32 %v2453_v40, %v1978_v41  ;;  %v2008_v45 = vld [vmem:[%s3732_s0 + $0x50] sm:$0xf]  ;;  %v2461_v46 = vld [vmem:[%s3732_s0 + $0x58] sm:$0xf0]  ;;  %v2456_v52 = vld [vmem:[%s3732_s0 + $0x34] sm:$0xf] }
   0xe   :  { %999 = vmatpush.bf16.msra.mxu0 %v2550_v11  ;;  %v2009_v47 = vor.u32 %v2461_v46, %v2008_v45  ;;  %v1988_v48 = vld [vmem:[%s3732_s0 + $0x30] sm:$0xf]  ;;  %v2457_v49 = vld [vmem:[%s3732_s0 + $0x38] sm:$0xf0]  ;;  %v1990_v53 = vld [vmem:[%s3732_s0 + $0x3c] sm:$0xf0] }
   0xf   :  { %2758 = vmatpush.bf16.msra.mxu3 %v2550_v11  ;;  %1168 = vmatpush.bf16.msra.mxu1 %v2558_v12  ;;  %v2276_v50 = vld [vmem:[%s3732_s0 + $0x270] sm:$0xf]  ;;  %v2529_v51 = vld [vmem:[%s3732_s0 + $0x278] sm:$0xf0]  ;;  %v1989_v54 = vor.u32 %v2457_v49, %v1988_v48  ;;  %v1993_v56 = vor.u32 %v2456_v52, %v1990_v53  ;;  %v2020_v57 = vld [vmem:[%s3732_s0 + $0x68] sm:$0xf] }
  0x10   :  { %v2277_v55 = vor.u32 %v2529_v51, %v2276_v50  ;;  %v2464_v58 = vld [vmem:[%s3732_s0 + $0x70] sm:$0xf0]  ;;  %v2000_v60 = vld [vmem:[%s3732_s0 + $0x48] sm:$0xf]  ;;  %v2459_v0 = vld [vmem:[%s3732_s0 + $0x4c] sm:$0xf] }
  0x11   :  { %v2021_v59 = vor.u32 %v2464_v58, %v2020_v57  ;;  %v2460_v61 = vld [vmem:[%s3732_s0 + $0x50] sm:$0xf0]  ;;  %v2288_v62 = vld [vmem:[%s3732_s0 + $0x288] sm:$0xf]  ;;  %v2467_v6 = vld [vmem:[%s3732_s0 + $0x88] sm:$0xf0] }
  0x12   :  { %1000 = vmatpush.bf16.msra.mxu0 %v2549_v13  ;;  %v2532_v63 = vld [vmem:[%s3732_s0 + $0x290] sm:$0xf0]  ;;  %v2012_v8 = vld [vmem:[%s3732_s0 + $0x60] sm:$0xf]  ;;  %v2463_v9 = vld [vmem:[%s3732_s0 + $0x68] sm:$0xf0] }
  0x13   :  { %2759 = vmatpush.bf16.msra.mxu3 %v2549_v13  ;;  %1169 = vmatpush.bf16.msra.mxu1 %v2557_v14  ;;  %v2289_v3 = vor.u32 %v2532_v63, %v2288_v62  ;;  %v2535_v11 = vld [vmem:[%s3732_s0 + $0x2a8] sm:$0xf0]  ;;  %v2014_v13 = vld [vmem:[%s3732_s0 + $0x6c] sm:$0xf0]  ;;  %v2044_v17 = vld [vmem:[%s3732_s0 + $0x98] sm:$0xf] }
  0x14   :  { %v2470_v18 = vld [vmem:[%s3732_s0 + $0xa0] sm:$0xf0]  ;;  %v2465_v24 = vld [vmem:[%s3732_s0 + $0x7c] sm:$0xf]  ;;  %v2026_v25 = vld [vmem:[%s3732_s0 + $0x84] sm:$0xf0] }
  0x15   :  { %v2029_v28 = vor.u32 %v2465_v24, %v2026_v25  ;;  %v2056_v29 = vld [vmem:[%s3732_s0 + $0xb0] sm:$0xf]  ;;  %v2469_v33 = vld [vmem:[%s3732_s0 + $0x98] sm:$0xf0]  ;;  %v2468_v36 = vld [vmem:[%s3732_s0 + $0x94] sm:$0xf] }
  0x16   :  { %1001 = vmatpush.bf16.msra.mxu0 %v2548_v15  ;;  %v2324_v34 = vld [vmem:[%s3732_s0 + $0x2d0] sm:$0xf]  ;;  %v2038_v37 = vld [vmem:[%s3732_s0 + $0x9c] sm:$0xf0]  ;;  %v2068_v41 = vld [vmem:[%s3732_s0 + $0xc8] sm:$0xf] }
  0x17   :  { %2760 = vmatpush.bf16.msra.mxu3 %v2548_v15  ;;  %1170 = vmatpush.bf16.msra.mxu1 %v2556_v16  ;;  %v2041_v40 = vor.u32 %v2468_v36, %v2038_v37  ;;  %v2472_v45 = vld [vmem:[%s3732_s0 + $0xb0] sm:$0xf0]  ;;  %v2336_v46 = vld [vmem:[%s3732_s0 + $0x2e8] sm:$0xf]  ;;  %v2471_v48 = vld [vmem:[%s3732_s0 + $0xac] sm:$0xf] }
  0x18   :  { %v2050_v49 = vld [vmem:[%s3732_s0 + $0xb4] sm:$0xf0]  ;;  %v2060_v58 = vld [vmem:[%s3732_s0 + $0xc0] sm:$0xf]  ;;  %v2522_v62 = vld [vmem:[%s3732_s0 + $0x244] sm:$0xf] }
  0x19   :  { %v2053_v53 = vor.u32 %v2471_v48, %v2050_v49  ;;  %v2254_v63 = vld [vmem:[%s3732_s0 + $0x24c] sm:$0xf0]  ;;  %v2266_v24 = vld [vmem:[%s3732_s0 + $0x264] sm:$0xf0]  ;;  %v2481_v49 = vld [vmem:[%s3732_s0 + $0xf8] sm:$0xf0] }
  0x1a   :  { %2419 = vmatmul.msk.bf16.gmra.mxu2 %vm899_vm0, %v1985_v19  ;;  %1002 = vmatpush.bf16.msra.mxu0 %v2547_v20  ;;  %v2045_v19 = vor.u32 %v2470_v18, %v2044_v17  ;;  %v2104_v37 = vld [vmem:[%s3732_s0 + $0x110] sm:$0xf] }
  0x1b   :  { %2761 = vmatpush.bf16.msra.mxu3 %v2547_v20  ;;  %1171 = vmatpush.bf16.msra.mxu1 %v2555_v21  ;;  %v2024_v20 = vld [vmem:[%s3732_s0 + $0x78] sm:$0xf]  ;;  %v2084_v48 = vld [vmem:[%s3732_s0 + $0xf0] sm:$0xf] }
  0x1e   :  { %1003 = vmatpush.bf16.msra.mxu0 %v2546_v22 }
  0x1f   :  { %2762 = vmatpush.bf16.msra.mxu3 %v2546_v22  ;;  %1172 = vmatpush.bf16.msra.mxu1 %v2554_v23  ;;  %v2312_v22 = vld [vmem:[%s3732_s0 + $0x2b8] sm:$0xf] }
  0x21   :  { %1004 = vmatmul.bf16.vlgmr.msra.gmra.mxu0 %v1965_v30  ;;  %v2473_v30 = vld [vmem:[%s3732_s0 + $0xb8] sm:$0xf0] }
  0x22   :  { %1124 = vmatmul.bf16.vlgmr.msra.gmra.mxu3 %v2253_v31  ;;  %1173 = vmatmul.bf16.vlgmr.msra.gmra.mxu1 %v1969_v32  ;;  %v2057_v31 = vor.u32 %v2473_v30, %v2056_v29  ;;  %v2036_v32 = vld [vmem:[%s3732_s0 + $0x90] sm:$0xf] }
  0x23   :  { %2763 = vmatpush.bf16.msrb.mxu3 %v2561_v1  ;;  %v2002_v1 = vld [vmem:[%s3732_s0 + $0x54] sm:$0xf0]  ;;  %v2037_v38 = vor.u32 %v2469_v33, %v2036_v32 }
  0x27   :  { %2764 = vmatpush.bf16.msrb.mxu3 %v2560_v4  ;;  %v2005_v4 = vor.u32 %v2459_v0, %v2002_v1 }
  0x2a   :  { %2420 = vmatmul.msk.bf16.gmra.mxu2 %vm899_vm0, %v1997_v35  ;;  %v2541_v35 = vld [vmem:[%s3732_s0 + $0x2d8] sm:$0xf0] }
  0x2b   :  { %2765 = vmatpush.bf16.msrb.mxu3 %v2559_v10  ;;  %v2300_v10 = vld [vmem:[%s3732_s0 + $0x2a0] sm:$0xf]  ;;  %v2325_v39 = vor.u32 %v2541_v35, %v2324_v34 }
  0x2c   :  { %v2301_v15 = vor.u32 %v2535_v11, %v2300_v10 }
  0x2f   :  { %2766 = vmatpush.bf16.msrb.mxu3 %v2558_v12  ;;  %v2462_v12 = vld [vmem:[%s3732_s0 + $0x64] sm:$0xf] }
  0x31   :  { %1009 = vmatmul.bf16.gmra.mxu0 %v1977_v42  ;;  %v2476_v42 = vld [vmem:[%s3732_s0 + $0xd0] sm:$0xf0] }
  0x32   :  { %1129 = vmatmul.bf16.gmra.mxu3 %v2265_v43  ;;  %1178 = vmatmul.bf16.gmra.mxu1 %v1981_v44  ;;  %v2069_v43 = vor.u32 %v2476_v42, %v2068_v41  ;;  %v2048_v44 = vld [vmem:[%s3732_s0 + $0xa8] sm:$0xf] }
  0x33   :  { %2767 = vmatpush.bf16.msrb.mxu3 %v2557_v14  ;;  %v2013_v14 = vor.u32 %v2463_v9, %v2012_v8  ;;  %v2049_v51 = vor.u32 %v2472_v45, %v2048_v44  ;;  %v2482_v8 = vld [vmem:[%s3732_s0 + $0x100] sm:$0xf0] }
  0x37   :  { %2768 = vmatpush.bf16.msrb.mxu3 %v2556_v16  ;;  %v2017_v16 = vor.u32 %v2462_v12, %v2014_v13  ;;  %v3100_v12 = vld [vmem:[%s3733_s2] ss:$0 sm:$0xff] }
  0x3a   :  { %2421 = vmatmul.msk.bf16.gmra.mxu2 %vm899_vm0, %v2009_v47  ;;  %v2544_v47 = vld [vmem:[%s3732_s0 + $0x2f0] sm:$0xf0] }
  0x3b   :  { %2769 = vmatpush.bf16.msrb.mxu3 %v2555_v21  ;;  %v2466_v21 = vld [vmem:[%s3732_s0 + $0x80] sm:$0xf0]  ;;  %v2337_v52 = vor.u32 %v2544_v47, %v2336_v46 }
  0x3c   :  { %v2025_v26 = vor.u32 %v2466_v21, %v2024_v20  ;;  %v2478_v20 = vld [vmem:[%s3732_s0 + $0xe0] sm:$0xf0]  ;;  %v2477_v21 = vld [vmem:[%s3732_s0 + $0xdc] sm:$0xf] }
  0x3f   :  { %2770 = vmatpush.bf16.msrb.mxu3 %v2554_v23  ;;  %v2538_v23 = vld [vmem:[%s3732_s0 + $0x2c0] sm:$0xf0] }
  0x40   :  { %v2313_v27 = vor.u32 %v2538_v23, %v2312_v22  ;;  %v2074_v22 = vld [vmem:[%s3732_s0 + $0xe4] sm:$0xf0]  ;;  %v2525_v23 = vld [vmem:[%s3732_s0 + $0x25c] sm:$0xf] }
  0x41   :  { %1014 = vmatmul.bf16.gmra.mxu0 %v1989_v54  ;;  %v2080_v54 = vld [vmem:[%s3732_s0 + $0xe0] sm:$0xf]  ;;  %v2077_v32 = vor.u32 %v2477_v21, %v2074_v22  ;;  %v2269_v33 = vor.u32 %v2525_v23, %v2266_v24 }
  0x42   :  { %1134 = vmatmul.bf16.gmra.mxu3 %v2277_v55  ;;  %1183 = vmatmul.bf16.gmra.mxu1 %v1993_v56  ;;  %v2479_v55 = vld [vmem:[%s3732_s0 + $0xe8] sm:$0xf0] }
  0x43   :  { %2771 = vmatpush.bf16.msra.mxu3 %v2804_v2  ;;  %v2001_v2 = vor.u32 %v2460_v61, %v2000_v60  ;;  %v2081_v57 = vor.u32 %v2479_v55, %v2080_v54  ;;  %v2474_v60 = vld [vmem:[%s3732_s0 + $0xc4] sm:$0xf]  ;;  %v2062_v61 = vld [vmem:[%s3732_s0 + $0xcc] sm:$0xf0] }
  0x47   :  { %2772 = vmatpush.bf16.msra.mxu3 %v2816_v5  ;;  %v2032_v5 = vld [vmem:[%s3732_s0 + $0x80] sm:$0xf] }
  0x48   :  { %v2033_v7 = vor.u32 %v2467_v6, %v2032_v5 }
  0x4a   :  { %2422 = vmatmul.msk.bf16.gmra.mxu2 %vm899_vm0, %v2021_v59  ;;  %v2475_v59 = vld [vmem:[%s3732_s0 + $0xc8] sm:$0xf0] }
  0x4b   :  { %v2061_v1 = vor.u32 %v2475_v59, %v2060_v58 }
  0x51   :  { %1019 = vmatmul.bf16.gmra.mxu0 %v2001_v2 }
  0x52   :  { %1139 = vmatmul.bf16.gmra.mxu3 %v2289_v3  ;;  %1188 = vmatmul.bf16.gmra.mxu1 %v2005_v4  ;;  %v2065_v3 = vor.u32 %v2474_v60, %v2062_v61  ;;  %v2257_v4 = vor.u32 %v2522_v62, %v2254_v63 }
  0x5a   :  { %2423 = vmatmul.msk.bf16.gmra.mxu2 %vm899_vm0, %v2033_v7  ;;  %v2092_v7 = vld [vmem:[%s3732_s0 + $0xf8] sm:$0xf] }
  0x61   :  { %1024 = vmatmul.bf16.gmra.mxu0 %v2013_v14  ;;  %v2093_v14 = vor.u32 %v2482_v8, %v2092_v7 }
  0x62   :  { %1144 = vmatmul.bf16.gmra.mxu3 %v2301_v15  ;;  %1193 = vmatmul.bf16.gmra.mxu1 %v2017_v16 }
  0x6a   :  { %2424 = vmatmul.msk.bf16.gmra.mxu2 %vm899_vm0, %v2045_v19  ;;  %v2072_v19 = vld [vmem:[%s3732_s0 + $0xd8] sm:$0xf] }
  0x71   :  { %1029 = vmatmul.bf16.gmra.mxu0 %v2025_v26 }
  0x72   :  { %1149 = vmatmul.bf16.gmra.mxu3 %v2313_v27  ;;  %1198 = vmatmul.bf16.gmra.mxu1 %v2029_v28  ;;  %v2073_v28 = vor.u32 %v2478_v20, %v2072_v19  ;;  %v2531_v19 = vld [vmem:[%s3732_s0 + $0x28c] sm:$0xf]  ;;  %v2290_v20 = vld [vmem:[%s3732_s0 + $0x294] sm:$0xf0] }
  0x7a   :  { %2425 = vmatmul.msk.bf16.gmra.mxu2 %vm899_vm0, %v2057_v31 }
  0x81   :  { %1034 = vmatmul.bf16.gmra.mxu0 %v2037_v38  ;;  %v2485_v38 = vld [vmem:[%s3732_s0 + $0x118] sm:$0xf0] }
  0x82   :  { %1154 = vmatmul.bf16.gmra.mxu3 %v2325_v39  ;;  %1203 = vmatmul.bf16.gmra.mxu1 %v2041_v40 }
  0x8a   :  { %2426 = vmatmul.msk.bf16.gmra.mxu2 %vm899_vm0, %v2069_v43  ;;  %v2105_v43 = vor.u32 %v2485_v38, %v2104_v37 }
  0x8d   :  { %v1343_v50 = vpop.f32.mrf.mxu2 }
  0x91   :  { %1039 = vmatmul.bf16.gmra.mxu0 %v2049_v51  ;;  %v2086_v51 = vld [vmem:[%s3732_s0 + $0xfc] sm:$0xf0] }
  0x92   :  { %1159 = vmatmul.bf16.gmra.mxu3 %v2337_v52  ;;  %1208 = vmatmul.bf16.gmra.mxu1 %v2053_v53  ;;  %v2528_v52 = vld [vmem:[%s3732_s0 + $0x274] sm:$0xf]  ;;  %v2278_v53 = vld [vmem:[%s3732_s0 + $0x27c] sm:$0xf0] }
  0x93   :  { %v2281_v62 = vor.u32 %v2528_v52, %v2278_v53 }
  0x95   :  { %v1345_v56 = vpop.f32.mrf.mxu2 }
  0x9a   :  { %2427 = vmatmul.msk.bf16.gmra.mxu2 %vm899_vm0, %v2081_v57  ;;  %v2085_v57 = vor.u32 %v2481_v49, %v2084_v48  ;;  %v2486_v48 = vld [vmem:[%s3732_s0 + $0x124] sm:$0xf]  ;;  %v2110_v49 = vld [vmem:[%s3732_s0 + $0x12c] sm:$0xf0] }
  0x9d   :  { %v1348_v0 = vpop.f32.mrf.mxu2 }
  0x9e   :  { %v1005_v2 = vpop.f32.mrf.mxu0 }
  0x9f   :  { %v1174_v5 = vpop.f32.mrf.mxu1 }
  0xa0   :  { %v1175_v6 = vadd.f32 %v1174_v5, %v1005_v2  ;;  %v2116_v2 = vld [vmem:[%s3732_s0 + $0x128] sm:$0xf] }
  0xa1   :  { %1044 = vmatmul.bf16.gmra.mxu0 %v2061_v1 }
  0xa2   :  { %1213 = vmatmul.bf16.gmra.mxu1 %v2065_v3  ;;  %1293 = vmatmul.bf16.vlgmr.msrb.gmra.mxu3 %v2257_v4  ;;  %v1344_v11 = vadd.f32 %v1343_v50, %v1175_v6  ;;  %v2480_v50 = vld [vmem:[%s3732_s0 + $0xf4] sm:$0xf] }
  0xa3   :  { %v2089_v61 = vor.u32 %v2480_v50, %v2086_v51  ;;  %v2488_v3 = vld [vmem:[%s3732_s0 + $0x130] sm:$0xf0]  ;;  %v2534_v50 = vld [vmem:[%s3732_s0 + $0x2a4] sm:$0xf]  ;;  %v2302_v51 = vld [vmem:[%s3732_s0 + $0x2ac] sm:$0xf0] }
  0xa4   :  { %v1702_v17 = vadd.f32 %v3100_v12, %v1344_v11  ;;  %v2117_v8 = vor.u32 %v2488_v3, %v2116_v2  ;;  %v2494_v2 = vld [vmem:[%s3732_s0 + $0x160] sm:$0xf0] }
  0xa5   :  { %v3095_v9 = vpop.f32.mrf.mxu3  ;;  %v1350_v10 = vpop.f32.mrf.mxu2 }
  0xa6   :  { %v1007_v13 = vpop.f32.mrf.mxu0  ;;  %v1766_v29 = vmax.f32 %v1702_v17, 0.0  ;;  %v2483_v17 = vld [vmem:[%s3732_s0 + $0x10c] sm:$0xf] }
  0xa7   :  { %v1176_v15 = vpop.f32.mrf.mxu1 }
  0xa8   :  { %v1177_v16 = vadd.f32 %v1176_v15, %v1007_v13  ;;  %v2096_v15 = vld [vmem:[%s3732_s0 + $0x108] sm:$0xf] }
  0xaa   :  { %v1346_v18 = vadd.f32 %v1345_v56, %v1177_v16  ;;  %2428 = vmatmul.msk.bf16.gmra.mxu2 %vm899_vm0, %v2093_v14  ;;  %v2484_v16 = vld [vmem:[%s3732_s0 + $0x110] sm:$0xf0] }
  0xab   :  { %v2097_v24 = vor.u32 %v2484_v16, %v2096_v15  ;;  %v2120_v15 = vld [vmem:[%s3732_s0 + $0x138] sm:$0xf]  ;;  %v2490_v16 = vld [vmem:[%s3732_s0 + $0x140] sm:$0xf0] }
  0xac   :  { %v1703_v25 = vadd.f32 %v3100_v12, %v1346_v18  ;;  %v2098_v18 = vld [vmem:[%s3732_s0 + $0x114] sm:$0xf0] }
  0xad   :  { %v3123_v26 = vpop.f32.mrf.mxu3  ;;  %v1353_v27 = vpop.f32.mrf.mxu2 }
  0xae   :  { %v1767_v30 = vmax.f32 %v1703_v25, 0.0  ;;  %v1010_v31 = vpop.f32.mrf.mxu0 }
  0xaf   :  { %v1179_v34 = vpop.f32.mrf.mxu1 }
  0xb0   :  { %v2567_v35 = vpack.c.bf16 %v1767_v30, %v1766_v29  ;;  %v1180_v36 = vadd.f32 %v1179_v34, %v1010_v31  ;;  %v2101_v29 = vor.u32 %v2483_v17, %v2098_v18  ;;  %v2293_v30 = vor.u32 %v2531_v19, %v2290_v20  ;;  %v2128_v34 = vld [vmem:[%s3732_s0 + $0x140] sm:$0xf]  ;;  %v2489_v17 = vld [vmem:[%s3732_s0 + $0x13c] sm:$0xf]  ;;  %v2122_v18 = vld [vmem:[%s3732_s0 + $0x144] sm:$0xf0] }
  0xb1   :  { %1049 = vmatmul.bf16.gmra.mxu0 %v2073_v28  ;;  %v2537_v19 = vld [vmem:[%s3732_s0 + $0x2bc] sm:$0xf]  ;;  %v2314_v20 = vld [vmem:[%s3732_s0 + $0x2c4] sm:$0xf0] }
  0xb2   :  { %2568 = vst [vmem:[%s3734_s3] sm:$0xff] %v2567_v35   ;;  %1218 = vmatmul.bf16.gmra.mxu1 %v2077_v32  ;;  %1298 = vmatmul.bf16.gmra.mxu3 %v2269_v33  ;;  %v1349_v41 = vadd.f32 %v1348_v0, %v1180_v36  ;;  %v2491_v35 = vld [vmem:[%s3732_s0 + $0x148] sm:$0xf0] }
  0xb4   :  { %v1704_v46 = vadd.f32 %v3100_v12, %v1349_v41  ;;  %v2129_v41 = vor.u32 %v2491_v35, %v2128_v34  ;;  %v2152_v35 = vld [vmem:[%s3732_s0 + $0x170] sm:$0xf] }
  0xb5   :  { %v3134_v39 = vpop.f32.mrf.mxu3  ;;  %v1355_v40 = vpop.f32.mrf.mxu2 }
  0xb6   :  { %v1012_v42 = vpop.f32.mrf.mxu0  ;;  %v1768_v58 = vmax.f32 %v1704_v46, 0.0  ;;  %v2108_v46 = vld [vmem:[%s3732_s0 + $0x120] sm:$0xf] }
  0xb7   :  { %v1181_v44 = vpop.f32.mrf.mxu1 }
  0xb8   :  { %v1182_v45 = vadd.f32 %v1181_v44, %v1012_v42 }
  0xba   :  { %v1351_v47 = vadd.f32 %v1350_v10, %v1182_v45  ;;  %2429 = vmatmul.msk.bf16.gmra.mxu2 %vm899_vm0, %v2105_v43 }
  0xbc   :  { %v1705_v54 = vadd.f32 %v3100_v12, %v1351_v47  ;;  %v2487_v47 = vld [vmem:[%s3732_s0 + $0x128] sm:$0xf0] }
  0xbd   :  { %v3157_v55 = vpop.f32.mrf.mxu3  ;;  %v1358_v56 = vpop.f32.mrf.mxu2 }
  0xbe   :  { %v1769_v59 = vmax.f32 %v1705_v54, 0.0  ;;  %v1015_v60 = vpop.f32.mrf.mxu0 }
  0xbf   :  { %v1184_v63 = vpop.f32.mrf.mxu1 }
  0xc0   :  { %v2572_v0 = vpack.c.bf16 %v1769_v59, %v1768_v58  ;;  %v1185_v1 = vadd.f32 %v1184_v63, %v1015_v60  ;;  %v2113_v60 = vor.u32 %v2486_v48, %v2110_v49  ;;  %v2132_v48 = vld [vmem:[%s3732_s0 + $0x150] sm:$0xf]  ;;  %v2493_v49 = vld [vmem:[%s3732_s0 + $0x158] sm:$0xf0] }
  0xc1   :  { %1054 = vmatmul.bf16.gmra.mxu0 %v2085_v57 }
  0xc2   :  { %2724 = vst [vmem:[%s3734_s3 + $0x8] sm:$0xff] %v2572_v0   ;;  %1223 = vmatmul.bf16.gmra.mxu1 %v2089_v61  ;;  %1303 = vmatmul.bf16.gmra.mxu3 %v2281_v62  ;;  %v1354_v6 = vadd.f32 %v1353_v27, %v1185_v1  ;;  %v2305_v61 = vor.u32 %v2534_v50, %v2302_v51  ;;  %v2140_v1 = vld [vmem:[%s3732_s0 + $0x158] sm:$0xf]  ;;  %v2492_v50 = vld [vmem:[%s3732_s0 + $0x154] sm:$0xf] }
  0xc3   :  { %v2134_v51 = vld [vmem:[%s3732_s0 + $0x15c] sm:$0xf0] }
  0xc4   :  { %v1706_v13 = vadd.f32 %v3100_v12, %v1354_v6 }
  0xc5   :  { %v3168_v4 = vpop.f32.mrf.mxu3  ;;  %v1360_v5 = vpop.f32.mrf.mxu2 }
  0xc6   :  { %v1017_v7 = vpop.f32.mrf.mxu0  ;;  %v1770_v25 = vmax.f32 %v1706_v13, 0.0 }
  0xc7   :  { %v1186_v10 = vpop.f32.mrf.mxu1 }
  0xc8   :  { %v1187_v11 = vadd.f32 %v1186_v10, %v1017_v7 }
  0xca   :  { %v1356_v14 = vadd.f32 %v1355_v40, %v1187_v11  ;;  %2430 = vmatmul.msk.bf16.gmra.mxu2 %vm899_vm0, %v2117_v8  ;;  %v2141_v8 = vor.u32 %v2494_v2, %v2140_v1 }
  0xcc   :  { %v1707_v21 = vadd.f32 %v3100_v12, %v1356_v14 }
  0xcd   :  { %v3191_v22 = vpop.f32.mrf.mxu3  ;;  %v1363_v23 = vpop.f32.mrf.mxu2 }
  0xce   :  { %v1771_v27 = vmax.f32 %v1707_v21, 0.0  ;;  %v1020_v28 = vpop.f32.mrf.mxu0 }
  0xcf   :  { %v1189_v31 = vpop.f32.mrf.mxu1 }
  0xd0   :  { %v2577_v32 = vpack.c.bf16 %v1771_v27, %v1770_v25  ;;  %v1190_v33 = vadd.f32 %v1189_v31, %v1020_v28  ;;  %v2121_v25 = vor.u32 %v2490_v16, %v2120_v15  ;;  %v2317_v31 = vor.u32 %v2537_v19, %v2314_v20  ;;  %v2144_v19 = vld [vmem:[%s3732_s0 + $0x168] sm:$0xf]  ;;  %v2496_v20 = vld [vmem:[%s3732_s0 + $0x170] sm:$0xf0] }
  0xd1   :  { %1059 = vmatmul.bf16.gmra.mxu0 %v2097_v24 }
  0xd2   :  { %2725 = vst [vmem:[%s3734_s3 + $0x10] sm:$0xff] %v2577_v32   ;;  %1228 = vmatmul.bf16.gmra.mxu1 %v2101_v29  ;;  %1308 = vmatmul.bf16.gmra.mxu3 %v2293_v30  ;;  %v1359_v38 = vadd.f32 %v1358_v56, %v1190_v33  ;;  %v2109_v56 = vor.u32 %v2487_v47, %v2108_v46 }
  0xd3   :  { %v2125_v30 = vor.u32 %v2489_v17, %v2122_v18 }
  0xd4   :  { %v1708_v44 = vadd.f32 %v3100_v12, %v1359_v38 }
  0xd5   :  { %v3202_v36 = vpop.f32.mrf.mxu3  ;;  %v1365_v37 = vpop.f32.mrf.mxu2 }
  0xd6   :  { %v1022_v40 = vpop.f32.mrf.mxu0  ;;  %v1772_v57 = vmax.f32 %v1708_v44, 0.0 }
  0xd7   :  { %v1191_v42 = vpop.f32.mrf.mxu1 }
  0xd8   :  { %v1192_v43 = vadd.f32 %v1191_v42, %v1022_v40 }
  0xda   :  { %v1361_v45 = vadd.f32 %v1360_v5, %v1192_v43  ;;  %2431 = vmatmul.msk.bf16.gmra.mxu2 %vm899_vm0, %v2129_v41 }
  0xdc   :  { %v1709_v52 = vadd.f32 %v3100_v12, %v1361_v45 }
  0xdd   :  { %v3225_v53 = vpop.f32.mrf.mxu3  ;;  %v1368_v54 = vpop.f32.mrf.mxu2 }
  0xde   :  { %v1773_v58 = vmax.f32 %v1709_v52, 0.0  ;;  %v1025_v59 = vpop.f32.mrf.mxu0  ;;  %v2540_v52 = vld [vmem:[%s3732_s0 + $0x2d4] sm:$0xf] }
  0xdf   :  { %v1194_v62 = vpop.f32.mrf.mxu1 }
  0xe0   :  { %v2582_v63 = vpack.c.bf16 %v1773_v58, %v1772_v57  ;;  %v1195_v0 = vadd.f32 %v1194_v62, %v1025_v59  ;;  %v2133_v59 = vor.u32 %v2493_v49, %v2132_v48 }
  0xe1   :  { %1064 = vmatmul.bf16.gmra.mxu0 %v2109_v56 }
  0xe2   :  { %2726 = vst [vmem:[%s3734_s3 + $0x18] sm:$0xff] %v2582_v63   ;;  %1233 = vmatmul.bf16.gmra.mxu1 %v2113_v60  ;;  %1313 = vmatmul.bf16.gmra.mxu3 %v2305_v61  ;;  %v1364_v6 = vadd.f32 %v1363_v23, %v1195_v0  ;;  %v2137_v63 = vor.u32 %v2492_v50, %v2134_v51 }
  0xe4   :  { %v1710_v13 = vadd.f32 %v3100_v12, %v1364_v6  ;;  %v2164_v6 = vld [vmem:[%s3732_s0 + $0x188] sm:$0xf] }
  0xe5   :  { %v3236_v3 = vpop.f32.mrf.mxu3  ;;  %v1370_v5 = vpop.f32.mrf.mxu2 }
  0xe6   :  { %v1027_v7 = vpop.f32.mrf.mxu0  ;;  %v1774_v27 = vmax.f32 %v1710_v13, 0.0 }
  0xe7   :  { %v1196_v10 = vpop.f32.mrf.mxu1 }
  0xe8   :  { %v1197_v11 = vadd.f32 %v1196_v10, %v1027_v7  ;;  %v2500_v7 = vld [vmem:[%s3732_s0 + $0x190] sm:$0xf0] }
  0xea   :  { %v1366_v14 = vadd.f32 %v1365_v37, %v1197_v11  ;;  %2432 = vmatmul.msk.bf16.gmra.mxu2 %vm899_vm0, %v2141_v8  ;;  %v2497_v37 = vld [vmem:[%s3732_s0 + $0x178] sm:$0xf0] }
  0xeb   :  { %v2153_v43 = vor.u32 %v2497_v37, %v2152_v35 }
  0xec   :  { %v1711_v21 = vadd.f32 %v3100_v12, %v1366_v14  ;;  %v2165_v14 = vor.u32 %v2500_v7, %v2164_v6 }
  0xed   :  { %v3259_v23 = vpop.f32.mrf.mxu3  ;;  %v1373_v24 = vpop.f32.mrf.mxu2 }
  0xee   :  { %v1775_v28 = vmax.f32 %v1711_v21, 0.0  ;;  %v1030_v29 = vpop.f32.mrf.mxu0  ;;  %v2495_v21 = vld [vmem:[%s3732_s0 + $0x16c] sm:$0xf] }
  0xef   :  { %v1199_v32 = vpop.f32.mrf.mxu1 }
  0xf0   :  { %v2587_v33 = vpack.c.bf16 %v1775_v28, %v1774_v27  ;;  %v1200_v34 = vadd.f32 %v1199_v32, %v1030_v29  ;;  %v2338_v27 = vld [vmem:[%s3732_s0 + $0x2f4] sm:$0xf0] }
  0xf1   :  { %1069 = vmatmul.bf16.gmra.mxu0 %v2121_v25  ;;  %v2543_v25 = vld [vmem:[%s3732_s0 + $0x2ec] sm:$0xf] }
  0xf2   :  { %2727 = vst [vmem:[%s3734_s3 + $0x20] sm:$0xff] %v2587_v33   ;;  %1238 = vmatmul.bf16.gmra.mxu1 %v2125_v30  ;;  %1318 = vmatmul.bf16.gmra.mxu3 %v2317_v31  ;;  %v1369_v41 = vadd.f32 %v1368_v54, %v1200_v34  ;;  %v2326_v54 = vld [vmem:[%s3732_s0 + $0x2dc] sm:$0xf0]  ;;  %v2145_v31 = vor.u32 %v2496_v20, %v2144_v19 }
  0xf3   :  { %v2329_v0 = vor.u32 %v2540_v52, %v2326_v54  ;;  %v2341_v37 = vor.u32 %v2543_v25, %v2338_v27 }
  0xf4   :  { %v1712_v46 = vadd.f32 %v3100_v12, %v1369_v41 }
  0xf5   :  { %v3270_v38 = vpop.f32.mrf.mxu3  ;;  %v1375_v40 = vpop.f32.mrf.mxu2 }
  0xf6   :  { %v1032_v42 = vpop.f32.mrf.mxu0  ;;  %v1776_v60 = vmax.f32 %v1712_v46, 0.0 }
  0xf7   :  { %v1201_v44 = vpop.f32.mrf.mxu1 }
  0xf8   :  { %v1202_v45 = vadd.f32 %v1201_v44, %v1032_v42  ;;  %v2503_v44 = vld [vmem:[%s3732_s0 + $0x1a8] sm:$0xf0] }
  0xfa   :  { %v1371_v47 = vadd.f32 %v1370_v5, %v1202_v45  ;;  %2433 = vmatmul.msk.bf16.gmra.mxu2 %vm899_vm0, %v2153_v43  ;;  %v2176_v43 = vld [vmem:[%s3732_s0 + $0x1a0] sm:$0xf] }
  0xfb   :  { %v2177_v49 = vor.u32 %v2503_v44, %v2176_v43 }
  0xfc   :  { %v1713_v56 = vadd.f32 %v3100_v12, %v1371_v47 }
  0xfd   :  { %v3293_v57 = vpop.f32.mrf.mxu3  ;;  %v1378_v58 = vpop.f32.mrf.mxu2 }
  0xfe   :  { %v1777_v61 = vmax.f32 %v1713_v56, 0.0  ;;  %v1035_v62 = vpop.f32.mrf.mxu0  ;;  %v2156_v56 = vld [vmem:[%s3732_s0 + $0x180] sm:$0xf] }
  0xff   :  { %v1204_v1 = vpop.f32.mrf.mxu1 }
 0x100   :  { %v2592_v2 = vpack.c.bf16 %v1777_v61, %v1776_v60  ;;  %v1205_v5 = vadd.f32 %v1204_v1, %v1035_v62  ;;  %v2158_v60 = vld [vmem:[%s3732_s0 + $0x18c] sm:$0xf0]  ;;  %v2284_v61 = vld [vmem:[%s3732_s0 + $0x278] sm:$0xf]  ;;  %v2530_v62 = vld [vmem:[%s3732_s0 + $0x280] sm:$0xf0] }
 0x101   :  { %1074 = vmatmul.bf16.gmra.mxu0 %v2133_v59  ;;  %v2499_v59 = vld [vmem:[%s3732_s0 + $0x188] sm:$0xf0] }
 0x102   :  { %2728 = vst [vmem:[%s3734_s3 + $0x28] sm:$0xff] %v2592_v2   ;;  %1243 = vmatmul.bf16.gmra.mxu1 %v2137_v63  ;;  %1323 = vmatmul.bf16.gmra.mxu3 %v2329_v0  ;;  %v1374_v11 = vadd.f32 %v1373_v24, %v1205_v5  ;;  %v2146_v24 = vld [vmem:[%s3732_s0 + $0x174] sm:$0xf0]  ;;  %v2157_v2 = vor.u32 %v2499_v59, %v2156_v56  ;;  %v2509_v56 = vld [vmem:[%s3732_s0 + $0x1d8] sm:$0xf0] }
 0x103   :  { %v2149_v35 = vor.u32 %v2495_v21, %v2146_v24 }
 0x104   :  { %v1714_v17 = vadd.f32 %v3100_v12, %v1374_v11  ;;  %v2285_v11 = vor.u32 %v2530_v62, %v2284_v61 }
 0x105   :  { %v3304_v8 = vpop.f32.mrf.mxu3  ;;  %v1380_v10 = vpop.f32.mrf.mxu2 }
 0x106   :  { %v1037_v13 = vpop.f32.mrf.mxu0  ;;  %v1778_v32 = vmax.f32 %v1714_v17, 0.0  ;;  %v2506_v17 = vld [vmem:[%s3732_s0 + $0x1c0] sm:$0xf0] }
 0x107   :  { %v1206_v15 = vpop.f32.mrf.mxu1 }
 0x108   :  { %v1207_v16 = vadd.f32 %v1206_v15, %v1037_v13 }
 0x10a   :  { %v1376_v18 = vadd.f32 %v1375_v40, %v1207_v16  ;;  %2434 = vmatmul.msk.bf16.gmra.mxu2 %vm899_vm0, %v2165_v14  ;;  %v2188_v16 = vld [vmem:[%s3732_s0 + $0x1b8] sm:$0xf] }
 0x10b   :  { %v2189_v24 = vor.u32 %v2506_v17, %v2188_v16 }
 0x10c   :  { %v1715_v28 = vadd.f32 %v3100_v12, %v1376_v18 }
 0x10d   :  { %v3327_v29 = vpop.f32.mrf.mxu3  ;;  %v1383_v30 = vpop.f32.mrf.mxu2 }
 0x10e   :  { %v1779_v33 = vmax.f32 %v1715_v28, 0.0  ;;  %v1040_v34 = vpop.f32.mrf.mxu0 }
 0x10f   :  { %v1209_v40 = vpop.f32.mrf.mxu1 }
 0x110   :  { %v2597_v41 = vpack.c.bf16 %v1779_v33, %v1778_v32  ;;  %v1210_v42 = vadd.f32 %v1209_v40, %v1040_v34  ;;  %v2168_v32 = vld [vmem:[%s3732_s0 + $0x198] sm:$0xf]  ;;  %v2502_v33 = vld [vmem:[%s3732_s0 + $0x1a0] sm:$0xf0]  ;;  %v2170_v34 = vld [vmem:[%s3732_s0 + $0x1a4] sm:$0xf0] }
 0x111   :  { %1079 = vmatmul.bf16.gmra.mxu0 %v2145_v31  ;;  %v2169_v43 = vor.u32 %v2502_v33, %v2168_v32  ;;  %v2212_v33 = vld [vmem:[%s3732_s0 + $0x1e8] sm:$0xf] }
 0x112   :  { %2729 = vst [vmem:[%s3734_s3 + $0x30] sm:$0xff] %v2597_v41   ;;  %1248 = vmatmul.bf16.gmra.mxu1 %v2149_v35  ;;  %1328 = vmatmul.bf16.gmra.mxu3 %v2341_v37  ;;  %v1379_v47 = vadd.f32 %v1378_v58, %v1210_v42  ;;  %v2498_v58 = vld [vmem:[%s3732_s0 + $0x184] sm:$0xf]  ;;  %v2296_v35 = vld [vmem:[%s3732_s0 + $0x290] sm:$0xf] }
 0x113   :  { %v2533_v37 = vld [vmem:[%s3732_s0 + $0x298] sm:$0xf0] }
 0x114   :  { %v1716_v52 = vadd.f32 %v3100_v12, %v1379_v47 }
 0x115   :  { %v3338_v45 = vpop.f32.mrf.mxu3  ;;  %v1385_v46 = vpop.f32.mrf.mxu2 }
 0x116   :  { %v1042_v48 = vpop.f32.mrf.mxu0  ;;  %v1780_v5 = vmax.f32 %v1716_v52, 0.0 }
 0x117   :  { %v1211_v50 = vpop.f32.mrf.mxu1 }
 0x118   :  { %v1212_v51 = vadd.f32 %v1211_v50, %v1042_v48 }
 0x11a   :  { %v1381_v54 = vadd.f32 %v1380_v10, %v1212_v51  ;;  %2435 = vmatmul.msk.bf16.gmra.mxu2 %vm899_vm0, %v2177_v49  ;;  %v2161_v10 = vor.u32 %v2498_v58, %v2158_v60  ;;  %v2297_v49 = vor.u32 %v2533_v37, %v2296_v35 }
 0x11c   :  { %v1717_v63 = vadd.f32 %v3100_v12, %v1381_v54  ;;  %v2200_v54 = vld [vmem:[%s3732_s0 + $0x1d0] sm:$0xf] }
 0x11d   :  { %v3361_v0 = vpop.f32.mrf.mxu3  ;;  %v1388_v1 = vpop.f32.mrf.mxu2  ;;  %v2201_v62 = vor.u32 %v2509_v56, %v2200_v54  ;;  %v2539_v54 = vld [vmem:[%s3732_s0 + $0x2c8] sm:$0xf0] }
 0x11e   :  { %v1781_v6 = vmax.f32 %v1717_v63, 0.0  ;;  %v1045_v7 = vpop.f32.mrf.mxu0 }
 0x11f   :  { %v1214_v13 = vpop.f32.mrf.mxu1 }
 0x120   :  { %v2602_v14 = vpack.c.bf16 %v1781_v6, %v1780_v5  ;;  %v1215_v15 = vadd.f32 %v1214_v13, %v1045_v7  ;;  %v2180_v7 = vld [vmem:[%s3732_s0 + $0x1b0] sm:$0xf]  ;;  %v2308_v13 = vld [vmem:[%s3732_s0 + $0x2a8] sm:$0xf] }
 0x121   :  { %1084 = vmatmul.bf16.gmra.mxu0 %v2157_v2 }
 0x122   :  { %2730 = vst [vmem:[%s3734_s3 + $0x38] sm:$0xff] %v2602_v14   ;;  %1253 = vmatmul.bf16.gmra.mxu1 %v2161_v10  ;;  %2444 = vmatmul.msk.bf16.vlgmr.msra.gmra.mxu3 %vm899_vm0, %v2285_v11  ;;  %v1384_v20 = vadd.f32 %v1383_v30, %v1215_v15  ;;  %v2501_v30 = vld [vmem:[%s3732_s0 + $0x19c] sm:$0xf]  ;;  %v2182_v11 = vld [vmem:[%s3732_s0 + $0x1bc] sm:$0xf0] }
 0x123   :  { %v2173_v48 = vor.u32 %v2501_v30, %v2170_v34  ;;  %v2505_v10 = vld [vmem:[%s3732_s0 + $0x1b8] sm:$0xf0]  ;;  %v2536_v14 = vld [vmem:[%s3732_s0 + $0x2b0] sm:$0xf0] }
 0x124   :  { %v1718_v28 = vadd.f32 %v3100_v12, %v1384_v20  ;;  %v2512_v30 = vld [vmem:[%s3732_s0 + $0x1f0] sm:$0xf0] }
 0x125   :  { %v3373_v18 = vpop.f32.mrf.mxu3  ;;  %v1390_v19 = vpop.f32.mrf.mxu2 }
 0x126   :  { %v1047_v21 = vpop.f32.mrf.mxu0  ;;  %v1782_v44 = vmax.f32 %v1718_v28, 0.0 }
 0x127   :  { %v1216_v25 = vpop.f32.mrf.mxu1 }
 0x128   :  { %v1217_v27 = vadd.f32 %v1216_v25, %v1047_v21 }
 0x12a   :  { %v1386_v31 = vadd.f32 %v1385_v46, %v1217_v27  ;;  %2436 = vmatmul.msk.bf16.gmra.mxu2 %vm899_vm0, %v2189_v24  ;;  %v2309_v27 = vor.u32 %v2536_v14, %v2308_v13  ;;  %v2515_v13 = vld [vmem:[%s3732_s0 + $0x208] sm:$0xf0] }
 0x12c   :  { %v1719_v40 = vadd.f32 %v3100_v12, %v1386_v31 }
 0x12d   :  { %v3396_v41 = vpop.f32.mrf.mxu3  ;;  %v1393_v42 = vpop.f32.mrf.mxu2 }
 0x12e   :  { %v1783_v46 = vmax.f32 %v1719_v40, 0.0  ;;  %v1050_v47 = vpop.f32.mrf.mxu0 }
 0x12f   :  { %v1219_v50 = vpop.f32.mrf.mxu1 }
 0x130   :  { %v2607_v51 = vpack.c.bf16 %v1783_v46, %v1782_v44  ;;  %v1220_v52 = vadd.f32 %v1219_v50, %v1050_v47  ;;  %v2508_v50 = vld [vmem:[%s3732_s0 + $0x1d0] sm:$0xf0] }
 0x131   :  { %1089 = vmatmul.bf16.gmra.mxu0 %v2169_v43  ;;  %v2213_v43 = vor.u32 %v2512_v30, %v2212_v33  ;;  %v2206_v33 = vld [vmem:[%s3732_s0 + $0x1ec] sm:$0xf0]  ;;  %v2332_v30 = vld [vmem:[%s3732_s0 + $0x2d8] sm:$0xf] }
 0x132   :  { %2731 = vst [vmem:[%s3734_s3 + $0x40] sm:$0xff] %v2607_v51   ;;  %1258 = vmatmul.bf16.gmra.mxu1 %v2173_v48  ;;  %2445 = vmatmul.msk.bf16.gmra.mxu3 %vm899_vm0, %v2297_v49  ;;  %v1389_v60 = vadd.f32 %v1388_v1, %v1220_v52  ;;  %v2504_v1 = vld [vmem:[%s3732_s0 + $0x1b4] sm:$0xf]  ;;  %v2192_v49 = vld [vmem:[%s3732_s0 + $0x1c8] sm:$0xf] }
 0x133   :  { %v2185_v25 = vor.u32 %v2504_v1, %v2182_v11  ;;  %v2194_v51 = vld [vmem:[%s3732_s0 + $0x1d4] sm:$0xf0]  ;;  %v2320_v52 = vld [vmem:[%s3732_s0 + $0x2c0] sm:$0xf] }
 0x134   :  { %v1720_v5 = vadd.f32 %v3100_v12, %v1389_v60  ;;  %v2224_v11 = vld [vmem:[%s3732_s0 + $0x200] sm:$0xf] }
 0x135   :  { %v3408_v59 = vpop.f32.mrf.mxu3  ;;  %v1395_v58 = vpop.f32.mrf.mxu2 }
 0x136   :  { %v1052_v61 = vpop.f32.mrf.mxu0  ;;  %v1784_v20 = vmax.f32 %v1720_v5, 0.0 }
 0x137   :  { %v1221_v63 = vpop.f32.mrf.mxu1 }
 0x138   :  { %v1222_v2 = vadd.f32 %v1221_v63, %v1052_v61  ;;  %v2193_v61 = vor.u32 %v2508_v50, %v2192_v49 }
 0x13a   :  { %v1391_v6 = vadd.f32 %v1390_v19, %v1222_v2  ;;  %2437 = vmatmul.msk.bf16.gmra.mxu2 %vm899_vm0, %v2201_v62  ;;  %v2181_v19 = vor.u32 %v2505_v10, %v2180_v7 }
 0x13c   :  { %v1721_v15 = vadd.f32 %v3100_v12, %v1391_v6  ;;  %v2321_v6 = vor.u32 %v2539_v54, %v2320_v52  ;;  %v2236_v54 = vld [vmem:[%s3732_s0 + $0x218] sm:$0xf] }
 0x13d   :  { %v3431_v16 = vpop.f32.mrf.mxu3  ;;  %v1398_v17 = vpop.f32.mrf.mxu2 }
 0x13e   :  { %v1785_v21 = vmax.f32 %v1721_v15, 0.0  ;;  %v1055_v24 = vpop.f32.mrf.mxu0 }
 0x13f   :  { %v1224_v28 = vpop.f32.mrf.mxu1 }
 0x140   :  { %v2612_v31 = vpack.c.bf16 %v1785_v21, %v1784_v20  ;;  %v1225_v32 = vadd.f32 %v1224_v28, %v1055_v24  ;;  %v2225_v21 = vor.u32 %v2515_v13, %v2224_v11  ;;  %v2216_v11 = vld [vmem:[%s3732_s0 + $0x1f8] sm:$0xf]  ;;  %v2514_v13 = vld [vmem:[%s3732_s0 + $0x200] sm:$0xf0] }
 0x141   :  { %1094 = vmatmul.bf16.gmra.mxu0 %v2181_v19 }
 0x142   :  { %2732 = vst [vmem:[%s3734_s3 + $0x48] sm:$0xff] %v2612_v31   ;;  %1263 = vmatmul.bf16.gmra.mxu1 %v2185_v25  ;;  %2446 = vmatmul.msk.bf16.gmra.mxu3 %vm899_vm0, %v2309_v27  ;;  %v1394_v37 = vadd.f32 %v1393_v42, %v1225_v32  ;;  %v2507_v42 = vld [vmem:[%s3732_s0 + $0x1cc] sm:$0xf]  ;;  %v2204_v31 = vld [vmem:[%s3732_s0 + $0x1e0] sm:$0xf] }
 0x143   :  { %v2197_v5 = vor.u32 %v2507_v42, %v2194_v51  ;;  %v2511_v32 = vld [vmem:[%s3732_s0 + $0x1e8] sm:$0xf0] }
 0x144   :  { %v1722_v47 = vadd.f32 %v3100_v12, %v1394_v37 }
 0x145   :  { %v3443_v34 = vpop.f32.mrf.mxu3  ;;  %v1400_v35 = vpop.f32.mrf.mxu2 }
 0x146   :  { %v1057_v40 = vpop.f32.mrf.mxu0  ;;  %v1786_v62 = vmax.f32 %v1722_v47, 0.0 }
 0x147   :  { %v1226_v44 = vpop.f32.mrf.mxu1 }
 0x148   :  { %v1227_v46 = vadd.f32 %v1226_v44, %v1057_v40  ;;  %v2205_v44 = vor.u32 %v2511_v32, %v2204_v31 }
 0x14a   :  { %v1396_v48 = vadd.f32 %v1395_v58, %v1227_v46  ;;  %2438 = vmatmul.msk.bf16.gmra.mxu2 %vm899_vm0, %v2213_v43 }
 0x14c   :  { %v1723_v56 = vadd.f32 %v3100_v12, %v1396_v48 }
 0x14d   :  { %v3466_v58 = vpop.f32.mrf.mxu3  ;;  %v1403_v60 = vpop.f32.mrf.mxu2 }
 0x14e   :  { %v1787_v63 = vmax.f32 %v1723_v56, 0.0  ;;  %v1060_v2 = vpop.f32.mrf.mxu0  ;;  %v2518_v56 = vld [vmem:[%s3732_s0 + $0x220] sm:$0xf0] }
 0x14f   :  { %v1229_v7 = vpop.f32.mrf.mxu1 }
 0x150   :  { %v2617_v10 = vpack.c.bf16 %v1787_v63, %v1786_v62  ;;  %v1230_v1 = vadd.f32 %v1229_v7, %v1060_v2 }
 0x151   :  { %1099 = vmatmul.bf16.gmra.mxu0 %v2193_v61 }
 0x152   :  { %2733 = vst [vmem:[%s3734_s3 + $0x50] sm:$0xff] %v2617_v10   ;;  %1268 = vmatmul.bf16.gmra.mxu1 %v2197_v5  ;;  %2447 = vmatmul.msk.bf16.gmra.mxu3 %vm899_vm0, %v2321_v6  ;;  %v1399_v19 = vadd.f32 %v1398_v17, %v1230_v1  ;;  %v2510_v17 = vld [vmem:[%s3732_s0 + $0x1e4] sm:$0xf]  ;;  %v2237_v5 = vor.u32 %v2518_v56, %v2236_v54 }
 0x153   :  { %v2209_v49 = vor.u32 %v2510_v17, %v2206_v33 }
 0x154   :  { %v1724_v27 = vadd.f32 %v3100_v12, %v1399_v19  ;;  %v2218_v19 = vld [vmem:[%s3732_s0 + $0x204] sm:$0xf0] }
 0x155   :  { %v3478_v14 = vpop.f32.mrf.mxu3  ;;  %v1405_v15 = vpop.f32.mrf.mxu2 }
 0x156   :  { %v1062_v20 = vpop.f32.mrf.mxu0  ;;  %v1788_v46 = vmax.f32 %v1724_v27, 0.0  ;;  %v2217_v27 = vor.u32 %v2514_v13, %v2216_v11 }
 0x157   :  { %v1231_v24 = vpop.f32.mrf.mxu1 }
 0x158   :  { %v1232_v25 = vadd.f32 %v1231_v24, %v1062_v20  ;;  %v2545_v20 = vld [vmem:[%s3732_s0 + $0x2f8] sm:$0xf0] }
 0x15a   :  { %v1401_v28 = vadd.f32 %v1400_v35, %v1232_v25  ;;  %2439 = vmatmul.msk.bf16.gmra.mxu2 %vm899_vm0, %v2225_v21  ;;  %v2542_v35 = vld [vmem:[%s3732_s0 + $0x2e0] sm:$0xf0] }
 0x15b   :  { %v2333_v50 = vor.u32 %v2542_v35, %v2332_v30 }
 0x15c   :  { %v1725_v37 = vadd.f32 %v3100_v12, %v1401_v28 }
 0x15d   :  { %v3501_v40 = vpop.f32.mrf.mxu3  ;;  %v1408_v43 = vpop.f32.mrf.mxu2 }
 0x15e   :  { %v1789_v47 = vmax.f32 %v1725_v37, 0.0  ;;  %v1065_v48 = vpop.f32.mrf.mxu0 }
 0x15f   :  { %v1234_v42 = vpop.f32.mrf.mxu1 }
 0x160   :  { %v2622_v51 = vpack.c.bf16 %v1789_v47, %v1788_v46  ;;  %v1235_v52 = vadd.f32 %v1234_v42, %v1065_v48  ;;  %v2521_v46 = vld [vmem:[%s3732_s0 + $0x238] sm:$0xf0] }
 0x161   :  { %1104 = vmatmul.bf16.gmra.mxu0 %v2205_v44  ;;  %v2248_v44 = vld [vmem:[%s3732_s0 + $0x230] sm:$0xf] }
 0x162   :  { %2734 = vst [vmem:[%s3734_s3 + $0x58] sm:$0xff] %v2622_v51   ;;  %1273 = vmatmul.bf16.gmra.mxu1 %v2209_v49  ;;  %2448 = vmatmul.msk.bf16.gmra.mxu3 %vm899_vm0, %v2333_v50  ;;  %v1404_v63 = vadd.f32 %v1403_v60, %v1235_v52  ;;  %v2513_v60 = vld [vmem:[%s3732_s0 + $0x1fc] sm:$0xf]  ;;  %v2249_v42 = vor.u32 %v2521_v46, %v2248_v44  ;;  %v2240_v46 = vld [vmem:[%s3732_s0 + $0x228] sm:$0xf] }
 0x163   :  { %v2221_v17 = vor.u32 %v2513_v60, %v2218_v19 }
 0x164   :  { %v1726_v10 = vadd.f32 %v3100_v12, %v1404_v63  ;;  %v2228_v63 = vld [vmem:[%s3732_s0 + $0x210] sm:$0xf] }
 0x165   :  { %v3513_v61 = vpop.f32.mrf.mxu3  ;;  %v1410_v62 = vpop.f32.mrf.mxu2 }
 0x166   :  { %v1067_v2 = vpop.f32.mrf.mxu0  ;;  %v1790_v28 = vmax.f32 %v1726_v10, 0.0 }
 0x167   :  { %v1236_v6 = vpop.f32.mrf.mxu1 }
 0x168   :  { %v1237_v7 = vadd.f32 %v1236_v6, %v1067_v2  ;;  %v2517_v2 = vld [vmem:[%s3732_s0 + $0x218] sm:$0xf0] }
 0x169   :  { %v2229_v10 = vor.u32 %v2517_v2, %v2228_v63 }
 0x16a   :  { %v1406_v1 = vadd.f32 %v1405_v15, %v1237_v7  ;;  %2440 = vmatmul.msk.bf16.gmra.mxu2 %vm899_vm0, %v2237_v5  ;;  %v2344_v15 = vld [vmem:[%s3732_s0 + $0x2f0] sm:$0xf]  ;;  %v2230_v5 = vld [vmem:[%s3732_s0 + $0x21c] sm:$0xf0] }
 0x16b   :  { %v2345_v33 = vor.u32 %v2545_v20, %v2344_v15 }
 0x16c   :  { %v1727_v21 = vadd.f32 %v3100_v12, %v1406_v1 }
 0x16d   :  { %v3536_v24 = vpop.f32.mrf.mxu3  ;;  %v1413_v25 = vpop.f32.mrf.mxu2 }
 0x16e   :  { %v1791_v31 = vmax.f32 %v1727_v21, 0.0  ;;  %v1070_v32 = vpop.f32.mrf.mxu0  ;;  %v2260_v21 = vld [vmem:[%s3732_s0 + $0x248] sm:$0xf] }
 0x16f   :  { %v1239_v30 = vpop.f32.mrf.mxu1 }
 0x170   :  { %v2627_v35 = vpack.c.bf16 %v1791_v31, %v1790_v28  ;;  %v1240_v37 = vadd.f32 %v1239_v30, %v1070_v32 }
 0x171   :  { %1109 = vmatmul.bf16.gmra.mxu0 %v2217_v27  ;;  %v2524_v27 = vld [vmem:[%s3732_s0 + $0x250] sm:$0xf0] }
 0x172   :  { %2735 = vst [vmem:[%s3734_s3 + $0x60] sm:$0xff] %v2627_v35   ;;  %1278 = vmatmul.bf16.gmra.mxu1 %v2221_v17  ;;  %2449 = vmatmul.msk.bf16.gmra.mxu3 %vm899_vm0, %v2345_v33  ;;  %v1409_v49 = vadd.f32 %v1408_v43, %v1240_v37  ;;  %v2516_v43 = vld [vmem:[%s3732_s0 + $0x214] sm:$0xf]  ;;  %v2261_v33 = vor.u32 %v2524_v27, %v2260_v21 }
 0x173   :  { %v2233_v60 = vor.u32 %v2516_v43, %v2230_v5 }
 0x174   :  { %v1728_v54 = vadd.f32 %v3100_v12, %v1409_v49  ;;  %v2520_v49 = vld [vmem:[%s3732_s0 + $0x230] sm:$0xf0] }
 0x175   :  { %v3548_v47 = vpop.f32.mrf.mxu3  ;;  %v1415_v48 = vpop.f32.mrf.mxu2 }
 0x176   :  { %v1072_v50 = vpop.f32.mrf.mxu0  ;;  %v1792_v1 = vmax.f32 %v1728_v54, 0.0 }
 0x177   :  { %v1241_v51 = vpop.f32.mrf.mxu1 }
 0x178   :  { %v1242_v52 = vadd.f32 %v1241_v51, %v1072_v50  ;;  %v2242_v50 = vld [vmem:[%s3732_s0 + $0x234] sm:$0xf0] }
 0x17a   :  { %v1411_v56 = vadd.f32 %v1410_v62, %v1242_v52  ;;  %2441 = vmatmul.msk.bf16.gmra.mxu2 %vm899_vm0, %v2249_v42  ;;  %v2241_v52 = vor.u32 %v2520_v49, %v2240_v46 }
 0x17c   :  { %v1729_v62 = vadd.f32 %v3100_v12, %v1411_v56 }
 0x17d   :  { %v3565_v6 = vpop.f32.mrf.mxu3  ;;  %v1418_v7 = vpop.f32.mrf.mxu2 }
 0x17e   :  { %v1793_v11 = vmax.f32 %v1729_v62, 0.0  ;;  %v1075_v13 = vpop.f32.mrf.mxu0 }
 0x17f   :  { %v1244_v19 = vpop.f32.mrf.mxu1 }
 0x180   :  { %v2632_v15 = vpack.c.bf16 %v1793_v11, %v1792_v1  ;;  %v1245_v20 = vadd.f32 %v1244_v19, %v1075_v13  ;;  %v2527_v1 = vld [vmem:[%s3732_s0 + $0x268] sm:$0xf0] }
 0x181   :  { %1114 = vmatmul.bf16.gmra.mxu0 %v2229_v10  ;;  %v2272_v10 = vld [vmem:[%s3732_s0 + $0x260] sm:$0xf] }
 0x182   :  { %2736 = vst [vmem:[%s3734_s3 + $0x68] sm:$0xff] %v2632_v15   ;;  %1283 = vmatmul.bf16.gmra.mxu1 %v2233_v60  ;;  %v1414_v32 = vadd.f32 %v1413_v25, %v1245_v20  ;;  %v2519_v25 = vld [vmem:[%s3732_s0 + $0x22c] sm:$0xf]  ;;  %v2273_v15 = vor.u32 %v2527_v1, %v2272_v10 }
 0x183   :  { %v2245_v2 = vor.u32 %v2519_v25, %v2242_v50 }
 0x184   :  { %v1730_v37 = vadd.f32 %v3100_v12, %v1414_v32 }
 0x185   :  { %v3576_v28 = vpop.f32.mrf.mxu3  ;;  %v1420_v31 = vpop.f32.mrf.mxu2 }
 0x186   :  { %v1077_v17 = vpop.f32.mrf.mxu0  ;;  %v1794_v54 = vmax.f32 %v1730_v37, 0.0 }
 0x187   :  { %v1246_v30 = vpop.f32.mrf.mxu1 }
 0x188   :  { %v1247_v35 = vadd.f32 %v1246_v30, %v1077_v17 }
 0x18a   :  { %v1416_v44 = vadd.f32 %v1415_v48, %v1247_v35  ;;  %2442 = vmatmul.msk.bf16.gmra.mxu2 %vm899_vm0, %v2261_v33 }
 0x18c   :  { %v1731_v48 = vadd.f32 %v3100_v12, %v1416_v44 }
 0x18d   :  { %v3593_v42 = vpop.f32.mrf.mxu3  ;;  %v1423_v51 = vpop.f32.mrf.mxu2 }
 0x18e   :  { %v1795_v56 = vmax.f32 %v1731_v48, 0.0  ;;  %v1080_v63 = vpop.f32.mrf.mxu0 }
 0x18f   :  { %v1249_v43 = vpop.f32.mrf.mxu1 }
 0x190   :  { %v2637_v5 = vpack.c.bf16 %v1795_v56, %v1794_v54  ;;  %v1250_v62 = vadd.f32 %v1249_v43, %v1080_v63  ;;  %v3619_v56 = vld [vmem:[%s3733_s2] ss:$0 sm:$0xff] }
 0x191   :  { %1119 = vmatmul.bf16.gmra.mxu0 %v2241_v52 }
 0x192   :  { %2737 = vst [vmem:[%s3734_s3 + $0x70] sm:$0xff] %v2637_v5   ;;  %1288 = vmatmul.bf16.gmra.mxu1 %v2245_v2  ;;  %v1419_v60 = vadd.f32 %v1418_v7, %v1250_v62  ;;  %v1307_v5 = vadd.f32 %v3466_v58, %v3191_v22 }
 0x194   :  { %v1732_v27 = vadd.f32 %v3100_v12, %v1419_v60 }
 0x195   :  { %v3604_v11 = vpop.f32.mrf.mxu3  ;;  %v1425_v13 = vpop.f32.mrf.mxu2 }
 0x196   :  { %v1082_v19 = vpop.f32.mrf.mxu0  ;;  %v1796_v35 = vmax.f32 %v1732_v27, 0.0 }
 0x197   :  { %v1251_v20 = vpop.f32.mrf.mxu1 }
 0x198   :  { %v1252_v21 = vadd.f32 %v1251_v20, %v1082_v19 }
 0x19a   :  { %v1421_v32 = vadd.f32 %v1420_v31, %v1252_v21  ;;  %2443 = vmatmul.msk.bf16.gmra.mxu2 %vm899_vm0, %v2273_v15 }
 0x19c   :  { %v1733_v17 = vadd.f32 %v3100_v12, %v1421_v32  ;;  %v1305_v12 = vadd.f32 %v3443_v34, %v3168_v4 }
 0x19d   :  { %v3609_v33 = vpop.f32.mrf.mxu3  ;;  %v1428_v30 = vpop.f32.mrf.mxu2 }
 0x19e   :  { %v1797_v37 = vmax.f32 %v1733_v17, 0.0  ;;  %v1085_v44 = vpop.f32.mrf.mxu0 }
 0x19f   :  { %v1254_v46 = vpop.f32.mrf.mxu1 }
 0x1a0   :  { %v2642_v49 = vpack.c.bf16 %v1797_v37, %v1796_v35  ;;  %v1255_v7 = vadd.f32 %v1254_v46, %v1085_v44  ;;  %v1310_v46 = vadd.f32 %v3478_v14, %v3202_v36 }
 0x1a2   :  { %2738 = vst [vmem:[%s3734_s3 + $0x78] sm:$0xff] %v2642_v49   ;;  %v1424_v31 = vadd.f32 %v1423_v51, %v1255_v7 }
 0x1a4   :  { %v1734_v63 = vadd.f32 %v3619_v56, %v1424_v31 }
 0x1a5   :  { %v1430_v25 = vpop.f32.mrf.mxu2  ;;  %v1473_v50 = vpop.f32.mrf.mxu3 }
 0x1a6   :  { %v1087_v48 = vpop.f32.mrf.mxu0  ;;  %v1474_v2 = vadd.f32 %v1473_v50, %v1305_v12  ;;  %v1798_v1 = vmax.f32 %v1734_v63, 0.0 }
 0x1a7   :  { %v1256_v52 = vpop.f32.mrf.mxu1 }
 0x1a8   :  { %v1257_v54 = vadd.f32 %v1256_v52, %v1087_v48  ;;  %v1754_v4 = vadd.f32 %v3619_v56, %v1474_v2  ;;  %v1312_v48 = vadd.f32 %v3501_v40, %v3225_v53 }
 0x1aa   :  { %v1426_v43 = vadd.f32 %v1425_v13, %v1257_v54  ;;  %v1818_v27 = vmax.f32 %v1754_v4, 0.0 }
 0x1ac   :  { %v1735_v51 = vadd.f32 %v3619_v56, %v1426_v43 }
 0x1ad   :  { %v1433_v62 = vpop.f32.mrf.mxu2  ;;  %v1475_v10 = vpop.f32.mrf.mxu3 }
 0x1ae   :  { %v1799_v34 = vmax.f32 %v1735_v51, 0.0  ;;  %v1476_v60 = vadd.f32 %v1475_v10, %v1307_v5  ;;  %v1090_v19 = vpop.f32.mrf.mxu0 }
 0x1af   :  { %v1259_v15 = vpop.f32.mrf.mxu1 }
 0x1b0   :  { %v2647_v20 = vpack.c.bf16 %v1799_v34, %v1798_v1  ;;  %v1755_v21 = vadd.f32 %v3619_v56, %v1476_v60  ;;  %v1260_v58 = vadd.f32 %v1259_v15, %v1090_v19  ;;  %v1315_v15 = vadd.f32 %v3513_v61, %v3236_v3 }
 0x1b2   :  { %2739 = vst [vmem:[%s3734_s3 + $0x80] sm:$0xff] %v2647_v20   ;;  %v1819_v22 = vmax.f32 %v1755_v21, 0.0  ;;  %v1429_v35 = vadd.f32 %v1428_v30, %v1260_v58  ;;  %v1317_v58 = vadd.f32 %v3536_v24, %v3259_v23 }
 0x1b4   :  { %v2697_v13 = vpack.c.bf16 %v1819_v22, %v1818_v27  ;;  %v1736_v7 = vadd.f32 %v3619_v56, %v1429_v35 }
 0x1b5   :  { %v1435_v32 = vpop.f32.mrf.mxu2  ;;  %v1478_v17 = vpop.f32.mrf.mxu3 }
 0x1b6   :  { %2749 = vst [vmem:[%s3734_s3 + $0xd0] sm:$0xff] %v2697_v13   ;;  %v1092_v37 = vpop.f32.mrf.mxu0  ;;  %v1479_v50 = vadd.f32 %v1478_v17, %v1310_v46  ;;  %v1800_v63 = vmax.f32 %v1736_v7, 0.0 }
 0x1b7   :  { %v1261_v44 = vpop.f32.mrf.mxu1 }
 0x1b8   :  { %v1262_v49 = vadd.f32 %v1261_v44, %v1092_v37  ;;  %v1756_v30 = vadd.f32 %v3619_v56, %v1479_v50 }
 0x1ba   :  { %v1431_v31 = vadd.f32 %v1430_v25, %v1262_v49  ;;  %v1820_v10 = vmax.f32 %v1756_v30, 0.0  ;;  %v1320_v30 = vadd.f32 %v3548_v47, %v3270_v38 }
 0x1bc   :  { %v1737_v52 = vadd.f32 %v3619_v56, %v1431_v31 }
 0x1bd   :  { %v1438_v12 = vpop.f32.mrf.mxu2  ;;  %v1480_v54 = vpop.f32.mrf.mxu3 }
 0x1be   :  { %v1801_v2 = vmax.f32 %v1737_v52, 0.0  ;;  %v1481_v43 = vadd.f32 %v1480_v54, %v1312_v48  ;;  %v1095_v5 = vpop.f32.mrf.mxu0 }
 0x1bf   :  { %v1264_v51 = vpop.f32.mrf.mxu1 }
 0x1c0   :  { %v2652_v36 = vpack.c.bf16 %v1801_v2, %v1800_v63  ;;  %v1757_v14 = vadd.f32 %v3619_v56, %v1481_v43  ;;  %v1265_v40 = vadd.f32 %v1264_v51, %v1095_v5 }
 0x1c2   :  { %2740 = vst [vmem:[%s3734_s3 + $0x88] sm:$0xff] %v2652_v36   ;;  %v1821_v53 = vmax.f32 %v1757_v14, 0.0  ;;  %v1434_v34 = vadd.f32 %v1433_v62, %v1265_v40  ;;  %v1322_v36 = vadd.f32 %v3565_v6, %v3293_v57 }
 0x1c4   :  { %v2702_v25 = vpack.c.bf16 %v1821_v53, %v1820_v10  ;;  %v1738_v21 = vadd.f32 %v3619_v56, %v1434_v34 }
 0x1c5   :  { %v1440_v1 = vpop.f32.mrf.mxu2  ;;  %v1483_v4 = vpop.f32.mrf.mxu3 }
 0x1c6   :  { %2750 = vst [vmem:[%s3734_s3 + $0xd8] sm:$0xff] %v2702_v25   ;;  %v1097_v60 = vpop.f32.mrf.mxu0  ;;  %v1484_v27 = vadd.f32 %v1483_v4, %v1315_v15  ;;  %v1802_v37 = vmax.f32 %v1738_v21, 0.0 }
 0x1c7   :  { %v1266_v19 = vpop.f32.mrf.mxu1 }
 0x1c8   :  { %v1267_v20 = vadd.f32 %v1266_v19, %v1097_v60  ;;  %v1758_v62 = vadd.f32 %v3619_v56, %v1484_v27 }
 0x1ca   :  { %v1436_v22 = vadd.f32 %v1435_v32, %v1267_v20  ;;  %v1822_v50 = vmax.f32 %v1758_v62, 0.0 }
 0x1cc   :  { %v1739_v13 = vadd.f32 %v3619_v56, %v1436_v22 }
 0x1cd   :  { %v1443_v17 = vpop.f32.mrf.mxu2  ;;  %v1485_v35 = vpop.f32.mrf.mxu3 }
 0x1ce   :  { %v1803_v44 = vmax.f32 %v1739_v13, 0.0  ;;  %v1486_v46 = vadd.f32 %v1485_v35, %v1317_v58  ;;  %v1100_v49 = vpop.f32.mrf.mxu0  ;;  %v1325_v58 = vadd.f32 %v3576_v28, %v3304_v8 }
 0x1cf   :  { %v1269_v7 = vpop.f32.mrf.mxu1 }
 0x1d0   :  { %v2657_v3 = vpack.c.bf16 %v1803_v44, %v1802_v37  ;;  %v1759_v61 = vadd.f32 %v3619_v56, %v1486_v46  ;;  %v1270_v24 = vadd.f32 %v1269_v7, %v1100_v49  ;;  %v1327_v44 = vadd.f32 %v3593_v42, %v3327_v29 }
 0x1d2   :  { %2741 = vst [vmem:[%s3734_s3 + $0x90] sm:$0xff] %v2657_v3   ;;  %v1823_v23 = vmax.f32 %v1759_v61, 0.0  ;;  %v1439_v52 = vadd.f32 %v1438_v12, %v1270_v24 }
 0x1d4   :  { %v2707_v32 = vpack.c.bf16 %v1823_v23, %v1822_v50  ;;  %v1740_v43 = vadd.f32 %v3619_v56, %v1439_v52 }
 0x1d5   :  { %v1445_v31 = vpop.f32.mrf.mxu2  ;;  %v1488_v48 = vpop.f32.mrf.mxu3 }
 0x1d6   :  { %2751 = vst [vmem:[%s3734_s3 + $0xe0] sm:$0xff] %v2707_v32   ;;  %v1102_v54 = vpop.f32.mrf.mxu0  ;;  %v1489_v5 = vadd.f32 %v1488_v48, %v1320_v30  ;;  %v1804_v40 = vmax.f32 %v1740_v43, 0.0 }
 0x1d7   :  { %v1271_v63 = vpop.f32.mrf.mxu1 }
 0x1d8   :  { %v1272_v2 = vadd.f32 %v1271_v63, %v1102_v54  ;;  %v1760_v12 = vadd.f32 %v3619_v56, %v1489_v5 }
 0x1da   :  { %v1441_v51 = vadd.f32 %v1440_v1, %v1272_v2  ;;  %v1824_v19 = vmax.f32 %v1760_v12, 0.0  ;;  %v1330_v2 = vadd.f32 %v3604_v11, %v3338_v45 }
 0x1dc   :  { %v1741_v14 = vadd.f32 %v3619_v56, %v1441_v51 }
 0x1dd   :  { %v1448_v10 = vpop.f32.mrf.mxu2  ;;  %v1490_v53 = vpop.f32.mrf.mxu3 }
 0x1de   :  { %v1805_v25 = vmax.f32 %v1741_v14, 0.0  ;;  %v1491_v4 = vadd.f32 %v1490_v53, %v1322_v36  ;;  %v1105_v34 = vpop.f32.mrf.mxu0  ;;  %v1332_v14 = vadd.f32 %v3609_v33, %v3361_v0 }
 0x1df   :  { %v1274_v60 = vpop.f32.mrf.mxu1 }
 0x1e0   :  { %v2662_v38 = vpack.c.bf16 %v1805_v25, %v1804_v40  ;;  %v1761_v47 = vadd.f32 %v3619_v56, %v1491_v4  ;;  %v1275_v6 = vadd.f32 %v1274_v60, %v1105_v34 }
 0x1e2   :  { %2742 = vst [vmem:[%s3734_s3 + $0x98] sm:$0xff] %v2662_v38   ;;  %v1825_v57 = vmax.f32 %v1761_v47, 0.0  ;;  %v1444_v21 = vadd.f32 %v1443_v17, %v1275_v6 }
 0x1e4   :  { %v2712_v1 = vpack.c.bf16 %v1825_v57, %v1824_v19  ;;  %v1742_v35 = vadd.f32 %v3619_v56, %v1444_v21 }
 0x1e5   :  { %v1450_v15 = vpop.f32.mrf.mxu2  ;;  %v1493_v20 = vpop.f32.mrf.mxu3 }
 0x1e6   :  { %2752 = vst [vmem:[%s3734_s3 + $0xe8] sm:$0xff] %v2712_v1   ;;  %v1107_v27 = vpop.f32.mrf.mxu0  ;;  %v1494_v37 = vadd.f32 %v1493_v20, %v1325_v58  ;;  %v1806_v3 = vmax.f32 %v1742_v35, 0.0 }
 0x1e7   :  { %v1276_v22 = vpop.f32.mrf.mxu1 }
 0x1e8   :  { %v1277_v13 = vadd.f32 %v1276_v22, %v1107_v27  ;;  %v1762_v17 = vadd.f32 %v3619_v56, %v1494_v37 }
 0x1ea   :  { %v1446_v62 = vadd.f32 %v1445_v31, %v1277_v13  ;;  %v1826_v32 = vmax.f32 %v1762_v17, 0.0 }
 0x1ec   :  { %v1743_v46 = vadd.f32 %v3619_v56, %v1446_v62 }
 0x1ed   :  { %v1453_v49 = vpop.f32.mrf.mxu2  ;;  %v1495_v7 = vpop.f32.mrf.mxu3 }
 0x1ee   :  { %v1807_v61 = vmax.f32 %v1743_v46, 0.0  ;;  %v1496_v50 = vadd.f32 %v1495_v7, %v1327_v44  ;;  %v1110_v23 = vpop.f32.mrf.mxu0  ;;  %v1295_v44 = vadd.f32 %v3373_v18, %v3095_v9 }
 0x1ef   :  { %v1279_v24 = vpop.f32.mrf.mxu1 }
 0x1f0   :  { %v2667_v8 = vpack.c.bf16 %v1807_v61, %v1806_v3  ;;  %v1763_v28 = vadd.f32 %v3619_v56, %v1496_v50  ;;  %v1280_v42 = vadd.f32 %v1279_v24, %v1110_v23  ;;  %v1297_v3 = vadd.f32 %v3396_v41, %v3123_v26 }
 0x1f2   :  { %2743 = vst [vmem:[%s3734_s3 + $0xa0] sm:$0xff] %v2667_v8   ;;  %v1827_v29 = vmax.f32 %v1763_v28, 0.0  ;;  %v1449_v54 = vadd.f32 %v1448_v10, %v1280_v42 }
 0x1f4   :  { %v2717_v31 = vpack.c.bf16 %v1827_v29, %v1826_v32  ;;  %v1744_v5 = vadd.f32 %v3619_v56, %v1449_v54  ;;  %v1300_v54 = vadd.f32 %v3408_v59, %v3134_v39 }
 0x1f5   :  { %v1455_v48 = vpop.f32.mrf.mxu2  ;;  %v1498_v52 = vpop.f32.mrf.mxu3 }
 0x1f6   :  { %2753 = vst [vmem:[%s3734_s3 + $0xf0] sm:$0xff] %v2717_v31   ;;  %v1112_v63 = vpop.f32.mrf.mxu0  ;;  %v1499_v51 = vadd.f32 %v1498_v52, %v1330_v2  ;;  %v1808_v25 = vmax.f32 %v1744_v5, 0.0  ;;  %v1302_v2 = vadd.f32 %v3431_v16, %v3157_v55 }
 0x1f7   :  { %v1281_v30 = vpop.f32.mrf.mxu1 }
 0x1f8   :  { %v1282_v43 = vadd.f32 %v1281_v30, %v1112_v63  ;;  %v1764_v10 = vadd.f32 %v3619_v56, %v1499_v51 }
 0x1fa   :  { %v1451_v36 = vadd.f32 %v1450_v15, %v1282_v43  ;;  %v1828_v47 = vmax.f32 %v1764_v10, 0.0 }
 0x1fc   :  { %v1745_v53 = vadd.f32 %v3619_v56, %v1451_v36 }
 0x1fd   :  { %v1458_v40 = vpop.f32.mrf.mxu2  ;;  %v1500_v12 = vpop.f32.mrf.mxu3 }
 0x1fe   :  { %v1809_v4 = vmax.f32 %v1745_v53, 0.0  ;;  %v1501_v34 = vadd.f32 %v1500_v12, %v1332_v14  ;;  %v1115_v60 = vpop.f32.mrf.mxu0 }
 0x1ff   :  { %v1284_v38 = vpop.f32.mrf.mxu1 }
 0x200   :  { %v2672_v45 = vpack.c.bf16 %v1809_v4, %v1808_v25  ;;  %v1765_v11 = vadd.f32 %v3619_v56, %v1501_v34  ;;  %v1285_v33 = vadd.f32 %v1284_v38, %v1115_v60 }
 0x202   :  { %2744 = vst [vmem:[%s3734_s3 + $0xa8] sm:$0xff] %v2672_v45   ;;  %v1829_v0 = vmax.f32 %v1765_v11, 0.0  ;;  %v1454_v6 = vadd.f32 %v1453_v49, %v1285_v33 }
 0x204   :  { %v2722_v19 = vpack.c.bf16 %v1829_v0, %v1828_v47  ;;  %v1746_v21 = vadd.f32 %v3619_v56, %v1454_v6 }
 0x205   :  { %v1460_v57 = vpop.f32.mrf.mxu2 }
 0x206   :  { %2754 = vst [vmem:[%s3734_s3 + $0xf8] sm:$0xff] %v2722_v19   ;;  %v1117_v1 = vpop.f32.mrf.mxu0  ;;  %v1810_v13 = vmax.f32 %v1746_v21, 0.0 }
 0x207   :  { %v1286_v15 = vpop.f32.mrf.mxu1 }
 0x208   :  { %v1287_v20 = vadd.f32 %v1286_v15, %v1117_v1 }
 0x20a   :  { %v1456_v27 = vadd.f32 %v1455_v48, %v1287_v20 }
 0x20c   :  { %v1747_v22 = vadd.f32 %v3619_v56, %v1456_v27 }
 0x20d   :  { %v1463_v58 = vpop.f32.mrf.mxu2 }
 0x20e   :  { %v1811_v35 = vmax.f32 %v1747_v22, 0.0  ;;  %v1120_v37 = vpop.f32.mrf.mxu0  ;;  %v1464_v49 = vadd.f32 %v1463_v58, %v1295_v44 }
 0x20f   :  { %v1289_v62 = vpop.f32.mrf.mxu1 }
 0x210   :  { %v2677_v46 = vpack.c.bf16 %v1811_v35, %v1810_v13  ;;  %v1290_v7 = vadd.f32 %v1289_v62, %v1120_v37  ;;  %v1750_v61 = vadd.f32 %v3619_v56, %v1464_v49 }
 0x212   :  { %2745 = vst [vmem:[%s3734_s3 + $0xb0] sm:$0xff] %v2677_v46   ;;  %v1459_v50 = vadd.f32 %v1458_v40, %v1290_v7  ;;  %v1814_v18 = vmax.f32 %v1750_v61, 0.0 }
 0x214   :  { %v1748_v32 = vadd.f32 %v3619_v56, %v1459_v50 }
 0x215   :  { %v1465_v17 = vpop.f32.mrf.mxu2 }
 0x216   :  { %v1466_v23 = vadd.f32 %v1465_v17, %v1297_v3  ;;  %v1122_v24 = vpop.f32.mrf.mxu0  ;;  %v1812_v26 = vmax.f32 %v1748_v32, 0.0 }
 0x217   :  { %v1291_v8 = vpop.f32.mrf.mxu1 }
 0x218   :  { %v1751_v28 = vadd.f32 %v3619_v56, %v1466_v23  ;;  %v1292_v9 = vadd.f32 %v1291_v8, %v1122_v24 }
 0x21a   :  { %v1815_v29 = vmax.f32 %v1751_v28, 0.0  ;;  %v1461_v42 = vadd.f32 %v1460_v57, %v1292_v9 }
 0x21c   :  { %v2687_v31 = vpack.c.bf16 %v1815_v29, %v1814_v18  ;;  %v1749_v48 = vadd.f32 %v3619_v56, %v1461_v42 }
 0x21d   :  { %v1468_v52 = vpop.f32.mrf.mxu2 }
 0x21e   :  { %2747 = vst [vmem:[%s3734_s3 + $0xc0] sm:$0xff] %v2687_v31   ;;  %v1813_v41 = vmax.f32 %v1749_v48, 0.0  ;;  %v1469_v30 = vadd.f32 %v1468_v52, %v1300_v54 }
 0x220   :  { %v2682_v63 = vpack.c.bf16 %v1813_v41, %v1812_v26  ;;  %v1752_v5 = vadd.f32 %v3619_v56, %v1469_v30 }
 0x222   :  { %2746 = vst [vmem:[%s3734_s3 + $0xb8] sm:$0xff] %v2682_v63   ;;  %v1816_v14 = vmax.f32 %v1752_v5, 0.0 }
 0x225   :  { %v1470_v43 = vpop.f32.mrf.mxu2 }
 0x226   :  { %v1471_v51 = vadd.f32 %v1470_v43, %v1302_v2 }
 0x228   :  { %v1753_v36 = vadd.f32 %v3619_v56, %v1471_v51 }
 0x22a   :  { %v1817_v53 = vmax.f32 %v1753_v36, 0.0 }
 0x22c   :  { %v2692_v40 = vpack.c.bf16 %v1817_v53, %v1816_v14 }
 0x22e   :  { %2748 = vst [vmem:[%s3734_s3 + $0xc8] sm:$0xff] %v2692_v40  }

// kernel: tile.63
= control target key start
LH: loop header
LB: loop body
LE: loop exit
PB: predicated region body
PF: predicated region fallthrough
CT: control target
= control target key end

     0   :  { %s22_s0 = inlined_call_operand.vmem [shape: f32[8], index: 0, kind: input, shape index: {}]   ;;  %s23_s1 = inlined_call_operand.vmem [shape: f32[4,8], index: 1, kind: output, shape index: {}]  }
   0x1   :  { %v4_v0 = vld [vmem:[%s22_s0] ss:$0 sm:$0xff] }
   0x2   :  { %5 = vst [vmem:[%s23_s1] sm:$0xf] %v4_v0 }

// kernel: tile.64
= control target key start
LH: loop header
LB: loop body
LE: loop exit
PB: predicated region body
PF: predicated region fallthrough
CT: control target
= control target key end

     0   :  { %s37_s8 = smov 8   ;;  %s38_s9 = smov 16   ;;  %vm7_vm0 = vcmask 64512   ;;  %vm13_vm1 = vcmask 261312   ;;  %vm19_vm2 = vcmask 195712   ;;  %vm25_vm3 = vcmask 130112   ;;  %s55_s0 = inlined_call_operand.vmem [shape: f32[4,8], index: 0, kind: input, shape index: {}]   ;;  %s56_s1 = inlined_call_operand.vmem [shape: f32[32], index: 1, kind: output, shape index: {}]  }
   0x1   :  { %v4_v0 = vld [vmem:[%s55_s0] sm:$0xf]  ;;  %s36_s0 = smov 24  }
   0x2   :  { %5 = vst [vmem:[#allocation1] sm:$0xf] %v4_v0 }
   0x9   :  { %v10_v1 = vld [vmem:[#allocation1 + $0x3] sm:$0x1]   ;;  %v22_v2 = vld [vmem:[#allocation1 + $0x1] sm:$0x1]   ;;  %v16_v3 = vld [vmem:[#allocation1 + $0x2] sm:$0x1]  }
   0xa   :  { %11 = vrot.lane.b32.xlu0 %v10_v1, %s36_s0  ;;  %23 = vrot.lane.b32.xlu1 %v22_v2, %s37_s8  ;;  %v6_v4 = vld [vmem:[#allocation1] sm:$0x1]  }
   0xb   :  { %8 = vst.msk [vmem:[#allocation0] sm:$0x1] %vm7_vm0, %v6_v4  }
  0x12   :  { %17 = vrot.lane.b32.xlu0 %v16_v3, %s38_s9 }
  0x7c   :  { %v12_v5 = vpop.permute.xlu0 %11   ;;  %v24_v6 = vpop.permute.xlu1 %23  }
  0x7d   :  { %14 = vst.msk [vmem:[#allocation0] sm:$0x1] %vm13_vm1, %v12_v5  }
  0x84   :  { %v18_v7 = vpop.permute.xlu0 %17  }
  0x85   :  { %20 = vst.msk [vmem:[#allocation0] sm:$0x1] %vm19_vm2, %v18_v7  }
  0x86   :  { %26 = vst.msk [vmem:[#allocation0] sm:$0x1] %vm25_vm3, %v24_v6  }
  0x8d   :  { %v29_v8 = vld [vmem:[#allocation0] sm:$0x1] }
  0x8e   :  { %32 = vst [vmem:[%s56_s1] sm:$0x1] %v29_v8 }

// kernel: generator_forward.10
= control target key start
LH: loop header
LB: loop body
LE: loop exit
PB: predicated region body
PF: predicated region fallthrough
CT: control target
= control target key end

     0   :  { %s2440_s12 = smov 0   ;;  %s2442_s13 = smov 0   ;;  %s2832_s0 = inlined_call_operand.vmem [shape: bf16[2048,144], index: 0, kind: input, shape index: {}]   ;;  %s2833_s1 = inlined_call_operand.vmem [shape: bf16[144,128], index: 1, kind: input, shape index: {}]   ;;  %s2834_s2 = inlined_call_operand.vmem [shape: f32[1,128], index: 2, kind: input, shape index: {}]   ;;  %s2835_s3 = inlined_call_operand.vmem [shape: bf16[2048,128], index: 3, kind: output, shape index: {}]  }
   0x1   :  { %s2444_s14 = smov 0  }
   0x2 LB: > { %s25_s15 = sadd.s32 1, %s2414_s13  ;;  %p1765_p0 = scmp.ge.s32.totalorder %s2418_s14, 1  ;;  %s2418_s14 = sphi %s2444_s14, %s13_s14   ;;  %s2414_s13 = sphi %s2442_s13, %s2837_s13   ;;  %s2410_s12 = sphi %s2440_s12, %s2836_s12  }
   0x3   : > { %p27_p1 = scmp.ge.s32.totalorder %s25_s15, 4  ;;  %p169_p2 = scmp.lt.s32.totalorder %s2418_s14, 5 }
   0x5   : > { %s2839_s15 = smov (%p27_p1, %s25_s15), 0  ;;  %p170_p3 = pnand %p1765_p0, %p169_p2 }
   0x6   : > { %s1766_s20 = sshll.u32 (!%p170_p3), %s2410_s12, 6 }
   0x7   : > { %173 = sbr.rel (%p170_p3) target bundleno = 433 (0x1b1), region = 32  ;;  %p205_p4 = scmp.lt.s32.totalorder (!%p170_p3), %s1766_s20, 255 }
   0xc   : > { %v2169_v0 = vld [vmem:[%s2833_s1 + $0x38] sm:$0xff]  ;;  %v2170_v1 = vld [vmem:[%s2833_s1 + $0x40] sm:$0xff]  ;;  %v2168_v2 = vld [vmem:[%s2833_s1 + $0x30] sm:$0xff]  ;;  %s2841_s20 = smov (!%p205_p4, %s1766_s20), 255  ;;  %vm784_vm0 = vcmask 130048  }
   0xd   : > { %881 = vmatpush.bf16.msra.mxu0 %v2169_v0  ;;  %2362 = vmatpush.bf16.msra.mxu2 %v2169_v0  ;;  %s2097_s23 = sshll.u32 %s2841_s20, 3  ;;  %v2167_v3 = vld [vmem:[%s2833_s1 + $0x28] sm:$0xff]  ;;  %v2166_v7 = vld [vmem:[%s2833_s1 + $0x20] sm:$0xff]  ;;  %v2165_v11 = vld [vmem:[%s2833_s1 + $0x18] sm:$0xff]  ;;  %s1770_s17 = sshll.u32 %s2841_s20, 2 }
   0xe   : > { %1057 = vmatpush.bf16.msra.mxu1 %v2170_v1  ;;  %2370 = vmatpush.bf16.msra.mxu3 %v2170_v1  ;;  %s2473_s26 = scalar_lea.vmem %s2832_s0, %s2097_s23  ;;  %v2164_v12 = vld [vmem:[%s2833_s1 + $0x10] sm:$0xff]  ;;  %v2163_v16 = vld [vmem:[%s2833_s1 + $0x8] sm:$0xff]  ;;  %v2162_v20 = vld [vmem:[%s2833_s1] sm:$0xff]  ;;  %s2621_s21 = scalar_lea.vmem %s2835_s3, %s1770_s17 }
   0xf   : > { %v2098_v4 = vld [vmem:[%s2473_s26 + $0x4] sm:$0xf]  ;;  %v1775_v5 = vld [vmem:[%s2473_s26 + $0x8] sm:$0xf0]  ;;  %v2132_v8 = vld [vmem:[%s2473_s26 + $0x114] sm:$0xf] }
  0x10   : > { %v1778_v6 = vor.u32 %v2098_v4, %v1775_v5  ;;  %v1911_v9 = vld [vmem:[%s2473_s26 + $0x118] sm:$0xf0]  ;;  %v2100_v13 = vld [vmem:[%s2473_s26 + $0x14] sm:$0xf]  ;;  %v2134_v17 = vld [vmem:[%s2473_s26 + $0x124] sm:$0xf] }
  0x11   : > { %882 = vmatpush.bf16.msra.mxu0 %v2168_v2  ;;  %2363 = vmatpush.bf16.msra.mxu2 %v2168_v2  ;;  %v1914_v10 = vor.u32 %v2132_v8, %v1911_v9  ;;  %v1783_v14 = vld [vmem:[%s2473_s26 + $0x18] sm:$0xf0]  ;;  %v1919_v18 = vld [vmem:[%s2473_s26 + $0x128] sm:$0xf0]  ;;  %v1773_v21 = vld [vmem:[%s2473_s26] sm:$0xf] }
  0x12   : > { %2063 = vmatmul.msk.bf16.vlgmr.msra.gmra.mxu1 %vm784_vm0, %v1778_v6  ;;  %v1786_v15 = vor.u32 %v2100_v13, %v1783_v14  ;;  %v1922_v19 = vor.u32 %v2134_v17, %v1919_v18  ;;  %v2099_v22 = vld [vmem:[%s2473_s26 + $0x4] sm:$0xf0]  ;;  %v1901_v23 = vld [vmem:[%s2473_s26 + $0x100] sm:$0xf]  ;;  %v2102_v27 = vld [vmem:[%s2473_s26 + $0x24] sm:$0xf] }
  0x13   : > { %2080 = vmatmul.msk.bf16.vlgmr.msra.gmra.mxu3 %vm784_vm0, %v1914_v10  ;;  %v2131_v24 = vld [vmem:[%s2473_s26 + $0x104] sm:$0xf0]  ;;  %v1774_v25 = vor.u32 %v2099_v22, %v1773_v21  ;;  %v1791_v28 = vld [vmem:[%s2473_s26 + $0x28] sm:$0xf0]  ;;  %v2136_v30 = vld [vmem:[%s2473_s26 + $0x134] sm:$0xf] }
  0x14   : > { %v1902_v26 = vor.u32 %v2131_v24, %v1901_v23  ;;  %v1794_v29 = vor.u32 %v2102_v27, %v1791_v28  ;;  %v1927_v31 = vld [vmem:[%s2473_s26 + $0x138] sm:$0xf0]  ;;  %v1781_v33 = vld [vmem:[%s2473_s26 + $0x10] sm:$0xf]  ;;  %v2101_v34 = vld [vmem:[%s2473_s26 + $0x14] sm:$0xf0] }
  0x15   : > { %883 = vmatpush.bf16.msra.mxu0 %v2167_v3  ;;  %2364 = vmatpush.bf16.msra.mxu2 %v2167_v3  ;;  %v1930_v32 = vor.u32 %v2136_v30, %v1927_v31  ;;  %v1909_v35 = vld [vmem:[%s2473_s26 + $0x110] sm:$0xf]  ;;  %v2133_v36 = vld [vmem:[%s2473_s26 + $0x114] sm:$0xf0]  ;;  %v1782_v37 = vor.u32 %v2101_v34, %v1781_v33  ;;  %v2104_v39 = vld [vmem:[%s2473_s26 + $0x34] sm:$0xf] }
  0x16   : > { %v1910_v38 = vor.u32 %v2133_v36, %v1909_v35  ;;  %v1799_v40 = vld [vmem:[%s2473_s26 + $0x38] sm:$0xf0]  ;;  %v2138_v42 = vld [vmem:[%s2473_s26 + $0x144] sm:$0xf]  ;;  %v1935_v43 = vld [vmem:[%s2473_s26 + $0x148] sm:$0xf0] }
  0x17   : > { %v1802_v41 = vor.u32 %v2104_v39, %v1799_v40  ;;  %v1938_v44 = vor.u32 %v2138_v42, %v1935_v43  ;;  %v1789_v45 = vld [vmem:[%s2473_s26 + $0x20] sm:$0xf]  ;;  %v2103_v46 = vld [vmem:[%s2473_s26 + $0x24] sm:$0xf0]  ;;  %v2106_v51 = vld [vmem:[%s2473_s26 + $0x44] sm:$0xf] }
  0x18   : > { %v1917_v47 = vld [vmem:[%s2473_s26 + $0x120] sm:$0xf]  ;;  %v2135_v48 = vld [vmem:[%s2473_s26 + $0x124] sm:$0xf0]  ;;  %v1790_v49 = vor.u32 %v2103_v46, %v1789_v45  ;;  %v1807_v52 = vld [vmem:[%s2473_s26 + $0x48] sm:$0xf0] }
  0x19   : > { %884 = vmatpush.bf16.msra.mxu0 %v2166_v7  ;;  %2365 = vmatpush.bf16.msra.mxu2 %v2166_v7  ;;  %v1918_v50 = vor.u32 %v2135_v48, %v1917_v47  ;;  %v1810_v53 = vor.u32 %v2106_v51, %v1807_v52  ;;  %v2140_v54 = vld [vmem:[%s2473_s26 + $0x154] sm:$0xf]  ;;  %v1943_v55 = vld [vmem:[%s2473_s26 + $0x158] sm:$0xf0]  ;;  %v1797_v57 = vld [vmem:[%s2473_s26 + $0x30] sm:$0xf] }
  0x1a   : > { %v1946_v56 = vor.u32 %v2140_v54, %v1943_v55  ;;  %v2105_v58 = vld [vmem:[%s2473_s26 + $0x34] sm:$0xf0]  ;;  %v1925_v59 = vld [vmem:[%s2473_s26 + $0x130] sm:$0xf]  ;;  %v2108_v63 = vld [vmem:[%s2473_s26 + $0x54] sm:$0xf] }
  0x1b   : > { %v2137_v60 = vld [vmem:[%s2473_s26 + $0x134] sm:$0xf0]  ;;  %v1798_v61 = vor.u32 %v2105_v58, %v1797_v57  ;;  %v1815_v0 = vld [vmem:[%s2473_s26 + $0x58] sm:$0xf0]  ;;  %v2142_v2 = vld [vmem:[%s2473_s26 + $0x164] sm:$0xf] }
  0x1c   : > { %v1926_v62 = vor.u32 %v2137_v60, %v1925_v59  ;;  %v1818_v1 = vor.u32 %v2108_v63, %v1815_v0  ;;  %v1951_v3 = vld [vmem:[%s2473_s26 + $0x168] sm:$0xf0]  ;;  %v1805_v5 = vld [vmem:[%s2473_s26 + $0x40] sm:$0xf]  ;;  %v2107_v6 = vld [vmem:[%s2473_s26 + $0x44] sm:$0xf0] }
  0x1d   : > { %885 = vmatpush.bf16.msra.mxu0 %v2165_v11  ;;  %2366 = vmatpush.bf16.msra.mxu2 %v2165_v11  ;;  %v1954_v4 = vor.u32 %v2142_v2, %v1951_v3  ;;  %v1933_v7 = vld [vmem:[%s2473_s26 + $0x140] sm:$0xf]  ;;  %v2139_v8 = vld [vmem:[%s2473_s26 + $0x144] sm:$0xf0]  ;;  %v1806_v9 = vor.u32 %v2107_v6, %v1805_v5  ;;  %v2110_v11 = vld [vmem:[%s2473_s26 + $0x64] sm:$0xf] }
  0x1e   : > { %v1934_v10 = vor.u32 %v2139_v8, %v1933_v7  ;;  %v2144_v14 = vld [vmem:[%s2473_s26 + $0x174] sm:$0xf]  ;;  %v1813_v17 = vld [vmem:[%s2473_s26 + $0x50] sm:$0xf]  ;;  %v2109_v18 = vld [vmem:[%s2473_s26 + $0x54] sm:$0xf0] }
  0x1f   : > { %v1814_v21 = vor.u32 %v2109_v18, %v1813_v17  ;;  %v2112_v23 = vld [vmem:[%s2473_s26 + $0x74] sm:$0xf]  ;;  %v1831_v24 = vld [vmem:[%s2473_s26 + $0x78] sm:$0xf0]  ;;  %v1967_v27 = vld [vmem:[%s2473_s26 + $0x188] sm:$0xf0] }
  0x20   : > { %v2111_v30 = vld [vmem:[%s2473_s26 + $0x64] sm:$0xf0]  ;;  %v1949_v31 = vld [vmem:[%s2473_s26 + $0x160] sm:$0xf]  ;;  %v2114_v35 = vld [vmem:[%s2473_s26 + $0x84] sm:$0xf] }
  0x21   : > { %886 = vmatpush.bf16.msra.mxu0 %v2164_v12  ;;  %2367 = vmatpush.bf16.msra.mxu2 %v2164_v12  ;;  %v1823_v12 = vld [vmem:[%s2473_s26 + $0x68] sm:$0xf0]  ;;  %v2148_v39 = vld [vmem:[%s2473_s26 + $0x194] sm:$0xf]  ;;  %v1975_v40 = vld [vmem:[%s2473_s26 + $0x198] sm:$0xf0] }
  0x22   : > { %2064 = vmatmul.msk.bf16.gmra.mxu1 %vm784_vm0, %v1786_v15  ;;  %v1826_v13 = vor.u32 %v2110_v11, %v1823_v12  ;;  %v1959_v15 = vld [vmem:[%s2473_s26 + $0x178] sm:$0xf0]  ;;  %v1839_v36 = vld [vmem:[%s2473_s26 + $0x88] sm:$0xf0]  ;;  %v1829_v42 = vld [vmem:[%s2473_s26 + $0x70] sm:$0xf] }
  0x23   : > { %2081 = vmatmul.msk.bf16.gmra.mxu3 %vm784_vm0, %v1922_v19  ;;  %v1941_v19 = vld [vmem:[%s2473_s26 + $0x150] sm:$0xf]  ;;  %v2113_v43 = vld [vmem:[%s2473_s26 + $0x74] sm:$0xf0]  ;;  %v1847_v51 = vld [vmem:[%s2473_s26 + $0x98] sm:$0xf0] }
  0x24   : > { %v2145_v45 = vld [vmem:[%s2473_s26 + $0x174] sm:$0xf0]  ;;  %v1830_v46 = vor.u32 %v2113_v43, %v1829_v42  ;;  %v2150_v54 = vld [vmem:[%s2473_s26 + $0x1a4] sm:$0xf]  ;;  %v1983_v55 = vld [vmem:[%s2473_s26 + $0x1a8] sm:$0xf0] }
  0x25   : > { %887 = vmatpush.bf16.msra.mxu0 %v2163_v16  ;;  %2368 = vmatpush.bf16.msra.mxu2 %v2163_v16  ;;  %v1962_v16 = vor.u32 %v2144_v14, %v1959_v15  ;;  %v1986_v57 = vor.u32 %v2150_v54, %v1983_v55  ;;  %v1837_v58 = vld [vmem:[%s2473_s26 + $0x80] sm:$0xf]  ;;  %v2115_v59 = vld [vmem:[%s2473_s26 + $0x84] sm:$0xf0]  ;;  %v2118_v5 = vld [vmem:[%s2473_s26 + $0xa4] sm:$0xf] }
  0x26   : > { %v1965_v60 = vld [vmem:[%s2473_s26 + $0x180] sm:$0xf]  ;;  %v1855_v6 = vld [vmem:[%s2473_s26 + $0xa8] sm:$0xf0]  ;;  %v1991_v14 = vld [vmem:[%s2473_s26 + $0x1b8] sm:$0xf0] }
  0x27   : > { %v1845_v18 = vld [vmem:[%s2473_s26 + $0x90] sm:$0xf] }
  0x29   : > { %888 = vmatpush.bf16.msra.mxu0 %v2162_v20  ;;  %2369 = vmatpush.bf16.msra.mxu2 %v2162_v20  ;;  %v2141_v20 = vld [vmem:[%s2473_s26 + $0x154] sm:$0xf0] }
  0x2a   : > { %v1942_v22 = vor.u32 %v2141_v20, %v1941_v19  ;;  %v2117_v19 = vld [vmem:[%s2473_s26 + $0x94] sm:$0xf0] }
  0x2c   : > { %889 = vmatmul.bf16.vlgmr.msra.gmra.mxu0 %v1774_v25  ;;  %969 = vmatmul.bf16.vlgmr.msra.gmra.mxu2 %v1902_v26  ;;  %v1834_v25 = vor.u32 %v2112_v23, %v1831_v24  ;;  %v2146_v26 = vld [vmem:[%s2473_s26 + $0x184] sm:$0xf]  ;;  %v2149_v23 = vld [vmem:[%s2473_s26 + $0x194] sm:$0xf0] }
  0x2d   : > { %v1970_v28 = vor.u32 %v2146_v26, %v1967_v27  ;;  %v1846_v26 = vor.u32 %v2117_v19, %v1845_v18 }
  0x32   : > { %2065 = vmatmul.msk.bf16.gmra.mxu1 %vm784_vm0, %v1794_v29  ;;  %v1821_v29 = vld [vmem:[%s2473_s26 + $0x60] sm:$0xf] }
  0x33   : > { %2082 = vmatmul.msk.bf16.gmra.mxu3 %vm784_vm0, %v1930_v32  ;;  %v2143_v32 = vld [vmem:[%s2473_s26 + $0x164] sm:$0xf0]  ;;  %v1822_v33 = vor.u32 %v2111_v30, %v1821_v29 }
  0x34   : > { %v1950_v34 = vor.u32 %v2143_v32, %v1949_v31  ;;  %v2120_v32 = vld [vmem:[%s2473_s26 + $0xb4] sm:$0xf] }
  0x3c   : > { %894 = vmatmul.bf16.gmra.mxu0 %v1782_v37  ;;  %974 = vmatmul.bf16.gmra.mxu2 %v1910_v38  ;;  %v1842_v37 = vor.u32 %v2114_v35, %v1839_v36 }
  0x42   : > { %2066 = vmatmul.msk.bf16.gmra.mxu1 %vm784_vm0, %v1802_v41  ;;  %v1978_v41 = vor.u32 %v2148_v39, %v1975_v40  ;;  %v2154_v40 = vld [vmem:[%s2473_s26 + $0x1c4] sm:$0xf] }
  0x43   : > { %2083 = vmatmul.msk.bf16.gmra.mxu3 %vm784_vm0, %v1938_v44  ;;  %v1957_v44 = vld [vmem:[%s2473_s26 + $0x170] sm:$0xf] }
  0x44   : > { %v1958_v47 = vor.u32 %v2145_v45, %v1957_v44 }
  0x4c   : > { %899 = vmatmul.bf16.gmra.mxu0 %v1790_v49  ;;  %979 = vmatmul.bf16.gmra.mxu2 %v1918_v50  ;;  %v2116_v50 = vld [vmem:[%s2473_s26 + $0x94] sm:$0xf] }
  0x4d   : > { %v1850_v52 = vor.u32 %v2116_v50, %v1847_v51  ;;  %v1981_v51 = vld [vmem:[%s2473_s26 + $0x1a0] sm:$0xf] }
  0x52   : > { %2067 = vmatmul.msk.bf16.gmra.mxu1 %vm784_vm0, %v1810_v53 }
  0x53   : > { %2084 = vmatmul.msk.bf16.gmra.mxu3 %vm784_vm0, %v1946_v56 }
  0x5c   : > { %904 = vmatmul.bf16.gmra.mxu0 %v1798_v61  ;;  %984 = vmatmul.bf16.gmra.mxu2 %v1926_v62  ;;  %v2147_v61 = vld [vmem:[%s2473_s26 + $0x184] sm:$0xf0]  ;;  %v1838_v62 = vor.u32 %v2115_v59, %v1837_v58 }
  0x5d   : > { %v1966_v0 = vor.u32 %v2147_v61, %v1965_v60 }
  0x62   : > { %2068 = vmatmul.msk.bf16.gmra.mxu1 %vm784_vm0, %v1818_v1 }
  0x63   : > { %2085 = vmatmul.msk.bf16.gmra.mxu3 %vm784_vm0, %v1954_v4  ;;  %v2598_v4 = vld [vmem:[%s2834_s2] ss:$0 sm:$0xff] }
  0x6c   : > { %909 = vmatmul.bf16.gmra.mxu0 %v1806_v9  ;;  %989 = vmatmul.bf16.gmra.mxu2 %v1934_v10  ;;  %v1858_v9 = vor.u32 %v2118_v5, %v1855_v6  ;;  %v1871_v5 = vld [vmem:[%s2473_s26 + $0xc8] sm:$0xf0] }
  0x72   : > { %2069 = vmatmul.msk.bf16.gmra.mxu1 %vm784_vm0, %v1826_v13  ;;  %v2152_v13 = vld [vmem:[%s2473_s26 + $0x1b4] sm:$0xf] }
  0x73   : > { %2086 = vmatmul.msk.bf16.gmra.mxu3 %vm784_vm0, %v1962_v16  ;;  %v1994_v17 = vor.u32 %v2152_v13, %v1991_v14  ;;  %v2156_v14 = vld [vmem:[%s2473_s26 + $0x1d4] sm:$0xf] }
  0x7c   : > { %914 = vmatmul.bf16.gmra.mxu0 %v1814_v21  ;;  %994 = vmatmul.bf16.gmra.mxu2 %v1942_v22  ;;  %v1973_v22 = vld [vmem:[%s2473_s26 + $0x190] sm:$0xf] }
  0x82   : > { %2070 = vmatmul.msk.bf16.gmra.mxu1 %vm784_vm0, %v1834_v25 }
  0x83   : > { %2087 = vmatmul.msk.bf16.gmra.mxu3 %vm784_vm0, %v1970_v28  ;;  %v1974_v28 = vor.u32 %v2149_v23, %v1973_v22 }
  0x8c   : > { %919 = vmatmul.bf16.gmra.mxu0 %v1822_v33  ;;  %999 = vmatmul.bf16.gmra.mxu2 %v1950_v34  ;;  %v1863_v33 = vld [vmem:[%s2473_s26 + $0xb8] sm:$0xf0] }
  0x8d   : > { %v1866_v36 = vor.u32 %v2120_v32, %v1863_v33 }
  0x8f   : > { %v1059_v38 = vpop.f32.mrf.mxu1 }
  0x92   : > { %2071 = vmatmul.msk.bf16.gmra.mxu1 %vm784_vm0, %v1842_v37 }
  0x93   : > { %2088 = vmatmul.msk.bf16.gmra.mxu3 %vm784_vm0, %v1978_v41  ;;  %v1999_v41 = vld [vmem:[%s2473_s26 + $0x1c8] sm:$0xf0] }
  0x94   : > { %v2002_v44 = vor.u32 %v2154_v40, %v1999_v41  ;;  %v2124_v41 = vld [vmem:[%s2473_s26 + $0xd4] sm:$0xf] }
  0x96   : > { %v2579_v49 = vpop.f32.mrf.mxu3 }
  0x97   : > { %v1061_v48 = vpop.f32.mrf.mxu1 }
  0x9c   : > { %924 = vmatmul.bf16.gmra.mxu0 %v1830_v46  ;;  %1004 = vmatmul.bf16.gmra.mxu2 %v1958_v47  ;;  %v1853_v46 = vld [vmem:[%s2473_s26 + $0xa0] sm:$0xf]  ;;  %v2119_v47 = vld [vmem:[%s2473_s26 + $0xa4] sm:$0xf0] }
  0x9d   : > { %v1854_v55 = vor.u32 %v2119_v47, %v1853_v46 }
  0x9e   : > { %v2585_v56 = vpop.f32.mrf.mxu3 }
  0x9f   : > { %v1064_v53 = vpop.f32.mrf.mxu1 }
  0xa2   : > { %2072 = vmatmul.msk.bf16.gmra.mxu1 %vm784_vm0, %v1850_v52  ;;  %v2151_v52 = vld [vmem:[%s2473_s26 + $0x1a4] sm:$0xf0] }
  0xa3   : > { %2089 = vmatmul.msk.bf16.gmra.mxu3 %vm784_vm0, %v1986_v57  ;;  %v1982_v59 = vor.u32 %v2151_v52, %v1981_v51  ;;  %v2158_v51 = vld [vmem:[%s2473_s26 + $0x1e4] sm:$0xf]  ;;  %v2015_v52 = vld [vmem:[%s2473_s26 + $0x1e8] sm:$0xf0] }
  0xa6   : > { %v2593_v2 = vpop.f32.mrf.mxu3 }
  0xa7   : > { %v1066_v1 = vpop.f32.mrf.mxu1 }
  0xa9   : > { %v890_v63 = vpop.f32.mrf.mxu0 }
  0xaa   : > { %v1060_v3 = vadd.f32 %v1059_v38, %v890_v63 }
  0xac   : > { %929 = vmatmul.bf16.gmra.mxu0 %v1838_v62  ;;  %1009 = vmatmul.bf16.gmra.mxu2 %v1966_v0  ;;  %v1418_v10 = vadd.f32 %v2598_v4, %v1060_v3  ;;  %v2122_v3 = vld [vmem:[%s2473_s26 + $0xc4] sm:$0xf] }
  0xae   : > { %v2609_v15 = vpop.f32.mrf.mxu3  ;;  %v1482_v20 = vmax.f32 %v1418_v10, 0.0 }
  0xaf   : > { %v2602_v7 = vpop.f32.mrf.mxu2  ;;  %v2605_v12 = vpop.f32.mrf.mxu1 }
  0xb1   : > { %v892_v8 = vpop.f32.mrf.mxu0 }
  0xb2   : > { %v1062_v11 = vadd.f32 %v1061_v48, %v892_v8  ;;  %2073 = vmatmul.msk.bf16.gmra.mxu1 %vm784_vm0, %v1858_v9  ;;  %v1874_v9 = vor.u32 %v2122_v3, %v1871_v5 }
  0xb3   : > { %2090 = vmatmul.msk.bf16.gmra.mxu3 %vm784_vm0, %v1994_v17 }
  0xb4   : > { %v1419_v16 = vadd.f32 %v2598_v4, %v1062_v11 }
  0xb6   : > { %v1483_v21 = vmax.f32 %v1419_v16, 0.0  ;;  %v2627_v30 = vpop.f32.mrf.mxu3  ;;  %v2007_v16 = vld [vmem:[%s2473_s26 + $0x1d8] sm:$0xf0] }
  0xb7   : > { %v2623_v25 = vpop.f32.mrf.mxu2  ;;  %v1071_v29 = vpop.f32.mrf.mxu1  ;;  %v2010_v18 = vor.u32 %v2156_v14, %v2007_v16  ;;  %v2126_v16 = vld [vmem:[%s2473_s26 + $0xe4] sm:$0xf] }
  0xb8   : > { %v2174_v24 = vpack.c.bf16 %v1483_v21, %v1482_v20  ;;  %v1861_v20 = vld [vmem:[%s2473_s26 + $0xb0] sm:$0xf]  ;;  %v2121_v21 = vld [vmem:[%s2473_s26 + $0xb4] sm:$0xf0] }
  0xb9   : > { %v895_v27 = vpop.f32.mrf.mxu0 }
  0xba   : > { %2175 = vst [vmem:[%s2621_s21] sm:$0xff] %v2174_v24   ;;  %v1065_v31 = vadd.f32 %v1064_v53, %v895_v27  ;;  %v1989_v24 = vld [vmem:[%s2473_s26 + $0x1b0] sm:$0xf] }
  0xbc   : > { %934 = vmatmul.bf16.gmra.mxu0 %v1846_v26  ;;  %1014 = vmatmul.bf16.gmra.mxu2 %v1974_v28  ;;  %v1420_v37 = vadd.f32 %v2598_v4, %v1065_v31  ;;  %v2153_v26 = vld [vmem:[%s2473_s26 + $0x1b4] sm:$0xf0] }
  0xbd   : > { %v1990_v33 = vor.u32 %v2153_v26, %v1989_v24  ;;  %v2160_v24 = vld [vmem:[%s2473_s26 + $0x1f4] sm:$0xf]  ;;  %v2023_v26 = vld [vmem:[%s2473_s26 + $0x1f8] sm:$0xf0] }
  0xbe   : > { %v2636_v42 = vpop.f32.mrf.mxu3  ;;  %v1484_v48 = vmax.f32 %v1420_v37, 0.0 }
  0xbf   : > { %v975_v34 = vpop.f32.mrf.mxu2  ;;  %v2632_v39 = vpop.f32.mrf.mxu1 }
  0xc0   : > { %v1145_v45 = vadd.f32 %v2579_v49, %v975_v34 }
  0xc1   : > { %v897_v35 = vpop.f32.mrf.mxu0 }
  0xc2   : > { %v1067_v38 = vadd.f32 %v1066_v1, %v897_v35  ;;  %2074 = vmatmul.msk.bf16.gmra.mxu1 %vm784_vm0, %v1866_v36  ;;  %v1452_v57 = vadd.f32 %v2598_v4, %v1145_v45 }
  0xc3   : > { %2091 = vmatmul.msk.bf16.gmra.mxu3 %vm784_vm0, %v2002_v44 }
  0xc4   : > { %v1421_v43 = vadd.f32 %v2598_v4, %v1067_v38  ;;  %v1516_v63 = vmax.f32 %v1452_v57, 0.0  ;;  %v1869_v57 = vld [vmem:[%s2473_s26 + $0xc0] sm:$0xf] }
  0xc6   : > { %v1485_v50 = vmax.f32 %v1421_v43, 0.0  ;;  %v2650_v62 = vpop.f32.mrf.mxu3  ;;  %v1879_v43 = vld [vmem:[%s2473_s26 + $0xd8] sm:$0xf0] }
  0xc7   : > { %v977_v54 = vpop.f32.mrf.mxu2  ;;  %v1076_v60 = vpop.f32.mrf.mxu1  ;;  %v1882_v46 = vor.u32 %v2124_v41, %v1879_v43 }
  0xc8   : > { %v2179_v53 = vpack.c.bf16 %v1485_v50, %v1484_v48  ;;  %v1147_v49 = vadd.f32 %v2585_v56, %v977_v54  ;;  %v2018_v54 = vor.u32 %v2158_v51, %v2015_v52  ;;  %v2128_v51 = vld [vmem:[%s2473_s26 + $0xf4] sm:$0xf]  ;;  %v1895_v52 = vld [vmem:[%s2473_s26 + $0xf8] sm:$0xf0] }
  0xc9   : > { %v900_v58 = vpop.f32.mrf.mxu0 }
  0xca   : > { %2331 = vst [vmem:[%s2621_s21 + $0x8] sm:$0xff] %v2179_v53   ;;  %v1453_v61 = vadd.f32 %v2598_v4, %v1147_v49  ;;  %v1070_v1 = vadd.f32 %v2605_v12, %v900_v58  ;;  %v2123_v49 = vld [vmem:[%s2473_s26 + $0xc4] sm:$0xf0] }
  0xcc   : > { %939 = vmatmul.bf16.gmra.mxu0 %v1854_v55  ;;  %v1517_v0 = vmax.f32 %v1453_v61, 0.0  ;;  %1019 = vmatmul.bf16.gmra.mxu2 %v1982_v59  ;;  %v1422_v10 = vadd.f32 %v2598_v4, %v1070_v1  ;;  %v1997_v61 = vld [vmem:[%s2473_s26 + $0x1c0] sm:$0xf]  ;;  %v1870_v1 = vor.u32 %v2123_v49, %v1869_v57  ;;  %v1898_v57 = vor.u32 %v2128_v51, %v1895_v52 }
  0xce   : > { %v2259_v56 = vpack.c.bf16 %v1517_v0, %v1516_v63  ;;  %v2661_v17 = vpop.f32.mrf.mxu3  ;;  %v1486_v22 = vmax.f32 %v1422_v10, 0.0 }
  0xcf   : > { %v980_v6 = vpop.f32.mrf.mxu2  ;;  %v2657_v13 = vpop.f32.mrf.mxu1 }
  0xd0   : > { %2347 = vst [vmem:[%s2621_s21 + $0x88] sm:$0xff] %v2259_v56   ;;  %v1150_v19 = vadd.f32 %v2593_v2, %v980_v6 }
  0xd1   : > { %v902_v8 = vpop.f32.mrf.mxu0 }
  0xd2   : > { %v1072_v11 = vadd.f32 %v1071_v29, %v902_v8  ;;  %2075 = vmatmul.msk.bf16.gmra.mxu1 %vm784_vm0, %v1874_v9  ;;  %v1862_v29 = vor.u32 %v2121_v21, %v1861_v20  ;;  %v1454_v31 = vadd.f32 %v2598_v4, %v1150_v19 }
  0xd3   : > { %2092 = vmatmul.msk.bf16.gmra.mxu3 %vm784_vm0, %v2010_v18 }
  0xd4   : > { %v1423_v12 = vadd.f32 %v2598_v4, %v1072_v11  ;;  %v1518_v37 = vmax.f32 %v1454_v31, 0.0  ;;  %v1877_v31 = vld [vmem:[%s2473_s26 + $0xd0] sm:$0xf] }
  0xd6   : > { %v1487_v23 = vmax.f32 %v1423_v12, 0.0  ;;  %v2675_v36 = vpop.f32.mrf.mxu3  ;;  %v1887_v12 = vld [vmem:[%s2473_s26 + $0xe8] sm:$0xf0] }
  0xd7   : > { %v982_v28 = vpop.f32.mrf.mxu2  ;;  %v1081_v34 = vpop.f32.mrf.mxu1  ;;  %v1890_v20 = vor.u32 %v2126_v16, %v1887_v12 }
  0xd8   : > { %v2184_v27 = vpack.c.bf16 %v1487_v23, %v1486_v22  ;;  %v1152_v2 = vadd.f32 %v2609_v15, %v982_v28  ;;  %v2026_v28 = vor.u32 %v2160_v24, %v2023_v26 }
  0xd9   : > { %v905_v32 = vpop.f32.mrf.mxu0 }
  0xda   : > { %2332 = vst [vmem:[%s2621_s21 + $0x10] sm:$0xff] %v2184_v27   ;;  %v1455_v35 = vadd.f32 %v2598_v4, %v1152_v2  ;;  %v1075_v40 = vadd.f32 %v2632_v39, %v905_v32  ;;  %v2125_v2 = vld [vmem:[%s2473_s26 + $0xd4] sm:$0xf0] }
  0xdc   : > { %944 = vmatmul.bf16.gmra.mxu0 %v1862_v29  ;;  %v1519_v38 = vmax.f32 %v1455_v35, 0.0  ;;  %1024 = vmatmul.bf16.gmra.mxu2 %v1990_v33  ;;  %v1424_v47 = vadd.f32 %v2598_v4, %v1075_v40  ;;  %v2005_v35 = vld [vmem:[%s2473_s26 + $0x1d0] sm:$0xf]  ;;  %v1878_v40 = vor.u32 %v2125_v2, %v1877_v31 }
  0xde   : > { %v2264_v15 = vpack.c.bf16 %v1519_v38, %v1518_v37  ;;  %v2686_v53 = vpop.f32.mrf.mxu3  ;;  %v1488_v58 = vmax.f32 %v1424_v47, 0.0 }
  0xdf   : > { %v985_v44 = vpop.f32.mrf.mxu2  ;;  %v2682_v50 = vpop.f32.mrf.mxu1 }
  0xe0   : > { %2348 = vst [vmem:[%s2621_s21 + $0x90] sm:$0xff] %v2264_v15   ;;  %v1155_v55 = vadd.f32 %v2627_v30, %v985_v44 }
  0xe1   : > { %v907_v45 = vpop.f32.mrf.mxu0 }
  0xe2   : > { %v1077_v48 = vadd.f32 %v1076_v60, %v907_v45  ;;  %2076 = vmatmul.msk.bf16.gmra.mxu1 %vm784_vm0, %v1882_v46  ;;  %v2155_v60 = vld [vmem:[%s2473_s26 + $0x1c4] sm:$0xf0]  ;;  %v1456_v3 = vadd.f32 %v2598_v4, %v1155_v55 }
  0xe3   : > { %2093 = vmatmul.msk.bf16.gmra.mxu3 %vm784_vm0, %v2018_v54  ;;  %v1998_v56 = vor.u32 %v2155_v60, %v1997_v61  ;;  %v1885_v60 = vld [vmem:[%s2473_s26 + $0xe0] sm:$0xf] }
  0xe4   : > { %v1425_v39 = vadd.f32 %v2598_v4, %v1077_v48  ;;  %v1520_v10 = vmax.f32 %v1456_v3, 0.0  ;;  %v2013_v3 = vld [vmem:[%s2473_s26 + $0x1e0] sm:$0xf] }
  0xe6   : > { %v1489_v59 = vmax.f32 %v1425_v39, 0.0  ;;  %v2700_v9 = vpop.f32.mrf.mxu3 }
  0xe7   : > { %v987_v0 = vpop.f32.mrf.mxu2  ;;  %v1086_v6 = vpop.f32.mrf.mxu1 }
  0xe8   : > { %v2189_v63 = vpack.c.bf16 %v1489_v59, %v1488_v58  ;;  %v1157_v30 = vadd.f32 %v2636_v42, %v987_v0 }
  0xe9   : > { %v910_v5 = vpop.f32.mrf.mxu0 }
  0xea   : > { %2333 = vst [vmem:[%s2621_s21 + $0x18] sm:$0xff] %v2189_v63   ;;  %v1457_v8 = vadd.f32 %v2598_v4, %v1157_v30  ;;  %v1080_v14 = vadd.f32 %v2657_v13, %v910_v5  ;;  %v2127_v63 = vld [vmem:[%s2473_s26 + $0xe4] sm:$0xf0] }
  0xeb   : > { %v2159_v30 = vld [vmem:[%s2473_s26 + $0x1e4] sm:$0xf0] }
  0xec   : > { %949 = vmatmul.bf16.gmra.mxu0 %v1870_v1  ;;  %v1521_v11 = vmax.f32 %v1457_v8, 0.0  ;;  %1029 = vmatmul.bf16.gmra.mxu2 %v1998_v56  ;;  %v1426_v21 = vadd.f32 %v2598_v4, %v1080_v14  ;;  %v1886_v8 = vor.u32 %v2127_v63, %v1885_v60  ;;  %v2014_v14 = vor.u32 %v2159_v30, %v2013_v3 }
  0xee   : > { %v2269_v42 = vpack.c.bf16 %v1521_v11, %v1520_v10  ;;  %v2712_v27 = vpop.f32.mrf.mxu3  ;;  %v1490_v32 = vmax.f32 %v1426_v21, 0.0  ;;  %v1903_v21 = vld [vmem:[%s2473_s26 + $0x108] sm:$0xf0] }
  0xef   : > { %v990_v18 = vpop.f32.mrf.mxu2  ;;  %v2707_v23 = vpop.f32.mrf.mxu1 }
  0xf0   : > { %2349 = vst [vmem:[%s2621_s21 + $0x98] sm:$0xff] %v2269_v42   ;;  %v1160_v29 = vadd.f32 %v2650_v62, %v990_v18 }
  0xf1   : > { %v912_v19 = vpop.f32.mrf.mxu0 }
  0xf2   : > { %v1082_v22 = vadd.f32 %v1081_v34, %v912_v19  ;;  %2077 = vmatmul.msk.bf16.gmra.mxu1 %vm784_vm0, %v1890_v20  ;;  %v2157_v34 = vld [vmem:[%s2473_s26 + $0x1d4] sm:$0xf0]  ;;  %v1458_v41 = vadd.f32 %v2598_v4, %v1160_v29  ;;  %v2130_v20 = vld [vmem:[%s2473_s26 + $0x104] sm:$0xf] }
  0xf3   : > { %2094 = vmatmul.msk.bf16.gmra.mxu3 %vm784_vm0, %v2026_v28  ;;  %v2006_v15 = vor.u32 %v2157_v34, %v2005_v35  ;;  %v1906_v26 = vor.u32 %v2130_v20, %v1903_v21 }
  0xf4   : > { %v1427_v13 = vadd.f32 %v2598_v4, %v1082_v22  ;;  %v1522_v46 = vmax.f32 %v1458_v41, 0.0 }
  0xf6   : > { %v1491_v33 = vmax.f32 %v1427_v13, 0.0  ;;  %v2728_v39 = vpop.f32.mrf.mxu3 }
  0xf7   : > { %v992_v38 = vpop.f32.mrf.mxu2  ;;  %v1091_v44 = vpop.f32.mrf.mxu1 }
  0xf8   : > { %v2194_v37 = vpack.c.bf16 %v1491_v33, %v1490_v32  ;;  %v1162_v62 = vadd.f32 %v2661_v17, %v992_v38  ;;  %v1893_v32 = vld [vmem:[%s2473_s26 + $0xf0] sm:$0xf]  ;;  %v2129_v33 = vld [vmem:[%s2473_s26 + $0xf4] sm:$0xf0] }
  0xf9   : > { %v915_v43 = vpop.f32.mrf.mxu0  ;;  %v2161_v38 = vld [vmem:[%s2473_s26 + $0x1f4] sm:$0xf0] }
  0xfa   : > { %2334 = vst [vmem:[%s2621_s21 + $0x20] sm:$0xff] %v2194_v37   ;;  %v1459_v45 = vadd.f32 %v2598_v4, %v1162_v62  ;;  %v1085_v48 = vadd.f32 %v2682_v50, %v915_v43  ;;  %v2021_v37 = vld [vmem:[%s2473_s26 + $0x1f0] sm:$0xf]  ;;  %v1894_v62 = vor.u32 %v2129_v33, %v1893_v32 }
  0xfc   : > { %954 = vmatmul.bf16.gmra.mxu0 %v1878_v40  ;;  %v1523_v47 = vmax.f32 %v1459_v45, 0.0  ;;  %1034 = vmatmul.bf16.gmra.mxu2 %v2006_v15  ;;  %v1428_v49 = vadd.f32 %v2598_v4, %v1085_v48  ;;  %v2022_v45 = vor.u32 %v2161_v38, %v2021_v37 }
  0xfe   : > { %v2274_v17 = vpack.c.bf16 %v1523_v47, %v1522_v46  ;;  %v1492_v0 = vmax.f32 %v1428_v49, 0.0 }
  0xff   : > { %v995_v54 = vpop.f32.mrf.mxu2  ;;  %v1094_v59 = vpop.f32.mrf.mxu1 }
 0x100   : > { %2350 = vst [vmem:[%s2621_s21 + $0xa0] sm:$0xff] %v2274_v17   ;;  %v1165_v50 = vadd.f32 %v2675_v36, %v995_v54 }
 0x101   : > { %v917_v55 = vpop.f32.mrf.mxu0 }
 0x102   : > { %v1087_v58 = vadd.f32 %v1086_v6, %v917_v55  ;;  %2078 = vmatmul.msk.bf16.gmra.mxu1 %vm784_vm0, %v1898_v57  ;;  %v2739_v6 = vpop.f32.mrf.mxu3  ;;  %v1460_v10 = vadd.f32 %v2598_v4, %v1165_v50 }
 0x104   : > { %v1429_v61 = vadd.f32 %v2598_v4, %v1087_v58  ;;  %v1524_v42 = vmax.f32 %v1460_v10, 0.0 }
 0x106   : > { %v1493_v1 = vmax.f32 %v1429_v61, 0.0 }
 0x107   : > { %v997_v56 = vpop.f32.mrf.mxu2  ;;  %v1096_v16 = vpop.f32.mrf.mxu1 }
 0x108   : > { %v2199_v5 = vpack.c.bf16 %v1493_v1, %v1492_v0  ;;  %v1167_v36 = vadd.f32 %v2686_v53, %v997_v56 }
 0x109   : > { %v920_v11 = vpop.f32.mrf.mxu0 }
 0x10a   : > { %2335 = vst [vmem:[%s2621_s21 + $0x28] sm:$0xff] %v2199_v5   ;;  %v1461_v12 = vadd.f32 %v2598_v4, %v1167_v36  ;;  %v1090_v19 = vadd.f32 %v2707_v23, %v920_v11  ;;  %v1179_v31 = vpop.f32.mrf.mxu3 }
 0x10c   : > { %959 = vmatmul.bf16.gmra.mxu0 %v1886_v8  ;;  %v1525_v18 = vmax.f32 %v1461_v12, 0.0  ;;  %1039 = vmatmul.bf16.gmra.mxu2 %v2014_v14  ;;  %v1430_v13 = vadd.f32 %v2598_v4, %v1090_v19 }
 0x10e   : > { %v2279_v22 = vpack.c.bf16 %v1525_v18, %v1524_v42  ;;  %v1494_v35 = vmax.f32 %v1430_v13, 0.0 }
 0x10f   : > { %v1000_v24 = vpop.f32.mrf.mxu2  ;;  %v1099_v29 = vpop.f32.mrf.mxu1 }
 0x110   : > { %2351 = vst [vmem:[%s2621_s21 + $0xa8] sm:$0xff] %v2279_v22   ;;  %v1170_v23 = vadd.f32 %v2700_v9, %v1000_v24 }
 0x111   : > { %v922_v53 = vpop.f32.mrf.mxu0 }
 0x112   : > { %v1092_v28 = vadd.f32 %v1091_v44, %v922_v53  ;;  %2079 = vmatmul.msk.bf16.gmra.mxu1 %vm784_vm0, %v1906_v26  ;;  %v1462_v43 = vadd.f32 %v2598_v4, %v1170_v23  ;;  %v1181_v47 = vpop.f32.mrf.mxu3 }
 0x114   : > { %v1431_v2 = vadd.f32 %v2598_v4, %v1092_v28  ;;  %v1526_v48 = vmax.f32 %v1462_v43, 0.0 }
 0x116   : > { %v1495_v34 = vmax.f32 %v1431_v2, 0.0 }
 0x117   : > { %v1002_v41 = vpop.f32.mrf.mxu2  ;;  %v1101_v9 = vpop.f32.mrf.mxu1 }
 0x118   : > { %v2204_v40 = vpack.c.bf16 %v1495_v34, %v1494_v35  ;;  %v1172_v15 = vadd.f32 %v2712_v27, %v1002_v41 }
 0x119   : > { %v925_v44 = vpop.f32.mrf.mxu0 }
 0x11a   : > { %2336 = vst [vmem:[%s2621_s21 + $0x30] sm:$0xff] %v2204_v40   ;;  %v1463_v46 = vadd.f32 %v2598_v4, %v1172_v15  ;;  %v1095_v52 = vadd.f32 %v1094_v59, %v925_v44  ;;  %v1184_v63 = vpop.f32.mrf.mxu3 }
 0x11c   : > { %964 = vmatmul.bf16.gmra.mxu0 %v1894_v62  ;;  %v1527_v51 = vmax.f32 %v1463_v46, 0.0  ;;  %1044 = vmatmul.bf16.gmra.mxu2 %v2022_v45  ;;  %v1432_v57 = vadd.f32 %v2598_v4, %v1095_v52 }
 0x11e   : > { %v2284_v17 = vpack.c.bf16 %v1527_v51, %v1526_v48  ;;  %v1496_v50 = vmax.f32 %v1432_v57, 0.0 }
 0x11f   : > { %v1005_v54 = vpop.f32.mrf.mxu2  ;;  %v1104_v49 = vpop.f32.mrf.mxu1 }
 0x120   : > { %2352 = vst [vmem:[%s2621_s21 + $0xb0] sm:$0xff] %v2284_v17   ;;  %v1175_v61 = vadd.f32 %v2728_v39, %v1005_v54 }
 0x121   : > { %v927_v55 = vpop.f32.mrf.mxu0 }
 0x122   : > { %v1097_v27 = vadd.f32 %v1096_v16, %v927_v55  ;;  %v1464_v59 = vadd.f32 %v2598_v4, %v1175_v61  ;;  %v1186_v14 = vpop.f32.mrf.mxu3 }
 0x124   : > { %v1433_v58 = vadd.f32 %v2598_v4, %v1097_v27  ;;  %v1528_v8 = vmax.f32 %v1464_v59, 0.0 }
 0x126   : > { %v1497_v60 = vmax.f32 %v1433_v58, 0.0 }
 0x127   : > { %v1007_v1 = vpop.f32.mrf.mxu2  ;;  %v1106_v5 = vpop.f32.mrf.mxu1 }
 0x128   : > { %v2209_v0 = vpack.c.bf16 %v1497_v60, %v1496_v50  ;;  %v1177_v3 = vadd.f32 %v2739_v6, %v1007_v1 }
 0x129   : > { %v930_v30 = vpop.f32.mrf.mxu0 }
 0x12a   : > { %2337 = vst [vmem:[%s2621_s21 + $0x38] sm:$0xff] %v2209_v0   ;;  %v1465_v56 = vadd.f32 %v2598_v4, %v1177_v3  ;;  %v1100_v36 = vadd.f32 %v1099_v29, %v930_v30  ;;  %v1189_v29 = vpop.f32.mrf.mxu3 }
 0x12c   : > { %v1529_v10 = vmax.f32 %v1465_v56, 0.0  ;;  %v1434_v12 = vadd.f32 %v2598_v4, %v1100_v36 }
 0x12e   : > { %v2289_v11 = vpack.c.bf16 %v1529_v10, %v1528_v8  ;;  %v1498_v20 = vmax.f32 %v1434_v12, 0.0 }
 0x12f   : > { %v1010_v39 = vpop.f32.mrf.mxu2  ;;  %v1109_v18 = vpop.f32.mrf.mxu1 }
 0x130   : > { %2353 = vst [vmem:[%s2621_s21 + $0xb8] sm:$0xff] %v2289_v11   ;;  %v1180_v19 = vadd.f32 %v1179_v31, %v1010_v39 }
 0x131   : > { %v932_v16 = vpop.f32.mrf.mxu0 }
 0x132   : > { %v1102_v42 = vadd.f32 %v1101_v9, %v932_v16  ;;  %v1466_v53 = vadd.f32 %v2598_v4, %v1180_v19  ;;  %v1191_v62 = vpop.f32.mrf.mxu3 }
 0x134   : > { %v1435_v6 = vadd.f32 %v2598_v4, %v1102_v42  ;;  %v1530_v23 = vmax.f32 %v1466_v53, 0.0 }
 0x136   : > { %v1499_v21 = vmax.f32 %v1435_v6, 0.0 }
 0x137   : > { %v1012_v24 = vpop.f32.mrf.mxu2  ;;  %v1111_v28 = vpop.f32.mrf.mxu1 }
 0x138   : > { %v2214_v22 = vpack.c.bf16 %v1499_v21, %v1498_v20  ;;  %v1182_v26 = vadd.f32 %v1181_v47, %v1012_v24 }
 0x139   : > { %v935_v13 = vpop.f32.mrf.mxu0 }
 0x13a   : > { %2338 = vst [vmem:[%s2621_s21 + $0x40] sm:$0xff] %v2214_v22   ;;  %v1467_v2 = vadd.f32 %v2598_v4, %v1182_v26  ;;  %v1105_v33 = vadd.f32 %v1104_v49, %v935_v13  ;;  %v1194_v57 = vpop.f32.mrf.mxu3 }
 0x13c   : > { %v1531_v32 = vmax.f32 %v1467_v2, 0.0  ;;  %v1436_v37 = vadd.f32 %v2598_v4, %v1105_v33 }
 0x13e   : > { %v2294_v35 = vpack.c.bf16 %v1531_v32, %v1530_v23  ;;  %v1500_v15 = vmax.f32 %v1436_v37, 0.0 }
 0x13f   : > { %v1015_v34 = vpop.f32.mrf.mxu2  ;;  %v1114_v40 = vpop.f32.mrf.mxu1 }
 0x140   : > { %2354 = vst [vmem:[%s2621_s21 + $0xc0] sm:$0xff] %v2294_v35   ;;  %v1185_v43 = vadd.f32 %v1184_v63, %v1015_v34 }
 0x141   : > { %v937_v31 = vpop.f32.mrf.mxu0 }
 0x142   : > { %v1107_v38 = vadd.f32 %v1106_v5, %v937_v31  ;;  %v1468_v46 = vadd.f32 %v2598_v4, %v1185_v43  ;;  %v1196_v5 = vpop.f32.mrf.mxu3 }
 0x144   : > { %v1437_v41 = vadd.f32 %v2598_v4, %v1107_v38  ;;  %v1532_v17 = vmax.f32 %v1468_v46, 0.0 }
 0x146   : > { %v1501_v44 = vmax.f32 %v1437_v41, 0.0 }
 0x147   : > { %v1017_v9 = vpop.f32.mrf.mxu2  ;;  %v1116_v51 = vpop.f32.mrf.mxu1 }
 0x148   : > { %v2219_v45 = vpack.c.bf16 %v1501_v44, %v1500_v15  ;;  %v1187_v47 = vadd.f32 %v1186_v14, %v1017_v9 }
 0x149   : > { %v940_v48 = vpop.f32.mrf.mxu0 }
 0x14a   : > { %2339 = vst [vmem:[%s2621_s21 + $0x48] sm:$0xff] %v2219_v45   ;;  %v1469_v52 = vadd.f32 %v2598_v4, %v1187_v47  ;;  %v1110_v55 = vadd.f32 %v1109_v18, %v940_v48  ;;  %v1199_v21 = vpop.f32.mrf.mxu3 }
 0x14c   : > { %v1533_v54 = vmax.f32 %v1469_v52, 0.0  ;;  %v1438_v61 = vadd.f32 %v2598_v4, %v1110_v55 }
 0x14e   : > { %v2299_v27 = vpack.c.bf16 %v1533_v54, %v1532_v17  ;;  %v1502_v1 = vmax.f32 %v1438_v61, 0.0 }
 0x14f   : > { %v1020_v49 = vpop.f32.mrf.mxu2  ;;  %v1119_v60 = vpop.f32.mrf.mxu1 }
 0x150   : > { %2355 = vst [vmem:[%s2621_s21 + $0xc8] sm:$0xff] %v2299_v27   ;;  %v1190_v0 = vadd.f32 %v1189_v29, %v1020_v49 }
 0x151   : > { %v942_v58 = vpop.f32.mrf.mxu0 }
 0x152   : > { %v1112_v50 = vadd.f32 %v1111_v28, %v942_v58  ;;  %v1470_v56 = vadd.f32 %v2598_v4, %v1190_v0  ;;  %v1201_v35 = vpop.f32.mrf.mxu3 }
 0x154   : > { %v1439_v63 = vadd.f32 %v2598_v4, %v1112_v50  ;;  %v1534_v39 = vmax.f32 %v1470_v56, 0.0 }
 0x156   : > { %v1503_v59 = vmax.f32 %v1439_v63, 0.0 }
 0x157   : > { %v1022_v30 = vpop.f32.mrf.mxu2  ;;  %v1121_v36 = vpop.f32.mrf.mxu1 }
 0x158   : > { %v2224_v3 = vpack.c.bf16 %v1503_v59, %v1502_v1  ;;  %v1192_v8 = vadd.f32 %v1191_v62, %v1022_v30 }
 0x159   : > { %v945_v10 = vpop.f32.mrf.mxu0 }
 0x15a   : > { %2340 = vst [vmem:[%s2621_s21 + $0x50] sm:$0xff] %v2224_v3   ;;  %v1471_v11 = vadd.f32 %v2598_v4, %v1192_v8  ;;  %v1115_v16 = vadd.f32 %v1114_v40, %v945_v10  ;;  %v1204_v47 = vpop.f32.mrf.mxu3 }
 0x15c   : > { %v1535_v14 = vmax.f32 %v1471_v11, 0.0  ;;  %v1440_v6 = vadd.f32 %v2598_v4, %v1115_v16 }
 0x15e   : > { %v2304_v12 = vpack.c.bf16 %v1535_v14, %v1534_v39  ;;  %v1504_v53 = vmax.f32 %v1440_v6, 0.0 }
 0x15f   : > { %v1025_v42 = vpop.f32.mrf.mxu2  ;;  %v1124_v20 = vpop.f32.mrf.mxu1 }
 0x160   : > { %2356 = vst [vmem:[%s2621_s21 + $0xd0] sm:$0xff] %v2304_v12   ;;  %v1195_v24 = vadd.f32 %v1194_v57, %v1025_v42 }
 0x161   : > { %v947_v18 = vpop.f32.mrf.mxu0 }
 0x162   : > { %v1117_v19 = vadd.f32 %v1116_v51, %v947_v18  ;;  %v1472_v29 = vadd.f32 %v2598_v4, %v1195_v24 }
 0x164   : > { %v1441_v22 = vadd.f32 %v2598_v4, %v1117_v19  ;;  %v1536_v34 = vmax.f32 %v1472_v29, 0.0 }
 0x166   : > { %v1505_v26 = vmax.f32 %v1441_v22, 0.0 }
 0x167   : > { %v1027_v28 = vpop.f32.mrf.mxu2  ;;  %v1126_v32 = vpop.f32.mrf.mxu1 }
 0x168   : > { %v2229_v13 = vpack.c.bf16 %v1505_v26, %v1504_v53  ;;  %v1197_v2 = vadd.f32 %v1196_v5, %v1027_v28 }
 0x169   : > { %v950_v23 = vpop.f32.mrf.mxu0 }
 0x16a   : > { %2341 = vst [vmem:[%s2621_s21 + $0x58] sm:$0xff] %v2229_v13   ;;  %v1473_v33 = vadd.f32 %v2598_v4, %v1197_v2  ;;  %v1120_v37 = vadd.f32 %v1119_v60, %v950_v23  ;;  %v1206_v60 = vpop.f32.mrf.mxu3 }
 0x16c   : > { %v1537_v31 = vmax.f32 %v1473_v33, 0.0  ;;  %v1442_v62 = vadd.f32 %v2598_v4, %v1120_v37 }
 0x16e   : > { %v2309_v38 = vpack.c.bf16 %v1537_v31, %v1536_v34  ;;  %v1506_v9 = vmax.f32 %v1442_v62, 0.0 }
 0x16f   : > { %v1030_v40 = vpop.f32.mrf.mxu2  ;;  %v1129_v15 = vpop.f32.mrf.mxu1 }
 0x170   : > { %2357 = vst [vmem:[%s2621_s21 + $0xd8] sm:$0xff] %v2309_v38   ;;  %v1200_v45 = vadd.f32 %v1199_v21, %v1030_v40 }
 0x171   : > { %v952_v41 = vpop.f32.mrf.mxu0 }
 0x172   : > { %v1122_v43 = vadd.f32 %v1121_v36, %v952_v41  ;;  %v1474_v52 = vadd.f32 %v2598_v4, %v1200_v45  ;;  %v1209_v14 = vpop.f32.mrf.mxu3 }
 0x174   : > { %v1443_v44 = vadd.f32 %v2598_v4, %v1122_v43  ;;  %v1538_v27 = vmax.f32 %v1474_v52, 0.0 }
 0x176   : > { %v1507_v46 = vmax.f32 %v1443_v44, 0.0 }
 0x177   : > { %v1032_v51 = vpop.f32.mrf.mxu2  ;;  %v1131_v55 = vpop.f32.mrf.mxu1 }
 0x178   : > { %v2234_v48 = vpack.c.bf16 %v1507_v46, %v1506_v9  ;;  %v1202_v17 = vadd.f32 %v1201_v35, %v1032_v51 }
 0x179   : > { %v955_v54 = vpop.f32.mrf.mxu0 }
 0x17a   : > { %2342 = vst [vmem:[%s2621_s21 + $0x60] sm:$0xff] %v2234_v48   ;;  %v1475_v57 = vadd.f32 %v2598_v4, %v1202_v17  ;;  %v1125_v58 = vadd.f32 %v1124_v20, %v955_v54  ;;  %v1211_v26 = vpop.f32.mrf.mxu3 }
 0x17c   : > { %v1539_v49 = vmax.f32 %v1475_v57, 0.0  ;;  %v1444_v0 = vadd.f32 %v2598_v4, %v1125_v58 }
 0x17e   : > { %v2314_v61 = vpack.c.bf16 %v1539_v49, %v1538_v27  ;;  %v1508_v5 = vmax.f32 %v1444_v0, 0.0 }
 0x17f   : > { %v1035_v50 = vpop.f32.mrf.mxu2  ;;  %v1134_v59 = vpop.f32.mrf.mxu1 }
 0x180   : > { %2358 = vst [vmem:[%s2621_s21 + $0xe0] sm:$0xff] %v2314_v61   ;;  %v1205_v30 = vadd.f32 %v1204_v47, %v1035_v50 }
 0x181   : > { %v957_v63 = vpop.f32.mrf.mxu0 }
 0x182   : > { %v1127_v1 = vadd.f32 %v1126_v32, %v957_v63  ;;  %v1476_v36 = vadd.f32 %v2598_v4, %v1205_v30 }
 0x184   : > { %v1445_v3 = vadd.f32 %v2598_v4, %v1127_v1  ;;  %v1540_v42 = vmax.f32 %v1476_v36, 0.0 }
 0x186   : > { %v1509_v56 = vmax.f32 %v1445_v3, 0.0 }
 0x187   : > { %v1037_v10 = vpop.f32.mrf.mxu2  ;;  %v1136_v16 = vpop.f32.mrf.mxu1 }
 0x188   : > { %v2239_v8 = vpack.c.bf16 %v1509_v56, %v1508_v5  ;;  %v1207_v11 = vadd.f32 %v1206_v60, %v1037_v10 }
 0x189   : > { %v960_v39 = vpop.f32.mrf.mxu0 }
 0x18a   : > { %2343 = vst [vmem:[%s2621_s21 + $0x68] sm:$0xff] %v2239_v8   ;;  %v1477_v12 = vadd.f32 %v2598_v4, %v1207_v11  ;;  %v1130_v6 = vadd.f32 %v1129_v15, %v960_v39  ;;  %v1214_v15 = vpop.f32.mrf.mxu3 }
 0x18c   : > { %v1541_v18 = vmax.f32 %v1477_v12, 0.0  ;;  %v1446_v22 = vadd.f32 %v2598_v4, %v1130_v6 }
 0x18e   : > { %v2319_v19 = vpack.c.bf16 %v1541_v18, %v1540_v42  ;;  %v1510_v29 = vmax.f32 %v1446_v22, 0.0 }
 0x18f   : > { %v1040_v20 = vpop.f32.mrf.mxu2  ;;  %v1139_v53 = vpop.f32.mrf.mxu1 }
 0x190   : > { %2359 = vst [vmem:[%s2621_s21 + $0xe8] sm:$0xff] %v2319_v19   ;;  %v1210_v28 = vadd.f32 %v1209_v14, %v1040_v20  ;;  %v1140_v23 = vadd.f32 %v1139_v53, %v2602_v7 }
 0x191   : > { %v962_v21 = vpop.f32.mrf.mxu0 }
 0x192   : > { %v1132_v24 = vadd.f32 %v1131_v55, %v962_v21  ;;  %v1478_v35 = vadd.f32 %v2598_v4, %v1210_v28  ;;  %v1450_v38 = vadd.f32 %v2598_v4, %v1140_v23  ;;  %v1216_v27 = vpop.f32.mrf.mxu3 }
 0x194   : > { %v1447_v13 = vadd.f32 %v2598_v4, %v1132_v24  ;;  %v1542_v62 = vmax.f32 %v1478_v35, 0.0  ;;  %v1514_v45 = vmax.f32 %v1450_v38, 0.0 }
 0x196   : > { %v1511_v2 = vmax.f32 %v1447_v13, 0.0 }
 0x197   : > { %v1042_v33 = vpop.f32.mrf.mxu2  ;;  %v1141_v37 = vpop.f32.mrf.mxu1 }
 0x198   : > { %v2244_v32 = vpack.c.bf16 %v1511_v2, %v1510_v29  ;;  %v1212_v34 = vadd.f32 %v1211_v26, %v1042_v33  ;;  %v1142_v41 = vadd.f32 %v1141_v37, %v2623_v25 }
 0x199   : > { %v965_v31 = vpop.f32.mrf.mxu0 }
 0x19a   : > { %2344 = vst [vmem:[%s2621_s21 + $0x70] sm:$0xff] %v2244_v32   ;;  %v1479_v40 = vadd.f32 %v2598_v4, %v1212_v34  ;;  %v1451_v7 = vadd.f32 %v2598_v4, %v1142_v41  ;;  %v1135_v44 = vadd.f32 %v1134_v59, %v965_v31 }
 0x19c   : > { %v1543_v43 = vmax.f32 %v1479_v40, 0.0  ;;  %v1515_v46 = vmax.f32 %v1451_v7, 0.0  ;;  %v1448_v52 = vadd.f32 %v2598_v4, %v1135_v44 }
 0x19e   : > { %v2324_v9 = vpack.c.bf16 %v1543_v43, %v1542_v62  ;;  %v2254_v48 = vpack.c.bf16 %v1515_v46, %v1514_v45  ;;  %v1512_v55 = vmax.f32 %v1448_v52, 0.0 }
 0x19f   : > { %v1045_v47 = vpop.f32.mrf.mxu2 }
 0x1a0   : > { %2360 = vst [vmem:[%s2621_s21 + $0xf0] sm:$0xff] %v2324_v9   ;;  %v1215_v54 = vadd.f32 %v1214_v15, %v1045_v47 }
 0x1a1   : > { %v967_v51 = vpop.f32.mrf.mxu0  ;;  %2346 = vst [vmem:[%s2621_s21 + $0x80] sm:$0xff] %v2254_v48  }
 0x1a2   : > { %v1137_v17 = vadd.f32 %v1136_v16, %v967_v51  ;;  %v1480_v61 = vadd.f32 %v2598_v4, %v1215_v54 }
 0x1a4   : > { %v1449_v25 = vadd.f32 %v2598_v4, %v1137_v17  ;;  %v1544_v63 = vmax.f32 %v1480_v61, 0.0 }
 0x1a6   : > { %v1513_v57 = vmax.f32 %v1449_v25, 0.0 }
 0x1a7   : > { %v1047_v58 = vpop.f32.mrf.mxu2 }
 0x1a8   : > { %v2249_v49 = vpack.c.bf16 %v1513_v57, %v1512_v55  ;;  %v1217_v50 = vadd.f32 %v1216_v27, %v1047_v58 }
 0x1aa   : > { %2345 = vst [vmem:[%s2621_s21 + $0x78] sm:$0xff] %v2249_v49   ;;  %v1481_v60 = vadd.f32 %v2598_v4, %v1217_v50 }
 0x1ac   : > { %v1545_v0 = vmax.f32 %v1481_v60, 0.0 }
 0x1ae   : > { %v2329_v1 = vpack.c.bf16 %v1545_v0, %v1544_v63 }
 0x1b0   : > { %2361 = vst [vmem:[%s2621_s21 + $0xf8] sm:$0xff] %v2329_v1  }
 0x1b1 PF: > { %s13_s14 = sadd.s32 1, %s2418_s14   ;;  %s2836_s12 = smov %s2414_s13 }
 0x1b2   : > { %p10_p5 = scmp.ge.s32.totalorder %s13_s14, 6   ;;  %s2837_s13 = smov %s2839_s15 }
 0x1b4   :  { %12 = sbr.rel (!%p10_p5) target bundleno = 2 (0x2), region = 73 }

// kernel: tile.68
= control target key start
LH: loop header
LB: loop body
LE: loop exit
PB: predicated region body
PF: predicated region fallthrough
CT: control target
= control target key end

     0   :  { %s22_s0 = inlined_call_operand.vmem [shape: f32[3], index: 0, kind: input, shape index: {}]   ;;  %s23_s1 = inlined_call_operand.vmem [shape: f32[4,3], index: 1, kind: output, shape index: {}]  }
   0x1   :  { %v4_v0 = vld [vmem:[%s22_s0] ss:$0 sm:$0xff] }
   0x2   :  { %5 = vst [vmem:[%s23_s1] sm:$0xf] %v4_v0 }

// kernel: tile.69
= control target key start
LH: loop header
LB: loop body
LE: loop exit
PB: predicated region body
PF: predicated region fallthrough
CT: control target
= control target key end

     0   :  { %s37_s8 = smov 3   ;;  %s38_s9 = smov 6   ;;  %vm7_vm0 = vcmask 23552   ;;  %vm13_vm1 = vcmask 97352   ;;  %vm19_vm2 = vcmask 72752   ;;  %vm25_vm3 = vcmask 48152   ;;  %s55_s0 = inlined_call_operand.vmem [shape: f32[4,3], index: 0, kind: input, shape index: {}]   ;;  %s56_s1 = inlined_call_operand.vmem [shape: f32[12], index: 1, kind: output, shape index: {}]  }
   0x1   :  { %v4_v0 = vld [vmem:[%s55_s0] sm:$0xf]  ;;  %s36_s0 = smov 9  }
   0x2   :  { %5 = vst [vmem:[#allocation1] sm:$0xf] %v4_v0 }
   0x9   :  { %v10_v1 = vld [vmem:[#allocation1 + $0x3] sm:$0x1]   ;;  %v22_v2 = vld [vmem:[#allocation1 + $0x1] sm:$0x1]   ;;  %v16_v3 = vld [vmem:[#allocation1 + $0x2] sm:$0x1]  }
   0xa   :  { %11 = vrot.lane.b32.xlu0 %v10_v1, %s36_s0  ;;  %23 = vrot.lane.b32.xlu1 %v22_v2, %s37_s8  ;;  %v6_v4 = vld [vmem:[#allocation1] sm:$0x1]  }
   0xb   :  { %8 = vst.msk [vmem:[#allocation0] sm:$0x1] %vm7_vm0, %v6_v4  }
  0x12   :  { %17 = vrot.lane.b32.xlu0 %v16_v3, %s38_s9 }
  0x7c   :  { %v12_v5 = vpop.permute.xlu0 %11   ;;  %v24_v6 = vpop.permute.xlu1 %23  }
  0x7d   :  { %14 = vst.msk [vmem:[#allocation0] sm:$0x1] %vm13_vm1, %v12_v5  }
  0x84   :  { %v18_v7 = vpop.permute.xlu0 %17  }
  0x85   :  { %20 = vst.msk [vmem:[#allocation0] sm:$0x1] %vm19_vm2, %v18_v7  }
  0x86   :  { %26 = vst.msk [vmem:[#allocation0] sm:$0x1] %vm25_vm3, %v24_v6  }
  0x8d   :  { %v29_v8 = vld [vmem:[#allocation0] sm:$0x1] }
  0x8e   :  { %32 = vst [vmem:[%s56_s1] sm:$0x1] %v29_v8 }

// kernel: generator_forward.11
= control target key start
LH: loop header
LB: loop body
LE: loop exit
PB: predicated region body
PF: predicated region fallthrough
CT: control target
= control target key end

     0   :  { %s1792_s12 = smov 0   ;;  %s1794_s13 = smov 0   ;;  %s2045_s0 = inlined_call_operand.vmem [shape: bf16[8192,72], index: 0, kind: input, shape index: {}]   ;;  %s2046_s1 = inlined_call_operand.vmem [shape: bf16[72,128], index: 1, kind: input, shape index: {}]   ;;  %s2047_s2 = inlined_call_operand.vmem [shape: f32[1,128], index: 2, kind: input, shape index: {}]   ;;  %s2048_s3 = inlined_call_operand.vmem [shape: f32[8192,128], index: 3, kind: output, shape index: {}]  }
   0x1   :  { %s1796_s14 = smov 0  }
   0x2 LB: > { %s25_s15 = sadd.s32 1, %s1766_s13  ;;  %p1361_p0 = scmp.ge.s32.totalorder %s1770_s14, 1  ;;  %s1770_s14 = sphi %s1796_s14, %s13_s14   ;;  %s1766_s13 = sphi %s1794_s13, %s2050_s13   ;;  %s1762_s12 = sphi %s1792_s12, %s2049_s12  }
   0x3   : > { %p27_p1 = scmp.ge.s32.totalorder %s25_s15, 16  ;;  %p166_p2 = scmp.lt.s32.totalorder %s1770_s14, 17 }
   0x5   : > { %s2052_s15 = smov (%p27_p1, %s25_s15), 0  ;;  %p167_p3 = pnand %p1361_p0, %p166_p2 }
   0x6   : > { %s1362_s18 = sshll.u32 (!%p167_p3), %s1762_s12, 6 }
   0x7   : > { %170 = sbr.rel (%p167_p3) target bundleno = 301 (0x12d), region = 32  ;;  %p199_p4 = scmp.lt.s32.totalorder (!%p167_p3), %s1362_s18, 1023 }
   0xc   : > { %v424_v0 = vld [vmem:[%s2046_s1 + $0x20] sm:$0xf]  ;;  %vm709_vm0 = vcmask 1043456   ;;  %v1579_v4 = vld [vmem:[%s2046_s1 + $0x18] sm:$0xff]  ;;  %v1578_v5 = vld [vmem:[%s2046_s1 + $0x10] sm:$0xff]  ;;  %s2054_s18 = smov (!%p199_p4, %s1362_s18), 1023 }
   0xd   : > { %v602_v1 = vunpack.c.l.b16 %v424_v0  ;;  %v1577_v6 = vld [vmem:[%s2046_s1 + $0x8] sm:$0xff]  ;;  %s1363_s25 = sshll.u32 %s2054_s18, 2  ;;  %v1576_v7 = vld [vmem:[%s2046_s1] sm:$0xff]  ;;  %vm612_vm1 = vcmask 588800   ;;  %s1365_s6 = sshll.u32 %s2054_s18, 3 }
   0xe   : > { %s1831_s30 = scalar_lea.vmem %s2045_s0, %s1363_s25  ;;  %v1900_v40 = vld [vmem:[%s2047_s2] ss:$0 sm:$0xff]  ;;  %s1908_s9 = scalar_lea.vmem %s2048_s3, %s1365_s6 }
   0xf   : > { %v607_v2 = vpack.c.b16 %v602_v1, %v602_v1  ;;  %v1544_v8 = vld [vmem:[%s1831_s30] sm:$0xff]  ;;  %v1545_v12 = vld [vmem:[%s1831_s30 + $0x8] sm:$0xff]  ;;  %v1546_v16 = vld [vmem:[%s1831_s30 + $0x10] sm:$0xff] }
  0x10   : > { %v1552_v9 = vld [vmem:[%s1831_s30 + $0x40] sm:$0xff]  ;;  %v1553_v13 = vld [vmem:[%s1831_s30 + $0x48] sm:$0xff]  ;;  %v1554_v17 = vld [vmem:[%s1831_s30 + $0x50] sm:$0xff] }
  0x11   : > { %v711_v3 = vsel %vm709_vm0, %v607_v2, 0  ;;  %v1560_v10 = vld [vmem:[%s1831_s30 + $0x80] sm:$0xff]  ;;  %v1561_v14 = vld [vmem:[%s1831_s30 + $0x88] sm:$0xff]  ;;  %v1562_v18 = vld [vmem:[%s1831_s30 + $0x90] sm:$0xff] }
  0x12   : > { %716 = vmatpush.bf16.msra.mxu0 %v711_v3  ;;  %1580 = vmatpush.bf16.msra.mxu1 %v711_v3  ;;  %v1568_v11 = vld [vmem:[%s1831_s30 + $0xc0] sm:$0xff]  ;;  %v1569_v15 = vld [vmem:[%s1831_s30 + $0xc8] sm:$0xff]  ;;  %v1570_v19 = vld [vmem:[%s1831_s30 + $0xd0] sm:$0xff] }
  0x13   : > { %1581 = vmatpush.bf16.msra.mxu2 %v711_v3  ;;  %1582 = vmatpush.bf16.msra.mxu3 %v711_v3  ;;  %v1547_v20 = vld [vmem:[%s1831_s30 + $0x18] sm:$0xff]  ;;  %v1548_v24 = vld [vmem:[%s1831_s30 + $0x20] sm:$0xff]  ;;  %v1549_v28 = vld [vmem:[%s1831_s30 + $0x28] sm:$0xff] }
  0x14   : > { %v1555_v21 = vld [vmem:[%s1831_s30 + $0x58] sm:$0xff]  ;;  %v1556_v25 = vld [vmem:[%s1831_s30 + $0x60] sm:$0xff]  ;;  %v1557_v29 = vld [vmem:[%s1831_s30 + $0x68] sm:$0xff] }
  0x15   : > { %v1563_v22 = vld [vmem:[%s1831_s30 + $0x98] sm:$0xff]  ;;  %v1564_v26 = vld [vmem:[%s1831_s30 + $0xa0] sm:$0xff]  ;;  %v1565_v30 = vld [vmem:[%s1831_s30 + $0xa8] sm:$0xff] }
  0x16   : > { %717 = vmatpush.bf16.msra.mxu0 %v1579_v4  ;;  %1583 = vmatpush.bf16.msra.mxu1 %v1579_v4  ;;  %v1571_v23 = vld [vmem:[%s1831_s30 + $0xd8] sm:$0xff]  ;;  %v1572_v27 = vld [vmem:[%s1831_s30 + $0xe0] sm:$0xff]  ;;  %v1573_v31 = vld [vmem:[%s1831_s30 + $0xe8] sm:$0xff] }
  0x17   : > { %1584 = vmatpush.bf16.msra.mxu2 %v1579_v4  ;;  %1585 = vmatpush.bf16.msra.mxu3 %v1579_v4  ;;  %v1550_v32 = vld [vmem:[%s1831_s30 + $0x30] sm:$0xff]  ;;  %v1551_v36 = vld [vmem:[%s1831_s30 + $0x38] sm:$0xff] }
  0x18   : > { %v1558_v33 = vld [vmem:[%s1831_s30 + $0x70] sm:$0xff]  ;;  %v1559_v37 = vld [vmem:[%s1831_s30 + $0x78] sm:$0xff] }
  0x19   : > { %v1566_v34 = vld [vmem:[%s1831_s30 + $0xb0] sm:$0xff]  ;;  %v1567_v38 = vld [vmem:[%s1831_s30 + $0xb8] sm:$0xff] }
  0x1a   : > { %718 = vmatpush.bf16.msra.mxu0 %v1578_v5  ;;  %1586 = vmatpush.bf16.msra.mxu1 %v1578_v5  ;;  %v1574_v35 = vld [vmem:[%s1831_s30 + $0xf0] sm:$0xff]  ;;  %v1575_v39 = vld [vmem:[%s1831_s30 + $0xf8] sm:$0xff] }
  0x1b   : > { %1587 = vmatpush.bf16.msra.mxu2 %v1578_v5  ;;  %1588 = vmatpush.bf16.msra.mxu3 %v1578_v5 }
  0x1e   : > { %719 = vmatpush.bf16.msra.mxu0 %v1577_v6  ;;  %1589 = vmatpush.bf16.msra.mxu1 %v1577_v6 }
  0x1f   : > { %1590 = vmatpush.bf16.msra.mxu2 %v1577_v6  ;;  %1591 = vmatpush.bf16.msra.mxu3 %v1577_v6 }
  0x22   : > { %720 = vmatpush.bf16.msra.mxu0 %v1576_v7  ;;  %1592 = vmatpush.bf16.msra.mxu1 %v1576_v7 }
  0x23   : > { %1593 = vmatpush.bf16.msra.mxu2 %v1576_v7  ;;  %1594 = vmatpush.bf16.msra.mxu3 %v1576_v7 }
  0x25   : > { %1510 = vmatmul.msk.bf16.vlgmr.msra.gmra.mxu0 %vm612_vm1, %v1544_v8  ;;  %1518 = vmatmul.msk.bf16.vlgmr.msra.gmra.mxu1 %vm612_vm1, %v1552_v9 }
  0x26   : > { %1526 = vmatmul.msk.bf16.vlgmr.msra.gmra.mxu2 %vm612_vm1, %v1560_v10  ;;  %1534 = vmatmul.msk.bf16.vlgmr.msra.gmra.mxu3 %vm612_vm1, %v1568_v11 }
  0x35   : > { %1511 = vmatmul.msk.bf16.gmra.mxu0 %vm612_vm1, %v1545_v12  ;;  %1519 = vmatmul.msk.bf16.gmra.mxu1 %vm612_vm1, %v1553_v13 }
  0x36   : > { %1527 = vmatmul.msk.bf16.gmra.mxu2 %vm612_vm1, %v1561_v14  ;;  %1535 = vmatmul.msk.bf16.gmra.mxu3 %vm612_vm1, %v1569_v15 }
  0x45   : > { %1512 = vmatmul.msk.bf16.gmra.mxu0 %vm612_vm1, %v1546_v16  ;;  %1520 = vmatmul.msk.bf16.gmra.mxu1 %vm612_vm1, %v1554_v17 }
  0x46   : > { %1528 = vmatmul.msk.bf16.gmra.mxu2 %vm612_vm1, %v1562_v18  ;;  %1536 = vmatmul.msk.bf16.gmra.mxu3 %vm612_vm1, %v1570_v19 }
  0x55   : > { %1513 = vmatmul.msk.bf16.gmra.mxu0 %vm612_vm1, %v1547_v20  ;;  %1521 = vmatmul.msk.bf16.gmra.mxu1 %vm612_vm1, %v1555_v21 }
  0x56   : > { %1529 = vmatmul.msk.bf16.gmra.mxu2 %vm612_vm1, %v1563_v22  ;;  %1537 = vmatmul.msk.bf16.gmra.mxu3 %vm612_vm1, %v1571_v23 }
  0x65   : > { %1514 = vmatmul.msk.bf16.gmra.mxu0 %vm612_vm1, %v1548_v24  ;;  %1522 = vmatmul.msk.bf16.gmra.mxu1 %vm612_vm1, %v1556_v25 }
  0x66   : > { %1530 = vmatmul.msk.bf16.gmra.mxu2 %vm612_vm1, %v1564_v26  ;;  %1538 = vmatmul.msk.bf16.gmra.mxu3 %vm612_vm1, %v1572_v27 }
  0x75   : > { %1515 = vmatmul.msk.bf16.gmra.mxu0 %vm612_vm1, %v1549_v28  ;;  %1523 = vmatmul.msk.bf16.gmra.mxu1 %vm612_vm1, %v1557_v29 }
  0x76   : > { %1531 = vmatmul.msk.bf16.gmra.mxu2 %vm612_vm1, %v1565_v30  ;;  %1539 = vmatmul.msk.bf16.gmra.mxu3 %vm612_vm1, %v1573_v31 }
  0x85   : > { %1516 = vmatmul.msk.bf16.gmra.mxu0 %vm612_vm1, %v1550_v32  ;;  %1524 = vmatmul.msk.bf16.gmra.mxu1 %vm612_vm1, %v1558_v33 }
  0x86   : > { %1532 = vmatmul.msk.bf16.gmra.mxu2 %vm612_vm1, %v1566_v34  ;;  %1540 = vmatmul.msk.bf16.gmra.mxu3 %vm612_vm1, %v1574_v35 }
  0x95   : > { %1517 = vmatmul.msk.bf16.gmra.mxu0 %vm612_vm1, %v1551_v36  ;;  %1525 = vmatmul.msk.bf16.gmra.mxu1 %vm612_vm1, %v1559_v37 }
  0x96   : > { %1533 = vmatmul.msk.bf16.gmra.mxu2 %vm612_vm1, %v1567_v38  ;;  %1541 = vmatmul.msk.bf16.gmra.mxu3 %vm612_vm1, %v1575_v39 }
  0xa2   : > { %v722_v41 = vpop.f32.mrf.mxu0  ;;  %v762_v42 = vpop.f32.mrf.mxu1 }
  0xa3   : > { %v1081_v43 = vadd.f32 %v1900_v40, %v722_v41  ;;  %v1097_v44 = vadd.f32 %v1900_v40, %v762_v42 }
  0xa5   : > { %1620 = vtanh.f32 %v1081_v43 }
  0xa6   : > { %1622 = vtanh.f32 %v1097_v44 }
  0xa9   : > { %v802_v45 = vpop.f32.mrf.mxu2  ;;  %v842_v46 = vpop.f32.mrf.mxu3 }
  0xaa   : > { %v1113_v47 = vadd.f32 %v1900_v40, %v802_v45  ;;  %v1129_v48 = vadd.f32 %v1900_v40, %v842_v46  ;;  %v724_v49 = vpop.f32.mrf.mxu0  ;;  %v764_v50 = vpop.f32.mrf.mxu1 }
  0xab   : > { %v1621_v51 = vpop.eup %1620  ;;  %v1082_v52 = vadd.f32 %v1900_v40, %v724_v49  ;;  %v1098_v53 = vadd.f32 %v1900_v40, %v764_v50 }
  0xac   : > { %v1623_v54 = vpop.eup %1622  ;;  %1209 = vst [vmem:[%s1908_s9] sm:$0xff] %v1621_v51  ;;  %1624 = vtanh.f32 %v1113_v47 }
  0xad   : > { %1225 = vst [vmem:[%s1908_s9 + $0x80] sm:$0xff] %v1623_v54  ;;  %1626 = vtanh.f32 %v1129_v48 }
  0xae   : > { %1628 = vtanh.f32 %v1082_v52 }
  0xaf   : > { %1630 = vtanh.f32 %v1098_v53 }
  0xb1   : > { %v804_v55 = vpop.f32.mrf.mxu2  ;;  %v844_v56 = vpop.f32.mrf.mxu3 }
  0xb2   : > { %v1625_v57 = vpop.eup %1624  ;;  %v1114_v58 = vadd.f32 %v1900_v40, %v804_v55  ;;  %v1130_v59 = vadd.f32 %v1900_v40, %v844_v56  ;;  %v727_v60 = vpop.f32.mrf.mxu0 }
  0xb3   : > { %v767_v61 = vpop.f32.mrf.mxu1  ;;  %v1627_v62 = vpop.eup %1626  ;;  %1241 = vst [vmem:[%s1908_s9 + $0x100] sm:$0xff] %v1625_v57  ;;  %v1083_v63 = vadd.f32 %v1900_v40, %v727_v60 }
  0xb4   : > { %v1099_v0 = vadd.f32 %v1900_v40, %v767_v61  ;;  %v1629_v1 = vpop.eup %1628  ;;  %1257 = vst [vmem:[%s1908_s9 + $0x180] sm:$0xff] %v1627_v62  ;;  %1632 = vtanh.f32 %v1114_v58 }
  0xb5   : > { %v1631_v2 = vpop.eup %1630  ;;  %1210 = vst [vmem:[%s1908_s9 + $0x8] sm:$0xff] %v1629_v1  ;;  %1634 = vtanh.f32 %v1130_v59 }
  0xb6   : > { %1226 = vst [vmem:[%s1908_s9 + $0x88] sm:$0xff] %v1631_v2  ;;  %1636 = vtanh.f32 %v1083_v63 }
  0xb7   : > { %1638 = vtanh.f32 %v1099_v0 }
  0xb9   : > { %v807_v3 = vpop.f32.mrf.mxu2  ;;  %v847_v4 = vpop.f32.mrf.mxu3 }
  0xba   : > { %v1633_v5 = vpop.eup %1632  ;;  %v1115_v6 = vadd.f32 %v1900_v40, %v807_v3  ;;  %v1131_v7 = vadd.f32 %v1900_v40, %v847_v4  ;;  %v729_v8 = vpop.f32.mrf.mxu0 }
  0xbb   : > { %v769_v9 = vpop.f32.mrf.mxu1  ;;  %v1635_v10 = vpop.eup %1634  ;;  %1242 = vst [vmem:[%s1908_s9 + $0x108] sm:$0xff] %v1633_v5  ;;  %v1084_v11 = vadd.f32 %v1900_v40, %v729_v8 }
  0xbc   : > { %v1100_v12 = vadd.f32 %v1900_v40, %v769_v9  ;;  %v1637_v13 = vpop.eup %1636  ;;  %1258 = vst [vmem:[%s1908_s9 + $0x188] sm:$0xff] %v1635_v10  ;;  %1640 = vtanh.f32 %v1115_v6 }
  0xbd   : > { %v1639_v14 = vpop.eup %1638  ;;  %1211 = vst [vmem:[%s1908_s9 + $0x10] sm:$0xff] %v1637_v13  ;;  %1642 = vtanh.f32 %v1131_v7 }
  0xbe   : > { %1227 = vst [vmem:[%s1908_s9 + $0x90] sm:$0xff] %v1639_v14  ;;  %1644 = vtanh.f32 %v1084_v11 }
  0xbf   : > { %1646 = vtanh.f32 %v1100_v12 }
  0xc1   : > { %v809_v15 = vpop.f32.mrf.mxu2  ;;  %v849_v16 = vpop.f32.mrf.mxu3 }
  0xc2   : > { %v1641_v17 = vpop.eup %1640  ;;  %v1116_v18 = vadd.f32 %v1900_v40, %v809_v15  ;;  %v1132_v19 = vadd.f32 %v1900_v40, %v849_v16  ;;  %v732_v20 = vpop.f32.mrf.mxu0 }
  0xc3   : > { %v772_v21 = vpop.f32.mrf.mxu1  ;;  %v1643_v22 = vpop.eup %1642  ;;  %1243 = vst [vmem:[%s1908_s9 + $0x110] sm:$0xff] %v1641_v17  ;;  %v1085_v23 = vadd.f32 %v1900_v40, %v732_v20 }
  0xc4   : > { %v1101_v24 = vadd.f32 %v1900_v40, %v772_v21  ;;  %v1645_v25 = vpop.eup %1644  ;;  %1259 = vst [vmem:[%s1908_s9 + $0x190] sm:$0xff] %v1643_v22  ;;  %1648 = vtanh.f32 %v1116_v18 }
  0xc5   : > { %v1647_v26 = vpop.eup %1646  ;;  %1212 = vst [vmem:[%s1908_s9 + $0x18] sm:$0xff] %v1645_v25  ;;  %1650 = vtanh.f32 %v1132_v19 }
  0xc6   : > { %1228 = vst [vmem:[%s1908_s9 + $0x98] sm:$0xff] %v1647_v26  ;;  %1652 = vtanh.f32 %v1085_v23 }
  0xc7   : > { %1654 = vtanh.f32 %v1101_v24 }
  0xc9   : > { %v812_v27 = vpop.f32.mrf.mxu2  ;;  %v852_v28 = vpop.f32.mrf.mxu3 }
  0xca   : > { %v1649_v29 = vpop.eup %1648  ;;  %v1117_v30 = vadd.f32 %v1900_v40, %v812_v27  ;;  %v1133_v31 = vadd.f32 %v1900_v40, %v852_v28  ;;  %v734_v32 = vpop.f32.mrf.mxu0 }
  0xcb   : > { %v774_v33 = vpop.f32.mrf.mxu1  ;;  %v1651_v34 = vpop.eup %1650  ;;  %1244 = vst [vmem:[%s1908_s9 + $0x118] sm:$0xff] %v1649_v29  ;;  %v1086_v35 = vadd.f32 %v1900_v40, %v734_v32 }
  0xcc   : > { %v1102_v36 = vadd.f32 %v1900_v40, %v774_v33  ;;  %v1653_v37 = vpop.eup %1652  ;;  %1260 = vst [vmem:[%s1908_s9 + $0x198] sm:$0xff] %v1651_v34  ;;  %1656 = vtanh.f32 %v1117_v30 }
  0xcd   : > { %v1655_v38 = vpop.eup %1654  ;;  %1213 = vst [vmem:[%s1908_s9 + $0x20] sm:$0xff] %v1653_v37  ;;  %1658 = vtanh.f32 %v1133_v31 }
  0xce   : > { %1229 = vst [vmem:[%s1908_s9 + $0xa0] sm:$0xff] %v1655_v38  ;;  %1660 = vtanh.f32 %v1086_v35 }
  0xcf   : > { %1662 = vtanh.f32 %v1102_v36 }
  0xd1   : > { %v814_v39 = vpop.f32.mrf.mxu2  ;;  %v854_v41 = vpop.f32.mrf.mxu3 }
  0xd2   : > { %v1657_v42 = vpop.eup %1656  ;;  %v1118_v43 = vadd.f32 %v1900_v40, %v814_v39  ;;  %v1134_v44 = vadd.f32 %v1900_v40, %v854_v41  ;;  %v737_v45 = vpop.f32.mrf.mxu0 }
  0xd3   : > { %v777_v46 = vpop.f32.mrf.mxu1  ;;  %v1659_v47 = vpop.eup %1658  ;;  %1245 = vst [vmem:[%s1908_s9 + $0x120] sm:$0xff] %v1657_v42  ;;  %v1087_v48 = vadd.f32 %v1900_v40, %v737_v45 }
  0xd4   : > { %v1103_v49 = vadd.f32 %v1900_v40, %v777_v46  ;;  %v1661_v50 = vpop.eup %1660  ;;  %1261 = vst [vmem:[%s1908_s9 + $0x1a0] sm:$0xff] %v1659_v47  ;;  %1664 = vtanh.f32 %v1118_v43 }
  0xd5   : > { %v1663_v51 = vpop.eup %1662  ;;  %1214 = vst [vmem:[%s1908_s9 + $0x28] sm:$0xff] %v1661_v50  ;;  %1666 = vtanh.f32 %v1134_v44 }
  0xd6   : > { %1230 = vst [vmem:[%s1908_s9 + $0xa8] sm:$0xff] %v1663_v51  ;;  %1668 = vtanh.f32 %v1087_v48 }
  0xd7   : > { %1670 = vtanh.f32 %v1103_v49 }
  0xd9   : > { %v817_v52 = vpop.f32.mrf.mxu2  ;;  %v857_v53 = vpop.f32.mrf.mxu3 }
  0xda   : > { %v1665_v54 = vpop.eup %1664  ;;  %v1119_v55 = vadd.f32 %v1900_v40, %v817_v52  ;;  %v1135_v56 = vadd.f32 %v1900_v40, %v857_v53  ;;  %v739_v57 = vpop.f32.mrf.mxu0 }
  0xdb   : > { %v779_v58 = vpop.f32.mrf.mxu1  ;;  %v1667_v59 = vpop.eup %1666  ;;  %1246 = vst [vmem:[%s1908_s9 + $0x128] sm:$0xff] %v1665_v54  ;;  %v1088_v60 = vadd.f32 %v1900_v40, %v739_v57 }
  0xdc   : > { %v1104_v61 = vadd.f32 %v1900_v40, %v779_v58  ;;  %v1669_v62 = vpop.eup %1668  ;;  %1262 = vst [vmem:[%s1908_s9 + $0x1a8] sm:$0xff] %v1667_v59  ;;  %1672 = vtanh.f32 %v1119_v55 }
  0xdd   : > { %v1671_v63 = vpop.eup %1670  ;;  %1215 = vst [vmem:[%s1908_s9 + $0x30] sm:$0xff] %v1669_v62  ;;  %1674 = vtanh.f32 %v1135_v56 }
  0xde   : > { %1231 = vst [vmem:[%s1908_s9 + $0xb0] sm:$0xff] %v1671_v63  ;;  %1676 = vtanh.f32 %v1088_v60 }
  0xdf   : > { %1678 = vtanh.f32 %v1104_v61 }
  0xe1   : > { %v819_v0 = vpop.f32.mrf.mxu2  ;;  %v859_v1 = vpop.f32.mrf.mxu3 }
  0xe2   : > { %v1673_v2 = vpop.eup %1672  ;;  %v1120_v3 = vadd.f32 %v1900_v40, %v819_v0  ;;  %v1136_v4 = vadd.f32 %v1900_v40, %v859_v1  ;;  %v742_v5 = vpop.f32.mrf.mxu0 }
  0xe3   : > { %v782_v6 = vpop.f32.mrf.mxu1  ;;  %v1675_v7 = vpop.eup %1674  ;;  %1247 = vst [vmem:[%s1908_s9 + $0x130] sm:$0xff] %v1673_v2  ;;  %v1089_v8 = vadd.f32 %v1900_v40, %v742_v5 }
  0xe4   : > { %v1105_v9 = vadd.f32 %v1900_v40, %v782_v6  ;;  %v1677_v10 = vpop.eup %1676  ;;  %1263 = vst [vmem:[%s1908_s9 + $0x1b0] sm:$0xff] %v1675_v7  ;;  %1680 = vtanh.f32 %v1120_v3 }
  0xe5   : > { %v1679_v11 = vpop.eup %1678  ;;  %1216 = vst [vmem:[%s1908_s9 + $0x38] sm:$0xff] %v1677_v10  ;;  %1682 = vtanh.f32 %v1136_v4 }
  0xe6   : > { %1232 = vst [vmem:[%s1908_s9 + $0xb8] sm:$0xff] %v1679_v11  ;;  %1684 = vtanh.f32 %v1089_v8 }
  0xe7   : > { %1686 = vtanh.f32 %v1105_v9 }
  0xe9   : > { %v822_v12 = vpop.f32.mrf.mxu2  ;;  %v862_v13 = vpop.f32.mrf.mxu3 }
  0xea   : > { %v1681_v14 = vpop.eup %1680  ;;  %v1121_v15 = vadd.f32 %v1900_v40, %v822_v12  ;;  %v1137_v16 = vadd.f32 %v1900_v40, %v862_v13  ;;  %v744_v17 = vpop.f32.mrf.mxu0 }
  0xeb   : > { %v784_v18 = vpop.f32.mrf.mxu1  ;;  %v1683_v19 = vpop.eup %1682  ;;  %1248 = vst [vmem:[%s1908_s9 + $0x138] sm:$0xff] %v1681_v14  ;;  %v1090_v20 = vadd.f32 %v1900_v40, %v744_v17 }
  0xec   : > { %v1106_v21 = vadd.f32 %v1900_v40, %v784_v18  ;;  %v1685_v22 = vpop.eup %1684  ;;  %1264 = vst [vmem:[%s1908_s9 + $0x1b8] sm:$0xff] %v1683_v19  ;;  %1688 = vtanh.f32 %v1121_v15 }
  0xed   : > { %v1687_v23 = vpop.eup %1686  ;;  %1217 = vst [vmem:[%s1908_s9 + $0x40] sm:$0xff] %v1685_v22  ;;  %1690 = vtanh.f32 %v1137_v16 }
  0xee   : > { %1233 = vst [vmem:[%s1908_s9 + $0xc0] sm:$0xff] %v1687_v23  ;;  %1692 = vtanh.f32 %v1090_v20 }
  0xef   : > { %1694 = vtanh.f32 %v1106_v21 }
  0xf1   : > { %v824_v24 = vpop.f32.mrf.mxu2  ;;  %v864_v25 = vpop.f32.mrf.mxu3 }
  0xf2   : > { %v1689_v26 = vpop.eup %1688  ;;  %v1122_v27 = vadd.f32 %v1900_v40, %v824_v24  ;;  %v1138_v28 = vadd.f32 %v1900_v40, %v864_v25  ;;  %v747_v29 = vpop.f32.mrf.mxu0 }
  0xf3   : > { %v787_v30 = vpop.f32.mrf.mxu1  ;;  %v1691_v31 = vpop.eup %1690  ;;  %1249 = vst [vmem:[%s1908_s9 + $0x140] sm:$0xff] %v1689_v26  ;;  %v1091_v32 = vadd.f32 %v1900_v40, %v747_v29 }
  0xf4   : > { %v1107_v33 = vadd.f32 %v1900_v40, %v787_v30  ;;  %v1693_v34 = vpop.eup %1692  ;;  %1265 = vst [vmem:[%s1908_s9 + $0x1c0] sm:$0xff] %v1691_v31  ;;  %1696 = vtanh.f32 %v1122_v27 }
  0xf5   : > { %v1695_v35 = vpop.eup %1694  ;;  %1218 = vst [vmem:[%s1908_s9 + $0x48] sm:$0xff] %v1693_v34  ;;  %1698 = vtanh.f32 %v1138_v28 }
  0xf6   : > { %1234 = vst [vmem:[%s1908_s9 + $0xc8] sm:$0xff] %v1695_v35  ;;  %1700 = vtanh.f32 %v1091_v32 }
  0xf7   : > { %1702 = vtanh.f32 %v1107_v33 }
  0xf9   : > { %v827_v36 = vpop.f32.mrf.mxu2  ;;  %v867_v37 = vpop.f32.mrf.mxu3 }
  0xfa   : > { %v1697_v38 = vpop.eup %1696  ;;  %v1123_v39 = vadd.f32 %v1900_v40, %v827_v36  ;;  %v1139_v41 = vadd.f32 %v1900_v40, %v867_v37  ;;  %v749_v42 = vpop.f32.mrf.mxu0 }
  0xfb   : > { %v789_v43 = vpop.f32.mrf.mxu1  ;;  %v1699_v44 = vpop.eup %1698  ;;  %1250 = vst [vmem:[%s1908_s9 + $0x148] sm:$0xff] %v1697_v38  ;;  %v1092_v45 = vadd.f32 %v1900_v40, %v749_v42 }
  0xfc   : > { %v1108_v46 = vadd.f32 %v1900_v40, %v789_v43  ;;  %v1701_v47 = vpop.eup %1700  ;;  %1266 = vst [vmem:[%s1908_s9 + $0x1c8] sm:$0xff] %v1699_v44  ;;  %1704 = vtanh.f32 %v1123_v39 }
  0xfd   : > { %v1703_v48 = vpop.eup %1702  ;;  %1219 = vst [vmem:[%s1908_s9 + $0x50] sm:$0xff] %v1701_v47  ;;  %1706 = vtanh.f32 %v1139_v41 }
  0xfe   : > { %1235 = vst [vmem:[%s1908_s9 + $0xd0] sm:$0xff] %v1703_v48  ;;  %1708 = vtanh.f32 %v1092_v45 }
  0xff   : > { %1710 = vtanh.f32 %v1108_v46 }
 0x101   : > { %v829_v49 = vpop.f32.mrf.mxu2  ;;  %v869_v50 = vpop.f32.mrf.mxu3 }
 0x102   : > { %v1705_v51 = vpop.eup %1704  ;;  %v1124_v52 = vadd.f32 %v1900_v40, %v829_v49  ;;  %v1140_v53 = vadd.f32 %v1900_v40, %v869_v50  ;;  %v752_v54 = vpop.f32.mrf.mxu0 }
 0x103   : > { %v792_v55 = vpop.f32.mrf.mxu1  ;;  %v1707_v56 = vpop.eup %1706  ;;  %1251 = vst [vmem:[%s1908_s9 + $0x150] sm:$0xff] %v1705_v51  ;;  %v1093_v57 = vadd.f32 %v1900_v40, %v752_v54 }
 0x104   : > { %v1109_v58 = vadd.f32 %v1900_v40, %v792_v55  ;;  %v1709_v59 = vpop.eup %1708  ;;  %1267 = vst [vmem:[%s1908_s9 + $0x1d0] sm:$0xff] %v1707_v56  ;;  %1712 = vtanh.f32 %v1124_v52 }
 0x105   : > { %v1711_v60 = vpop.eup %1710  ;;  %1220 = vst [vmem:[%s1908_s9 + $0x58] sm:$0xff] %v1709_v59  ;;  %1714 = vtanh.f32 %v1140_v53 }
 0x106   : > { %1236 = vst [vmem:[%s1908_s9 + $0xd8] sm:$0xff] %v1711_v60  ;;  %1716 = vtanh.f32 %v1093_v57 }
 0x107   : > { %1718 = vtanh.f32 %v1109_v58 }
 0x109   : > { %v832_v61 = vpop.f32.mrf.mxu2  ;;  %v872_v62 = vpop.f32.mrf.mxu3 }
 0x10a   : > { %v1713_v63 = vpop.eup %1712  ;;  %v1125_v0 = vadd.f32 %v1900_v40, %v832_v61  ;;  %v1141_v1 = vadd.f32 %v1900_v40, %v872_v62  ;;  %v754_v2 = vpop.f32.mrf.mxu0 }
 0x10b   : > { %v794_v3 = vpop.f32.mrf.mxu1  ;;  %v1715_v4 = vpop.eup %1714  ;;  %1252 = vst [vmem:[%s1908_s9 + $0x158] sm:$0xff] %v1713_v63  ;;  %v1094_v5 = vadd.f32 %v1900_v40, %v754_v2 }
 0x10c   : > { %v1110_v6 = vadd.f32 %v1900_v40, %v794_v3  ;;  %v1717_v7 = vpop.eup %1716  ;;  %1268 = vst [vmem:[%s1908_s9 + $0x1d8] sm:$0xff] %v1715_v4  ;;  %1720 = vtanh.f32 %v1125_v0 }
 0x10d   : > { %v1719_v8 = vpop.eup %1718  ;;  %1221 = vst [vmem:[%s1908_s9 + $0x60] sm:$0xff] %v1717_v7  ;;  %1722 = vtanh.f32 %v1141_v1 }
 0x10e   : > { %1237 = vst [vmem:[%s1908_s9 + $0xe0] sm:$0xff] %v1719_v8  ;;  %1724 = vtanh.f32 %v1094_v5 }
 0x10f   : > { %1726 = vtanh.f32 %v1110_v6 }
 0x111   : > { %v834_v9 = vpop.f32.mrf.mxu2  ;;  %v874_v10 = vpop.f32.mrf.mxu3 }
 0x112   : > { %v1721_v11 = vpop.eup %1720  ;;  %v1126_v12 = vadd.f32 %v1900_v40, %v834_v9  ;;  %v1142_v13 = vadd.f32 %v1900_v40, %v874_v10  ;;  %v757_v14 = vpop.f32.mrf.mxu0 }
 0x113   : > { %v797_v15 = vpop.f32.mrf.mxu1  ;;  %v1723_v16 = vpop.eup %1722  ;;  %1253 = vst [vmem:[%s1908_s9 + $0x160] sm:$0xff] %v1721_v11  ;;  %v1095_v17 = vadd.f32 %v1900_v40, %v757_v14 }
 0x114   : > { %v1111_v18 = vadd.f32 %v1900_v40, %v797_v15  ;;  %v1725_v19 = vpop.eup %1724  ;;  %1269 = vst [vmem:[%s1908_s9 + $0x1e0] sm:$0xff] %v1723_v16  ;;  %1728 = vtanh.f32 %v1126_v12 }
 0x115   : > { %v1727_v20 = vpop.eup %1726  ;;  %1222 = vst [vmem:[%s1908_s9 + $0x68] sm:$0xff] %v1725_v19  ;;  %1730 = vtanh.f32 %v1142_v13 }
 0x116   : > { %1238 = vst [vmem:[%s1908_s9 + $0xe8] sm:$0xff] %v1727_v20  ;;  %1732 = vtanh.f32 %v1095_v17 }
 0x117   : > { %1734 = vtanh.f32 %v1111_v18 }
 0x119   : > { %v837_v21 = vpop.f32.mrf.mxu2  ;;  %v877_v22 = vpop.f32.mrf.mxu3 }
 0x11a   : > { %v1729_v23 = vpop.eup %1728  ;;  %v1127_v24 = vadd.f32 %v1900_v40, %v837_v21  ;;  %v1143_v25 = vadd.f32 %v1900_v40, %v877_v22  ;;  %v759_v26 = vpop.f32.mrf.mxu0 }
 0x11b   : > { %v799_v27 = vpop.f32.mrf.mxu1  ;;  %v1731_v28 = vpop.eup %1730  ;;  %1254 = vst [vmem:[%s1908_s9 + $0x168] sm:$0xff] %v1729_v23  ;;  %v1096_v29 = vadd.f32 %v1900_v40, %v759_v26 }
 0x11c   : > { %v1112_v30 = vadd.f32 %v1900_v40, %v799_v27  ;;  %v1733_v31 = vpop.eup %1732  ;;  %1270 = vst [vmem:[%s1908_s9 + $0x1e8] sm:$0xff] %v1731_v28  ;;  %1736 = vtanh.f32 %v1127_v24 }
 0x11d   : > { %v1735_v32 = vpop.eup %1734  ;;  %1223 = vst [vmem:[%s1908_s9 + $0x70] sm:$0xff] %v1733_v31  ;;  %1738 = vtanh.f32 %v1143_v25 }
 0x11e   : > { %1239 = vst [vmem:[%s1908_s9 + $0xf0] sm:$0xff] %v1735_v32  ;;  %1740 = vtanh.f32 %v1096_v29 }
 0x11f   : > { %1742 = vtanh.f32 %v1112_v30 }
 0x121   : > { %v839_v33 = vpop.f32.mrf.mxu2  ;;  %v879_v34 = vpop.f32.mrf.mxu3 }
 0x122   : > { %v1737_v35 = vpop.eup %1736  ;;  %v1128_v36 = vadd.f32 %v1900_v40, %v839_v33  ;;  %v1144_v37 = vadd.f32 %v1900_v40, %v879_v34 }
 0x123   : > { %v1739_v38 = vpop.eup %1738  ;;  %1255 = vst [vmem:[%s1908_s9 + $0x170] sm:$0xff] %v1737_v35 }
 0x124   : > { %v1741_v39 = vpop.eup %1740  ;;  %1271 = vst [vmem:[%s1908_s9 + $0x1f0] sm:$0xff] %v1739_v38  ;;  %1744 = vtanh.f32 %v1128_v36 }
 0x125   : > { %v1743_v41 = vpop.eup %1742  ;;  %1224 = vst [vmem:[%s1908_s9 + $0x78] sm:$0xff] %v1741_v39  ;;  %1746 = vtanh.f32 %v1144_v37 }
 0x126   : > { %1240 = vst [vmem:[%s1908_s9 + $0xf8] sm:$0xff] %v1743_v41 }
 0x12a   : > { %v1745_v42 = vpop.eup %1744 }
 0x12b   : > { %v1747_v43 = vpop.eup %1746  ;;  %1256 = vst [vmem:[%s1908_s9 + $0x178] sm:$0xff] %v1745_v42 }
 0x12c   : > { %1272 = vst [vmem:[%s1908_s9 + $0x1f8] sm:$0xff] %v1747_v43 }
 0x12d PF: > { %s13_s14 = sadd.s32 1, %s1770_s14   ;;  %s2049_s12 = smov %s1766_s13 }
 0x12e   : > { %p10_p5 = scmp.ge.s32.totalorder %s13_s14, 18   ;;  %s2050_s13 = smov %s2052_s15 }
 0x130   :  { %12 = sbr.rel (!%p10_p5) target bundleno = 2 (0x2), region = 73 }

</bundles_post_ra>
